<compile_context>
chip_gen: v7x
topology: tpu7x:2x2x1
jax: 0.10.0
libtpu: 0.0.40
codegen_flags: <defaults>
</compile_context>

<pallas_src>
import functools

import numpy as np

import jax
import jax.numpy as jnp
from jax import lax
from jax.experimental import pallas as pl
from jax.experimental.pallas import tpu as pltpu

BN_EPS = 1e-5


# ----------------------------------------------------------------------------
# Pallas kernels
# ----------------------------------------------------------------------------
def _conv_relu(x_ref, m_ref, b_ref, kh_taps, dil, ho):
    """Conv (as KH row-shifted banded matmuls) + bias + ReLU. Returns f32 (Ho, Wo*Cout)."""
    x = x_ref[...]                                             # (Hp, Wp*Cin) bf16
    acc = jnp.dot(x[0:ho, :], m_ref[0], preferred_element_type=jnp.float32)
    for k in range(1, kh_taps):                                # static, unrolled (<= 6)
        acc = acc + jnp.dot(x[k * dil:k * dil + ho, :], m_ref[k],
                            preferred_element_type=jnp.float32)
    acc = acc + b_ref[...]                                     # conv bias (f32)
    return jnp.maximum(acc, 0.0)                               # ReLU (before BN)


def _conv_relu_stats_kernel(x_ref, m_ref, b_ref, stat_ref, *, kh_taps, dil, ho):
    """Pass 1: accumulate per-lane sum and sum-of-squares of the activation."""
    act = _conv_relu(x_ref, m_ref, b_ref, kh_taps, dil, ho)
    part = jnp.concatenate(
        [jnp.sum(act, axis=0, keepdims=True),
         jnp.sum(act * act, axis=0, keepdims=True)], axis=0)   # (2, Wo*Cout)

    @pl.when(pl.program_id(0) == 0)
    def _init():
        stat_ref[...] = jnp.zeros_like(stat_ref)

    stat_ref[...] += part


def _conv_relu_affine_kernel(x_ref, m_ref, b_ref, scale_ref, shift_ref, o_ref,
                             *, kh_taps, dil, ho):
    """Pass 2: recompute conv+bias+ReLU and apply the per-channel scale/shift."""
    act = _conv_relu(x_ref, m_ref, b_ref, kh_taps, dil, ho)
    o_ref[...] = (act * scale_ref[...] + shift_ref[...]).astype(o_ref.dtype)


def _bn_stats_kernel(x_ref, stat_ref):
    """Standalone BN pass 1: per-lane sum / sum-of-squares over (H, W*C) slab."""
    x = x_ref[...].astype(jnp.float32)
    part = jnp.concatenate(
        [jnp.sum(x, axis=0, keepdims=True),
         jnp.sum(x * x, axis=0, keepdims=True)], axis=0)

    @pl.when(pl.program_id(0) == 0)
    def _init():
        stat_ref[...] = jnp.zeros_like(stat_ref)

    stat_ref[...] += part


def _affine_kernel(x_ref, scale_ref, shift_ref, o_ref):
    """Standalone BN pass 2: y = x * scale + shift (per channel, lane-tiled)."""
    x = x_ref[...].astype(jnp.float32)
    o_ref[...] = (x * scale_ref[...] + shift_ref[...]).astype(o_ref.dtype)


# ----------------------------------------------------------------------------
# Wrappers: BlockSpecs / grids + thin JAX glue
# ----------------------------------------------------------------------------
def _bn_scale_shift(stat, count, c, gamma, beta):
    """Fold the per-(w, channel) lane sums to per-channel stats -> scale/shift."""
    s = stat.reshape(2, -1, c).sum(axis=1)                     # (2, C)
    mean = s[0] / count
    # Biased variance (matches BatchNorm2d training normalization).  f32
    # sum/sumsq is precise enough at these magnitudes; clamp for safety.
    var = jnp.maximum(s[1] / count - mean * mean, 0.0)
    scale = gamma.astype(jnp.float32) * lax.rsqrt(var + BN_EPS)
    shift = beta.astype(jnp.float32) - mean * scale
    return scale, shift


def conv_block(x_nhwc, prm, *, kh, kw, dil=1, pad_h=(0, 0), pad_w=(0, 0),
               with_bn=True):
    """F.pad -> Conv2d((kh,kw), stride 1, dilation) -> ReLU -> (BatchNorm2d)."""
    w, b = prm[0], prm[1]
    n, h, wdim, cin = x_nhwc.shape
    cout = w.shape[0]
    hp = h + pad_h[0] + pad_h[1]
    wp = wdim + pad_w[0] + pad_w[1]
    ho = hp - dil * (kh - 1)
    wo = wp - dil * (kw - 1)
    lanes = wo * cout

    # Pad, flatten (W, C) into the lane axis (free row-major reshape), bf16 for MXU.
    xp = jnp.pad(x_nhwc, ((0, 0), pad_h, pad_w, (0, 0)))
    xp = xp.reshape(n, hp, wp * cin).astype(jnp.bfloat16)

    # Banded weight matrix M[kh, wk*Cin+ci, w*Cout+co] = W[co, ci, kh, kw]
    # iff wk == w + kw*dil (static 0/1 selector built with numpy).
    sel = np.zeros((kw, wp, wo), np.float32)
    for k in range(kw):
        sel[k, np.arange(wo) + k * dil, np.arange(wo)] = 1.0
    wt = jnp.transpose(w, (2, 3, 1, 0)).astype(jnp.float32)    # (kh, kw, cin, cout)
    m = jnp.einsum('hkco,kpw->hpcwo', wt, jnp.asarray(sel))
    m = m.reshape(kh, wp * cin, lanes).astype(jnp.bfloat16)

    b_t = jnp.tile(b.astype(jnp.float32), (wo,)).reshape(1, lanes)

    in_specs = [
        pl.BlockSpec((None, hp, wp * cin), lambda i: (i, 0, 0)),   # one image / step
        pl.BlockSpec((kh, wp * cin, lanes), lambda i: (0, 0, 0)),  # weights: resident
        pl.BlockSpec((1, lanes), lambda i: (0, 0)),                # tiled bias
    ]

    if with_bn:
        stat = pl.pallas_call(
            functools.partial(_conv_relu_stats_kernel, kh_taps=kh, dil=dil, ho=ho),
            out_shape=jax.ShapeDtypeStruct((2, lanes), jnp.float32),
            grid=(n,),
            in_specs=in_specs,
            out_specs=pl.BlockSpec((2, lanes), lambda i: (0, 0)),  # accumulator
            compiler_params=pltpu.CompilerParams(
                dimension_semantics=("arbitrary",)),
        )(xp, m, b_t)
        scale, shift = _bn_scale_shift(stat, n * ho * wo, cout, prm[2], prm[3])
    else:
        scale = jnp.ones((cout,), jnp.float32)
        shift = jnp.zeros((cout,), jnp.float32)

    scale_t = jnp.tile(scale, (wo,)).reshape(1, lanes)
    shift_t = jnp.tile(shift, (wo,)).reshape(1, lanes)

    y = pl.pallas_call(
        functools.partial(_conv_relu_affine_kernel, kh_taps=kh, dil=dil, ho=ho),
        out_shape=jax.ShapeDtypeStruct((n, ho, lanes), jnp.float32),
        grid=(n,),
        in_specs=in_specs + [
            pl.BlockSpec((1, lanes), lambda i: (0, 0)),
            pl.BlockSpec((1, lanes), lambda i: (0, 0)),
        ],
        out_specs=pl.BlockSpec((None, ho, lanes), lambda i: (i, 0, 0)),
        compiler_params=pltpu.CompilerParams(
            dimension_semantics=("parallel",)),
    )(xp, m, b_t, scale_t, shift_t)
    return y.reshape(n, ho, wo, cout)


def batch_norm(x_nhwc, gamma, beta):
    """Standalone BatchNorm2d (training mode) on an NHWC tensor."""
    n, h, wdim, c = x_nhwc.shape
    lanes = wdim * c
    xf = x_nhwc.reshape(n, h, lanes)

    stat = pl.pallas_call(
        _bn_stats_kernel,
        out_shape=jax.ShapeDtypeStruct((2, lanes), jnp.float32),
        grid=(n,),
        in_specs=[pl.BlockSpec((None, h, lanes), lambda i: (i, 0, 0))],
        out_specs=pl.BlockSpec((2, lanes), lambda i: (0, 0)),
        compiler_params=pltpu.CompilerParams(dimension_semantics=("arbitrary",)),
    )(xf)
    scale, shift = _bn_scale_shift(stat, n * h * wdim, c, gamma, beta)
    scale_t = jnp.tile(scale, (wdim,)).reshape(1, lanes)
    shift_t = jnp.tile(shift, (wdim,)).reshape(1, lanes)

    y = pl.pallas_call(
        _affine_kernel,
        out_shape=jax.ShapeDtypeStruct((n, h, lanes), jnp.float32),
        grid=(n,),
        in_specs=[pl.BlockSpec((None, h, lanes), lambda i: (i, 0, 0)),
                  pl.BlockSpec((1, lanes), lambda i: (0, 0)),
                  pl.BlockSpec((1, lanes), lambda i: (0, 0))],
        out_specs=pl.BlockSpec((None, h, lanes), lambda i: (i, 0, 0)),
        compiler_params=pltpu.CompilerParams(dimension_semantics=("parallel",)),
    )(xf, scale_t, shift_t)
    return y.reshape(n, h, wdim, c)


# ----------------------------------------------------------------------------
# DUCKBlock forward
# ----------------------------------------------------------------------------
def duck_block_forward(x_nchw, p):
    x = jnp.transpose(x_nchw, (0, 2, 3, 1))                    # NCHW -> NHWC
    x = batch_norm(x, p['bn1_g'], p['bn1_b'])

    def conv3(h, prm, d):                                      # 3x3, stride 1, pad=d, dil=d
        return conv_block(h, prm, kh=3, kw=3, dil=d, pad_h=(d, d), pad_w=(d, d))

    # WideScope / MidScope
    x1 = conv3(conv3(conv3(x, p['ws1'], 1), p['ws2'], 2), p['ws3'], 3)
    x2 = conv3(conv3(x, p['ms1'], 1), p['ms2'], 2)

    # SeparatedBlock(size=6):  F.pad(0,0,2,3) -> (1,6) conv -> F.pad(2,3,0,0) -> (6,1) conv
    x3 = conv_block(x, p['sp1'], kh=1, kw=6, pad_h=(2, 3), pad_w=(0, 0))
    x3 = conv_block(x3, p['sp2'], kh=6, kw=1, pad_h=(0, 0), pad_w=(2, 3))

    def residual(h, pr):
        r = conv_block(h, pr['c1'], kh=1, kw=1, with_bn=False)  # 1x1, ReLU, no BN
        y = conv3(h, pr['c2'], 1)
        y = conv3(y, pr['c3'], 1)
        return batch_norm(y + r, pr['bn_g'], pr['bn_b'])        # x += residual; BN

    x4 = residual(x, p['r1'])
    x5 = residual(residual(x, p['r2a']), p['r2b'])
    x6 = residual(residual(residual(x, p['r3a']), p['r3b']), p['r3c'])

    s = x1 + x2 + x3 + x4 + x5 + x6
    out = batch_norm(s, p['bn2_g'], p['bn2_b'])
    return jnp.transpose(out, (0, 3, 1, 2))                     # NHWC -> NCHW


# ----------------------------------------------------------------------------
# Deterministic parameter init (same shapes as the PyTorch module __init__)
# ----------------------------------------------------------------------------
def _conv_init(key, cin, cout, kh, kw, with_bn=True):
    k1, k2 = jax.random.split(key)
    bound = 1.0 / float(cin * kh * kw) ** 0.5
    w = jax.random.uniform(k1, (cout, cin, kh, kw), jnp.float32, -bound, bound)
    b = jax.random.uniform(k2, (cout,), jnp.float32, -bound, bound)
    if with_bn:
        return (w, b, jnp.ones((cout,), jnp.float32), jnp.zeros((cout,), jnp.float32))
    return (w, b)


def _res_init(key, cin, cout):
    k1, k2, k3 = jax.random.split(key, 3)
    return dict(
        c1=_conv_init(k1, cin, cout, 1, 1, with_bn=False),
        c2=_conv_init(k2, cin, cout, 3, 3),
        c3=_conv_init(k3, cout, cout, 3, 3),
        bn_g=jnp.ones((cout,), jnp.float32),
        bn_b=jnp.zeros((cout,), jnp.float32),
    )


def init_duck_params(key, cin, cout):
    ks = jax.random.split(key, 16)
    return dict(
        bn1_g=jnp.ones((cin,), jnp.float32), bn1_b=jnp.zeros((cin,), jnp.float32),
        ws1=_conv_init(ks[0], cin, cout, 3, 3),
        ws2=_conv_init(ks[1], cout, cout, 3, 3),
        ws3=_conv_init(ks[2], cout, cout, 3, 3),
        ms1=_conv_init(ks[3], cin, cout, 3, 3),
        ms2=_conv_init(ks[4], cout, cout, 3, 3),
        sp1=_conv_init(ks[5], cin, cout, 1, 6),
        sp2=_conv_init(ks[6], cout, cout, 6, 1),
        r1=_res_init(ks[7], cin, cout),
        r2a=_res_init(ks[8], cin, cout),
        r2b=_res_init(ks[9], cout, cout),
        r3a=_res_init(ks[10], cin, cout),
        r3b=_res_init(ks[11], cout, cout),
        r3c=_res_init(ks[12], cout, cout),
        bn2_g=jnp.ones((cout,), jnp.float32), bn2_b=jnp.zeros((cout,), jnp.float32),
    )


# ----------------------------------------------------------------------------
# Pure-JAX reference (lax.conv, bf16 matmul inputs to match the kernel path)
# ----------------------------------------------------------------------------
def _ref_duck_forward(x, p):
    def bn(y, g, be):
        mean = jnp.mean(y, axis=(0, 2, 3), keepdims=True)
        var = jnp.mean((y - mean) ** 2, axis=(0, 2, 3), keepdims=True)
        return ((y - mean) * lax.rsqrt(var + BN_EPS) * g[None, :, None, None]
                + be[None, :, None, None])

    def cb(y, prm, *, padding=((0, 0), (0, 0)), dilation=1, with_bn=True):
        w, b = prm[0], prm[1]
        z = lax.conv_general_dilated(
            y.astype(jnp.bfloat16), w.astype(jnp.bfloat16), (1, 1), padding,
            rhs_dilation=(dilation, dilation),
            dimension_numbers=('NCHW', 'OIHW', 'NCHW'),
            preferred_element_type=jnp.float32)
        z = z + b[None, :, None, None]
        z = jnp.maximum(z, 0.0)
        if with_bn:
            z = bn(z, prm[2], prm[3])
        return z

    def c3(y, prm, d):
        return cb(y, prm, padding=((d, d), (d, d)), dilation=d)

    x0 = bn(x, p['bn1_g'], p['bn1_b'])
    x1 = c3(c3(c3(x0, p['ws1'], 1), p['ws2'], 2), p['ws3'], 3)
    x2 = c3(c3(x0, p['ms1'], 1), p['ms2'], 2)
    x3 = jnp.pad(x0, ((0, 0), (0, 0), (2, 3), (0, 0)))          # F.pad(0,0,2,3)
    x3 = cb(x3, p['sp1'])
    x3 = jnp.pad(x3, ((0, 0), (0, 0), (0, 0), (2, 3)))          # F.pad(2,3,0,0)
    x3 = cb(x3, p['sp2'])

    def rb(y, pr):
        r = cb(y, pr['c1'], with_bn=False)
        z = c3(y, pr['c2'], 1)
        z = c3(z, pr['c3'], 1)
        return bn(z + r, pr['bn_g'], pr['bn_b'])

    x4 = rb(x0, p['r1'])
    x5 = rb(rb(x0, p['r2a']), p['r2b'])
    x6 = rb(rb(rb(x0, p['r3a']), p['r3b']), p['r3c'])
    s = x1 + x2 + x3 + x4 + x5 + x6
    return bn(s, p['bn2_g'], p['bn2_b'])


if __name__ == "__main__":
    N, CIN, COUT, H, W = 2, 4, 8, 16, 16
    key = jax.random.PRNGKey(0)
    kx, kp = jax.random.split(key)
    x = jax.random.normal(kx, (N, CIN, H, W), jnp.float32)
    params = init_duck_params(kp, CIN, COUT)

    fwd = jax.jit(duck_block_forward)
    out = jax.block_until_ready(fwd(x, params))
    assert out.shape == (N, COUT, H, W), out.shape

    ref = _ref_duck_forward(x, params)
    max_err = float(jnp.max(jnp.abs(out - ref)))
    # bf16 MXU inputs (sanctioned by the perf review) => loosened tolerance.
    if not (max_err < 2e-2):
        raise AssertionError(f"kernel/reference mismatch: max abs err = {max_err}")
    print("KERNEL_OK")
</pallas_src>

<mosaic_0001>
module attributes {stable_mosaic.version = 11 : i64} {
  func.func @_bn_stats_kernel(%arg0: i32, %arg1: memref<1x16x64xf32, #tpu.memory_space<vmem>>, %arg2: memref<2x64xf32, #tpu.memory_space<vmem>>) attributes {dimension_semantics = [#tpu.dimension_semantics<arbitrary>], iteration_bounds = array<i64: 2>, scalar_prefetch = 0 : i64, scratch_operands = 0 : i64, tpu.core_type = #tpu.core_type<tc>, window_params = [{transform_indices = @transform_0, window_bounds = array<i64: 1, 16, 64>}, {pipeline_mode = #tpu.pipeline_mode<synchronous>, transform_indices = @transform_1, window_bounds = array<i64: 2, 64>}]} {
    %c0 = arith.constant 0 : index
    %c0_0 = arith.constant 0 : index
    %c0_1 = arith.constant 0 : index
    %0 = vector.load %arg1[%c0, %c0_0, %c0_1] : memref<1x16x64xf32, #tpu.memory_space<vmem>>, vector<1x16x64xf32>
    %1 = vector.shape_cast %0 : vector<1x16x64xf32> to vector<16x64xf32>
    %cst = arith.constant dense<0.000000e+00> : vector<64xf32>
    %2 = vector.multi_reduction <add>, %1, %cst [0] : vector<16x64xf32> to vector<64xf32>
    %3 = vector.shape_cast %2 : vector<64xf32> to vector<1x64xf32>
    %4 = arith.mulf %1, %1 : vector<16x64xf32>
    %cst_2 = arith.constant dense<0.000000e+00> : vector<64xf32>
    %5 = vector.multi_reduction <add>, %4, %cst_2 [0] : vector<16x64xf32> to vector<64xf32>
    %6 = vector.shape_cast %5 : vector<64xf32> to vector<1x64xf32>
    %7 = tpu.concatenate %3, %6 in 0 : vector<1x64xf32>, vector<1x64xf32> -> vector<2x64xf32>
    %c0_i32 = arith.constant 0 : i32
    %8 = arith.cmpi eq, %arg0, %c0_i32 : i32
    %9 = arith.extui %8 : i1 to i32
    %c0_i32_3 = arith.constant 0 : i32
    %10 = arith.cmpi ne, %9, %c0_i32_3 : i32
    scf.if %10 {
      %cst_8 = arith.constant 0.000000e+00 : f32
      %14 = vector.broadcast %cst_8 : f32 to vector<2x64xf32>
      %c0_9 = arith.constant 0 : index
      %c0_10 = arith.constant 0 : index
      %15 = vector.load %arg2[%c0_9, %c0_10] : memref<2x64xf32, #tpu.memory_space<vmem>>, vector<2x64xf32>
      tpu.vector_store %arg2[%c0_9, %c0_10], %14 {strides = array<i32>} : memref<2x64xf32, #tpu.memory_space<vmem>>, vector<2x64xf32>,
    } else {
    }
    %c0_4 = arith.constant 0 : index
    %c0_5 = arith.constant 0 : index
    %11 = vector.load %arg2[%c0_4, %c0_5] : memref<2x64xf32, #tpu.memory_space<vmem>>, vector<2x64xf32>
    %12 = arith.addf %11, %7 : vector<2x64xf32>
    %c0_6 = arith.constant 0 : index
    %c0_7 = arith.constant 0 : index
    %13 = vector.load %arg2[%c0_6, %c0_7] : memref<2x64xf32, #tpu.memory_space<vmem>>, vector<2x64xf32>
    tpu.vector_store %arg2[%c0_6, %c0_7], %12 {strides = array<i32>} : memref<2x64xf32, #tpu.memory_space<vmem>>, vector<2x64xf32>,
    return
  }
  func.func @transform_0(%arg0: i32) -> (i32, i32, i32) {
    %c0_i32 = arith.constant 0 : i32
    %c0_i32_0 = arith.constant 0 : i32
    %c0_i32_1 = arith.constant 0 : i32
    return %arg0, %c0_i32, %c0_i32_0 : i32, i32, i32
  }
  func.func @transform_1(%arg0: i32) -> (i32, i32) {
    %c0_i32 = arith.constant 0 : i32
    %c0_i32_0 = arith.constant 0 : i32
    %c0_i32_1 = arith.constant 0 : i32
    return %c0_i32, %c0_i32_0 : i32, i32
  }
}

module attributes {stable_mosaic.version = 11 : i64} {
  func.func @_affine_kernel(%arg0: i32, %arg1: memref<1x16x64xf32, #tpu.memory_space<vmem>>, %arg2: memref<1x64xf32, #tpu.memory_space<vmem>>, %arg3: memref<1x64xf32, #tpu.memory_space<vmem>>, %arg4: memref<1x16x64xf32, #tpu.memory_space<vmem>>) attributes {dimension_semantics = [#tpu.dimension_semantics<parallel>], iteration_bounds = array<i64: 2>, scalar_prefetch = 0 : i64, scratch_operands = 0 : i64, tpu.core_type = #tpu.core_type<tc>, window_params = [{transform_indices = @transform_0, window_bounds = array<i64: 1, 16, 64>}, {pipeline_mode = #tpu.pipeline_mode<synchronous>, transform_indices = @transform_1, window_bounds = array<i64: 1, 64>}, {pipeline_mode = #tpu.pipeline_mode<synchronous>, transform_indices = @transform_2, window_bounds = array<i64: 1, 64>}, {transform_indices = @transform_3, window_bounds = array<i64: 1, 16, 64>}]} {
    %c0 = arith.constant 0 : index
    %c0_0 = arith.constant 0 : index
    %c0_1 = arith.constant 0 : index
    %0 = vector.load %arg1[%c0, %c0_0, %c0_1] : memref<1x16x64xf32, #tpu.memory_space<vmem>>, vector<1x16x64xf32>
    %1 = vector.shape_cast %0 : vector<1x16x64xf32> to vector<16x64xf32>
    %c0_2 = arith.constant 0 : index
    %c0_3 = arith.constant 0 : index
    %2 = vector.load %arg2[%c0_2, %c0_3] : memref<1x64xf32, #tpu.memory_space<vmem>>, vector<1x64xf32>
    %3 = vector.broadcast %2 : vector<1x64xf32> to vector<16x64xf32>
    %4 = arith.mulf %1, %3 : vector<16x64xf32>
    %c0_4 = arith.constant 0 : index
    %c0_5 = arith.constant 0 : index
    %5 = vector.load %arg3[%c0_4, %c0_5] : memref<1x64xf32, #tpu.memory_space<vmem>>, vector<1x64xf32>
    %6 = vector.broadcast %5 : vector<1x64xf32> to vector<16x64xf32>
    %7 = arith.addf %4, %6 : vector<16x64xf32>
    %c0_6 = arith.constant 0 : index
    %c0_7 = arith.constant 0 : index
    %c0_8 = arith.constant 0 : index
    %8 = vector.load %arg4[%c0_6, %c0_7, %c0_8] : memref<1x16x64xf32, #tpu.memory_space<vmem>>, vector<1x16x64xf32>
    %9 = vector.shape_cast %8 : vector<1x16x64xf32> to vector<16x64xf32>
    %10 = vector.shape_cast %7 : vector<16x64xf32> to vector<1x16x64xf32>
    tpu.vector_store %arg4[%c0_6, %c0_7, %c0_8], %10 {strides = array<i32>} : memref<1x16x64xf32, #tpu.memory_space<vmem>>, vector<1x16x64xf32>,
    return
  }
  func.func @transform_0(%arg0: i32) -> (i32, i32, i32) {
    %c0_i32 = arith.constant 0 : i32
    %c0_i32_0 = arith.constant 0 : i32
    %c0_i32_1 = arith.constant 0 : i32
    return %arg0, %c0_i32, %c0_i32_0 : i32, i32, i32
  }
  func.func @transform_1(%arg0: i32) -> (i32, i32) {
    %c0_i32 = arith.constant 0 : i32
    %c0_i32_0 = arith.constant 0 : i32
    %c0_i32_1 = arith.constant 0 : i32
    return %c0_i32, %c0_i32_0 : i32, i32
  }
  func.func @transform_2(%arg0: i32) -> (i32, i32) {
    %c0_i32 = arith.constant 0 : i32
    %c0_i32_0 = arith.constant 0 : i32
    %c0_i32_1 = arith.constant 0 : i32
    return %c0_i32, %c0_i32_0 : i32, i32
  }
  func.func @transform_3(%arg0: i32) -> (i32, i32, i32) {
    %c0_i32 = arith.constant 0 : i32
    %c0_i32_0 = arith.constant 0 : i32
    %c0_i32_1 = arith.constant 0 : i32
    return %arg0, %c0_i32, %c0_i32_0 : i32, i32, i32
  }
}

module attributes {stable_mosaic.version = 11 : i64} {
  func.func @_conv_relu_stats_kernel(%arg0: i32, %arg1: memref<1x18x72xbf16, #tpu.memory_space<vmem>>, %arg2: memref<3x72x128xbf16, #tpu.memory_space<vmem>>, %arg3: memref<1x128xf32, #tpu.memory_space<vmem>>, %arg4: memref<2x128xf32, #tpu.memory_space<vmem>>) attributes {dimension_semantics = [#tpu.dimension_semantics<arbitrary>], iteration_bounds = array<i64: 2>, scalar_prefetch = 0 : i64, scratch_operands = 0 : i64, tpu.core_type = #tpu.core_type<tc>, window_params = [{transform_indices = @transform_0, window_bounds = array<i64: 1, 18, 72>}, {pipeline_mode = #tpu.pipeline_mode<synchronous>, transform_indices = @transform_1, window_bounds = array<i64: 3, 72, 128>}, {pipeline_mode = #tpu.pipeline_mode<synchronous>, transform_indices = @transform_2, window_bounds = array<i64: 1, 128>}, {pipeline_mode = #tpu.pipeline_mode<synchronous>, transform_indices = @transform_3, window_bounds = array<i64: 2, 128>}]} {
    %c0 = arith.constant 0 : index
    %c0_0 = arith.constant 0 : index
    %c0_1 = arith.constant 0 : index
    %0 = vector.load %arg1[%c0, %c0_0, %c0_1] : memref<1x18x72xbf16, #tpu.memory_space<vmem>>, vector<1x18x72xbf16>
    %1 = vector.shape_cast %0 : vector<1x18x72xbf16> to vector<18x72xbf16>
    %2 = vector.extract_strided_slice %1 {offsets = [0, 0], sizes = [16, 72], strides = [1, 1]} : vector<18x72xbf16> to vector<16x72xbf16>
    %c0_2 = arith.constant 0 : index
    %c0_3 = arith.constant 0 : index
    %c0_4 = arith.constant 0 : index
    %3 = vector.load %arg2[%c0_2, %c0_3, %c0_4] : memref<3x72x128xbf16, #tpu.memory_space<vmem>>, vector<1x72x128xbf16>
    %4 = vector.shape_cast %3 : vector<1x72x128xbf16> to vector<72x128xbf16>
    %cst = arith.constant dense<0.000000e+00> : vector<16x128xf32>
    %5 = tpu.matmul %2, %4, %cst {dimension_numbers = #tpu.dot_dimension_numbers<[1], [0], [0], [1], [0, 0, 1, 1], [], []>} : vector<16x72xbf16>, vector<72x128xbf16>, vector<16x128xf32> -> vector<16x128xf32>
    %6 = vector.extract_strided_slice %1 {offsets = [1, 0], sizes = [16, 72], strides = [1, 1]} : vector<18x72xbf16> to vector<16x72xbf16>
    %c1 = arith.constant 1 : index
    %c0_5 = arith.constant 0 : index
    %c0_6 = arith.constant 0 : index
    %7 = vector.load %arg2[%c1, %c0_5, %c0_6] : memref<3x72x128xbf16, #tpu.memory_space<vmem>>, vector<1x72x128xbf16>
    %8 = vector.shape_cast %7 : vector<1x72x128xbf16> to vector<72x128xbf16>
    %cst_7 = arith.constant dense<0.000000e+00> : vector<16x128xf32>
    %9 = tpu.matmul %6, %8, %cst_7 {dimension_numbers = #tpu.dot_dimension_numbers<[1], [0], [0], [1], [0, 0, 1, 1], [], []>} : vector<16x72xbf16>, vector<72x128xbf16>, vector<16x128xf32> -> vector<16x128xf32>
    %10 = arith.addf %5, %9 : vector<16x128xf32>
    %11 = vector.extract_strided_slice %1 {offsets = [2, 0], sizes = [16, 72], strides = [1, 1]} : vector<18x72xbf16> to vector<16x72xbf16>
    %c2 = arith.constant 2 : index
    %c0_8 = arith.constant 0 : index
    %c0_9 = arith.constant 0 : index
    %12 = vector.load %arg2[%c2, %c0_8, %c0_9] : memref<3x72x128xbf16, #tpu.memory_space<vmem>>, vector<1x72x128xbf16>
    %13 = vector.shape_cast %12 : vector<1x72x128xbf16> to vector<72x128xbf16>
    %cst_10 = arith.constant dense<0.000000e+00> : vector<16x128xf32>
    %14 = tpu.matmul %11, %13, %cst_10 {dimension_numbers = #tpu.dot_dimension_numbers<[1], [0], [0], [1], [0, 0, 1, 1], [], []>} : vector<16x72xbf16>, vector<72x128xbf16>, vector<16x128xf32> -> vector<16x128xf32>
    %15 = arith.addf %10, %14 : vector<16x128xf32>
    %c0_11 = arith.constant 0 : index
    %c0_12 = arith.constant 0 : index
    %16 = vector.load %arg3[%c0_11, %c0_12] : memref<1x128xf32, #tpu.memory_space<vmem>>, vector<1x128xf32>
    %17 = vector.broadcast %16 : vector<1x128xf32> to vector<16x128xf32>
    %18 = arith.addf %15, %17 : vector<16x128xf32>
    %cst_13 = arith.constant 0.000000e+00 : f32
    %19 = vector.broadcast %cst_13 : f32 to vector<16x128xf32>
    %20 = arith.maximumf %18, %19 : vector<16x128xf32>
    %cst_14 = arith.constant dense<0.000000e+00> : vector<128xf32>
    %21 = vector.multi_reduction <add>, %20, %cst_14 [0] : vector<16x128xf32> to vector<128xf32>
    %22 = vector.shape_cast %21 : vector<128xf32> to vector<1x128xf32>
    %23 = arith.mulf %20, %20 : vector<16x128xf32>
    %cst_15 = arith.constant dense<0.000000e+00> : vector<128xf32>
    %24 = vector.multi_reduction <add>, %23, %cst_15 [0] : vector<16x128xf32> to vector<128xf32>
    %25 = vector.shape_cast %24 : vector<128xf32> to vector<1x128xf32>
    %26 = tpu.concatenate %22, %25 in 0 : vector<1x128xf32>, vector<1x128xf32> -> vector<2x128xf32>
    %c0_i32 = arith.constant 0 : i32
    %27 = arith.cmpi eq, %arg0, %c0_i32 : i32
    %28 = arith.extui %27 : i1 to i32
    %c0_i32_16 = arith.constant 0 : i32
    %29 = arith.cmpi ne, %28, %c0_i32_16 : i32
    scf.if %29 {
      %cst_21 = arith.constant 0.000000e+00 : f32
      %33 = vector.broadcast %cst_21 : f32 to vector<2x128xf32>
      %c0_22 = arith.constant 0 : index
      %c0_23 = arith.constant 0 : index
      %34 = vector.load %arg4[%c0_22, %c0_23] : memref<2x128xf32, #tpu.memory_space<vmem>>, vector<2x128xf32>
      tpu.vector_store %arg4[%c0_22, %c0_23], %33 {strides = array<i32>} : memref<2x128xf32, #tpu.memory_space<vmem>>, vector<2x128xf32>,
    } else {
    }
    %c0_17 = arith.constant 0 : index
    %c0_18 = arith.constant 0 : index
    %30 = vector.load %arg4[%c0_17, %c0_18] : memref<2x128xf32, #tpu.memory_space<vmem>>, vector<2x128xf32>
    %31 = arith.addf %30, %26 : vector<2x128xf32>
    %c0_19 = arith.constant 0 : index
    %c0_20 = arith.constant 0 : index
    %32 = vector.load %arg4[%c0_19, %c0_20] : memref<2x128xf32, #tpu.memory_space<vmem>>, vector<2x128xf32>
    tpu.vector_store %arg4[%c0_19, %c0_20], %31 {strides = array<i32>} : memref<2x128xf32, #tpu.memory_space<vmem>>, vector<2x128xf32>,
    return
  }
  func.func @transform_0(%arg0: i32) -> (i32, i32, i32) {
    %c0_i32 = arith.constant 0 : i32
    %c0_i32_0 = arith.constant 0 : i32
    %c0_i32_1 = arith.constant 0 : i32
    return %arg0, %c0_i32, %c0_i32_0 : i32, i32, i32
  }
  func.func @transform_1(%arg0: i32) -> (i32, i32, i32) {
    %c0_i32 = arith.constant 0 : i32
    %c0_i32_0 = arith.constant 0 : i32
    %c0_i32_1 = arith.constant 0 : i32
    %c0_i32_2 = arith.constant 0 : i32
    return %c0_i32, %c0_i32_0, %c0_i32_1 : i32, i32, i32
  }
  func.func @transform_2(%arg0: i32) -> (i32, i32) {
    %c0_i32 = arith.constant 0 : i32
    %c0_i32_0 = arith.constant 0 : i32
    %c0_i32_1 = arith.constant 0 : i32
    return %c0_i32, %c0_i32_0 : i32, i32
  }
  func.func @transform_3(%arg0: i32) -> (i32, i32) {
    %c0_i32 = arith.constant 0 : i32
    %c0_i32_0 = arith.constant 0 : i32
    %c0_i32_1 = arith.constant 0 : i32
    return %c0_i32, %c0_i32_0 : i32, i32
  }
}

module attributes {stable_mosaic.version = 11 : i64} {
  func.func @_conv_relu_affine_kernel(%arg0: i32, %arg1: memref<1x18x72xbf16, #tpu.memory_space<vmem>>, %arg2: memref<3x72x128xbf16, #tpu.memory_space<vmem>>, %arg3: memref<1x128xf32, #tpu.memory_space<vmem>>, %arg4: memref<1x128xf32, #tpu.memory_space<vmem>>, %arg5: memref<1x128xf32, #tpu.memory_space<vmem>>, %arg6: memref<1x16x128xf32, #tpu.memory_space<vmem>>) attributes {dimension_semantics = [#tpu.dimension_semantics<parallel>], iteration_bounds = array<i64: 2>, scalar_prefetch = 0 : i64, scratch_operands = 0 : i64, tpu.core_type = #tpu.core_type<tc>, window_params = [{transform_indices = @transform_0, window_bounds = array<i64: 1, 18, 72>}, {pipeline_mode = #tpu.pipeline_mode<synchronous>, transform_indices = @transform_1, window_bounds = array<i64: 3, 72, 128>}, {pipeline_mode = #tpu.pipeline_mode<synchronous>, transform_indices = @transform_2, window_bounds = array<i64: 1, 128>}, {pipeline_mode = #tpu.pipeline_mode<synchronous>, transform_indices = @transform_3, window_bounds = array<i64: 1, 128>}, {pipeline_mode = #tpu.pipeline_mode<synchronous>, transform_indices = @transform_4, window_bounds = array<i64: 1, 128>}, {transform_indices = @transform_5, window_bounds = array<i64: 1, 16, 128>}]} {
    %c0 = arith.constant 0 : index
    %c0_0 = arith.constant 0 : index
    %c0_1 = arith.constant 0 : index
    %0 = vector.load %arg1[%c0, %c0_0, %c0_1] : memref<1x18x72xbf16, #tpu.memory_space<vmem>>, vector<1x18x72xbf16>
    %1 = vector.shape_cast %0 : vector<1x18x72xbf16> to vector<18x72xbf16>
    %2 = vector.extract_strided_slice %1 {offsets = [0, 0], sizes = [16, 72], strides = [1, 1]} : vector<18x72xbf16> to vector<16x72xbf16>
    %c0_2 = arith.constant 0 : index
    %c0_3 = arith.constant 0 : index
    %c0_4 = arith.constant 0 : index
    %3 = vector.load %arg2[%c0_2, %c0_3, %c0_4] : memref<3x72x128xbf16, #tpu.memory_space<vmem>>, vector<1x72x128xbf16>
    %4 = vector.shape_cast %3 : vector<1x72x128xbf16> to vector<72x128xbf16>
    %cst = arith.constant dense<0.000000e+00> : vector<16x128xf32>
    %5 = tpu.matmul %2, %4, %cst {dimension_numbers = #tpu.dot_dimension_numbers<[1], [0], [0], [1], [0, 0, 1, 1], [], []>} : vector<16x72xbf16>, vector<72x128xbf16>, vector<16x128xf32> -> vector<16x128xf32>
    %6 = vector.extract_strided_slice %1 {offsets = [1, 0], sizes = [16, 72], strides = [1, 1]} : vector<18x72xbf16> to vector<16x72xbf16>
    %c1 = arith.constant 1 : index
    %c0_5 = arith.constant 0 : index
    %c0_6 = arith.constant 0 : index
    %7 = vector.load %arg2[%c1, %c0_5, %c0_6] : memref<3x72x128xbf16, #tpu.memory_space<vmem>>, vector<1x72x128xbf16>
    %8 = vector.shape_cast %7 : vector<1x72x128xbf16> to vector<72x128xbf16>
    %cst_7 = arith.constant dense<0.000000e+00> : vector<16x128xf32>
    %9 = tpu.matmul %6, %8, %cst_7 {dimension_numbers = #tpu.dot_dimension_numbers<[1], [0], [0], [1], [0, 0, 1, 1], [], []>} : vector<16x72xbf16>, vector<72x128xbf16>, vector<16x128xf32> -> vector<16x128xf32>
    %10 = arith.addf %5, %9 : vector<16x128xf32>
    %11 = vector.extract_strided_slice %1 {offsets = [2, 0], sizes = [16, 72], strides = [1, 1]} : vector<18x72xbf16> to vector<16x72xbf16>
    %c2 = arith.constant 2 : index
    %c0_8 = arith.constant 0 : index
    %c0_9 = arith.constant 0 : index
    %12 = vector.load %arg2[%c2, %c0_8, %c0_9] : memref<3x72x128xbf16, #tpu.memory_space<vmem>>, vector<1x72x128xbf16>
    %13 = vector.shape_cast %12 : vector<1x72x128xbf16> to vector<72x128xbf16>
    %cst_10 = arith.constant dense<0.000000e+00> : vector<16x128xf32>
    %14 = tpu.matmul %11, %13, %cst_10 {dimension_numbers = #tpu.dot_dimension_numbers<[1], [0], [0], [1], [0, 0, 1, 1], [], []>} : vector<16x72xbf16>, vector<72x128xbf16>, vector<16x128xf32> -> vector<16x128xf32>
    %15 = arith.addf %10, %14 : vector<16x128xf32>
    %c0_11 = arith.constant 0 : index
    %c0_12 = arith.constant 0 : index
    %16 = vector.load %arg3[%c0_11, %c0_12] : memref<1x128xf32, #tpu.memory_space<vmem>>, vector<1x128xf32>
    %17 = vector.broadcast %16 : vector<1x128xf32> to vector<16x128xf32>
    %18 = arith.addf %15, %17 : vector<16x128xf32>
    %cst_13 = arith.constant 0.000000e+00 : f32
    %19 = vector.broadcast %cst_13 : f32 to vector<16x128xf32>
    %20 = arith.maximumf %18, %19 : vector<16x128xf32>
    %c0_14 = arith.constant 0 : index
    %c0_15 = arith.constant 0 : index
    %21 = vector.load %arg4[%c0_14, %c0_15] : memref<1x128xf32, #tpu.memory_space<vmem>>, vector<1x128xf32>
    %22 = vector.broadcast %21 : vector<1x128xf32> to vector<16x128xf32>
    %23 = arith.mulf %20, %22 : vector<16x128xf32>
    %c0_16 = arith.constant 0 : index
    %c0_17 = arith.constant 0 : index
    %24 = vector.load %arg5[%c0_16, %c0_17] : memref<1x128xf32, #tpu.memory_space<vmem>>, vector<1x128xf32>
    %25 = vector.broadcast %24 : vector<1x128xf32> to vector<16x128xf32>
    %26 = arith.addf %23, %25 : vector<16x128xf32>
    %c0_18 = arith.constant 0 : index
    %c0_19 = arith.constant 0 : index
    %c0_20 = arith.constant 0 : index
    %27 = vector.load %arg6[%c0_18, %c0_19, %c0_20] : memref<1x16x128xf32, #tpu.memory_space<vmem>>, vector<1x16x128xf32>
    %28 = vector.shape_cast %27 : vector<1x16x128xf32> to vector<16x128xf32>
    %29 = vector.shape_cast %26 : vector<16x128xf32> to vector<1x16x128xf32>
    tpu.vector_store %arg6[%c0_18, %c0_19, %c0_20], %29 {strides = array<i32>} : memref<1x16x128xf32, #tpu.memory_space<vmem>>, vector<1x16x128xf32>,
    return
  }
  func.func @transform_0(%arg0: i32) -> (i32, i32, i32) {
    %c0_i32 = arith.constant 0 : i32
    %c0_i32_0 = arith.constant 0 : i32
    %c0_i32_1 = arith.constant 0 : i32
    return %arg0, %c0_i32, %c0_i32_0 : i32, i32, i32
  }
  func.func @transform_1(%arg0: i32) -> (i32, i32, i32) {
    %c0_i32 = arith.constant 0 : i32
    %c0_i32_0 = arith.constant 0 : i32
    %c0_i32_1 = arith.constant 0 : i32
    %c0_i32_2 = arith.constant 0 : i32
    return %c0_i32, %c0_i32_0, %c0_i32_1 : i32, i32, i32
  }
  func.func @transform_2(%arg0: i32) -> (i32, i32) {
    %c0_i32 = arith.constant 0 : i32
    %c0_i32_0 = arith.constant 0 : i32
    %c0_i32_1 = arith.constant 0 : i32
    return %c0_i32, %c0_i32_0 : i32, i32
  }
  func.func @transform_3(%arg0: i32) -> (i32, i32) {
    %c0_i32 = arith.constant 0 : i32
    %c0_i32_0 = arith.constant 0 : i32
    %c0_i32_1 = arith.constant 0 : i32
    return %c0_i32, %c0_i32_0 : i32, i32
  }
  func.func @transform_4(%arg0: i32) -> (i32, i32) {
    %c0_i32 = arith.constant 0 : i32
    %c0_i32_0 = arith.constant 0 : i32
    %c0_i32_1 = arith.constant 0 : i32
    return %c0_i32, %c0_i32_0 : i32, i32
  }
  func.func @transform_5(%arg0: i32) -> (i32, i32, i32) {
    %c0_i32 = arith.constant 0 : i32
    %c0_i32_0 = arith.constant 0 : i32
    %c0_i32_1 = arith.constant 0 : i32
    return %arg0, %c0_i32, %c0_i32_0 : i32, i32, i32
  }
}

module attributes {stable_mosaic.version = 11 : i64} {
  func.func @_conv_relu_stats_kernel(%arg0: i32, %arg1: memref<1x18x144xbf16, #tpu.memory_space<vmem>>, %arg2: memref<3x144x128xbf16, #tpu.memory_space<vmem>>, %arg3: memref<1x128xf32, #tpu.memory_space<vmem>>, %arg4: memref<2x128xf32, #tpu.memory_space<vmem>>) attributes {dimension_semantics = [#tpu.dimension_semantics<arbitrary>], iteration_bounds = array<i64: 2>, scalar_prefetch = 0 : i64, scratch_operands = 0 : i64, tpu.core_type = #tpu.core_type<tc>, window_params = [{transform_indices = @transform_0, window_bounds = array<i64: 1, 18, 144>}, {pipeline_mode = #tpu.pipeline_mode<synchronous>, transform_indices = @transform_1, window_bounds = array<i64: 3, 144, 128>}, {pipeline_mode = #tpu.pipeline_mode<synchronous>, transform_indices = @transform_2, window_bounds = array<i64: 1, 128>}, {pipeline_mode = #tpu.pipeline_mode<synchronous>, transform_indices = @transform_3, window_bounds = array<i64: 2, 128>}]} {
    %c0 = arith.constant 0 : index
    %c0_0 = arith.constant 0 : index
    %c0_1 = arith.constant 0 : index
    %0 = vector.load %arg1[%c0, %c0_0, %c0_1] : memref<1x18x144xbf16, #tpu.memory_space<vmem>>, vector<1x18x144xbf16>
    %1 = vector.shape_cast %0 : vector<1x18x144xbf16> to vector<18x144xbf16>
    %2 = vector.extract_strided_slice %1 {offsets = [0, 0], sizes = [16, 144], strides = [1, 1]} : vector<18x144xbf16> to vector<16x144xbf16>
    %c0_2 = arith.constant 0 : index
    %c0_3 = arith.constant 0 : index
    %c0_4 = arith.constant 0 : index
    %3 = vector.load %arg2[%c0_2, %c0_3, %c0_4] : memref<3x144x128xbf16, #tpu.memory_space<vmem>>, vector<1x144x128xbf16>
    %4 = vector.shape_cast %3 : vector<1x144x128xbf16> to vector<144x128xbf16>
    %cst = arith.constant dense<0.000000e+00> : vector<16x128xf32>
    %5 = tpu.matmul %2, %4, %cst {dimension_numbers = #tpu.dot_dimension_numbers<[1], [0], [0], [1], [0, 0, 1, 1], [], []>} : vector<16x144xbf16>, vector<144x128xbf16>, vector<16x128xf32> -> vector<16x128xf32>
    %6 = vector.extract_strided_slice %1 {offsets = [1, 0], sizes = [16, 144], strides = [1, 1]} : vector<18x144xbf16> to vector<16x144xbf16>
    %c1 = arith.constant 1 : index
    %c0_5 = arith.constant 0 : index
    %c0_6 = arith.constant 0 : index
    %7 = vector.load %arg2[%c1, %c0_5, %c0_6] : memref<3x144x128xbf16, #tpu.memory_space<vmem>>, vector<1x144x128xbf16>
    %8 = vector.shape_cast %7 : vector<1x144x128xbf16> to vector<144x128xbf16>
    %cst_7 = arith.constant dense<0.000000e+00> : vector<16x128xf32>
    %9 = tpu.matmul %6, %8, %cst_7 {dimension_numbers = #tpu.dot_dimension_numbers<[1], [0], [0], [1], [0, 0, 1, 1], [], []>} : vector<16x144xbf16>, vector<144x128xbf16>, vector<16x128xf32> -> vector<16x128xf32>
    %10 = arith.addf %5, %9 : vector<16x128xf32>
    %11 = vector.extract_strided_slice %1 {offsets = [2, 0], sizes = [16, 144], strides = [1, 1]} : vector<18x144xbf16> to vector<16x144xbf16>
    %c2 = arith.constant 2 : index
    %c0_8 = arith.constant 0 : index
    %c0_9 = arith.constant 0 : index
    %12 = vector.load %arg2[%c2, %c0_8, %c0_9] : memref<3x144x128xbf16, #tpu.memory_space<vmem>>, vector<1x144x128xbf16>
    %13 = vector.shape_cast %12 : vector<1x144x128xbf16> to vector<144x128xbf16>
    %cst_10 = arith.constant dense<0.000000e+00> : vector<16x128xf32>
    %14 = tpu.matmul %11, %13, %cst_10 {dimension_numbers = #tpu.dot_dimension_numbers<[1], [0], [0], [1], [0, 0, 1, 1], [], []>} : vector<16x144xbf16>, vector<144x128xbf16>, vector<16x128xf32> -> vector<16x128xf32>
    %15 = arith.addf %10, %14 : vector<16x128xf32>
    %c0_11 = arith.constant 0 : index
    %c0_12 = arith.constant 0 : index
    %16 = vector.load %arg3[%c0_11, %c0_12] : memref<1x128xf32, #tpu.memory_space<vmem>>, vector<1x128xf32>
    %17 = vector.broadcast %16 : vector<1x128xf32> to vector<16x128xf32>
    %18 = arith.addf %15, %17 : vector<16x128xf32>
    %cst_13 = arith.constant 0.000000e+00 : f32
    %19 = vector.broadcast %cst_13 : f32 to vector<16x128xf32>
    %20 = arith.maximumf %18, %19 : vector<16x128xf32>
    %cst_14 = arith.constant dense<0.000000e+00> : vector<128xf32>
    %21 = vector.multi_reduction <add>, %20, %cst_14 [0] : vector<16x128xf32> to vector<128xf32>
    %22 = vector.shape_cast %21 : vector<128xf32> to vector<1x128xf32>
    %23 = arith.mulf %20, %20 : vector<16x128xf32>
    %cst_15 = arith.constant dense<0.000000e+00> : vector<128xf32>
    %24 = vector.multi_reduction <add>, %23, %cst_15 [0] : vector<16x128xf32> to vector<128xf32>
    %25 = vector.shape_cast %24 : vector<128xf32> to vector<1x128xf32>
    %26 = tpu.concatenate %22, %25 in 0 : vector<1x128xf32>, vector<1x128xf32> -> vector<2x128xf32>
    %c0_i32 = arith.constant 0 : i32
    %27 = arith.cmpi eq, %arg0, %c0_i32 : i32
    %28 = arith.extui %27 : i1 to i32
    %c0_i32_16 = arith.constant 0 : i32
    %29 = arith.cmpi ne, %28, %c0_i32_16 : i32
    scf.if %29 {
      %cst_21 = arith.constant 0.000000e+00 : f32
      %33 = vector.broadcast %cst_21 : f32 to vector<2x128xf32>
      %c0_22 = arith.constant 0 : index
      %c0_23 = arith.constant 0 : index
      %34 = vector.load %arg4[%c0_22, %c0_23] : memref<2x128xf32, #tpu.memory_space<vmem>>, vector<2x128xf32>
      tpu.vector_store %arg4[%c0_22, %c0_23], %33 {strides = array<i32>} : memref<2x128xf32, #tpu.memory_space<vmem>>, vector<2x128xf32>,
    } else {
    }
    %c0_17 = arith.constant 0 : index
    %c0_18 = arith.constant 0 : index
    %30 = vector.load %arg4[%c0_17, %c0_18] : memref<2x128xf32, #tpu.memory_space<vmem>>, vector<2x128xf32>
    %31 = arith.addf %30, %26 : vector<2x128xf32>
    %c0_19 = arith.constant 0 : index
    %c0_20 = arith.constant 0 : index
    %32 = vector.load %arg4[%c0_19, %c0_20] : memref<2x128xf32, #tpu.memory_space<vmem>>, vector<2x128xf32>
    tpu.vector_store %arg4[%c0_19, %c0_20], %31 {strides = array<i32>} : memref<2x128xf32, #tpu.memory_space<vmem>>, vector<2x128xf32>,
    return
  }
  func.func @transform_0(%arg0: i32) -> (i32, i32, i32) {
    %c0_i32 = arith.constant 0 : i32
    %c0_i32_0 = arith.constant 0 : i32
    %c0_i32_1 = arith.constant 0 : i32
    return %arg0, %c0_i32, %c0_i32_0 : i32, i32, i32
  }
  func.func @transform_1(%arg0: i32) -> (i32, i32, i32) {
    %c0_i32 = arith.constant 0 : i32
    %c0_i32_0 = arith.constant 0 : i32
    %c0_i32_1 = arith.constant 0 : i32
    %c0_i32_2 = arith.constant 0 : i32
    return %c0_i32, %c0_i32_0, %c0_i32_1 : i32, i32, i32
  }
  func.func @transform_2(%arg0: i32) -> (i32, i32) {
    %c0_i32 = arith.constant 0 : i32
    %c0_i32_0 = arith.constant 0 : i32
    %c0_i32_1 = arith.constant 0 : i32
    return %c0_i32, %c0_i32_0 : i32, i32
  }
  func.func @transform_3(%arg0: i32) -> (i32, i32) {
    %c0_i32 = arith.constant 0 : i32
    %c0_i32_0 = arith.constant 0 : i32
    %c0_i32_1 = arith.constant 0 : i32
    return %c0_i32, %c0_i32_0 : i32, i32
  }
}

module attributes {stable_mosaic.version = 11 : i64} {
  func.func @_conv_relu_affine_kernel(%arg0: i32, %arg1: memref<1x18x144xbf16, #tpu.memory_space<vmem>>, %arg2: memref<3x144x128xbf16, #tpu.memory_space<vmem>>, %arg3: memref<1x128xf32, #tpu.memory_space<vmem>>, %arg4: memref<1x128xf32, #tpu.memory_space<vmem>>, %arg5: memref<1x128xf32, #tpu.memory_space<vmem>>, %arg6: memref<1x16x128xf32, #tpu.memory_space<vmem>>) attributes {dimension_semantics = [#tpu.dimension_semantics<parallel>], iteration_bounds = array<i64: 2>, scalar_prefetch = 0 : i64, scratch_operands = 0 : i64, tpu.core_type = #tpu.core_type<tc>, window_params = [{transform_indices = @transform_0, window_bounds = array<i64: 1, 18, 144>}, {pipeline_mode = #tpu.pipeline_mode<synchronous>, transform_indices = @transform_1, window_bounds = array<i64: 3, 144, 128>}, {pipeline_mode = #tpu.pipeline_mode<synchronous>, transform_indices = @transform_2, window_bounds = array<i64: 1, 128>}, {pipeline_mode = #tpu.pipeline_mode<synchronous>, transform_indices = @transform_3, window_bounds = array<i64: 1, 128>}, {pipeline_mode = #tpu.pipeline_mode<synchronous>, transform_indices = @transform_4, window_bounds = array<i64: 1, 128>}, {transform_indices = @transform_5, window_bounds = array<i64: 1, 16, 128>}]} {
    %c0 = arith.constant 0 : index
    %c0_0 = arith.constant 0 : index
    %c0_1 = arith.constant 0 : index
    %0 = vector.load %arg1[%c0, %c0_0, %c0_1] : memref<1x18x144xbf16, #tpu.memory_space<vmem>>, vector<1x18x144xbf16>
    %1 = vector.shape_cast %0 : vector<1x18x144xbf16> to vector<18x144xbf16>
    %2 = vector.extract_strided_slice %1 {offsets = [0, 0], sizes = [16, 144], strides = [1, 1]} : vector<18x144xbf16> to vector<16x144xbf16>
    %c0_2 = arith.constant 0 : index
    %c0_3 = arith.constant 0 : index
    %c0_4 = arith.constant 0 : index
    %3 = vector.load %arg2[%c0_2, %c0_3, %c0_4] : memref<3x144x128xbf16, #tpu.memory_space<vmem>>, vector<1x144x128xbf16>
    %4 = vector.shape_cast %3 : vector<1x144x128xbf16> to vector<144x128xbf16>
    %cst = arith.constant dense<0.000000e+00> : vector<16x128xf32>
    %5 = tpu.matmul %2, %4, %cst {dimension_numbers = #tpu.dot_dimension_numbers<[1], [0], [0], [1], [0, 0, 1, 1], [], []>} : vector<16x144xbf16>, vector<144x128xbf16>, vector<16x128xf32> -> vector<16x128xf32>
    %6 = vector.extract_strided_slice %1 {offsets = [1, 0], sizes = [16, 144], strides = [1, 1]} : vector<18x144xbf16> to vector<16x144xbf16>
    %c1 = arith.constant 1 : index
    %c0_5 = arith.constant 0 : index
    %c0_6 = arith.constant 0 : index
    %7 = vector.load %arg2[%c1, %c0_5, %c0_6] : memref<3x144x128xbf16, #tpu.memory_space<vmem>>, vector<1x144x128xbf16>
    %8 = vector.shape_cast %7 : vector<1x144x128xbf16> to vector<144x128xbf16>
    %cst_7 = arith.constant dense<0.000000e+00> : vector<16x128xf32>
    %9 = tpu.matmul %6, %8, %cst_7 {dimension_numbers = #tpu.dot_dimension_numbers<[1], [0], [0], [1], [0, 0, 1, 1], [], []>} : vector<16x144xbf16>, vector<144x128xbf16>, vector<16x128xf32> -> vector<16x128xf32>
    %10 = arith.addf %5, %9 : vector<16x128xf32>
    %11 = vector.extract_strided_slice %1 {offsets = [2, 0], sizes = [16, 144], strides = [1, 1]} : vector<18x144xbf16> to vector<16x144xbf16>
    %c2 = arith.constant 2 : index
    %c0_8 = arith.constant 0 : index
    %c0_9 = arith.constant 0 : index
    %12 = vector.load %arg2[%c2, %c0_8, %c0_9] : memref<3x144x128xbf16, #tpu.memory_space<vmem>>, vector<1x144x128xbf16>
    %13 = vector.shape_cast %12 : vector<1x144x128xbf16> to vector<144x128xbf16>
    %cst_10 = arith.constant dense<0.000000e+00> : vector<16x128xf32>
    %14 = tpu.matmul %11, %13, %cst_10 {dimension_numbers = #tpu.dot_dimension_numbers<[1], [0], [0], [1], [0, 0, 1, 1], [], []>} : vector<16x144xbf16>, vector<144x128xbf16>, vector<16x128xf32> -> vector<16x128xf32>
    %15 = arith.addf %10, %14 : vector<16x128xf32>
    %c0_11 = arith.constant 0 : index
    %c0_12 = arith.constant 0 : index
    %16 = vector.load %arg3[%c0_11, %c0_12] : memref<1x128xf32, #tpu.memory_space<vmem>>, vector<1x128xf32>
    %17 = vector.broadcast %16 : vector<1x128xf32> to vector<16x128xf32>
    %18 = arith.addf %15, %17 : vector<16x128xf32>
    %cst_13 = arith.constant 0.000000e+00 : f32
    %19 = vector.broadcast %cst_13 : f32 to vector<16x128xf32>
    %20 = arith.maximumf %18, %19 : vector<16x128xf32>
    %c0_14 = arith.constant 0 : index
    %c0_15 = arith.constant 0 : index
    %21 = vector.load %arg4[%c0_14, %c0_15] : memref<1x128xf32, #tpu.memory_space<vmem>>, vector<1x128xf32>
    %22 = vector.broadcast %21 : vector<1x128xf32> to vector<16x128xf32>
    %23 = arith.mulf %20, %22 : vector<16x128xf32>
    %c0_16 = arith.constant 0 : index
    %c0_17 = arith.constant 0 : index
    %24 = vector.load %arg5[%c0_16, %c0_17] : memref<1x128xf32, #tpu.memory_space<vmem>>, vector<1x128xf32>
    %25 = vector.broadcast %24 : vector<1x128xf32> to vector<16x128xf32>
    %26 = arith.addf %23, %25 : vector<16x128xf32>
    %c0_18 = arith.constant 0 : index
    %c0_19 = arith.constant 0 : index
    %c0_20 = arith.constant 0 : index
    %27 = vector.load %arg6[%c0_18, %c0_19, %c0_20] : memref<1x16x128xf32, #tpu.memory_space<vmem>>, vector<1x16x128xf32>
    %28 = vector.shape_cast %27 : vector<1x16x128xf32> to vector<16x128xf32>
    %29 = vector.shape_cast %26 : vector<16x128xf32> to vector<1x16x128xf32>
    tpu.vector_store %arg6[%c0_18, %c0_19, %c0_20], %29 {strides = array<i32>} : memref<1x16x128xf32, #tpu.memory_space<vmem>>, vector<1x16x128xf32>,
    return
  }
  func.func @transform_0(%arg0: i32) -> (i32, i32, i32) {
    %c0_i32 = arith.constant 0 : i32
    %c0_i32_0 = arith.constant 0 : i32
    %c0_i32_1 = arith.constant 0 : i32
    return %arg0, %c0_i32, %c0_i32_0 : i32, i32, i32
  }
  func.func @transform_1(%arg0: i32) -> (i32, i32, i32) {
    %c0_i32 = arith.constant 0 : i32
    %c0_i32_0 = arith.constant 0 : i32
    %c0_i32_1 = arith.constant 0 : i32
    %c0_i32_2 = arith.constant 0 : i32
    return %c0_i32, %c0_i32_0, %c0_i32_1 : i32, i32, i32
  }
  func.func @transform_2(%arg0: i32) -> (i32, i32) {
    %c0_i32 = arith.constant 0 : i32
    %c0_i32_0 = arith.constant 0 : i32
    %c0_i32_1 = arith.constant 0 : i32
    return %c0_i32, %c0_i32_0 : i32, i32
  }
  func.func @transform_3(%arg0: i32) -> (i32, i32) {
    %c0_i32 = arith.constant 0 : i32
    %c0_i32_0 = arith.constant 0 : i32
    %c0_i32_1 = arith.constant 0 : i32
    return %c0_i32, %c0_i32_0 : i32, i32
  }
  func.func @transform_4(%arg0: i32) -> (i32, i32) {
    %c0_i32 = arith.constant 0 : i32
    %c0_i32_0 = arith.constant 0 : i32
    %c0_i32_1 = arith.constant 0 : i32
    return %c0_i32, %c0_i32_0 : i32, i32
  }
  func.func @transform_5(%arg0: i32) -> (i32, i32, i32) {
    %c0_i32 = arith.constant 0 : i32
    %c0_i32_0 = arith.constant 0 : i32
    %c0_i32_1 = arith.constant 0 : i32
    return %arg0, %c0_i32, %c0_i32_0 : i32, i32, i32
  }
}

module attributes {stable_mosaic.version = 11 : i64} {
  func.func @_conv_relu_affine_kernel(%arg0: i32, %arg1: memref<1x16x64xbf16, #tpu.memory_space<vmem>>, %arg2: memref<1x64x128xbf16, #tpu.memory_space<vmem>>, %arg3: memref<1x128xf32, #tpu.memory_space<vmem>>, %arg4: memref<1x128xf32, #tpu.memory_space<vmem>>, %arg5: memref<1x128xf32, #tpu.memory_space<vmem>>, %arg6: memref<1x16x128xf32, #tpu.memory_space<vmem>>) attributes {dimension_semantics = [#tpu.dimension_semantics<parallel>], iteration_bounds = array<i64: 2>, scalar_prefetch = 0 : i64, scratch_operands = 0 : i64, tpu.core_type = #tpu.core_type<tc>, window_params = [{transform_indices = @transform_0, window_bounds = array<i64: 1, 16, 64>}, {pipeline_mode = #tpu.pipeline_mode<synchronous>, transform_indices = @transform_1, window_bounds = array<i64: 1, 64, 128>}, {pipeline_mode = #tpu.pipeline_mode<synchronous>, transform_indices = @transform_2, window_bounds = array<i64: 1, 128>}, {pipeline_mode = #tpu.pipeline_mode<synchronous>, transform_indices = @transform_3, window_bounds = array<i64: 1, 128>}, {pipeline_mode = #tpu.pipeline_mode<synchronous>, transform_indices = @transform_4, window_bounds = array<i64: 1, 128>}, {transform_indices = @transform_5, window_bounds = array<i64: 1, 16, 128>}]} {
    %c0 = arith.constant 0 : index
    %c0_0 = arith.constant 0 : index
    %c0_1 = arith.constant 0 : index
    %0 = vector.load %arg1[%c0, %c0_0, %c0_1] : memref<1x16x64xbf16, #tpu.memory_space<vmem>>, vector<1x16x64xbf16>
    %1 = vector.shape_cast %0 : vector<1x16x64xbf16> to vector<16x64xbf16>
    %c0_2 = arith.constant 0 : index
    %c0_3 = arith.constant 0 : index
    %c0_4 = arith.constant 0 : index
    %2 = vector.load %arg2[%c0_2, %c0_3, %c0_4] : memref<1x64x128xbf16, #tpu.memory_space<vmem>>, vector<1x64x128xbf16>
    %3 = vector.shape_cast %2 : vector<1x64x128xbf16> to vector<64x128xbf16>
    %cst = arith.constant dense<0.000000e+00> : vector<16x128xf32>
    %4 = tpu.matmul %1, %3, %cst {dimension_numbers = #tpu.dot_dimension_numbers<[1], [0], [0], [1], [0, 0, 1, 1], [], []>} : vector<16x64xbf16>, vector<64x128xbf16>, vector<16x128xf32> -> vector<16x128xf32>
    %c0_5 = arith.constant 0 : index
    %c0_6 = arith.constant 0 : index
    %5 = vector.load %arg3[%c0_5, %c0_6] : memref<1x128xf32, #tpu.memory_space<vmem>>, vector<1x128xf32>
    %6 = vector.broadcast %5 : vector<1x128xf32> to vector<16x128xf32>
    %7 = arith.addf %4, %6 : vector<16x128xf32>
    %cst_7 = arith.constant 0.000000e+00 : f32
    %8 = vector.broadcast %cst_7 : f32 to vector<16x128xf32>
    %9 = arith.maximumf %7, %8 : vector<16x128xf32>
    %c0_8 = arith.constant 0 : index
    %c0_9 = arith.constant 0 : index
    %10 = vector.load %arg4[%c0_8, %c0_9] : memref<1x128xf32, #tpu.memory_space<vmem>>, vector<1x128xf32>
    %11 = vector.broadcast %10 : vector<1x128xf32> to vector<16x128xf32>
    %12 = arith.mulf %9, %11 : vector<16x128xf32>
    %c0_10 = arith.constant 0 : index
    %c0_11 = arith.constant 0 : index
    %13 = vector.load %arg5[%c0_10, %c0_11] : memref<1x128xf32, #tpu.memory_space<vmem>>, vector<1x128xf32>
    %14 = vector.broadcast %13 : vector<1x128xf32> to vector<16x128xf32>
    %15 = arith.addf %12, %14 : vector<16x128xf32>
    %c0_12 = arith.constant 0 : index
    %c0_13 = arith.constant 0 : index
    %c0_14 = arith.constant 0 : index
    %16 = vector.load %arg6[%c0_12, %c0_13, %c0_14] : memref<1x16x128xf32, #tpu.memory_space<vmem>>, vector<1x16x128xf32>
    %17 = vector.shape_cast %16 : vector<1x16x128xf32> to vector<16x128xf32>
    %18 = vector.shape_cast %15 : vector<16x128xf32> to vector<1x16x128xf32>
    tpu.vector_store %arg6[%c0_12, %c0_13, %c0_14], %18 {strides = array<i32>} : memref<1x16x128xf32, #tpu.memory_space<vmem>>, vector<1x16x128xf32>,
    return
  }
  func.func @transform_0(%arg0: i32) -> (i32, i32, i32) {
    %c0_i32 = arith.constant 0 : i32
    %c0_i32_0 = arith.constant 0 : i32
    %c0_i32_1 = arith.constant 0 : i32
    return %arg0, %c0_i32, %c0_i32_0 : i32, i32, i32
  }
  func.func @transform_1(%arg0: i32) -> (i32, i32, i32) {
    %c0_i32 = arith.constant 0 : i32
    %c0_i32_0 = arith.constant 0 : i32
    %c0_i32_1 = arith.constant 0 : i32
    %c0_i32_2 = arith.constant 0 : i32
    return %c0_i32, %c0_i32_0, %c0_i32_1 : i32, i32, i32
  }
  func.func @transform_2(%arg0: i32) -> (i32, i32) {
    %c0_i32 = arith.constant 0 : i32
    %c0_i32_0 = arith.constant 0 : i32
    %c0_i32_1 = arith.constant 0 : i32
    return %c0_i32, %c0_i32_0 : i32, i32
  }
  func.func @transform_3(%arg0: i32) -> (i32, i32) {
    %c0_i32 = arith.constant 0 : i32
    %c0_i32_0 = arith.constant 0 : i32
    %c0_i32_1 = arith.constant 0 : i32
    return %c0_i32, %c0_i32_0 : i32, i32
  }
  func.func @transform_4(%arg0: i32) -> (i32, i32) {
    %c0_i32 = arith.constant 0 : i32
    %c0_i32_0 = arith.constant 0 : i32
    %c0_i32_1 = arith.constant 0 : i32
    return %c0_i32, %c0_i32_0 : i32, i32
  }
  func.func @transform_5(%arg0: i32) -> (i32, i32, i32) {
    %c0_i32 = arith.constant 0 : i32
    %c0_i32_0 = arith.constant 0 : i32
    %c0_i32_1 = arith.constant 0 : i32
    return %arg0, %c0_i32, %c0_i32_0 : i32, i32, i32
  }
}

module attributes {stable_mosaic.version = 11 : i64} {
  func.func @_bn_stats_kernel(%arg0: i32, %arg1: memref<1x16x128xf32, #tpu.memory_space<vmem>>, %arg2: memref<2x128xf32, #tpu.memory_space<vmem>>) attributes {dimension_semantics = [#tpu.dimension_semantics<arbitrary>], iteration_bounds = array<i64: 2>, scalar_prefetch = 0 : i64, scratch_operands = 0 : i64, tpu.core_type = #tpu.core_type<tc>, window_params = [{transform_indices = @transform_0, window_bounds = array<i64: 1, 16, 128>}, {pipeline_mode = #tpu.pipeline_mode<synchronous>, transform_indices = @transform_1, window_bounds = array<i64: 2, 128>}]} {
    %c0 = arith.constant 0 : index
    %c0_0 = arith.constant 0 : index
    %c0_1 = arith.constant 0 : index
    %0 = vector.load %arg1[%c0, %c0_0, %c0_1] : memref<1x16x128xf32, #tpu.memory_space<vmem>>, vector<1x16x128xf32>
    %1 = vector.shape_cast %0 : vector<1x16x128xf32> to vector<16x128xf32>
    %cst = arith.constant dense<0.000000e+00> : vector<128xf32>
    %2 = vector.multi_reduction <add>, %1, %cst [0] : vector<16x128xf32> to vector<128xf32>
    %3 = vector.shape_cast %2 : vector<128xf32> to vector<1x128xf32>
    %4 = arith.mulf %1, %1 : vector<16x128xf32>
    %cst_2 = arith.constant dense<0.000000e+00> : vector<128xf32>
    %5 = vector.multi_reduction <add>, %4, %cst_2 [0] : vector<16x128xf32> to vector<128xf32>
    %6 = vector.shape_cast %5 : vector<128xf32> to vector<1x128xf32>
    %7 = tpu.concatenate %3, %6 in 0 : vector<1x128xf32>, vector<1x128xf32> -> vector<2x128xf32>
    %c0_i32 = arith.constant 0 : i32
    %8 = arith.cmpi eq, %arg0, %c0_i32 : i32
    %9 = arith.extui %8 : i1 to i32
    %c0_i32_3 = arith.constant 0 : i32
    %10 = arith.cmpi ne, %9, %c0_i32_3 : i32
    scf.if %10 {
      %cst_8 = arith.constant 0.000000e+00 : f32
      %14 = vector.broadcast %cst_8 : f32 to vector<2x128xf32>
      %c0_9 = arith.constant 0 : index
      %c0_10 = arith.constant 0 : index
      %15 = vector.load %arg2[%c0_9, %c0_10] : memref<2x128xf32, #tpu.memory_space<vmem>>, vector<2x128xf32>
      tpu.vector_store %arg2[%c0_9, %c0_10], %14 {strides = array<i32>} : memref<2x128xf32, #tpu.memory_space<vmem>>, vector<2x128xf32>,
    } else {
    }
    %c0_4 = arith.constant 0 : index
    %c0_5 = arith.constant 0 : index
    %11 = vector.load %arg2[%c0_4, %c0_5] : memref<2x128xf32, #tpu.memory_space<vmem>>, vector<2x128xf32>
    %12 = arith.addf %11, %7 : vector<2x128xf32>
    %c0_6 = arith.constant 0 : index
    %c0_7 = arith.constant 0 : index
    %13 = vector.load %arg2[%c0_6, %c0_7] : memref<2x128xf32, #tpu.memory_space<vmem>>, vector<2x128xf32>
    tpu.vector_store %arg2[%c0_6, %c0_7], %12 {strides = array<i32>} : memref<2x128xf32, #tpu.memory_space<vmem>>, vector<2x128xf32>,
    return
  }
  func.func @transform_0(%arg0: i32) -> (i32, i32, i32) {
    %c0_i32 = arith.constant 0 : i32
    %c0_i32_0 = arith.constant 0 : i32
    %c0_i32_1 = arith.constant 0 : i32
    return %arg0, %c0_i32, %c0_i32_0 : i32, i32, i32
  }
  func.func @transform_1(%arg0: i32) -> (i32, i32) {
    %c0_i32 = arith.constant 0 : i32
    %c0_i32_0 = arith.constant 0 : i32
    %c0_i32_1 = arith.constant 0 : i32
    return %c0_i32, %c0_i32_0 : i32, i32
  }
}

module attributes {stable_mosaic.version = 11 : i64} {
  func.func @_affine_kernel(%arg0: i32, %arg1: memref<1x16x128xf32, #tpu.memory_space<vmem>>, %arg2: memref<1x128xf32, #tpu.memory_space<vmem>>, %arg3: memref<1x128xf32, #tpu.memory_space<vmem>>, %arg4: memref<1x16x128xf32, #tpu.memory_space<vmem>>) attributes {dimension_semantics = [#tpu.dimension_semantics<parallel>], iteration_bounds = array<i64: 2>, scalar_prefetch = 0 : i64, scratch_operands = 0 : i64, tpu.core_type = #tpu.core_type<tc>, window_params = [{transform_indices = @transform_0, window_bounds = array<i64: 1, 16, 128>}, {pipeline_mode = #tpu.pipeline_mode<synchronous>, transform_indices = @transform_1, window_bounds = array<i64: 1, 128>}, {pipeline_mode = #tpu.pipeline_mode<synchronous>, transform_indices = @transform_2, window_bounds = array<i64: 1, 128>}, {transform_indices = @transform_3, window_bounds = array<i64: 1, 16, 128>}]} {
    %c0 = arith.constant 0 : index
    %c0_0 = arith.constant 0 : index
    %c0_1 = arith.constant 0 : index
    %0 = vector.load %arg1[%c0, %c0_0, %c0_1] : memref<1x16x128xf32, #tpu.memory_space<vmem>>, vector<1x16x128xf32>
    %1 = vector.shape_cast %0 : vector<1x16x128xf32> to vector<16x128xf32>
    %c0_2 = arith.constant 0 : index
    %c0_3 = arith.constant 0 : index
    %2 = vector.load %arg2[%c0_2, %c0_3] : memref<1x128xf32, #tpu.memory_space<vmem>>, vector<1x128xf32>
    %3 = vector.broadcast %2 : vector<1x128xf32> to vector<16x128xf32>
    %4 = arith.mulf %1, %3 : vector<16x128xf32>
    %c0_4 = arith.constant 0 : index
    %c0_5 = arith.constant 0 : index
    %5 = vector.load %arg3[%c0_4, %c0_5] : memref<1x128xf32, #tpu.memory_space<vmem>>, vector<1x128xf32>
    %6 = vector.broadcast %5 : vector<1x128xf32> to vector<16x128xf32>
    %7 = arith.addf %4, %6 : vector<16x128xf32>
    %c0_6 = arith.constant 0 : index
    %c0_7 = arith.constant 0 : index
    %c0_8 = arith.constant 0 : index
    %8 = vector.load %arg4[%c0_6, %c0_7, %c0_8] : memref<1x16x128xf32, #tpu.memory_space<vmem>>, vector<1x16x128xf32>
    %9 = vector.shape_cast %8 : vector<1x16x128xf32> to vector<16x128xf32>
    %10 = vector.shape_cast %7 : vector<16x128xf32> to vector<1x16x128xf32>
    tpu.vector_store %arg4[%c0_6, %c0_7, %c0_8], %10 {strides = array<i32>} : memref<1x16x128xf32, #tpu.memory_space<vmem>>, vector<1x16x128xf32>,
    return
  }
  func.func @transform_0(%arg0: i32) -> (i32, i32, i32) {
    %c0_i32 = arith.constant 0 : i32
    %c0_i32_0 = arith.constant 0 : i32
    %c0_i32_1 = arith.constant 0 : i32
    return %arg0, %c0_i32, %c0_i32_0 : i32, i32, i32
  }
  func.func @transform_1(%arg0: i32) -> (i32, i32) {
    %c0_i32 = arith.constant 0 : i32
    %c0_i32_0 = arith.constant 0 : i32
    %c0_i32_1 = arith.constant 0 : i32
    return %c0_i32, %c0_i32_0 : i32, i32
  }
  func.func @transform_2(%arg0: i32) -> (i32, i32) {
    %c0_i32 = arith.constant 0 : i32
    %c0_i32_0 = arith.constant 0 : i32
    %c0_i32_1 = arith.constant 0 : i32
    return %c0_i32, %c0_i32_0 : i32, i32
  }
  func.func @transform_3(%arg0: i32) -> (i32, i32, i32) {
    %c0_i32 = arith.constant 0 : i32
    %c0_i32_0 = arith.constant 0 : i32
    %c0_i32_1 = arith.constant 0 : i32
    return %arg0, %c0_i32, %c0_i32_0 : i32, i32, i32
  }
}

module attributes {stable_mosaic.version = 11 : i64} {
  func.func @_conv_relu_affine_kernel(%arg0: i32, %arg1: memref<1x16x128xbf16, #tpu.memory_space<vmem>>, %arg2: memref<1x128x128xbf16, #tpu.memory_space<vmem>>, %arg3: memref<1x128xf32, #tpu.memory_space<vmem>>, %arg4: memref<1x128xf32, #tpu.memory_space<vmem>>, %arg5: memref<1x128xf32, #tpu.memory_space<vmem>>, %arg6: memref<1x16x128xf32, #tpu.memory_space<vmem>>) attributes {dimension_semantics = [#tpu.dimension_semantics<parallel>], iteration_bounds = array<i64: 2>, scalar_prefetch = 0 : i64, scratch_operands = 0 : i64, tpu.core_type = #tpu.core_type<tc>, window_params = [{transform_indices = @transform_0, window_bounds = array<i64: 1, 16, 128>}, {pipeline_mode = #tpu.pipeline_mode<synchronous>, transform_indices = @transform_1, window_bounds = array<i64: 1, 128, 128>}, {pipeline_mode = #tpu.pipeline_mode<synchronous>, transform_indices = @transform_2, window_bounds = array<i64: 1, 128>}, {pipeline_mode = #tpu.pipeline_mode<synchronous>, transform_indices = @transform_3, window_bounds = array<i64: 1, 128>}, {pipeline_mode = #tpu.pipeline_mode<synchronous>, transform_indices = @transform_4, window_bounds = array<i64: 1, 128>}, {transform_indices = @transform_5, window_bounds = array<i64: 1, 16, 128>}]} {
    %c0 = arith.constant 0 : index
    %c0_0 = arith.constant 0 : index
    %c0_1 = arith.constant 0 : index
    %0 = vector.load %arg1[%c0, %c0_0, %c0_1] : memref<1x16x128xbf16, #tpu.memory_space<vmem>>, vector<1x16x128xbf16>
    %1 = vector.shape_cast %0 : vector<1x16x128xbf16> to vector<16x128xbf16>
    %c0_2 = arith.constant 0 : index
    %c0_3 = arith.constant 0 : index
    %c0_4 = arith.constant 0 : index
    %2 = vector.load %arg2[%c0_2, %c0_3, %c0_4] : memref<1x128x128xbf16, #tpu.memory_space<vmem>>, vector<1x128x128xbf16>
    %3 = vector.shape_cast %2 : vector<1x128x128xbf16> to vector<128x128xbf16>
    %cst = arith.constant dense<0.000000e+00> : vector<16x128xf32>
    %4 = tpu.matmul %1, %3, %cst {dimension_numbers = #tpu.dot_dimension_numbers<[1], [0], [0], [1], [0, 0, 1, 1], [], []>} : vector<16x128xbf16>, vector<128x128xbf16>, vector<16x128xf32> -> vector<16x128xf32>
    %c0_5 = arith.constant 0 : index
    %c0_6 = arith.constant 0 : index
    %5 = vector.load %arg3[%c0_5, %c0_6] : memref<1x128xf32, #tpu.memory_space<vmem>>, vector<1x128xf32>
    %6 = vector.broadcast %5 : vector<1x128xf32> to vector<16x128xf32>
    %7 = arith.addf %4, %6 : vector<16x128xf32>
    %cst_7 = arith.constant 0.000000e+00 : f32
    %8 = vector.broadcast %cst_7 : f32 to vector<16x128xf32>
    %9 = arith.maximumf %7, %8 : vector<16x128xf32>
    %c0_8 = arith.constant 0 : index
    %c0_9 = arith.constant 0 : index
    %10 = vector.load %arg4[%c0_8, %c0_9] : memref<1x128xf32, #tpu.memory_space<vmem>>, vector<1x128xf32>
    %11 = vector.broadcast %10 : vector<1x128xf32> to vector<16x128xf32>
    %12 = arith.mulf %9, %11 : vector<16x128xf32>
    %c0_10 = arith.constant 0 : index
    %c0_11 = arith.constant 0 : index
    %13 = vector.load %arg5[%c0_10, %c0_11] : memref<1x128xf32, #tpu.memory_space<vmem>>, vector<1x128xf32>
    %14 = vector.broadcast %13 : vector<1x128xf32> to vector<16x128xf32>
    %15 = arith.addf %12, %14 : vector<16x128xf32>
    %c0_12 = arith.constant 0 : index
    %c0_13 = arith.constant 0 : index
    %c0_14 = arith.constant 0 : index
    %16 = vector.load %arg6[%c0_12, %c0_13, %c0_14] : memref<1x16x128xf32, #tpu.memory_space<vmem>>, vector<1x16x128xf32>
    %17 = vector.shape_cast %16 : vector<1x16x128xf32> to vector<16x128xf32>
    %18 = vector.shape_cast %15 : vector<16x128xf32> to vector<1x16x128xf32>
    tpu.vector_store %arg6[%c0_12, %c0_13, %c0_14], %18 {strides = array<i32>} : memref<1x16x128xf32, #tpu.memory_space<vmem>>, vector<1x16x128xf32>,
    return
  }
  func.func @transform_0(%arg0: i32) -> (i32, i32, i32) {
    %c0_i32 = arith.constant 0 : i32
    %c0_i32_0 = arith.constant 0 : i32
    %c0_i32_1 = arith.constant 0 : i32
    return %arg0, %c0_i32, %c0_i32_0 : i32, i32, i32
  }
  func.func @transform_1(%arg0: i32) -> (i32, i32, i32) {
    %c0_i32 = arith.constant 0 : i32
    %c0_i32_0 = arith.constant 0 : i32
    %c0_i32_1 = arith.constant 0 : i32
    %c0_i32_2 = arith.constant 0 : i32
    return %c0_i32, %c0_i32_0, %c0_i32_1 : i32, i32, i32
  }
  func.func @transform_2(%arg0: i32) -> (i32, i32) {
    %c0_i32 = arith.constant 0 : i32
    %c0_i32_0 = arith.constant 0 : i32
    %c0_i32_1 = arith.constant 0 : i32
    return %c0_i32, %c0_i32_0 : i32, i32
  }
  func.func @transform_3(%arg0: i32) -> (i32, i32) {
    %c0_i32 = arith.constant 0 : i32
    %c0_i32_0 = arith.constant 0 : i32
    %c0_i32_1 = arith.constant 0 : i32
    return %c0_i32, %c0_i32_0 : i32, i32
  }
  func.func @transform_4(%arg0: i32) -> (i32, i32) {
    %c0_i32 = arith.constant 0 : i32
    %c0_i32_0 = arith.constant 0 : i32
    %c0_i32_1 = arith.constant 0 : i32
    return %c0_i32, %c0_i32_0 : i32, i32
  }
  func.func @transform_5(%arg0: i32) -> (i32, i32, i32) {
    %c0_i32 = arith.constant 0 : i32
    %c0_i32_0 = arith.constant 0 : i32
    %c0_i32_1 = arith.constant 0 : i32
    return %arg0, %c0_i32, %c0_i32_0 : i32, i32, i32
  }
}

module attributes {stable_mosaic.version = 11 : i64} {
  func.func @_conv_relu_stats_kernel(%arg0: i32, %arg1: memref<1x21x64xbf16, #tpu.memory_space<vmem>>, %arg2: memref<1x64x88xbf16, #tpu.memory_space<vmem>>, %arg3: memref<1x88xf32, #tpu.memory_space<vmem>>, %arg4: memref<2x88xf32, #tpu.memory_space<vmem>>) attributes {dimension_semantics = [#tpu.dimension_semantics<arbitrary>], iteration_bounds = array<i64: 2>, scalar_prefetch = 0 : i64, scratch_operands = 0 : i64, tpu.core_type = #tpu.core_type<tc>, window_params = [{transform_indices = @transform_0, window_bounds = array<i64: 1, 21, 64>}, {pipeline_mode = #tpu.pipeline_mode<synchronous>, transform_indices = @transform_1, window_bounds = array<i64: 1, 64, 88>}, {pipeline_mode = #tpu.pipeline_mode<synchronous>, transform_indices = @transform_2, window_bounds = array<i64: 1, 88>}, {pipeline_mode = #tpu.pipeline_mode<synchronous>, transform_indices = @transform_3, window_bounds = array<i64: 2, 88>}]} {
    %c0 = arith.constant 0 : index
    %c0_0 = arith.constant 0 : index
    %c0_1 = arith.constant 0 : index
    %0 = vector.load %arg1[%c0, %c0_0, %c0_1] : memref<1x21x64xbf16, #tpu.memory_space<vmem>>, vector<1x21x64xbf16>
    %1 = vector.shape_cast %0 : vector<1x21x64xbf16> to vector<21x64xbf16>
    %c0_2 = arith.constant 0 : index
    %c0_3 = arith.constant 0 : index
    %c0_4 = arith.constant 0 : index
    %2 = vector.load %arg2[%c0_2, %c0_3, %c0_4] : memref<1x64x88xbf16, #tpu.memory_space<vmem>>, vector<1x64x88xbf16>
    %3 = vector.shape_cast %2 : vector<1x64x88xbf16> to vector<64x88xbf16>
    %cst = arith.constant dense<0.000000e+00> : vector<21x88xf32>
    %4 = tpu.matmul %1, %3, %cst {dimension_numbers = #tpu.dot_dimension_numbers<[1], [0], [0], [1], [0, 0, 1, 1], [], []>} : vector<21x64xbf16>, vector<64x88xbf16>, vector<21x88xf32> -> vector<21x88xf32>
    %c0_5 = arith.constant 0 : index
    %c0_6 = arith.constant 0 : index
    %5 = vector.load %arg3[%c0_5, %c0_6] : memref<1x88xf32, #tpu.memory_space<vmem>>, vector<1x88xf32>
    %6 = vector.broadcast %5 : vector<1x88xf32> to vector<21x88xf32>
    %7 = arith.addf %4, %6 : vector<21x88xf32>
    %cst_7 = arith.constant 0.000000e+00 : f32
    %8 = vector.broadcast %cst_7 : f32 to vector<21x88xf32>
    %9 = arith.maximumf %7, %8 : vector<21x88xf32>
    %cst_8 = arith.constant dense<0.000000e+00> : vector<88xf32>
    %10 = vector.multi_reduction <add>, %9, %cst_8 [0] : vector<21x88xf32> to vector<88xf32>
    %11 = vector.shape_cast %10 : vector<88xf32> to vector<1x88xf32>
    %12 = arith.mulf %9, %9 : vector<21x88xf32>
    %cst_9 = arith.constant dense<0.000000e+00> : vector<88xf32>
    %13 = vector.multi_reduction <add>, %12, %cst_9 [0] : vector<21x88xf32> to vector<88xf32>
    %14 = vector.shape_cast %13 : vector<88xf32> to vector<1x88xf32>
    %15 = tpu.concatenate %11, %14 in 0 : vector<1x88xf32>, vector<1x88xf32> -> vector<2x88xf32>
    %c0_i32 = arith.constant 0 : i32
    %16 = arith.cmpi eq, %arg0, %c0_i32 : i32
    %17 = arith.extui %16 : i1 to i32
    %c0_i32_10 = arith.constant 0 : i32
    %18 = arith.cmpi ne, %17, %c0_i32_10 : i32
    scf.if %18 {
      %cst_15 = arith.constant 0.000000e+00 : f32
      %22 = vector.broadcast %cst_15 : f32 to vector<2x88xf32>
      %c0_16 = arith.constant 0 : index
      %c0_17 = arith.constant 0 : index
      %23 = vector.load %arg4[%c0_16, %c0_17] : memref<2x88xf32, #tpu.memory_space<vmem>>, vector<2x88xf32>
      tpu.vector_store %arg4[%c0_16, %c0_17], %22 {strides = array<i32>} : memref<2x88xf32, #tpu.memory_space<vmem>>, vector<2x88xf32>,
    } else {
    }
    %c0_11 = arith.constant 0 : index
    %c0_12 = arith.constant 0 : index
    %19 = vector.load %arg4[%c0_11, %c0_12] : memref<2x88xf32, #tpu.memory_space<vmem>>, vector<2x88xf32>
    %20 = arith.addf %19, %15 : vector<2x88xf32>
    %c0_13 = arith.constant 0 : index
    %c0_14 = arith.constant 0 : index
    %21 = vector.load %arg4[%c0_13, %c0_14] : memref<2x88xf32, #tpu.memory_space<vmem>>, vector<2x88xf32>
    tpu.vector_store %arg4[%c0_13, %c0_14], %20 {strides = array<i32>} : memref<2x88xf32, #tpu.memory_space<vmem>>, vector<2x88xf32>,
    return
  }
  func.func @transform_0(%arg0: i32) -> (i32, i32, i32) {
    %c0_i32 = arith.constant 0 : i32
    %c0_i32_0 = arith.constant 0 : i32
    %c0_i32_1 = arith.constant 0 : i32
    return %arg0, %c0_i32, %c0_i32_0 : i32, i32, i32
  }
  func.func @transform_1(%arg0: i32) -> (i32, i32, i32) {
    %c0_i32 = arith.constant 0 : i32
    %c0_i32_0 = arith.constant 0 : i32
    %c0_i32_1 = arith.constant 0 : i32
    %c0_i32_2 = arith.constant 0 : i32
    return %c0_i32, %c0_i32_0, %c0_i32_1 : i32, i32, i32
  }
  func.func @transform_2(%arg0: i32) -> (i32, i32) {
    %c0_i32 = arith.constant 0 : i32
    %c0_i32_0 = arith.constant 0 : i32
    %c0_i32_1 = arith.constant 0 : i32
    return %c0_i32, %c0_i32_0 : i32, i32
  }
  func.func @transform_3(%arg0: i32) -> (i32, i32) {
    %c0_i32 = arith.constant 0 : i32
    %c0_i32_0 = arith.constant 0 : i32
    %c0_i32_1 = arith.constant 0 : i32
    return %c0_i32, %c0_i32_0 : i32, i32
  }
}

module attributes {stable_mosaic.version = 11 : i64} {
  func.func @_conv_relu_affine_kernel(%arg0: i32, %arg1: memref<1x21x64xbf16, #tpu.memory_space<vmem>>, %arg2: memref<1x64x88xbf16, #tpu.memory_space<vmem>>, %arg3: memref<1x88xf32, #tpu.memory_space<vmem>>, %arg4: memref<1x88xf32, #tpu.memory_space<vmem>>, %arg5: memref<1x88xf32, #tpu.memory_space<vmem>>, %arg6: memref<1x21x88xf32, #tpu.memory_space<vmem>>) attributes {dimension_semantics = [#tpu.dimension_semantics<parallel>], iteration_bounds = array<i64: 2>, scalar_prefetch = 0 : i64, scratch_operands = 0 : i64, tpu.core_type = #tpu.core_type<tc>, window_params = [{transform_indices = @transform_0, window_bounds = array<i64: 1, 21, 64>}, {pipeline_mode = #tpu.pipeline_mode<synchronous>, transform_indices = @transform_1, window_bounds = array<i64: 1, 64, 88>}, {pipeline_mode = #tpu.pipeline_mode<synchronous>, transform_indices = @transform_2, window_bounds = array<i64: 1, 88>}, {pipeline_mode = #tpu.pipeline_mode<synchronous>, transform_indices = @transform_3, window_bounds = array<i64: 1, 88>}, {pipeline_mode = #tpu.pipeline_mode<synchronous>, transform_indices = @transform_4, window_bounds = array<i64: 1, 88>}, {transform_indices = @transform_5, window_bounds = array<i64: 1, 21, 88>}]} {
    %c0 = arith.constant 0 : index
    %c0_0 = arith.constant 0 : index
    %c0_1 = arith.constant 0 : index
    %0 = vector.load %arg1[%c0, %c0_0, %c0_1] : memref<1x21x64xbf16, #tpu.memory_space<vmem>>, vector<1x21x64xbf16>
    %1 = vector.shape_cast %0 : vector<1x21x64xbf16> to vector<21x64xbf16>
    %c0_2 = arith.constant 0 : index
    %c0_3 = arith.constant 0 : index
    %c0_4 = arith.constant 0 : index
    %2 = vector.load %arg2[%c0_2, %c0_3, %c0_4] : memref<1x64x88xbf16, #tpu.memory_space<vmem>>, vector<1x64x88xbf16>
    %3 = vector.shape_cast %2 : vector<1x64x88xbf16> to vector<64x88xbf16>
    %cst = arith.constant dense<0.000000e+00> : vector<21x88xf32>
    %4 = tpu.matmul %1, %3, %cst {dimension_numbers = #tpu.dot_dimension_numbers<[1], [0], [0], [1], [0, 0, 1, 1], [], []>} : vector<21x64xbf16>, vector<64x88xbf16>, vector<21x88xf32> -> vector<21x88xf32>
    %c0_5 = arith.constant 0 : index
    %c0_6 = arith.constant 0 : index
    %5 = vector.load %arg3[%c0_5, %c0_6] : memref<1x88xf32, #tpu.memory_space<vmem>>, vector<1x88xf32>
    %6 = vector.broadcast %5 : vector<1x88xf32> to vector<21x88xf32>
    %7 = arith.addf %4, %6 : vector<21x88xf32>
    %cst_7 = arith.constant 0.000000e+00 : f32
    %8 = vector.broadcast %cst_7 : f32 to vector<21x88xf32>
    %9 = arith.maximumf %7, %8 : vector<21x88xf32>
    %c0_8 = arith.constant 0 : index
    %c0_9 = arith.constant 0 : index
    %10 = vector.load %arg4[%c0_8, %c0_9] : memref<1x88xf32, #tpu.memory_space<vmem>>, vector<1x88xf32>
    %11 = vector.broadcast %10 : vector<1x88xf32> to vector<21x88xf32>
    %12 = arith.mulf %9, %11 : vector<21x88xf32>
    %c0_10 = arith.constant 0 : index
    %c0_11 = arith.constant 0 : index
    %13 = vector.load %arg5[%c0_10, %c0_11] : memref<1x88xf32, #tpu.memory_space<vmem>>, vector<1x88xf32>
    %14 = vector.broadcast %13 : vector<1x88xf32> to vector<21x88xf32>
    %15 = arith.addf %12, %14 : vector<21x88xf32>
    %c0_12 = arith.constant 0 : index
    %c0_13 = arith.constant 0 : index
    %c0_14 = arith.constant 0 : index
    %16 = vector.load %arg6[%c0_12, %c0_13, %c0_14] : memref<1x21x88xf32, #tpu.memory_space<vmem>>, vector<1x21x88xf32>
    %17 = vector.shape_cast %16 : vector<1x21x88xf32> to vector<21x88xf32>
    %18 = vector.shape_cast %15 : vector<21x88xf32> to vector<1x21x88xf32>
    tpu.vector_store %arg6[%c0_12, %c0_13, %c0_14], %18 {strides = array<i32>} : memref<1x21x88xf32, #tpu.memory_space<vmem>>, vector<1x21x88xf32>,
    return
  }
  func.func @transform_0(%arg0: i32) -> (i32, i32, i32) {
    %c0_i32 = arith.constant 0 : i32
    %c0_i32_0 = arith.constant 0 : i32
    %c0_i32_1 = arith.constant 0 : i32
    return %arg0, %c0_i32, %c0_i32_0 : i32, i32, i32
  }
  func.func @transform_1(%arg0: i32) -> (i32, i32, i32) {
    %c0_i32 = arith.constant 0 : i32
    %c0_i32_0 = arith.constant 0 : i32
    %c0_i32_1 = arith.constant 0 : i32
    %c0_i32_2 = arith.constant 0 : i32
    return %c0_i32, %c0_i32_0, %c0_i32_1 : i32, i32, i32
  }
  func.func @transform_2(%arg0: i32) -> (i32, i32) {
    %c0_i32 = arith.constant 0 : i32
    %c0_i32_0 = arith.constant 0 : i32
    %c0_i32_1 = arith.constant 0 : i32
    return %c0_i32, %c0_i32_0 : i32, i32
  }
  func.func @transform_3(%arg0: i32) -> (i32, i32) {
    %c0_i32 = arith.constant 0 : i32
    %c0_i32_0 = arith.constant 0 : i32
    %c0_i32_1 = arith.constant 0 : i32
    return %c0_i32, %c0_i32_0 : i32, i32
  }
  func.func @transform_4(%arg0: i32) -> (i32, i32) {
    %c0_i32 = arith.constant 0 : i32
    %c0_i32_0 = arith.constant 0 : i32
    %c0_i32_1 = arith.constant 0 : i32
    return %c0_i32, %c0_i32_0 : i32, i32
  }
  func.func @transform_5(%arg0: i32) -> (i32, i32, i32) {
    %c0_i32 = arith.constant 0 : i32
    %c0_i32_0 = arith.constant 0 : i32
    %c0_i32_1 = arith.constant 0 : i32
    return %arg0, %c0_i32, %c0_i32_0 : i32, i32, i32
  }
}

module attributes {stable_mosaic.version = 11 : i64} {
  func.func @_conv_relu_stats_kernel(%arg0: i32, %arg1: memref<1x21x128xbf16, #tpu.memory_space<vmem>>, %arg2: memref<6x128x128xbf16, #tpu.memory_space<vmem>>, %arg3: memref<1x128xf32, #tpu.memory_space<vmem>>, %arg4: memref<2x128xf32, #tpu.memory_space<vmem>>) attributes {dimension_semantics = [#tpu.dimension_semantics<arbitrary>], iteration_bounds = array<i64: 2>, scalar_prefetch = 0 : i64, scratch_operands = 0 : i64, tpu.core_type = #tpu.core_type<tc>, window_params = [{transform_indices = @transform_0, window_bounds = array<i64: 1, 21, 128>}, {pipeline_mode = #tpu.pipeline_mode<synchronous>, transform_indices = @transform_1, window_bounds = array<i64: 6, 128, 128>}, {pipeline_mode = #tpu.pipeline_mode<synchronous>, transform_indices = @transform_2, window_bounds = array<i64: 1, 128>}, {pipeline_mode = #tpu.pipeline_mode<synchronous>, transform_indices = @transform_3, window_bounds = array<i64: 2, 128>}]} {
    %c0 = arith.constant 0 : index
    %c0_0 = arith.constant 0 : index
    %c0_1 = arith.constant 0 : index
    %0 = vector.load %arg1[%c0, %c0_0, %c0_1] : memref<1x21x128xbf16, #tpu.memory_space<vmem>>, vector<1x21x128xbf16>
    %1 = vector.shape_cast %0 : vector<1x21x128xbf16> to vector<21x128xbf16>
    %2 = vector.extract_strided_slice %1 {offsets = [0, 0], sizes = [16, 128], strides = [1, 1]} : vector<21x128xbf16> to vector<16x128xbf16>
    %c0_2 = arith.constant 0 : index
    %c0_3 = arith.constant 0 : index
    %c0_4 = arith.constant 0 : index
    %3 = vector.load %arg2[%c0_2, %c0_3, %c0_4] : memref<6x128x128xbf16, #tpu.memory_space<vmem>>, vector<1x128x128xbf16>
    %4 = vector.shape_cast %3 : vector<1x128x128xbf16> to vector<128x128xbf16>
    %cst = arith.constant dense<0.000000e+00> : vector<16x128xf32>
    %5 = tpu.matmul %2, %4, %cst {dimension_numbers = #tpu.dot_dimension_numbers<[1], [0], [0], [1], [0, 0, 1, 1], [], []>} : vector<16x128xbf16>, vector<128x128xbf16>, vector<16x128xf32> -> vector<16x128xf32>
    %6 = vector.extract_strided_slice %1 {offsets = [1, 0], sizes = [16, 128], strides = [1, 1]} : vector<21x128xbf16> to vector<16x128xbf16>
    %c1 = arith.constant 1 : index
    %c0_5 = arith.constant 0 : index
    %c0_6 = arith.constant 0 : index
    %7 = vector.load %arg2[%c1, %c0_5, %c0_6] : memref<6x128x128xbf16, #tpu.memory_space<vmem>>, vector<1x128x128xbf16>
    %8 = vector.shape_cast %7 : vector<1x128x128xbf16> to vector<128x128xbf16>
    %cst_7 = arith.constant dense<0.000000e+00> : vector<16x128xf32>
    %9 = tpu.matmul %6, %8, %cst_7 {dimension_numbers = #tpu.dot_dimension_numbers<[1], [0], [0], [1], [0, 0, 1, 1], [], []>} : vector<16x128xbf16>, vector<128x128xbf16>, vector<16x128xf32> -> vector<16x128xf32>
    %10 = arith.addf %5, %9 : vector<16x128xf32>
    %11 = vector.extract_strided_slice %1 {offsets = [2, 0], sizes = [16, 128], strides = [1, 1]} : vector<21x128xbf16> to vector<16x128xbf16>
    %c2 = arith.constant 2 : index
    %c0_8 = arith.constant 0 : index
    %c0_9 = arith.constant 0 : index
    %12 = vector.load %arg2[%c2, %c0_8, %c0_9] : memref<6x128x128xbf16, #tpu.memory_space<vmem>>, vector<1x128x128xbf16>
    %13 = vector.shape_cast %12 : vector<1x128x128xbf16> to vector<128x128xbf16>
    %cst_10 = arith.constant dense<0.000000e+00> : vector<16x128xf32>
    %14 = tpu.matmul %11, %13, %cst_10 {dimension_numbers = #tpu.dot_dimension_numbers<[1], [0], [0], [1], [0, 0, 1, 1], [], []>} : vector<16x128xbf16>, vector<128x128xbf16>, vector<16x128xf32> -> vector<16x128xf32>
    %15 = arith.addf %10, %14 : vector<16x128xf32>
    %16 = vector.extract_strided_slice %1 {offsets = [3, 0], sizes = [16, 128], strides = [1, 1]} : vector<21x128xbf16> to vector<16x128xbf16>
    %c3 = arith.constant 3 : index
    %c0_11 = arith.constant 0 : index
    %c0_12 = arith.constant 0 : index
    %17 = vector.load %arg2[%c3, %c0_11, %c0_12] : memref<6x128x128xbf16, #tpu.memory_space<vmem>>, vector<1x128x128xbf16>
    %18 = vector.shape_cast %17 : vector<1x128x128xbf16> to vector<128x128xbf16>
    %cst_13 = arith.constant dense<0.000000e+00> : vector<16x128xf32>
    %19 = tpu.matmul %16, %18, %cst_13 {dimension_numbers = #tpu.dot_dimension_numbers<[1], [0], [0], [1], [0, 0, 1, 1], [], []>} : vector<16x128xbf16>, vector<128x128xbf16>, vector<16x128xf32> -> vector<16x128xf32>
    %20 = arith.addf %15, %19 : vector<16x128xf32>
    %21 = vector.extract_strided_slice %1 {offsets = [4, 0], sizes = [16, 128], strides = [1, 1]} : vector<21x128xbf16> to vector<16x128xbf16>
    %c4 = arith.constant 4 : index
    %c0_14 = arith.constant 0 : index
    %c0_15 = arith.constant 0 : index
    %22 = vector.load %arg2[%c4, %c0_14, %c0_15] : memref<6x128x128xbf16, #tpu.memory_space<vmem>>, vector<1x128x128xbf16>
    %23 = vector.shape_cast %22 : vector<1x128x128xbf16> to vector<128x128xbf16>
    %cst_16 = arith.constant dense<0.000000e+00> : vector<16x128xf32>
    %24 = tpu.matmul %21, %23, %cst_16 {dimension_numbers = #tpu.dot_dimension_numbers<[1], [0], [0], [1], [0, 0, 1, 1], [], []>} : vector<16x128xbf16>, vector<128x128xbf16>, vector<16x128xf32> -> vector<16x128xf32>
    %25 = arith.addf %20, %24 : vector<16x128xf32>
    %26 = vector.extract_strided_slice %1 {offsets = [5, 0], sizes = [16, 128], strides = [1, 1]} : vector<21x128xbf16> to vector<16x128xbf16>
    %c5 = arith.constant 5 : index
    %c0_17 = arith.constant 0 : index
    %c0_18 = arith.constant 0 : index
    %27 = vector.load %arg2[%c5, %c0_17, %c0_18] : memref<6x128x128xbf16, #tpu.memory_space<vmem>>, vector<1x128x128xbf16>
    %28 = vector.shape_cast %27 : vector<1x128x128xbf16> to vector<128x128xbf16>
    %cst_19 = arith.constant dense<0.000000e+00> : vector<16x128xf32>
    %29 = tpu.matmul %26, %28, %cst_19 {dimension_numbers = #tpu.dot_dimension_numbers<[1], [0], [0], [1], [0, 0, 1, 1], [], []>} : vector<16x128xbf16>, vector<128x128xbf16>, vector<16x128xf32> -> vector<16x128xf32>
    %30 = arith.addf %25, %29 : vector<16x128xf32>
    %c0_20 = arith.constant 0 : index
    %c0_21 = arith.constant 0 : index
    %31 = vector.load %arg3[%c0_20, %c0_21] : memref<1x128xf32, #tpu.memory_space<vmem>>, vector<1x128xf32>
    %32 = vector.broadcast %31 : vector<1x128xf32> to vector<16x128xf32>
    %33 = arith.addf %30, %32 : vector<16x128xf32>
    %cst_22 = arith.constant 0.000000e+00 : f32
    %34 = vector.broadcast %cst_22 : f32 to vector<16x128xf32>
    %35 = arith.maximumf %33, %34 : vector<16x128xf32>
    %cst_23 = arith.constant dense<0.000000e+00> : vector<128xf32>
    %36 = vector.multi_reduction <add>, %35, %cst_23 [0] : vector<16x128xf32> to vector<128xf32>
    %37 = vector.shape_cast %36 : vector<128xf32> to vector<1x128xf32>
    %38 = arith.mulf %35, %35 : vector<16x128xf32>
    %cst_24 = arith.constant dense<0.000000e+00> : vector<128xf32>
    %39 = vector.multi_reduction <add>, %38, %cst_24 [0] : vector<16x128xf32> to vector<128xf32>
    %40 = vector.shape_cast %39 : vector<128xf32> to vector<1x128xf32>
    %41 = tpu.concatenate %37, %40 in 0 : vector<1x128xf32>, vector<1x128xf32> -> vector<2x128xf32>
    %c0_i32 = arith.constant 0 : i32
    %42 = arith.cmpi eq, %arg0, %c0_i32 : i32
    %43 = arith.extui %42 : i1 to i32
    %c0_i32_25 = arith.constant 0 : i32
    %44 = arith.cmpi ne, %43, %c0_i32_25 : i32
    scf.if %44 {
      %cst_30 = arith.constant 0.000000e+00 : f32
      %48 = vector.broadcast %cst_30 : f32 to vector<2x128xf32>
      %c0_31 = arith.constant 0 : index
      %c0_32 = arith.constant 0 : index
      %49 = vector.load %arg4[%c0_31, %c0_32] : memref<2x128xf32, #tpu.memory_space<vmem>>, vector<2x128xf32>
      tpu.vector_store %arg4[%c0_31, %c0_32], %48 {strides = array<i32>} : memref<2x128xf32, #tpu.memory_space<vmem>>, vector<2x128xf32>,
    } else {
    }
    %c0_26 = arith.constant 0 : index
    %c0_27 = arith.constant 0 : index
    %45 = vector.load %arg4[%c0_26, %c0_27] : memref<2x128xf32, #tpu.memory_space<vmem>>, vector<2x128xf32>
    %46 = arith.addf %45, %41 : vector<2x128xf32>
    %c0_28 = arith.constant 0 : index
    %c0_29 = arith.constant 0 : index
    %47 = vector.load %arg4[%c0_28, %c0_29] : memref<2x128xf32, #tpu.memory_space<vmem>>, vector<2x128xf32>
    tpu.vector_store %arg4[%c0_28, %c0_29], %46 {strides = array<i32>} : memref<2x128xf32, #tpu.memory_space<vmem>>, vector<2x128xf32>,
    return
  }
  func.func @transform_0(%arg0: i32) -> (i32, i32, i32) {
    %c0_i32 = arith.constant 0 : i32
    %c0_i32_0 = arith.constant 0 : i32
    %c0_i32_1 = arith.constant 0 : i32
    return %arg0, %c0_i32, %c0_i32_0 : i32, i32, i32
  }
  func.func @transform_1(%arg0: i32) -> (i32, i32, i32) {
    %c0_i32 = arith.constant 0 : i32
    %c0_i32_0 = arith.constant 0 : i32
    %c0_i32_1 = arith.constant 0 : i32
    %c0_i32_2 = arith.constant 0 : i32
    return %c0_i32, %c0_i32_0, %c0_i32_1 : i32, i32, i32
  }
  func.func @transform_2(%arg0: i32) -> (i32, i32) {
    %c0_i32 = arith.constant 0 : i32
    %c0_i32_0 = arith.constant 0 : i32
    %c0_i32_1 = arith.constant 0 : i32
    return %c0_i32, %c0_i32_0 : i32, i32
  }
  func.func @transform_3(%arg0: i32) -> (i32, i32) {
    %c0_i32 = arith.constant 0 : i32
    %c0_i32_0 = arith.constant 0 : i32
    %c0_i32_1 = arith.constant 0 : i32
    return %c0_i32, %c0_i32_0 : i32, i32
  }
}

module attributes {stable_mosaic.version = 11 : i64} {
  func.func @_conv_relu_affine_kernel(%arg0: i32, %arg1: memref<1x21x128xbf16, #tpu.memory_space<vmem>>, %arg2: memref<6x128x128xbf16, #tpu.memory_space<vmem>>, %arg3: memref<1x128xf32, #tpu.memory_space<vmem>>, %arg4: memref<1x128xf32, #tpu.memory_space<vmem>>, %arg5: memref<1x128xf32, #tpu.memory_space<vmem>>, %arg6: memref<1x16x128xf32, #tpu.memory_space<vmem>>) attributes {dimension_semantics = [#tpu.dimension_semantics<parallel>], iteration_bounds = array<i64: 2>, scalar_prefetch = 0 : i64, scratch_operands = 0 : i64, tpu.core_type = #tpu.core_type<tc>, window_params = [{transform_indices = @transform_0, window_bounds = array<i64: 1, 21, 128>}, {pipeline_mode = #tpu.pipeline_mode<synchronous>, transform_indices = @transform_1, window_bounds = array<i64: 6, 128, 128>}, {pipeline_mode = #tpu.pipeline_mode<synchronous>, transform_indices = @transform_2, window_bounds = array<i64: 1, 128>}, {pipeline_mode = #tpu.pipeline_mode<synchronous>, transform_indices = @transform_3, window_bounds = array<i64: 1, 128>}, {pipeline_mode = #tpu.pipeline_mode<synchronous>, transform_indices = @transform_4, window_bounds = array<i64: 1, 128>}, {transform_indices = @transform_5, window_bounds = array<i64: 1, 16, 128>}]} {
    %c0 = arith.constant 0 : index
    %c0_0 = arith.constant 0 : index
    %c0_1 = arith.constant 0 : index
    %0 = vector.load %arg1[%c0, %c0_0, %c0_1] : memref<1x21x128xbf16, #tpu.memory_space<vmem>>, vector<1x21x128xbf16>
    %1 = vector.shape_cast %0 : vector<1x21x128xbf16> to vector<21x128xbf16>
    %2 = vector.extract_strided_slice %1 {offsets = [0, 0], sizes = [16, 128], strides = [1, 1]} : vector<21x128xbf16> to vector<16x128xbf16>
    %c0_2 = arith.constant 0 : index
    %c0_3 = arith.constant 0 : index
    %c0_4 = arith.constant 0 : index
    %3 = vector.load %arg2[%c0_2, %c0_3, %c0_4] : memref<6x128x128xbf16, #tpu.memory_space<vmem>>, vector<1x128x128xbf16>
    %4 = vector.shape_cast %3 : vector<1x128x128xbf16> to vector<128x128xbf16>
    %cst = arith.constant dense<0.000000e+00> : vector<16x128xf32>
    %5 = tpu.matmul %2, %4, %cst {dimension_numbers = #tpu.dot_dimension_numbers<[1], [0], [0], [1], [0, 0, 1, 1], [], []>} : vector<16x128xbf16>, vector<128x128xbf16>, vector<16x128xf32> -> vector<16x128xf32>
    %6 = vector.extract_strided_slice %1 {offsets = [1, 0], sizes = [16, 128], strides = [1, 1]} : vector<21x128xbf16> to vector<16x128xbf16>
    %c1 = arith.constant 1 : index
    %c0_5 = arith.constant 0 : index
    %c0_6 = arith.constant 0 : index
    %7 = vector.load %arg2[%c1, %c0_5, %c0_6] : memref<6x128x128xbf16, #tpu.memory_space<vmem>>, vector<1x128x128xbf16>
    %8 = vector.shape_cast %7 : vector<1x128x128xbf16> to vector<128x128xbf16>
    %cst_7 = arith.constant dense<0.000000e+00> : vector<16x128xf32>
    %9 = tpu.matmul %6, %8, %cst_7 {dimension_numbers = #tpu.dot_dimension_numbers<[1], [0], [0], [1], [0, 0, 1, 1], [], []>} : vector<16x128xbf16>, vector<128x128xbf16>, vector<16x128xf32> -> vector<16x128xf32>
    %10 = arith.addf %5, %9 : vector<16x128xf32>
    %11 = vector.extract_strided_slice %1 {offsets = [2, 0], sizes = [16, 128], strides = [1, 1]} : vector<21x128xbf16> to vector<16x128xbf16>
    %c2 = arith.constant 2 : index
    %c0_8 = arith.constant 0 : index
    %c0_9 = arith.constant 0 : index
    %12 = vector.load %arg2[%c2, %c0_8, %c0_9] : memref<6x128x128xbf16, #tpu.memory_space<vmem>>, vector<1x128x128xbf16>
    %13 = vector.shape_cast %12 : vector<1x128x128xbf16> to vector<128x128xbf16>
    %cst_10 = arith.constant dense<0.000000e+00> : vector<16x128xf32>
    %14 = tpu.matmul %11, %13, %cst_10 {dimension_numbers = #tpu.dot_dimension_numbers<[1], [0], [0], [1], [0, 0, 1, 1], [], []>} : vector<16x128xbf16>, vector<128x128xbf16>, vector<16x128xf32> -> vector<16x128xf32>
    %15 = arith.addf %10, %14 : vector<16x128xf32>
    %16 = vector.extract_strided_slice %1 {offsets = [3, 0], sizes = [16, 128], strides = [1, 1]} : vector<21x128xbf16> to vector<16x128xbf16>
    %c3 = arith.constant 3 : index
    %c0_11 = arith.constant 0 : index
    %c0_12 = arith.constant 0 : index
    %17 = vector.load %arg2[%c3, %c0_11, %c0_12] : memref<6x128x128xbf16, #tpu.memory_space<vmem>>, vector<1x128x128xbf16>
    %18 = vector.shape_cast %17 : vector<1x128x128xbf16> to vector<128x128xbf16>
    %cst_13 = arith.constant dense<0.000000e+00> : vector<16x128xf32>
    %19 = tpu.matmul %16, %18, %cst_13 {dimension_numbers = #tpu.dot_dimension_numbers<[1], [0], [0], [1], [0, 0, 1, 1], [], []>} : vector<16x128xbf16>, vector<128x128xbf16>, vector<16x128xf32> -> vector<16x128xf32>
    %20 = arith.addf %15, %19 : vector<16x128xf32>
    %21 = vector.extract_strided_slice %1 {offsets = [4, 0], sizes = [16, 128], strides = [1, 1]} : vector<21x128xbf16> to vector<16x128xbf16>
    %c4 = arith.constant 4 : index
    %c0_14 = arith.constant 0 : index
    %c0_15 = arith.constant 0 : index
    %22 = vector.load %arg2[%c4, %c0_14, %c0_15] : memref<6x128x128xbf16, #tpu.memory_space<vmem>>, vector<1x128x128xbf16>
    %23 = vector.shape_cast %22 : vector<1x128x128xbf16> to vector<128x128xbf16>
    %cst_16 = arith.constant dense<0.000000e+00> : vector<16x128xf32>
    %24 = tpu.matmul %21, %23, %cst_16 {dimension_numbers = #tpu.dot_dimension_numbers<[1], [0], [0], [1], [0, 0, 1, 1], [], []>} : vector<16x128xbf16>, vector<128x128xbf16>, vector<16x128xf32> -> vector<16x128xf32>
    %25 = arith.addf %20, %24 : vector<16x128xf32>
    %26 = vector.extract_strided_slice %1 {offsets = [5, 0], sizes = [16, 128], strides = [1, 1]} : vector<21x128xbf16> to vector<16x128xbf16>
    %c5 = arith.constant 5 : index
    %c0_17 = arith.constant 0 : index
    %c0_18 = arith.constant 0 : index
    %27 = vector.load %arg2[%c5, %c0_17, %c0_18] : memref<6x128x128xbf16, #tpu.memory_space<vmem>>, vector<1x128x128xbf16>
    %28 = vector.shape_cast %27 : vector<1x128x128xbf16> to vector<128x128xbf16>
    %cst_19 = arith.constant dense<0.000000e+00> : vector<16x128xf32>
    %29 = tpu.matmul %26, %28, %cst_19 {dimension_numbers = #tpu.dot_dimension_numbers<[1], [0], [0], [1], [0, 0, 1, 1], [], []>} : vector<16x128xbf16>, vector<128x128xbf16>, vector<16x128xf32> -> vector<16x128xf32>
    %30 = arith.addf %25, %29 : vector<16x128xf32>
    %c0_20 = arith.constant 0 : index
    %c0_21 = arith.constant 0 : index
    %31 = vector.load %arg3[%c0_20, %c0_21] : memref<1x128xf32, #tpu.memory_space<vmem>>, vector<1x128xf32>
    %32 = vector.broadcast %31 : vector<1x128xf32> to vector<16x128xf32>
    %33 = arith.addf %30, %32 : vector<16x128xf32>
    %cst_22 = arith.constant 0.000000e+00 : f32
    %34 = vector.broadcast %cst_22 : f32 to vector<16x128xf32>
    %35 = arith.maximumf %33, %34 : vector<16x128xf32>
    %c0_23 = arith.constant 0 : index
    %c0_24 = arith.constant 0 : index
    %36 = vector.load %arg4[%c0_23, %c0_24] : memref<1x128xf32, #tpu.memory_space<vmem>>, vector<1x128xf32>
    %37 = vector.broadcast %36 : vector<1x128xf32> to vector<16x128xf32>
    %38 = arith.mulf %35, %37 : vector<16x128xf32>
    %c0_25 = arith.constant 0 : index
    %c0_26 = arith.constant 0 : index
    %39 = vector.load %arg5[%c0_25, %c0_26] : memref<1x128xf32, #tpu.memory_space<vmem>>, vector<1x128xf32>
    %40 = vector.broadcast %39 : vector<1x128xf32> to vector<16x128xf32>
    %41 = arith.addf %38, %40 : vector<16x128xf32>
    %c0_27 = arith.constant 0 : index
    %c0_28 = arith.constant 0 : index
    %c0_29 = arith.constant 0 : index
    %42 = vector.load %arg6[%c0_27, %c0_28, %c0_29] : memref<1x16x128xf32, #tpu.memory_space<vmem>>, vector<1x16x128xf32>
    %43 = vector.shape_cast %42 : vector<1x16x128xf32> to vector<16x128xf32>
    %44 = vector.shape_cast %41 : vector<16x128xf32> to vector<1x16x128xf32>
    tpu.vector_store %arg6[%c0_27, %c0_28, %c0_29], %44 {strides = array<i32>} : memref<1x16x128xf32, #tpu.memory_space<vmem>>, vector<1x16x128xf32>,
    return
  }
  func.func @transform_0(%arg0: i32) -> (i32, i32, i32) {
    %c0_i32 = arith.constant 0 : i32
    %c0_i32_0 = arith.constant 0 : i32
    %c0_i32_1 = arith.constant 0 : i32
    return %arg0, %c0_i32, %c0_i32_0 : i32, i32, i32
  }
  func.func @transform_1(%arg0: i32) -> (i32, i32, i32) {
    %c0_i32 = arith.constant 0 : i32
    %c0_i32_0 = arith.constant 0 : i32
    %c0_i32_1 = arith.constant 0 : i32
    %c0_i32_2 = arith.constant 0 : i32
    return %c0_i32, %c0_i32_0, %c0_i32_1 : i32, i32, i32
  }
  func.func @transform_2(%arg0: i32) -> (i32, i32) {
    %c0_i32 = arith.constant 0 : i32
    %c0_i32_0 = arith.constant 0 : i32
    %c0_i32_1 = arith.constant 0 : i32
    return %c0_i32, %c0_i32_0 : i32, i32
  }
  func.func @transform_3(%arg0: i32) -> (i32, i32) {
    %c0_i32 = arith.constant 0 : i32
    %c0_i32_0 = arith.constant 0 : i32
    %c0_i32_1 = arith.constant 0 : i32
    return %c0_i32, %c0_i32_0 : i32, i32
  }
  func.func @transform_4(%arg0: i32) -> (i32, i32) {
    %c0_i32 = arith.constant 0 : i32
    %c0_i32_0 = arith.constant 0 : i32
    %c0_i32_1 = arith.constant 0 : i32
    return %c0_i32, %c0_i32_0 : i32, i32
  }
  func.func @transform_5(%arg0: i32) -> (i32, i32, i32) {
    %c0_i32 = arith.constant 0 : i32
    %c0_i32_0 = arith.constant 0 : i32
    %c0_i32_1 = arith.constant 0 : i32
    return %arg0, %c0_i32, %c0_i32_0 : i32, i32, i32
  }
}

module attributes {stable_mosaic.version = 11 : i64} {
  func.func @_conv_relu_stats_kernel(%arg0: i32, %arg1: memref<1x20x160xbf16, #tpu.memory_space<vmem>>, %arg2: memref<3x160x128xbf16, #tpu.memory_space<vmem>>, %arg3: memref<1x128xf32, #tpu.memory_space<vmem>>, %arg4: memref<2x128xf32, #tpu.memory_space<vmem>>) attributes {dimension_semantics = [#tpu.dimension_semantics<arbitrary>], iteration_bounds = array<i64: 2>, scalar_prefetch = 0 : i64, scratch_operands = 0 : i64, tpu.core_type = #tpu.core_type<tc>, window_params = [{transform_indices = @transform_0, window_bounds = array<i64: 1, 20, 160>}, {pipeline_mode = #tpu.pipeline_mode<synchronous>, transform_indices = @transform_1, window_bounds = array<i64: 3, 160, 128>}, {pipeline_mode = #tpu.pipeline_mode<synchronous>, transform_indices = @transform_2, window_bounds = array<i64: 1, 128>}, {pipeline_mode = #tpu.pipeline_mode<synchronous>, transform_indices = @transform_3, window_bounds = array<i64: 2, 128>}]} {
    %c0 = arith.constant 0 : index
    %c0_0 = arith.constant 0 : index
    %c0_1 = arith.constant 0 : index
    %0 = vector.load %arg1[%c0, %c0_0, %c0_1] : memref<1x20x160xbf16, #tpu.memory_space<vmem>>, vector<1x20x160xbf16>
    %1 = vector.shape_cast %0 : vector<1x20x160xbf16> to vector<20x160xbf16>
    %2 = vector.extract_strided_slice %1 {offsets = [0, 0], sizes = [16, 160], strides = [1, 1]} : vector<20x160xbf16> to vector<16x160xbf16>
    %c0_2 = arith.constant 0 : index
    %c0_3 = arith.constant 0 : index
    %c0_4 = arith.constant 0 : index
    %3 = vector.load %arg2[%c0_2, %c0_3, %c0_4] : memref<3x160x128xbf16, #tpu.memory_space<vmem>>, vector<1x160x128xbf16>
    %4 = vector.shape_cast %3 : vector<1x160x128xbf16> to vector<160x128xbf16>
    %cst = arith.constant dense<0.000000e+00> : vector<16x128xf32>
    %5 = tpu.matmul %2, %4, %cst {dimension_numbers = #tpu.dot_dimension_numbers<[1], [0], [0], [1], [0, 0, 1, 1], [], []>} : vector<16x160xbf16>, vector<160x128xbf16>, vector<16x128xf32> -> vector<16x128xf32>
    %6 = vector.extract_strided_slice %1 {offsets = [2, 0], sizes = [16, 160], strides = [1, 1]} : vector<20x160xbf16> to vector<16x160xbf16>
    %c1 = arith.constant 1 : index
    %c0_5 = arith.constant 0 : index
    %c0_6 = arith.constant 0 : index
    %7 = vector.load %arg2[%c1, %c0_5, %c0_6] : memref<3x160x128xbf16, #tpu.memory_space<vmem>>, vector<1x160x128xbf16>
    %8 = vector.shape_cast %7 : vector<1x160x128xbf16> to vector<160x128xbf16>
    %cst_7 = arith.constant dense<0.000000e+00> : vector<16x128xf32>
    %9 = tpu.matmul %6, %8, %cst_7 {dimension_numbers = #tpu.dot_dimension_numbers<[1], [0], [0], [1], [0, 0, 1, 1], [], []>} : vector<16x160xbf16>, vector<160x128xbf16>, vector<16x128xf32> -> vector<16x128xf32>
    %10 = arith.addf %5, %9 : vector<16x128xf32>
    %11 = vector.extract_strided_slice %1 {offsets = [4, 0], sizes = [16, 160], strides = [1, 1]} : vector<20x160xbf16> to vector<16x160xbf16>
    %c2 = arith.constant 2 : index
    %c0_8 = arith.constant 0 : index
    %c0_9 = arith.constant 0 : index
    %12 = vector.load %arg2[%c2, %c0_8, %c0_9] : memref<3x160x128xbf16, #tpu.memory_space<vmem>>, vector<1x160x128xbf16>
    %13 = vector.shape_cast %12 : vector<1x160x128xbf16> to vector<160x128xbf16>
    %cst_10 = arith.constant dense<0.000000e+00> : vector<16x128xf32>
    %14 = tpu.matmul %11, %13, %cst_10 {dimension_numbers = #tpu.dot_dimension_numbers<[1], [0], [0], [1], [0, 0, 1, 1], [], []>} : vector<16x160xbf16>, vector<160x128xbf16>, vector<16x128xf32> -> vector<16x128xf32>
    %15 = arith.addf %10, %14 : vector<16x128xf32>
    %c0_11 = arith.constant 0 : index
    %c0_12 = arith.constant 0 : index
    %16 = vector.load %arg3[%c0_11, %c0_12] : memref<1x128xf32, #tpu.memory_space<vmem>>, vector<1x128xf32>
    %17 = vector.broadcast %16 : vector<1x128xf32> to vector<16x128xf32>
    %18 = arith.addf %15, %17 : vector<16x128xf32>
    %cst_13 = arith.constant 0.000000e+00 : f32
    %19 = vector.broadcast %cst_13 : f32 to vector<16x128xf32>
    %20 = arith.maximumf %18, %19 : vector<16x128xf32>
    %cst_14 = arith.constant dense<0.000000e+00> : vector<128xf32>
    %21 = vector.multi_reduction <add>, %20, %cst_14 [0] : vector<16x128xf32> to vector<128xf32>
    %22 = vector.shape_cast %21 : vector<128xf32> to vector<1x128xf32>
    %23 = arith.mulf %20, %20 : vector<16x128xf32>
    %cst_15 = arith.constant dense<0.000000e+00> : vector<128xf32>
    %24 = vector.multi_reduction <add>, %23, %cst_15 [0] : vector<16x128xf32> to vector<128xf32>
    %25 = vector.shape_cast %24 : vector<128xf32> to vector<1x128xf32>
    %26 = tpu.concatenate %22, %25 in 0 : vector<1x128xf32>, vector<1x128xf32> -> vector<2x128xf32>
    %c0_i32 = arith.constant 0 : i32
    %27 = arith.cmpi eq, %arg0, %c0_i32 : i32
    %28 = arith.extui %27 : i1 to i32
    %c0_i32_16 = arith.constant 0 : i32
    %29 = arith.cmpi ne, %28, %c0_i32_16 : i32
    scf.if %29 {
      %cst_21 = arith.constant 0.000000e+00 : f32
      %33 = vector.broadcast %cst_21 : f32 to vector<2x128xf32>
      %c0_22 = arith.constant 0 : index
      %c0_23 = arith.constant 0 : index
      %34 = vector.load %arg4[%c0_22, %c0_23] : memref<2x128xf32, #tpu.memory_space<vmem>>, vector<2x128xf32>
      tpu.vector_store %arg4[%c0_22, %c0_23], %33 {strides = array<i32>} : memref<2x128xf32, #tpu.memory_space<vmem>>, vector<2x128xf32>,
    } else {
    }
    %c0_17 = arith.constant 0 : index
    %c0_18 = arith.constant 0 : index
    %30 = vector.load %arg4[%c0_17, %c0_18] : memref<2x128xf32, #tpu.memory_space<vmem>>, vector<2x128xf32>
    %31 = arith.addf %30, %26 : vector<2x128xf32>
    %c0_19 = arith.constant 0 : index
    %c0_20 = arith.constant 0 : index
    %32 = vector.load %arg4[%c0_19, %c0_20] : memref<2x128xf32, #tpu.memory_space<vmem>>, vector<2x128xf32>
    tpu.vector_store %arg4[%c0_19, %c0_20], %31 {strides = array<i32>} : memref<2x128xf32, #tpu.memory_space<vmem>>, vector<2x128xf32>,
    return
  }
  func.func @transform_0(%arg0: i32) -> (i32, i32, i32) {
    %c0_i32 = arith.constant 0 : i32
    %c0_i32_0 = arith.constant 0 : i32
    %c0_i32_1 = arith.constant 0 : i32
    return %arg0, %c0_i32, %c0_i32_0 : i32, i32, i32
  }
  func.func @transform_1(%arg0: i32) -> (i32, i32, i32) {
    %c0_i32 = arith.constant 0 : i32
    %c0_i32_0 = arith.constant 0 : i32
    %c0_i32_1 = arith.constant 0 : i32
    %c0_i32_2 = arith.constant 0 : i32
    return %c0_i32, %c0_i32_0, %c0_i32_1 : i32, i32, i32
  }
  func.func @transform_2(%arg0: i32) -> (i32, i32) {
    %c0_i32 = arith.constant 0 : i32
    %c0_i32_0 = arith.constant 0 : i32
    %c0_i32_1 = arith.constant 0 : i32
    return %c0_i32, %c0_i32_0 : i32, i32
  }
  func.func @transform_3(%arg0: i32) -> (i32, i32) {
    %c0_i32 = arith.constant 0 : i32
    %c0_i32_0 = arith.constant 0 : i32
    %c0_i32_1 = arith.constant 0 : i32
    return %c0_i32, %c0_i32_0 : i32, i32
  }
}

module attributes {stable_mosaic.version = 11 : i64} {
  func.func @_conv_relu_affine_kernel(%arg0: i32, %arg1: memref<1x20x160xbf16, #tpu.memory_space<vmem>>, %arg2: memref<3x160x128xbf16, #tpu.memory_space<vmem>>, %arg3: memref<1x128xf32, #tpu.memory_space<vmem>>, %arg4: memref<1x128xf32, #tpu.memory_space<vmem>>, %arg5: memref<1x128xf32, #tpu.memory_space<vmem>>, %arg6: memref<1x16x128xf32, #tpu.memory_space<vmem>>) attributes {dimension_semantics = [#tpu.dimension_semantics<parallel>], iteration_bounds = array<i64: 2>, scalar_prefetch = 0 : i64, scratch_operands = 0 : i64, tpu.core_type = #tpu.core_type<tc>, window_params = [{transform_indices = @transform_0, window_bounds = array<i64: 1, 20, 160>}, {pipeline_mode = #tpu.pipeline_mode<synchronous>, transform_indices = @transform_1, window_bounds = array<i64: 3, 160, 128>}, {pipeline_mode = #tpu.pipeline_mode<synchronous>, transform_indices = @transform_2, window_bounds = array<i64: 1, 128>}, {pipeline_mode = #tpu.pipeline_mode<synchronous>, transform_indices = @transform_3, window_bounds = array<i64: 1, 128>}, {pipeline_mode = #tpu.pipeline_mode<synchronous>, transform_indices = @transform_4, window_bounds = array<i64: 1, 128>}, {transform_indices = @transform_5, window_bounds = array<i64: 1, 16, 128>}]} {
    %c0 = arith.constant 0 : index
    %c0_0 = arith.constant 0 : index
    %c0_1 = arith.constant 0 : index
    %0 = vector.load %arg1[%c0, %c0_0, %c0_1] : memref<1x20x160xbf16, #tpu.memory_space<vmem>>, vector<1x20x160xbf16>
    %1 = vector.shape_cast %0 : vector<1x20x160xbf16> to vector<20x160xbf16>
    %2 = vector.extract_strided_slice %1 {offsets = [0, 0], sizes = [16, 160], strides = [1, 1]} : vector<20x160xbf16> to vector<16x160xbf16>
    %c0_2 = arith.constant 0 : index
    %c0_3 = arith.constant 0 : index
    %c0_4 = arith.constant 0 : index
    %3 = vector.load %arg2[%c0_2, %c0_3, %c0_4] : memref<3x160x128xbf16, #tpu.memory_space<vmem>>, vector<1x160x128xbf16>
    %4 = vector.shape_cast %3 : vector<1x160x128xbf16> to vector<160x128xbf16>
    %cst = arith.constant dense<0.000000e+00> : vector<16x128xf32>
    %5 = tpu.matmul %2, %4, %cst {dimension_numbers = #tpu.dot_dimension_numbers<[1], [0], [0], [1], [0, 0, 1, 1], [], []>} : vector<16x160xbf16>, vector<160x128xbf16>, vector<16x128xf32> -> vector<16x128xf32>
    %6 = vector.extract_strided_slice %1 {offsets = [2, 0], sizes = [16, 160], strides = [1, 1]} : vector<20x160xbf16> to vector<16x160xbf16>
    %c1 = arith.constant 1 : index
    %c0_5 = arith.constant 0 : index
    %c0_6 = arith.constant 0 : index
    %7 = vector.load %arg2[%c1, %c0_5, %c0_6] : memref<3x160x128xbf16, #tpu.memory_space<vmem>>, vector<1x160x128xbf16>
    %8 = vector.shape_cast %7 : vector<1x160x128xbf16> to vector<160x128xbf16>
    %cst_7 = arith.constant dense<0.000000e+00> : vector<16x128xf32>
    %9 = tpu.matmul %6, %8, %cst_7 {dimension_numbers = #tpu.dot_dimension_numbers<[1], [0], [0], [1], [0, 0, 1, 1], [], []>} : vector<16x160xbf16>, vector<160x128xbf16>, vector<16x128xf32> -> vector<16x128xf32>
    %10 = arith.addf %5, %9 : vector<16x128xf32>
    %11 = vector.extract_strided_slice %1 {offsets = [4, 0], sizes = [16, 160], strides = [1, 1]} : vector<20x160xbf16> to vector<16x160xbf16>
    %c2 = arith.constant 2 : index
    %c0_8 = arith.constant 0 : index
    %c0_9 = arith.constant 0 : index
    %12 = vector.load %arg2[%c2, %c0_8, %c0_9] : memref<3x160x128xbf16, #tpu.memory_space<vmem>>, vector<1x160x128xbf16>
    %13 = vector.shape_cast %12 : vector<1x160x128xbf16> to vector<160x128xbf16>
    %cst_10 = arith.constant dense<0.000000e+00> : vector<16x128xf32>
    %14 = tpu.matmul %11, %13, %cst_10 {dimension_numbers = #tpu.dot_dimension_numbers<[1], [0], [0], [1], [0, 0, 1, 1], [], []>} : vector<16x160xbf16>, vector<160x128xbf16>, vector<16x128xf32> -> vector<16x128xf32>
    %15 = arith.addf %10, %14 : vector<16x128xf32>
    %c0_11 = arith.constant 0 : index
    %c0_12 = arith.constant 0 : index
    %16 = vector.load %arg3[%c0_11, %c0_12] : memref<1x128xf32, #tpu.memory_space<vmem>>, vector<1x128xf32>
    %17 = vector.broadcast %16 : vector<1x128xf32> to vector<16x128xf32>
    %18 = arith.addf %15, %17 : vector<16x128xf32>
    %cst_13 = arith.constant 0.000000e+00 : f32
    %19 = vector.broadcast %cst_13 : f32 to vector<16x128xf32>
    %20 = arith.maximumf %18, %19 : vector<16x128xf32>
    %c0_14 = arith.constant 0 : index
    %c0_15 = arith.constant 0 : index
    %21 = vector.load %arg4[%c0_14, %c0_15] : memref<1x128xf32, #tpu.memory_space<vmem>>, vector<1x128xf32>
    %22 = vector.broadcast %21 : vector<1x128xf32> to vector<16x128xf32>
    %23 = arith.mulf %20, %22 : vector<16x128xf32>
    %c0_16 = arith.constant 0 : index
    %c0_17 = arith.constant 0 : index
    %24 = vector.load %arg5[%c0_16, %c0_17] : memref<1x128xf32, #tpu.memory_space<vmem>>, vector<1x128xf32>
    %25 = vector.broadcast %24 : vector<1x128xf32> to vector<16x128xf32>
    %26 = arith.addf %23, %25 : vector<16x128xf32>
    %c0_18 = arith.constant 0 : index
    %c0_19 = arith.constant 0 : index
    %c0_20 = arith.constant 0 : index
    %27 = vector.load %arg6[%c0_18, %c0_19, %c0_20] : memref<1x16x128xf32, #tpu.memory_space<vmem>>, vector<1x16x128xf32>
    %28 = vector.shape_cast %27 : vector<1x16x128xf32> to vector<16x128xf32>
    %29 = vector.shape_cast %26 : vector<16x128xf32> to vector<1x16x128xf32>
    tpu.vector_store %arg6[%c0_18, %c0_19, %c0_20], %29 {strides = array<i32>} : memref<1x16x128xf32, #tpu.memory_space<vmem>>, vector<1x16x128xf32>,
    return
  }
  func.func @transform_0(%arg0: i32) -> (i32, i32, i32) {
    %c0_i32 = arith.constant 0 : i32
    %c0_i32_0 = arith.constant 0 : i32
    %c0_i32_1 = arith.constant 0 : i32
    return %arg0, %c0_i32, %c0_i32_0 : i32, i32, i32
  }
  func.func @transform_1(%arg0: i32) -> (i32, i32, i32) {
    %c0_i32 = arith.constant 0 : i32
    %c0_i32_0 = arith.constant 0 : i32
    %c0_i32_1 = arith.constant 0 : i32
    %c0_i32_2 = arith.constant 0 : i32
    return %c0_i32, %c0_i32_0, %c0_i32_1 : i32, i32, i32
  }
  func.func @transform_2(%arg0: i32) -> (i32, i32) {
    %c0_i32 = arith.constant 0 : i32
    %c0_i32_0 = arith.constant 0 : i32
    %c0_i32_1 = arith.constant 0 : i32
    return %c0_i32, %c0_i32_0 : i32, i32
  }
  func.func @transform_3(%arg0: i32) -> (i32, i32) {
    %c0_i32 = arith.constant 0 : i32
    %c0_i32_0 = arith.constant 0 : i32
    %c0_i32_1 = arith.constant 0 : i32
    return %c0_i32, %c0_i32_0 : i32, i32
  }
  func.func @transform_4(%arg0: i32) -> (i32, i32) {
    %c0_i32 = arith.constant 0 : i32
    %c0_i32_0 = arith.constant 0 : i32
    %c0_i32_1 = arith.constant 0 : i32
    return %c0_i32, %c0_i32_0 : i32, i32
  }
  func.func @transform_5(%arg0: i32) -> (i32, i32, i32) {
    %c0_i32 = arith.constant 0 : i32
    %c0_i32_0 = arith.constant 0 : i32
    %c0_i32_1 = arith.constant 0 : i32
    return %arg0, %c0_i32, %c0_i32_0 : i32, i32, i32
  }
}

module attributes {stable_mosaic.version = 11 : i64} {
  func.func @_conv_relu_stats_kernel(%arg0: i32, %arg1: memref<1x22x176xbf16, #tpu.memory_space<vmem>>, %arg2: memref<3x176x128xbf16, #tpu.memory_space<vmem>>, %arg3: memref<1x128xf32, #tpu.memory_space<vmem>>, %arg4: memref<2x128xf32, #tpu.memory_space<vmem>>) attributes {dimension_semantics = [#tpu.dimension_semantics<arbitrary>], iteration_bounds = array<i64: 2>, scalar_prefetch = 0 : i64, scratch_operands = 0 : i64, tpu.core_type = #tpu.core_type<tc>, window_params = [{transform_indices = @transform_0, window_bounds = array<i64: 1, 22, 176>}, {pipeline_mode = #tpu.pipeline_mode<synchronous>, transform_indices = @transform_1, window_bounds = array<i64: 3, 176, 128>}, {pipeline_mode = #tpu.pipeline_mode<synchronous>, transform_indices = @transform_2, window_bounds = array<i64: 1, 128>}, {pipeline_mode = #tpu.pipeline_mode<synchronous>, transform_indices = @transform_3, window_bounds = array<i64: 2, 128>}]} {
    %c0 = arith.constant 0 : index
    %c0_0 = arith.constant 0 : index
    %c0_1 = arith.constant 0 : index
    %0 = vector.load %arg1[%c0, %c0_0, %c0_1] : memref<1x22x176xbf16, #tpu.memory_space<vmem>>, vector<1x22x176xbf16>
    %1 = vector.shape_cast %0 : vector<1x22x176xbf16> to vector<22x176xbf16>
    %2 = vector.extract_strided_slice %1 {offsets = [0, 0], sizes = [16, 176], strides = [1, 1]} : vector<22x176xbf16> to vector<16x176xbf16>
    %c0_2 = arith.constant 0 : index
    %c0_3 = arith.constant 0 : index
    %c0_4 = arith.constant 0 : index
    %3 = vector.load %arg2[%c0_2, %c0_3, %c0_4] : memref<3x176x128xbf16, #tpu.memory_space<vmem>>, vector<1x176x128xbf16>
    %4 = vector.shape_cast %3 : vector<1x176x128xbf16> to vector<176x128xbf16>
    %cst = arith.constant dense<0.000000e+00> : vector<16x128xf32>
    %5 = tpu.matmul %2, %4, %cst {dimension_numbers = #tpu.dot_dimension_numbers<[1], [0], [0], [1], [0, 0, 1, 1], [], []>} : vector<16x176xbf16>, vector<176x128xbf16>, vector<16x128xf32> -> vector<16x128xf32>
    %6 = vector.extract_strided_slice %1 {offsets = [3, 0], sizes = [16, 176], strides = [1, 1]} : vector<22x176xbf16> to vector<16x176xbf16>
    %c1 = arith.constant 1 : index
    %c0_5 = arith.constant 0 : index
    %c0_6 = arith.constant 0 : index
    %7 = vector.load %arg2[%c1, %c0_5, %c0_6] : memref<3x176x128xbf16, #tpu.memory_space<vmem>>, vector<1x176x128xbf16>
    %8 = vector.shape_cast %7 : vector<1x176x128xbf16> to vector<176x128xbf16>
    %cst_7 = arith.constant dense<0.000000e+00> : vector<16x128xf32>
    %9 = tpu.matmul %6, %8, %cst_7 {dimension_numbers = #tpu.dot_dimension_numbers<[1], [0], [0], [1], [0, 0, 1, 1], [], []>} : vector<16x176xbf16>, vector<176x128xbf16>, vector<16x128xf32> -> vector<16x128xf32>
    %10 = arith.addf %5, %9 : vector<16x128xf32>
    %11 = vector.extract_strided_slice %1 {offsets = [6, 0], sizes = [16, 176], strides = [1, 1]} : vector<22x176xbf16> to vector<16x176xbf16>
    %c2 = arith.constant 2 : index
    %c0_8 = arith.constant 0 : index
    %c0_9 = arith.constant 0 : index
    %12 = vector.load %arg2[%c2, %c0_8, %c0_9] : memref<3x176x128xbf16, #tpu.memory_space<vmem>>, vector<1x176x128xbf16>
    %13 = vector.shape_cast %12 : vector<1x176x128xbf16> to vector<176x128xbf16>
    %cst_10 = arith.constant dense<0.000000e+00> : vector<16x128xf32>
    %14 = tpu.matmul %11, %13, %cst_10 {dimension_numbers = #tpu.dot_dimension_numbers<[1], [0], [0], [1], [0, 0, 1, 1], [], []>} : vector<16x176xbf16>, vector<176x128xbf16>, vector<16x128xf32> -> vector<16x128xf32>
    %15 = arith.addf %10, %14 : vector<16x128xf32>
    %c0_11 = arith.constant 0 : index
    %c0_12 = arith.constant 0 : index
    %16 = vector.load %arg3[%c0_11, %c0_12] : memref<1x128xf32, #tpu.memory_space<vmem>>, vector<1x128xf32>
    %17 = vector.broadcast %16 : vector<1x128xf32> to vector<16x128xf32>
    %18 = arith.addf %15, %17 : vector<16x128xf32>
    %cst_13 = arith.constant 0.000000e+00 : f32
    %19 = vector.broadcast %cst_13 : f32 to vector<16x128xf32>
    %20 = arith.maximumf %18, %19 : vector<16x128xf32>
    %cst_14 = arith.constant dense<0.000000e+00> : vector<128xf32>
    %21 = vector.multi_reduction <add>, %20, %cst_14 [0] : vector<16x128xf32> to vector<128xf32>
    %22 = vector.shape_cast %21 : vector<128xf32> to vector<1x128xf32>
    %23 = arith.mulf %20, %20 : vector<16x128xf32>
    %cst_15 = arith.constant dense<0.000000e+00> : vector<128xf32>
    %24 = vector.multi_reduction <add>, %23, %cst_15 [0] : vector<16x128xf32> to vector<128xf32>
    %25 = vector.shape_cast %24 : vector<128xf32> to vector<1x128xf32>
    %26 = tpu.concatenate %22, %25 in 0 : vector<1x128xf32>, vector<1x128xf32> -> vector<2x128xf32>
    %c0_i32 = arith.constant 0 : i32
    %27 = arith.cmpi eq, %arg0, %c0_i32 : i32
    %28 = arith.extui %27 : i1 to i32
    %c0_i32_16 = arith.constant 0 : i32
    %29 = arith.cmpi ne, %28, %c0_i32_16 : i32
    scf.if %29 {
      %cst_21 = arith.constant 0.000000e+00 : f32
      %33 = vector.broadcast %cst_21 : f32 to vector<2x128xf32>
      %c0_22 = arith.constant 0 : index
      %c0_23 = arith.constant 0 : index
      %34 = vector.load %arg4[%c0_22, %c0_23] : memref<2x128xf32, #tpu.memory_space<vmem>>, vector<2x128xf32>
      tpu.vector_store %arg4[%c0_22, %c0_23], %33 {strides = array<i32>} : memref<2x128xf32, #tpu.memory_space<vmem>>, vector<2x128xf32>,
    } else {
    }
    %c0_17 = arith.constant 0 : index
    %c0_18 = arith.constant 0 : index
    %30 = vector.load %arg4[%c0_17, %c0_18] : memref<2x128xf32, #tpu.memory_space<vmem>>, vector<2x128xf32>
    %31 = arith.addf %30, %26 : vector<2x128xf32>
    %c0_19 = arith.constant 0 : index
    %c0_20 = arith.constant 0 : index
    %32 = vector.load %arg4[%c0_19, %c0_20] : memref<2x128xf32, #tpu.memory_space<vmem>>, vector<2x128xf32>
    tpu.vector_store %arg4[%c0_19, %c0_20], %31 {strides = array<i32>} : memref<2x128xf32, #tpu.memory_space<vmem>>, vector<2x128xf32>,
    return
  }
  func.func @transform_0(%arg0: i32) -> (i32, i32, i32) {
    %c0_i32 = arith.constant 0 : i32
    %c0_i32_0 = arith.constant 0 : i32
    %c0_i32_1 = arith.constant 0 : i32
    return %arg0, %c0_i32, %c0_i32_0 : i32, i32, i32
  }
  func.func @transform_1(%arg0: i32) -> (i32, i32, i32) {
    %c0_i32 = arith.constant 0 : i32
    %c0_i32_0 = arith.constant 0 : i32
    %c0_i32_1 = arith.constant 0 : i32
    %c0_i32_2 = arith.constant 0 : i32
    return %c0_i32, %c0_i32_0, %c0_i32_1 : i32, i32, i32
  }
  func.func @transform_2(%arg0: i32) -> (i32, i32) {
    %c0_i32 = arith.constant 0 : i32
    %c0_i32_0 = arith.constant 0 : i32
    %c0_i32_1 = arith.constant 0 : i32
    return %c0_i32, %c0_i32_0 : i32, i32
  }
  func.func @transform_3(%arg0: i32) -> (i32, i32) {
    %c0_i32 = arith.constant 0 : i32
    %c0_i32_0 = arith.constant 0 : i32
    %c0_i32_1 = arith.constant 0 : i32
    return %c0_i32, %c0_i32_0 : i32, i32
  }
}

module attributes {stable_mosaic.version = 11 : i64} {
  func.func @_conv_relu_affine_kernel(%arg0: i32, %arg1: memref<1x22x176xbf16, #tpu.memory_space<vmem>>, %arg2: memref<3x176x128xbf16, #tpu.memory_space<vmem>>, %arg3: memref<1x128xf32, #tpu.memory_space<vmem>>, %arg4: memref<1x128xf32, #tpu.memory_space<vmem>>, %arg5: memref<1x128xf32, #tpu.memory_space<vmem>>, %arg6: memref<1x16x128xf32, #tpu.memory_space<vmem>>) attributes {dimension_semantics = [#tpu.dimension_semantics<parallel>], iteration_bounds = array<i64: 2>, scalar_prefetch = 0 : i64, scratch_operands = 0 : i64, tpu.core_type = #tpu.core_type<tc>, window_params = [{transform_indices = @transform_0, window_bounds = array<i64: 1, 22, 176>}, {pipeline_mode = #tpu.pipeline_mode<synchronous>, transform_indices = @transform_1, window_bounds = array<i64: 3, 176, 128>}, {pipeline_mode = #tpu.pipeline_mode<synchronous>, transform_indices = @transform_2, window_bounds = array<i64: 1, 128>}, {pipeline_mode = #tpu.pipeline_mode<synchronous>, transform_indices = @transform_3, window_bounds = array<i64: 1, 128>}, {pipeline_mode = #tpu.pipeline_mode<synchronous>, transform_indices = @transform_4, window_bounds = array<i64: 1, 128>}, {transform_indices = @transform_5, window_bounds = array<i64: 1, 16, 128>}]} {
    %c0 = arith.constant 0 : index
    %c0_0 = arith.constant 0 : index
    %c0_1 = arith.constant 0 : index
    %0 = vector.load %arg1[%c0, %c0_0, %c0_1] : memref<1x22x176xbf16, #tpu.memory_space<vmem>>, vector<1x22x176xbf16>
    %1 = vector.shape_cast %0 : vector<1x22x176xbf16> to vector<22x176xbf16>
    %2 = vector.extract_strided_slice %1 {offsets = [0, 0], sizes = [16, 176], strides = [1, 1]} : vector<22x176xbf16> to vector<16x176xbf16>
    %c0_2 = arith.constant 0 : index
    %c0_3 = arith.constant 0 : index
    %c0_4 = arith.constant 0 : index
    %3 = vector.load %arg2[%c0_2, %c0_3, %c0_4] : memref<3x176x128xbf16, #tpu.memory_space<vmem>>, vector<1x176x128xbf16>
    %4 = vector.shape_cast %3 : vector<1x176x128xbf16> to vector<176x128xbf16>
    %cst = arith.constant dense<0.000000e+00> : vector<16x128xf32>
    %5 = tpu.matmul %2, %4, %cst {dimension_numbers = #tpu.dot_dimension_numbers<[1], [0], [0], [1], [0, 0, 1, 1], [], []>} : vector<16x176xbf16>, vector<176x128xbf16>, vector<16x128xf32> -> vector<16x128xf32>
    %6 = vector.extract_strided_slice %1 {offsets = [3, 0], sizes = [16, 176], strides = [1, 1]} : vector<22x176xbf16> to vector<16x176xbf16>
    %c1 = arith.constant 1 : index
    %c0_5 = arith.constant 0 : index
    %c0_6 = arith.constant 0 : index
    %7 = vector.load %arg2[%c1, %c0_5, %c0_6] : memref<3x176x128xbf16, #tpu.memory_space<vmem>>, vector<1x176x128xbf16>
    %8 = vector.shape_cast %7 : vector<1x176x128xbf16> to vector<176x128xbf16>
    %cst_7 = arith.constant dense<0.000000e+00> : vector<16x128xf32>
    %9 = tpu.matmul %6, %8, %cst_7 {dimension_numbers = #tpu.dot_dimension_numbers<[1], [0], [0], [1], [0, 0, 1, 1], [], []>} : vector<16x176xbf16>, vector<176x128xbf16>, vector<16x128xf32> -> vector<16x128xf32>
    %10 = arith.addf %5, %9 : vector<16x128xf32>
    %11 = vector.extract_strided_slice %1 {offsets = [6, 0], sizes = [16, 176], strides = [1, 1]} : vector<22x176xbf16> to vector<16x176xbf16>
    %c2 = arith.constant 2 : index
    %c0_8 = arith.constant 0 : index
    %c0_9 = arith.constant 0 : index
    %12 = vector.load %arg2[%c2, %c0_8, %c0_9] : memref<3x176x128xbf16, #tpu.memory_space<vmem>>, vector<1x176x128xbf16>
    %13 = vector.shape_cast %12 : vector<1x176x128xbf16> to vector<176x128xbf16>
    %cst_10 = arith.constant dense<0.000000e+00> : vector<16x128xf32>
    %14 = tpu.matmul %11, %13, %cst_10 {dimension_numbers = #tpu.dot_dimension_numbers<[1], [0], [0], [1], [0, 0, 1, 1], [], []>} : vector<16x176xbf16>, vector<176x128xbf16>, vector<16x128xf32> -> vector<16x128xf32>
    %15 = arith.addf %10, %14 : vector<16x128xf32>
    %c0_11 = arith.constant 0 : index
    %c0_12 = arith.constant 0 : index
    %16 = vector.load %arg3[%c0_11, %c0_12] : memref<1x128xf32, #tpu.memory_space<vmem>>, vector<1x128xf32>
    %17 = vector.broadcast %16 : vector<1x128xf32> to vector<16x128xf32>
    %18 = arith.addf %15, %17 : vector<16x128xf32>
    %cst_13 = arith.constant 0.000000e+00 : f32
    %19 = vector.broadcast %cst_13 : f32 to vector<16x128xf32>
    %20 = arith.maximumf %18, %19 : vector<16x128xf32>
    %c0_14 = arith.constant 0 : index
    %c0_15 = arith.constant 0 : index
    %21 = vector.load %arg4[%c0_14, %c0_15] : memref<1x128xf32, #tpu.memory_space<vmem>>, vector<1x128xf32>
    %22 = vector.broadcast %21 : vector<1x128xf32> to vector<16x128xf32>
    %23 = arith.mulf %20, %22 : vector<16x128xf32>
    %c0_16 = arith.constant 0 : index
    %c0_17 = arith.constant 0 : index
    %24 = vector.load %arg5[%c0_16, %c0_17] : memref<1x128xf32, #tpu.memory_space<vmem>>, vector<1x128xf32>
    %25 = vector.broadcast %24 : vector<1x128xf32> to vector<16x128xf32>
    %26 = arith.addf %23, %25 : vector<16x128xf32>
    %c0_18 = arith.constant 0 : index
    %c0_19 = arith.constant 0 : index
    %c0_20 = arith.constant 0 : index
    %27 = vector.load %arg6[%c0_18, %c0_19, %c0_20] : memref<1x16x128xf32, #tpu.memory_space<vmem>>, vector<1x16x128xf32>
    %28 = vector.shape_cast %27 : vector<1x16x128xf32> to vector<16x128xf32>
    %29 = vector.shape_cast %26 : vector<16x128xf32> to vector<1x16x128xf32>
    tpu.vector_store %arg6[%c0_18, %c0_19, %c0_20], %29 {strides = array<i32>} : memref<1x16x128xf32, #tpu.memory_space<vmem>>, vector<1x16x128xf32>,
    return
  }
  func.func @transform_0(%arg0: i32) -> (i32, i32, i32) {
    %c0_i32 = arith.constant 0 : i32
    %c0_i32_0 = arith.constant 0 : i32
    %c0_i32_1 = arith.constant 0 : i32
    return %arg0, %c0_i32, %c0_i32_0 : i32, i32, i32
  }
  func.func @transform_1(%arg0: i32) -> (i32, i32, i32) {
    %c0_i32 = arith.constant 0 : i32
    %c0_i32_0 = arith.constant 0 : i32
    %c0_i32_1 = arith.constant 0 : i32
    %c0_i32_2 = arith.constant 0 : i32
    return %c0_i32, %c0_i32_0, %c0_i32_1 : i32, i32, i32
  }
  func.func @transform_2(%arg0: i32) -> (i32, i32) {
    %c0_i32 = arith.constant 0 : i32
    %c0_i32_0 = arith.constant 0 : i32
    %c0_i32_1 = arith.constant 0 : i32
    return %c0_i32, %c0_i32_0 : i32, i32
  }
  func.func @transform_3(%arg0: i32) -> (i32, i32) {
    %c0_i32 = arith.constant 0 : i32
    %c0_i32_0 = arith.constant 0 : i32
    %c0_i32_1 = arith.constant 0 : i32
    return %c0_i32, %c0_i32_0 : i32, i32
  }
  func.func @transform_4(%arg0: i32) -> (i32, i32) {
    %c0_i32 = arith.constant 0 : i32
    %c0_i32_0 = arith.constant 0 : i32
    %c0_i32_1 = arith.constant 0 : i32
    return %c0_i32, %c0_i32_0 : i32, i32
  }
  func.func @transform_5(%arg0: i32) -> (i32, i32, i32) {
    %c0_i32 = arith.constant 0 : i32
    %c0_i32_0 = arith.constant 0 : i32
    %c0_i32_1 = arith.constant 0 : i32
    return %arg0, %c0_i32, %c0_i32_0 : i32, i32, i32
  }
}

</mosaic_0001>

<bundles_post_ra>
// kernel: tile.398
= control target key start
LH: loop header
LB: loop body
LE: loop exit
PB: predicated region body
PF: predicated region fallthrough
CT: control target
= control target key end

     0   :  { %s28_s0 = inlined_call_operand.vmem [shape: f32[4], index: 0, kind: input, shape index: {}]   ;;  %s29_s1 = inlined_call_operand.vmem [shape: f32[16,4], index: 1, kind: output, shape index: {}]  }
   0x1   :  { %v4_v0 = vld [vmem:[%s28_s0] ss:$0 sm:$0xff] }
   0x2   :  { %5 = vst [vmem:[%s29_s1] sm:$0xff] %v4_v0  ;;  %8 = vst [vmem:[%s29_s1 + $0x8] sm:$0xff] %v4_v0 }

// kernel: tile.399
= control target key start
LH: loop header
LB: loop body
LE: loop exit
PB: predicated region body
PF: predicated region fallthrough
CT: control target
= control target key end

     0   :  { %s131_s10 = smov 60   ;;  %s132_s11 = smov 52   ;;  %vm3_vm0 = vcmask 31744   ;;  %vm9_vm1 = vcmask 523744   ;;  %vm15_vm2 = vcmask 490944   ;;  %vm21_vm3 = vcmask 458144   ;;  %s207_s0 = inlined_call_operand.vmem [shape: f32[16,4], index: 0, kind: input, shape index: {}]   ;;  %s208_s1 = inlined_call_operand.vmem [shape: f32[1,64], index: 1, kind: output, shape index: {}]  }
   0x1   :  { %v101_v0 = vld [vmem:[%s207_s0 + $0xf] sm:$0x1]   ;;  %v103_v1 = vld [vmem:[%s207_s0 + $0xd] sm:$0x1]   ;;  %v102_v2 = vld [vmem:[%s207_s0 + $0xe] sm:$0x1]  }
   0x2   :  { %7 = vrot.lane.b32.xlu0 %v101_v0, %s131_s10  ;;  %19 = vrot.lane.b32.xlu1 %v103_v1, %s132_s11  ;;  %v104_v3 = vld [vmem:[%s207_s0 + $0xc] sm:$0x1]   ;;  %s133_s16 = smov 56   ;;  %s134_s17 = smov 48   ;;  %v105_v4 = vld [vmem:[%s207_s0 + $0xb] sm:$0x1]  }
   0x3   :  { %v106_v5 = vld [vmem:[%s207_s0 + $0xa] sm:$0x1]   ;;  %v2_v6 = vld [vmem:[%s207_s0] sm:$0x1]   ;;  %s135_s24 = smov 44   ;;  %s136_s25 = smov 40  }
   0x4   :  { %4 = vst.msk [vmem:[#allocation0] sm:$0x1] %vm3_vm0, %v2_v6   ;;  %v107_v7 = vld [vmem:[%s207_s0 + $0x9] sm:$0x1]   ;;  %v108_v8 = vld [vmem:[%s207_s0 + $0x8] sm:$0x1]  }
   0x5   :  { %s137_s30 = smov 36   ;;  %s138_s2 = smov 32   ;;  %v109_v9 = vld [vmem:[%s207_s0 + $0x7] sm:$0x1]   ;;  %v110_v10 = vld [vmem:[%s207_s0 + $0x6] sm:$0x1]  }
   0x6   :  { %13 = vrot.lane.b32.xlu0 %v102_v2, %s133_s16  ;;  %25 = vrot.lane.b32.xlu1 %v104_v3, %s134_s17  ;;  %s139_s7 = smov 28   ;;  %s140_s8 = smov 24   ;;  %v111_v11 = vld [vmem:[%s207_s0 + $0x5] sm:$0x1]   ;;  %v112_v12 = vld [vmem:[%s207_s0 + $0x4] sm:$0x1]  }
   0x7   :  { %s141_s13 = smov 20   ;;  %s142_s14 = smov 16   ;;  %v113_v13 = vld [vmem:[%s207_s0 + $0x3] sm:$0x1]   ;;  %v114_v14 = vld [vmem:[%s207_s0 + $0x2] sm:$0x1]  }
   0x8   :  { %s143_s19 = smov 12   ;;  %s144_s20 = smov 8   ;;  %v115_v15 = vld [vmem:[%s207_s0 + $0x1] sm:$0x1]   ;;  %vm27_vm4 = vcmask 425344   ;;  %vm33_vm5 = vcmask 392544  }
   0x9   :  { %s145_s0 = smov 4   ;;  %vm39_vm6 = vcmask 359744   ;;  %vm45_vm7 = vcmask 326944   ;;  %vm51_vm8 = vcmask 294144   ;;  %vm57_vm9 = vcmask 261344  }
   0xa   :  { %31 = vrot.lane.b32.xlu0 %v105_v4, %s135_s24  ;;  %37 = vrot.lane.b32.xlu1 %v106_v5, %s136_s25  ;;  %vm63_vm10 = vcmask 228544   ;;  %vm69_vm11 = vcmask 195744   ;;  %vm75_vm12 = vcmask 162944   ;;  %vm81_vm13 = vcmask 130144  }
   0xb   :  { %vm87_vm14 = vcmask 97344   ;;  %vm93_vm15 = vcmask 64544  }
   0xe   :  { %43 = vrot.lane.b32.xlu0 %v107_v7, %s137_s30  ;;  %49 = vrot.lane.b32.xlu1 %v108_v8, %s138_s2 }
  0x12   :  { %55 = vrot.lane.b32.xlu0 %v109_v9, %s139_s7  ;;  %61 = vrot.lane.b32.xlu1 %v110_v10, %s140_s8 }
  0x16   :  { %67 = vrot.lane.b32.xlu0 %v111_v11, %s141_s13  ;;  %73 = vrot.lane.b32.xlu1 %v112_v12, %s142_s14 }
  0x1a   :  { %79 = vrot.lane.b32.xlu0 %v113_v13, %s143_s19  ;;  %85 = vrot.lane.b32.xlu1 %v114_v14, %s144_s20 }
  0x1e   :  { %91 = vrot.lane.b32.xlu0 %v115_v15, %s145_s0 }
  0x74   :  { %v8_v16 = vpop.permute.xlu0 %7   ;;  %v20_v17 = vpop.permute.xlu1 %19  }
  0x75   :  { %10 = vst.msk [vmem:[#allocation0] sm:$0x1] %vm9_vm1, %v8_v16  }
  0x78   :  { %v14_v18 = vpop.permute.xlu0 %13   ;;  %v26_v19 = vpop.permute.xlu1 %25  }
  0x79   :  { %16 = vst.msk [vmem:[#allocation0] sm:$0x1] %vm15_vm2, %v14_v18  }
  0x7a   :  { %22 = vst.msk [vmem:[#allocation0] sm:$0x1] %vm21_vm3, %v20_v17  }
  0x7b   :  { %28 = vst.msk [vmem:[#allocation0] sm:$0x1] %vm27_vm4, %v26_v19  }
  0x7c   :  { %v32_v20 = vpop.permute.xlu0 %31   ;;  %v38_v21 = vpop.permute.xlu1 %37  }
  0x7d   :  { %34 = vst.msk [vmem:[#allocation0] sm:$0x1] %vm33_vm5, %v32_v20  }
  0x7e   :  { %40 = vst.msk [vmem:[#allocation0] sm:$0x1] %vm39_vm6, %v38_v21  }
  0x80   :  { %v44_v22 = vpop.permute.xlu0 %43   ;;  %v50_v23 = vpop.permute.xlu1 %49  }
  0x81   :  { %46 = vst.msk [vmem:[#allocation0] sm:$0x1] %vm45_vm7, %v44_v22  }
  0x82   :  { %52 = vst.msk [vmem:[#allocation0] sm:$0x1] %vm51_vm8, %v50_v23  }
  0x84   :  { %v56_v24 = vpop.permute.xlu0 %55   ;;  %v62_v25 = vpop.permute.xlu1 %61  }
  0x85   :  { %58 = vst.msk [vmem:[#allocation0] sm:$0x1] %vm57_vm9, %v56_v24  }
  0x86   :  { %64 = vst.msk [vmem:[#allocation0] sm:$0x1] %vm63_vm10, %v62_v25  }
  0x88   :  { %v68_v26 = vpop.permute.xlu0 %67   ;;  %v74_v27 = vpop.permute.xlu1 %73  }
  0x89   :  { %70 = vst.msk [vmem:[#allocation0] sm:$0x1] %vm69_vm11, %v68_v26  }
  0x8a   :  { %76 = vst.msk [vmem:[#allocation0] sm:$0x1] %vm75_vm12, %v74_v27  }
  0x8c   :  { %v80_v28 = vpop.permute.xlu0 %79   ;;  %v86_v29 = vpop.permute.xlu1 %85  }
  0x8d   :  { %82 = vst.msk [vmem:[#allocation0] sm:$0x1] %vm81_vm13, %v80_v28  }
  0x8e   :  { %88 = vst.msk [vmem:[#allocation0] sm:$0x1] %vm87_vm14, %v86_v29  }
  0x90   :  { %v92_v30 = vpop.permute.xlu0 %91  }
  0x91   :  { %94 = vst.msk [vmem:[#allocation0] sm:$0x1] %vm93_vm15, %v92_v30  }
  0x98   :  { %v98_v31 = vld [vmem:[#allocation0] sm:$0x1] }
  0x99   :  { %100 = vst [vmem:[%s208_s1] sm:$0x1] %v98_v31 }

// kernel: duck_block_forward.60
= control target key start
LH: loop header
LB: loop body
LE: loop exit
PB: predicated region body
PF: predicated region fallthrough
CT: control target
= control target key end

     0   :  { %s203_s6 = smov 0   ;;  %s231_s0 = inlined_call_operand.vmem [shape: f32[2,16,64], index: 0, kind: input, shape index: {}]   ;;  %s232_s1 = inlined_call_operand.vmem [shape: f32[2,64], index: 1, kind: output, shape index: {}]  }
   0x1 LB: > { %s209_s7 = sadd.s32 4294967295, %s190_s6   ;;  %p168_p0 = scmp.ge.s32.totalorder %s190_s6, 1  ;;  %s190_s6 = sphi %s203_s6, %s11_s6  }
   0x2   : > { %p82_p1 = scmp.lt.s32.totalorder %s190_s6, 3 }
   0x4   : > { %p83_p2 = pnand %p168_p0, %p82_p1 }
   0x5   : > { %p97_p3 = scmp.lt.s32.totalorder (!%p83_p2), %s209_s7, 1  ;;  %vm104_vm0 = vcmask (!%p83_p2), 523264   ;;  %vm125_vm1 = vcmask (!%p83_p2), 1040384   ;;  %p171_p4 = scmp.ne.s32.totalorder (!%p83_p2), %s209_s7, 0 }
   0x6   : > { %86 = sbr.rel (%p83_p2) target bundleno = 40 (0x28), region = 24 }
   0xd   : > { %s98_s8 = scalar_select %p97_p3, %s209_s7, 1 }
   0xe   : > { %vm131_vm2 = vcmask (!%p171_p4), 517120   ;;  %v192_v23 = vmov (!%p171_p4), 0.0  }
   0xf   : > { %s174_s9 = sshll.u32 %s98_s8, 4  ;;  %132 = vst.msk [vmem:[%s232_s1] sm:$0x3] (!%p171_p4), %vm131_vm2, %v192_v23 }
  0x10   : > { %s101_s12 = scalar_lea.vmem %s231_s0, %s174_s9 }
  0x11   : > { %v102_v0 = vld [vmem:[%s101_s12] sm:$0xff]  ;;  %v103_v1 = vld [vmem:[%s101_s12 + $0x8] sm:$0xff] }
  0x12   : > { %v105_v2 = vsel %vm104_vm0, %v102_v0, 0.0  ;;  %v106_v3 = vsel %vm104_vm0, %v103_v1, 0.0  ;;  %v114_v4 = vmul.f32 %v102_v0, %v102_v0  ;;  %v115_v5 = vmul.f32 %v103_v1, %v103_v1 }
  0x13   : > { %v107_v6 = vadd.f32 %v106_v3, %v105_v2 }
  0x14   : > { %v116_v7 = vsel %vm104_vm0, %v114_v4, 0.0  ;;  %v117_v8 = vsel %vm104_vm0, %v115_v5, 0.0 }
  0x15   : > { %v108_v9 = vrot.slane %v107_v6, 4  ;;  %v118_v10 = vadd.f32 %v117_v8, %v116_v7 }
  0x17   : > { %v109_v11 = vadd.f32 %v108_v9, %v107_v6  ;;  %v119_v12 = vrot.slane %v118_v10, 4 }
  0x19   : > { %v110_v13 = vrot.slane %v109_v11, 2  ;;  %v120_v14 = vadd.f32 %v119_v12, %v118_v10 }
  0x1b   : > { %v111_v15 = vadd.f32 %v110_v13, %v109_v11  ;;  %v121_v16 = vrot.slane %v120_v14, 2 }
  0x1d   : > { %v112_v17 = vrot.slane %v111_v15, 1  ;;  %v122_v18 = vadd.f32 %v121_v16, %v120_v14  ;;  %130 = sbr.rel (%p171_p4) target bundleno = 36 (0x24), region = 28 }
  0x1f   : > { %v113_v19 = vadd.f32 %v112_v17, %v111_v15  ;;  %v123_v20 = vrot.slane %v122_v18, 1 }
  0x21   : > { %v124_v21 = vadd.f32 %v123_v20, %v122_v18 }
  0x23   : > { %v126_v22 = vsel %vm125_vm1, %v113_v19, %v124_v21 }
  0x24 PF: > { %v133_v24 = vld [vmem:[%s232_s1] sm:$0x3]  ;;  %vm135_vm3 = vcmask 517120  }
  0x25   : > { %v134_v25 = vadd.f32 %v133_v24, %v126_v22 }
  0x27   : > { %136 = vst.msk [vmem:[%s232_s1] sm:$0x3] %vm135_vm3, %v134_v25 }
  0x28 PF: > { %s11_s6 = sadd.s32 1, %s190_s6  }
  0x29   : > { %p8_p5 = scmp.ge.s32.totalorder %s11_s6, 4  }
  0x2b   :  { %10 = sbr.rel (!%p8_p5) target bundleno = 1 (0x1), region = 54 }

// kernel: duck_block_forward.61
= control target key start
LH: loop header
LB: loop body
LE: loop exit
PB: predicated region body
PF: predicated region fallthrough
CT: control target
= control target key end

     0   :  { %s276_s12 = smov 0   ;;  %s312_s0 = inlined_call_operand.vmem [shape: f32[2,16,64], index: 0, kind: input, shape index: {}]   ;;  %s313_s1 = inlined_call_operand.vmem [shape: f32[1,64], index: 1, kind: input, shape index: {}]   ;;  %s314_s2 = inlined_call_operand.vmem [shape: f32[1,64], index: 2, kind: input, shape index: {}]   ;;  %s315_s3 = inlined_call_operand.vmem [shape: f32[2,16,64], index: 3, kind: output, shape index: {}]  }
   0x1 LB: > { %s249_s13 = sadd.s32 4294967295, %s278_s12   ;;  %p253_p0 = scmp.ge.s32.totalorder %s278_s12, 1  ;;  %s278_s12 = sphi %s276_s12, %s13_s12  }
   0x2   : > { %p137_p1 = scmp.lt.s32.totalorder %s278_s12, 3 }
   0x4   : > { %p138_p2 = pnand %p253_p0, %p137_p1 }
   0x5   : > { %p161_p3 = scmp.lt.s32.totalorder (!%p138_p2), %s249_s13, 1  ;;  %v258_v0 = vld [vmem:[%s313_s1] ss:$0 sm:$0xff] (!%p138_p2)  ;;  %vm191_vm0 = vcmask (!%p138_p2), 523264  }
   0x6   : > { %141 = sbr.rel (%p138_p2) target bundleno = 22 (0x16), region = 32  ;;  %v259_v3 = vld [vmem:[%s314_s2] ss:$0 sm:$0xff] (!%p138_p2) }
   0xd   : > { %s317_s13 = smov (!%p161_p3, %s249_s13), 1 }
   0xe   : > { %s262_s14 = sshll.u32 %s317_s13, 4 }
   0xf   : > { %s165_s19 = scalar_lea.vmem %s312_s0, %s262_s14  ;;  %s170_s24 = scalar_lea.vmem %s315_s3, %s262_s14 }
  0x10   : > { %v171_v1 = vld [vmem:[%s165_s19] sm:$0xff]  ;;  %v172_v2 = vld [vmem:[%s165_s19 + $0x8] sm:$0xff] }
  0x11   : > { %v180_v4 = vmul.f32 %v258_v0, %v171_v1  ;;  %v181_v5 = vmul.f32 %v258_v0, %v172_v2 }
  0x13   : > { %v189_v6 = vadd.f32 %v259_v3, %v180_v4  ;;  %v190_v7 = vadd.f32 %v259_v3, %v181_v5 }
  0x15   : > { %192 = vst.msk [vmem:[%s170_s24] sm:$0xff] %vm191_vm0, %v189_v6  ;;  %193 = vst.msk [vmem:[%s170_s24 + $0x8] sm:$0xff] %vm191_vm0, %v190_v7 }
  0x16 PF: > { %s13_s12 = sadd.s32 1, %s278_s12  }
  0x17   : > { %p10_p4 = scmp.ge.s32.totalorder %s13_s12, 4  }
  0x19   :  { %12 = sbr.rel (!%p10_p4) target bundleno = 1 (0x1), region = 62 }

// kernel: tile.653
= control target key start
LH: loop header
LB: loop body
LE: loop exit
PB: predicated region body
PF: predicated region fallthrough
CT: control target
= control target key end

     0   :  { %s28_s0 = inlined_call_operand.vmem [shape: f32[8], index: 0, kind: input, shape index: {}]   ;;  %s29_s1 = inlined_call_operand.vmem [shape: f32[16,8], index: 1, kind: output, shape index: {}]  }
   0x1   :  { %v4_v0 = vld [vmem:[%s28_s0] ss:$0 sm:$0xff] }
   0x2   :  { %5 = vst [vmem:[%s29_s1] sm:$0xff] %v4_v0  ;;  %8 = vst [vmem:[%s29_s1 + $0x8] sm:$0xff] %v4_v0 }

// kernel: tile.654
= control target key start
LH: loop header
LB: loop body
LE: loop exit
PB: predicated region body
PF: predicated region fallthrough
CT: control target
= control target key end

     0   :  { %s131_s10 = smov 120   ;;  %s132_s11 = smov 104   ;;  %vm3_vm0 = vcmask 64512   ;;  %vm9_vm1 = vcmask 1048512   ;;  %vm15_vm2 = vcmask 982912   ;;  %vm21_vm3 = vcmask 917312   ;;  %s207_s0 = inlined_call_operand.vmem [shape: f32[16,8], index: 0, kind: input, shape index: {}]   ;;  %s208_s1 = inlined_call_operand.vmem [shape: f32[1,128], index: 1, kind: output, shape index: {}]  }
   0x1   :  { %v101_v0 = vld [vmem:[%s207_s0 + $0xf] sm:$0x1]   ;;  %v103_v1 = vld [vmem:[%s207_s0 + $0xd] sm:$0x1]   ;;  %v102_v2 = vld [vmem:[%s207_s0 + $0xe] sm:$0x1]  }
   0x2   :  { %7 = vrot.lane.b32.xlu0 %v101_v0, %s131_s10  ;;  %19 = vrot.lane.b32.xlu1 %v103_v1, %s132_s11  ;;  %v104_v3 = vld [vmem:[%s207_s0 + $0xc] sm:$0x1]   ;;  %s133_s16 = smov 112   ;;  %s134_s17 = smov 96   ;;  %v105_v4 = vld [vmem:[%s207_s0 + $0xb] sm:$0x1]  }
   0x3   :  { %v106_v5 = vld [vmem:[%s207_s0 + $0xa] sm:$0x1]   ;;  %v2_v6 = vld [vmem:[%s207_s0] sm:$0x1]   ;;  %s135_s24 = smov 88   ;;  %s136_s25 = smov 80  }
   0x4   :  { %4 = vst.msk [vmem:[#allocation0] sm:$0x1] %vm3_vm0, %v2_v6   ;;  %v107_v7 = vld [vmem:[%s207_s0 + $0x9] sm:$0x1]   ;;  %v108_v8 = vld [vmem:[%s207_s0 + $0x8] sm:$0x1]  }
   0x5   :  { %s137_s30 = smov 72   ;;  %s138_s2 = smov 64   ;;  %v109_v9 = vld [vmem:[%s207_s0 + $0x7] sm:$0x1]   ;;  %v110_v10 = vld [vmem:[%s207_s0 + $0x6] sm:$0x1]  }
   0x6   :  { %13 = vrot.lane.b32.xlu0 %v102_v2, %s133_s16  ;;  %25 = vrot.lane.b32.xlu1 %v104_v3, %s134_s17  ;;  %s139_s7 = smov 56   ;;  %s140_s8 = smov 48   ;;  %v111_v11 = vld [vmem:[%s207_s0 + $0x5] sm:$0x1]   ;;  %v112_v12 = vld [vmem:[%s207_s0 + $0x4] sm:$0x1]  }
   0x7   :  { %s141_s13 = smov 40   ;;  %s142_s14 = smov 32   ;;  %v113_v13 = vld [vmem:[%s207_s0 + $0x3] sm:$0x1]   ;;  %v114_v14 = vld [vmem:[%s207_s0 + $0x2] sm:$0x1]  }
   0x8   :  { %s143_s19 = smov 24   ;;  %s144_s20 = smov 16   ;;  %v115_v15 = vld [vmem:[%s207_s0 + $0x1] sm:$0x1]   ;;  %vm27_vm4 = vcmask 851712   ;;  %vm33_vm5 = vcmask 786112  }
   0x9   :  { %s145_s0 = smov 8   ;;  %vm39_vm6 = vcmask 720512   ;;  %vm45_vm7 = vcmask 654912   ;;  %vm51_vm8 = vcmask 589312   ;;  %vm57_vm9 = vcmask 523712  }
   0xa   :  { %31 = vrot.lane.b32.xlu0 %v105_v4, %s135_s24  ;;  %37 = vrot.lane.b32.xlu1 %v106_v5, %s136_s25  ;;  %vm63_vm10 = vcmask 458112   ;;  %vm69_vm11 = vcmask 392512   ;;  %vm75_vm12 = vcmask 326912   ;;  %vm81_vm13 = vcmask 261312  }
   0xb   :  { %vm87_vm14 = vcmask 195712   ;;  %vm93_vm15 = vcmask 130112  }
   0xe   :  { %43 = vrot.lane.b32.xlu0 %v107_v7, %s137_s30  ;;  %49 = vrot.lane.b32.xlu1 %v108_v8, %s138_s2 }
  0x12   :  { %55 = vrot.lane.b32.xlu0 %v109_v9, %s139_s7  ;;  %61 = vrot.lane.b32.xlu1 %v110_v10, %s140_s8 }
  0x16   :  { %67 = vrot.lane.b32.xlu0 %v111_v11, %s141_s13  ;;  %73 = vrot.lane.b32.xlu1 %v112_v12, %s142_s14 }
  0x1a   :  { %79 = vrot.lane.b32.xlu0 %v113_v13, %s143_s19  ;;  %85 = vrot.lane.b32.xlu1 %v114_v14, %s144_s20 }
  0x1e   :  { %91 = vrot.lane.b32.xlu0 %v115_v15, %s145_s0 }
  0x74   :  { %v8_v16 = vpop.permute.xlu0 %7   ;;  %v20_v17 = vpop.permute.xlu1 %19  }
  0x75   :  { %10 = vst.msk [vmem:[#allocation0] sm:$0x1] %vm9_vm1, %v8_v16  }
  0x78   :  { %v14_v18 = vpop.permute.xlu0 %13   ;;  %v26_v19 = vpop.permute.xlu1 %25  }
  0x79   :  { %16 = vst.msk [vmem:[#allocation0] sm:$0x1] %vm15_vm2, %v14_v18  }
  0x7a   :  { %22 = vst.msk [vmem:[#allocation0] sm:$0x1] %vm21_vm3, %v20_v17  }
  0x7b   :  { %28 = vst.msk [vmem:[#allocation0] sm:$0x1] %vm27_vm4, %v26_v19  }
  0x7c   :  { %v32_v20 = vpop.permute.xlu0 %31   ;;  %v38_v21 = vpop.permute.xlu1 %37  }
  0x7d   :  { %34 = vst.msk [vmem:[#allocation0] sm:$0x1] %vm33_vm5, %v32_v20  }
  0x7e   :  { %40 = vst.msk [vmem:[#allocation0] sm:$0x1] %vm39_vm6, %v38_v21  }
  0x80   :  { %v44_v22 = vpop.permute.xlu0 %43   ;;  %v50_v23 = vpop.permute.xlu1 %49  }
  0x81   :  { %46 = vst.msk [vmem:[#allocation0] sm:$0x1] %vm45_vm7, %v44_v22  }
  0x82   :  { %52 = vst.msk [vmem:[#allocation0] sm:$0x1] %vm51_vm8, %v50_v23  }
  0x84   :  { %v56_v24 = vpop.permute.xlu0 %55   ;;  %v62_v25 = vpop.permute.xlu1 %61  }
  0x85   :  { %58 = vst.msk [vmem:[#allocation0] sm:$0x1] %vm57_vm9, %v56_v24  }
  0x86   :  { %64 = vst.msk [vmem:[#allocation0] sm:$0x1] %vm63_vm10, %v62_v25  }
  0x88   :  { %v68_v26 = vpop.permute.xlu0 %67   ;;  %v74_v27 = vpop.permute.xlu1 %73  }
  0x89   :  { %70 = vst.msk [vmem:[#allocation0] sm:$0x1] %vm69_vm11, %v68_v26  }
  0x8a   :  { %76 = vst.msk [vmem:[#allocation0] sm:$0x1] %vm75_vm12, %v74_v27  }
  0x8c   :  { %v80_v28 = vpop.permute.xlu0 %79   ;;  %v86_v29 = vpop.permute.xlu1 %85  }
  0x8d   :  { %82 = vst.msk [vmem:[#allocation0] sm:$0x1] %vm81_vm13, %v80_v28  }
  0x8e   :  { %88 = vst.msk [vmem:[#allocation0] sm:$0x1] %vm87_vm14, %v86_v29  }
  0x90   :  { %v92_v30 = vpop.permute.xlu0 %91  }
  0x91   :  { %94 = vst.msk [vmem:[#allocation0] sm:$0x1] %vm93_vm15, %v92_v30  }
  0x98   :  { %v98_v31 = vld [vmem:[#allocation0] sm:$0x1] }
  0x99   :  { %100 = vst [vmem:[%s208_s1] sm:$0x1] %v98_v31 }

// kernel: duck_block_forward.98
= control target key start
LH: loop header
LB: loop body
LE: loop exit
PB: predicated region body
PF: predicated region fallthrough
CT: control target
= control target key end

     0   :  { %s671_s12 = smov 0   ;;  %s774_s0 = inlined_call_operand.vmem [shape: bf16[2,18,72], index: 0, kind: input, shape index: {}]   ;;  %s775_s1 = inlined_call_operand.vmem [shape: bf16[3,72,128], index: 1, kind: input, shape index: {}]   ;;  %s776_s2 = inlined_call_operand.vmem [shape: f32[1,128], index: 2, kind: input, shape index: {}]   ;;  %s777_s3 = inlined_call_operand.vmem [shape: f32[2,128], index: 3, kind: output, shape index: {}]  }
   0x1 LB: > { %s677_s13 = sadd.s32 4294967295, %s646_s12   ;;  %p507_p0 = scmp.ge.s32.totalorder %s646_s12, 1  ;;  %s646_s12 = sphi %s671_s12, %s13_s12  }
   0x2   : > { %p132_p1 = scmp.lt.s32.totalorder %s646_s12, 3 }
   0x4   : > { %p133_p2 = pnand %p507_p0, %p132_p1 }
   0x5   : > { %v623_v0 = vld [vmem:[%s775_s1 + $0x24] sm:$0xff] (!%p133_p2)   ;;  %v648_v1 = vmov (!%p133_p2), 0.0   ;;  %v625_v3 = vld [vmem:[%s775_s1 + $0x2c] sm:$0xff] (!%p133_p2)   ;;  %p151_p3 = scmp.lt.s32.totalorder (!%p133_p2), %s677_s13, 1  ;;  %vm649_vm0 = vmmov (!%p133_p2), 0   ;;  %v627_v5 = vld [vmem:[%s775_s1 + $0x34] sm:$0xff] (!%p133_p2)  }
   0x6   : > { %136 = sbr.rel (%p133_p2) target bundleno = 287 (0x11f), region = 32  ;;  %569 = vmatprep.subr.bf16.mxu0 (!%p133_p2), %v648_v1  ;;  %583 = vmatprep.subr.bf16.mxu1 (!%p133_p2), %v648_v1  ;;  %v624_v2 = vld [vmem:[%s775_s1] sm:$0xff] (!%p133_p2)   ;;  %v626_v4 = vld [vmem:[%s775_s1 + $0x8] sm:$0xff] (!%p133_p2)   ;;  %v628_v6 = vld [vmem:[%s775_s1 + $0x10] sm:$0xff] (!%p133_p2)   ;;  %vm231_vm1 = vcmask (!%p133_p2), 1043456   ;;  %vm227_vm3 = vcmask (!%p133_p2), 588800  }
   0x7   : > { %570 = vmatpush3.bf16.msra.mxu0 (!%p133_p2), %v623_v0  ;;  %584 = vmatpush3.bf16.msra.mxu1 (!%p133_p2), %v624_v2  ;;  %v629_v7 = vld [vmem:[%s775_s1 + $0x3c] sm:$0xff] (!%p133_p2)   ;;  %v631_v8 = vld [vmem:[%s775_s1 + $0x44] ss:$0 sps:$4 sm:$0xff] (!%p133_p2)   ;;  %vm187_vm2 = vsmask.f32 (!%p133_p2), 7424  ;;  %v635_v22 = vld [vmem:[%s775_s1 + $0x48] sm:$0xff] (!%p133_p2)  }
   0x8   : > { %571 = vmatprep.subr.bf16.mxu0 (!%p133_p2), %v648_v1  ;;  %585 = vmatprep.subr.bf16.mxu1 (!%p133_p2), %v648_v1  ;;  %v632_v9 = vld [vmem:[%s775_s1 + $0x20] ss:$0 sps:$4 sm:$0xff] (!%p133_p2)   ;;  %v630_v11 = vld [vmem:[%s775_s1 + $0x18] sm:$0xff] (!%p133_p2)   ;;  %v233_v17 = vsel (!%p133_p2), %vm231_vm1, %v631_v8, 0  ;;  %v636_v23 = vld [vmem:[%s775_s1 + $0x50] sm:$0xff] (!%p133_p2)   ;;  %vm359_vm4 = vcmask (!%p133_p2), 1046528  }
   0x9   : > { %579 = vmatprep.mubr.msk.bf16.mxu0 (!%p133_p2), %vm649_vm0, %v648_v1  ;;  %593 = vmatprep.mubr.msk.bf16.mxu1 (!%p133_p2), %vm649_vm0, %v648_v1  ;;  %v306_v19 = vsel (!%p133_p2), %vm231_vm1, %v632_v9, 0  ;;  %v637_v24 = vld [vmem:[%s775_s1 + $0x58] sm:$0xff] (!%p133_p2)   ;;  %v638_v25 = vld [vmem:[%s775_s1 + $0x60] sm:$0xff] (!%p133_p2)   ;;  %v639_v26 = vld [vmem:[%s775_s1 + $0x68] ss:$0 sps:$4 sm:$0xff] (!%p133_p2)   ;;  %vm466_vm5 = vcmask (!%p133_p2), 1040384  }
   0xa   : > { %v394_v29 = vsel (!%p133_p2), %vm231_vm1, %v639_v26, 0  ;;  %v547_v42 = vld [vmem:[%s776_s2] ss:$0 sm:$0xff] (!%p133_p2)  ;;  %p548_p4 = scmp.ne.s32.totalorder (!%p133_p2), %s677_s13, 0 }
   0xb   : > { %572 = vmatpush3.bf16.msra.mxu0 (!%p133_p2), %v625_v3  ;;  %586 = vmatpush3.bf16.msra.mxu1 (!%p133_p2), %v626_v4 }
   0xc   : > { %573 = vmatprep.subr.bf16.mxu0 (!%p133_p2), %v648_v1  ;;  %587 = vmatprep.subr.bf16.mxu1 (!%p133_p2), %v648_v1 }
   0xd   : > { %s152_s22 = scalar_select %p151_p3, %s677_s13, 1 }
   0xf   : > { %s611_s27 = smul.u32 12, %s152_s22  ;;  %574 = vmatpush3.bf16.msra.mxu0 %v627_v5  ;;  %588 = vmatpush3.bf16.msra.mxu1 %v628_v6  ;;  %v650_v5 = vmov (!%p548_p4), 0.0  }
  0x10   : > { %575 = vmatprep.subr.bf16.mxu0 %v648_v1  ;;  %589 = vmatprep.subr.bf16.mxu1 %v648_v1  ;;  %472 = vst [vmem:[%s777_s3] sm:$0x3] (!%p548_p4), %v650_v5 }
  0x11   : > { %s155_s7 = scalar_lea.vmem %s774_s0, %s611_s27 }
  0x12   : > { %v633_v10 = vld [vmem:[%s155_s7] sm:$0xff]   ;;  %v634_v12 = vld [vmem:[%s155_s7 + $0x8] ss:$0 sps:$4 sm:$0x11]  }
  0x13   : > { %v189_v13 = vshrl.u32 %v633_v10, 16  ;;  %v191_v14 = vshll.u32 %v633_v10, 16  ;;  %v196_v15 = vshll.u32 %v634_v12, 16  ;;  %576 = vmatpush3.bf16.msra.mxu0 %v629_v7  ;;  %590 = vmatpush3.bf16.msra.mxu1 %v630_v11  ;;  %v360_v27 = vrot.slane %v633_v10, 1 }
  0x14   : > { %577 = vmatprep.subr.bf16.mxu0 %v648_v1  ;;  %591 = vmatprep.subr.bf16.mxu1 %v648_v1  ;;  %v361_v28 = vrot.slane %v634_v12, 1 }
  0x15   : > { %v193_v16 = vrot.slane %v191_v14, 1  ;;  %v198_v18 = vrot.slane %v196_v15, 1 }
  0x16   : > { %v362_v30 = vsel %vm359_vm4, %v360_v27, %v361_v28 }
  0x17   : > { %v194_v20 = vor.u32 %v193_v16, %v189_v13  ;;  %578 = vmatpush3.bf16.msra.mxu0 %v233_v17  ;;  %592 = vmatpush3.bf16.msra.mxu1 %v306_v19 }
  0x18   : > { %597 = vmatprep.subr.bf16.mxu0 %v648_v1 }
  0x19   : > { %v199_v21 = vsel %vm187_vm2, %v194_v20, %v198_v18 }
  0x1a   : > { %580 = vmatmul.mubr.msk.bf16.vlgmr.msra.gmra.mrb[0].mxu0 %vm227_vm3, %v199_v21  ;;  %594 = vmatmul.mubr.msk.bf16.vlgmr.msra.gmra.mrb[0].mxu1 %vm227_vm3, %v633_v10 }
  0x1b   : > { %598 = vmatpush3.bf16.msra.mxu0 %v635_v22  ;;  %607 = vmatprep.mubr.msk.bf16.mxu0 %vm649_vm0, %v648_v1 }
  0x1c   : > { %599 = vmatprep.subr.bf16.mxu0 %v648_v1 }
  0x1f   : > { %600 = vmatpush3.bf16.msra.mxu0 %v636_v23 }
  0x20   : > { %601 = vmatprep.subr.bf16.mxu0 %v648_v1 }
  0x23   : > { %602 = vmatpush3.bf16.msra.mxu0 %v637_v24 }
  0x24   : > { %603 = vmatprep.subr.bf16.mxu0 %v648_v1 }
  0x27   : > { %604 = vmatpush3.bf16.msra.mxu0 %v638_v25 }
  0x28   : > { %605 = vmatprep.subr.bf16.mxu0 %v648_v1 }
  0x2b   : > { %606 = vmatpush3.bf16.msra.mxu0 %v394_v29 }
  0x2e   : > { %608 = vmatmul.mubr.msk.bf16.vlgmr.msra.gmra.mrb[4].mxu0 %vm227_vm3, %v362_v30 }
  0xed   : > { %v269_v31 = vpop.f32.mrb[0].mxu0  ;;  %v342_v32 = vpop.f32.mrb[0].mxu1 }
  0xee   : > { %v581_v33 = vpop.f32.mrb[1].mxu0  ;;  %v343_v34 = vadd.f32 %v342_v32, %v269_v31  ;;  %v595_v35 = vpop.f32.mrb[1].mxu1 }
  0xef   : > { %v272_v36 = vpop.f32.mrb[2].mxu0  ;;  %v345_v37 = vpop.f32.mrb[2].mxu1 }
  0xf0   : > { %v582_v38 = vpop.f32.mrb[3].mxu0  ;;  %v346_v39 = vadd.f32 %v345_v37, %v272_v36  ;;  %v596_v40 = vpop.f32.mrb[3].mxu1 }
 0x101   : > { %v430_v41 = vpop.f32.mrb[4].mxu0 }
 0x102   : > { %v437_v43 = vadd.f32 %v430_v41, %v343_v34  ;;  %v609_v44 = vpop.f32.mrb[5].mxu0 }
 0x103   : > { %v433_v45 = vpop.f32.mrb[6].mxu0 }
 0x104   : > { %v446_v46 = vadd.f32 %v547_v42, %v437_v43  ;;  %v438_v47 = vadd.f32 %v433_v45, %v346_v39  ;;  %v610_v48 = vpop.f32.mrb[7].mxu0 }
 0x106   : > { %v448_v49 = vmax.f32 %v446_v46, 0.0  ;;  %v447_v50 = vadd.f32 %v547_v42, %v438_v47 }
 0x108   : > { %v449_v51 = vmax.f32 %v447_v50, 0.0  ;;  %v457_v52 = vmul.f32 %v448_v49, %v448_v49 }
 0x10a   : > { %v450_v53 = vadd.f32 %v449_v51, %v448_v49  ;;  %v458_v54 = vmul.f32 %v449_v51, %v449_v51 }
 0x10c   : > { %v451_v55 = vrot.slane %v450_v53, 4  ;;  %v459_v56 = vadd.f32 %v458_v54, %v457_v52 }
 0x10e   : > { %v452_v57 = vadd.f32 %v451_v55, %v450_v53  ;;  %v460_v58 = vrot.slane %v459_v56, 4 }
 0x110   : > { %v453_v59 = vrot.slane %v452_v57, 2  ;;  %v461_v60 = vadd.f32 %v460_v58, %v459_v56 }
 0x112   : > { %v454_v61 = vadd.f32 %v453_v59, %v452_v57  ;;  %v462_v62 = vrot.slane %v461_v60, 2 }
 0x114   : > { %v455_v63 = vrot.slane %v454_v61, 1  ;;  %v463_v0 = vadd.f32 %v462_v62, %v461_v60  ;;  %471 = sbr.rel (%p548_p4) target bundleno = 283 (0x11b), region = 36 }
 0x116   : > { %v464_v1 = vrot.slane %v463_v0, 1  ;;  %v456_v2 = vadd.f32 %v455_v63, %v454_v61 }
 0x118   : > { %v465_v3 = vadd.f32 %v464_v1, %v463_v0 }
 0x11a   : > { %v467_v4 = vsel %vm466_vm5, %v456_v2, %v465_v3 }
 0x11b PF: > { %v473_v6 = vld [vmem:[%s777_s3] sm:$0x3] }
 0x11c   : > { %v474_v7 = vadd.f32 %v473_v6, %v467_v4 }
 0x11e   : > { %475 = vst [vmem:[%s777_s3] sm:$0x3] %v474_v7 }
 0x11f PF: > { %s13_s12 = sadd.s32 1, %s646_s12  }
 0x120   : > { %p10_p5 = scmp.ge.s32.totalorder %s13_s12, 4  }
 0x122   :  { %12 = sbr.rel (!%p10_p5) target bundleno = 1 (0x1), region = 64 }

// kernel: duck_block_forward.99
= control target key start
LH: loop header
LB: loop body
LE: loop exit
PB: predicated region body
PF: predicated region fallthrough
CT: control target
= control target key end

     0   :  { %s774_s18 = smov 0   ;;  %s876_s0 = inlined_call_operand.vmem [shape: bf16[2,18,72], index: 0, kind: input, shape index: {}]   ;;  %s877_s1 = inlined_call_operand.vmem [shape: bf16[3,72,128], index: 1, kind: input, shape index: {}]   ;;  %s878_s2 = inlined_call_operand.vmem [shape: f32[1,128], index: 2, kind: input, shape index: {}]   ;;  %s879_s3 = inlined_call_operand.vmem [shape: f32[1,128], index: 3, kind: input, shape index: {}]   ;;  %s880_s4 = inlined_call_operand.vmem [shape: f32[1,128], index: 4, kind: input, shape index: {}]   ;;  %s881_s5 = inlined_call_operand.vmem [shape: f32[2,16,128], index: 5, kind: output, shape index: {}]  }
   0x1 LB: > { %s594_s19 = sadd.s32 4294967295, %s740_s18   ;;  %p598_p0 = scmp.ge.s32.totalorder %s740_s18, 1  ;;  %s740_s18 = sphi %s774_s18, %s15_s18  }
   0x2   : > { %p187_p1 = scmp.lt.s32.totalorder %s740_s18, 3 }
   0x4   : > { %p188_p2 = pnand %p598_p0, %p187_p1 }
   0x5   : > { %v717_v0 = vld [vmem:[%s877_s1 + $0x24] sm:$0xff] (!%p188_p2)   ;;  %v742_v1 = vmov (!%p188_p2), 0.0   ;;  %v719_v3 = vld [vmem:[%s877_s1 + $0x2c] sm:$0xff] (!%p188_p2)   ;;  %p215_p3 = scmp.lt.s32.totalorder (!%p188_p2), %s594_s19, 1  ;;  %vm743_vm0 = vmmov (!%p188_p2), 0   ;;  %v721_v5 = vld [vmem:[%s877_s1 + $0x34] sm:$0xff] (!%p188_p2)  }
   0x6   : > { %191 = sbr.rel (%p188_p2) target bundleno = 271 (0x10f), region = 40  ;;  %664 = vmatprep.subr.bf16.mxu0 (!%p188_p2), %v742_v1  ;;  %678 = vmatprep.subr.bf16.mxu1 (!%p188_p2), %v742_v1  ;;  %v718_v2 = vld [vmem:[%s877_s1] sm:$0xff] (!%p188_p2)   ;;  %v720_v4 = vld [vmem:[%s877_s1 + $0x8] sm:$0xff] (!%p188_p2)   ;;  %v722_v6 = vld [vmem:[%s877_s1 + $0x10] sm:$0xff] (!%p188_p2)   ;;  %vm300_vm1 = vcmask (!%p188_p2), 1043456   ;;  %vm296_vm3 = vcmask (!%p188_p2), 588800  }
   0x7   : > { %665 = vmatpush3.bf16.msra.mxu0 (!%p188_p2), %v717_v0  ;;  %679 = vmatpush3.bf16.msra.mxu1 (!%p188_p2), %v718_v2  ;;  %v723_v7 = vld [vmem:[%s877_s1 + $0x3c] sm:$0xff] (!%p188_p2)   ;;  %v725_v8 = vld [vmem:[%s877_s1 + $0x44] ss:$0 sps:$4 sm:$0xff] (!%p188_p2)   ;;  %vm256_vm2 = vsmask.f32 (!%p188_p2), 7424  ;;  %v729_v22 = vld [vmem:[%s877_s1 + $0x48] sm:$0xff] (!%p188_p2)  }
   0x8   : > { %666 = vmatprep.subr.bf16.mxu0 (!%p188_p2), %v742_v1  ;;  %680 = vmatprep.subr.bf16.mxu1 (!%p188_p2), %v742_v1  ;;  %v726_v9 = vld [vmem:[%s877_s1 + $0x20] ss:$0 sps:$4 sm:$0xff] (!%p188_p2)   ;;  %v724_v11 = vld [vmem:[%s877_s1 + $0x18] sm:$0xff] (!%p188_p2)   ;;  %v302_v17 = vsel (!%p188_p2), %vm300_vm1, %v725_v8, 0  ;;  %v730_v23 = vld [vmem:[%s877_s1 + $0x50] sm:$0xff] (!%p188_p2)   ;;  %vm428_vm4 = vcmask (!%p188_p2), 1046528  }
   0x9   : > { %674 = vmatprep.mubr.msk.bf16.mxu0 (!%p188_p2), %vm743_vm0, %v742_v1  ;;  %688 = vmatprep.mubr.msk.bf16.mxu1 (!%p188_p2), %vm743_vm0, %v742_v1  ;;  %v375_v19 = vsel (!%p188_p2), %vm300_vm1, %v726_v9, 0  ;;  %v731_v24 = vld [vmem:[%s877_s1 + $0x58] sm:$0xff] (!%p188_p2)   ;;  %v732_v25 = vld [vmem:[%s877_s1 + $0x60] sm:$0xff] (!%p188_p2)   ;;  %v733_v26 = vld [vmem:[%s877_s1 + $0x68] ss:$0 sps:$4 sm:$0xff] (!%p188_p2)  }
   0xa   : > { %v463_v29 = vsel (!%p188_p2), %vm300_vm1, %v733_v26, 0  ;;  %v640_v42 = vld [vmem:[%s878_s2] ss:$0 sm:$0xff] (!%p188_p2) }
   0xb   : > { %667 = vmatpush3.bf16.msra.mxu0 (!%p188_p2), %v719_v3  ;;  %681 = vmatpush3.bf16.msra.mxu1 (!%p188_p2), %v720_v4  ;;  %v641_v49 = vld [vmem:[%s879_s3] ss:$0 sm:$0xff] (!%p188_p2) }
   0xc   : > { %668 = vmatprep.subr.bf16.mxu0 (!%p188_p2), %v742_v1  ;;  %682 = vmatprep.subr.bf16.mxu1 (!%p188_p2), %v742_v1  ;;  %v642_v52 = vld [vmem:[%s880_s4] ss:$0 sm:$0xff] (!%p188_p2) }
   0xd   : > { %s883_s19 = smov (!%p215_p3, %s594_s19), 1 }
   0xe   : > { %s706_s7 = smul.u32 12, %s883_s19  ;;  %s645_s10 = sshll.u32 %s883_s19, 4 }
   0xf   : > { %669 = vmatpush3.bf16.msra.mxu0 %v721_v5  ;;  %683 = vmatpush3.bf16.msra.mxu1 %v722_v6  ;;  %s224_s15 = scalar_lea.vmem %s881_s5, %s645_s10 }
  0x10   : > { %s219_s14 = scalar_lea.vmem %s876_s0, %s706_s7  ;;  %670 = vmatprep.subr.bf16.mxu0 %v742_v1  ;;  %684 = vmatprep.subr.bf16.mxu1 %v742_v1 }
  0x11   : > { %v727_v10 = vld [vmem:[%s219_s14] sm:$0xff]   ;;  %v728_v12 = vld [vmem:[%s219_s14 + $0x8] ss:$0 sps:$4 sm:$0x11]  }
  0x12   : > { %v258_v13 = vshrl.u32 %v727_v10, 16  ;;  %v260_v14 = vshll.u32 %v727_v10, 16  ;;  %v265_v15 = vshll.u32 %v728_v12, 16  ;;  %v429_v27 = vrot.slane %v727_v10, 1 }
  0x13   : > { %671 = vmatpush3.bf16.msra.mxu0 %v723_v7  ;;  %685 = vmatpush3.bf16.msra.mxu1 %v724_v11  ;;  %v430_v28 = vrot.slane %v728_v12, 1 }
  0x14   : > { %v262_v16 = vrot.slane %v260_v14, 1  ;;  %672 = vmatprep.subr.bf16.mxu0 %v742_v1  ;;  %v267_v18 = vrot.slane %v265_v15, 1  ;;  %686 = vmatprep.subr.bf16.mxu1 %v742_v1 }
  0x15   : > { %v431_v30 = vsel %vm428_vm4, %v429_v27, %v430_v28 }
  0x16   : > { %v263_v20 = vor.u32 %v262_v16, %v258_v13 }
  0x17   : > { %673 = vmatpush3.bf16.msra.mxu0 %v302_v17  ;;  %687 = vmatpush3.bf16.msra.mxu1 %v375_v19 }
  0x18   : > { %v268_v21 = vsel %vm256_vm2, %v263_v20, %v267_v18  ;;  %692 = vmatprep.subr.bf16.mxu0 %v742_v1 }
  0x1a   : > { %675 = vmatmul.mubr.msk.bf16.vlgmr.msra.gmra.mrb[0].mxu0 %vm296_vm3, %v268_v21  ;;  %689 = vmatmul.mubr.msk.bf16.vlgmr.msra.gmra.mrb[0].mxu1 %vm296_vm3, %v727_v10 }
  0x1b   : > { %693 = vmatpush3.bf16.msra.mxu0 %v729_v22  ;;  %702 = vmatprep.mubr.msk.bf16.mxu0 %vm743_vm0, %v742_v1 }
  0x1c   : > { %694 = vmatprep.subr.bf16.mxu0 %v742_v1 }
  0x1f   : > { %695 = vmatpush3.bf16.msra.mxu0 %v730_v23 }
  0x20   : > { %696 = vmatprep.subr.bf16.mxu0 %v742_v1 }
  0x23   : > { %697 = vmatpush3.bf16.msra.mxu0 %v731_v24 }
  0x24   : > { %698 = vmatprep.subr.bf16.mxu0 %v742_v1 }
  0x27   : > { %699 = vmatpush3.bf16.msra.mxu0 %v732_v25 }
  0x28   : > { %700 = vmatprep.subr.bf16.mxu0 %v742_v1 }
  0x2b   : > { %701 = vmatpush3.bf16.msra.mxu0 %v463_v29 }
  0x2e   : > { %703 = vmatmul.mubr.msk.bf16.vlgmr.msra.gmra.mrb[4].mxu0 %vm296_vm3, %v431_v30 }
  0xed   : > { %v338_v31 = vpop.f32.mrb[0].mxu0  ;;  %v411_v32 = vpop.f32.mrb[0].mxu1 }
  0xee   : > { %v676_v33 = vpop.f32.mrb[1].mxu0  ;;  %v412_v34 = vadd.f32 %v411_v32, %v338_v31  ;;  %v690_v35 = vpop.f32.mrb[1].mxu1 }
  0xef   : > { %v341_v36 = vpop.f32.mrb[2].mxu0  ;;  %v414_v37 = vpop.f32.mrb[2].mxu1 }
  0xf0   : > { %v677_v38 = vpop.f32.mrb[3].mxu0  ;;  %v415_v39 = vadd.f32 %v414_v37, %v341_v36  ;;  %v691_v40 = vpop.f32.mrb[3].mxu1 }
 0x101   : > { %v499_v41 = vpop.f32.mrb[4].mxu0 }
 0x102   : > { %v506_v43 = vadd.f32 %v499_v41, %v412_v34  ;;  %v704_v44 = vpop.f32.mrb[5].mxu0 }
 0x103   : > { %v502_v45 = vpop.f32.mrb[6].mxu0 }
 0x104   : > { %v515_v46 = vadd.f32 %v640_v42, %v506_v43  ;;  %v507_v47 = vadd.f32 %v502_v45, %v415_v39  ;;  %v705_v48 = vpop.f32.mrb[7].mxu0 }
 0x106   : > { %v517_v50 = vmax.f32 %v515_v46, 0.0  ;;  %v516_v51 = vadd.f32 %v640_v42, %v507_v47 }
 0x108   : > { %v526_v53 = vmul.f32 %v641_v49, %v517_v50  ;;  %v518_v54 = vmax.f32 %v516_v51, 0.0 }
 0x10a   : > { %v535_v55 = vadd.f32 %v642_v52, %v526_v53  ;;  %v527_v56 = vmul.f32 %v641_v49, %v518_v54 }
 0x10c   : > { %537 = vst [vmem:[%s224_s15] sm:$0xff] %v535_v55  ;;  %v536_v57 = vadd.f32 %v642_v52, %v527_v56 }
 0x10e   : > { %538 = vst [vmem:[%s224_s15 + $0x8] sm:$0xff] %v536_v57 }
 0x10f PF: > { %s15_s18 = sadd.s32 1, %s740_s18  }
 0x110   : > { %p12_p4 = scmp.ge.s32.totalorder %s15_s18, 4  }
 0x112   :  { %14 = sbr.rel (!%p12_p4) target bundleno = 1 (0x1), region = 72 }

// kernel: duck_block_forward.100
= control target key start
LH: loop header
LB: loop body
LE: loop exit
PB: predicated region body
PF: predicated region fallthrough
CT: control target
= control target key end

     0   :  { %s777_s12 = smov 0   ;;  %s933_s0 = inlined_call_operand.vmem [shape: bf16[2,18,144], index: 0, kind: input, shape index: {}]   ;;  %s934_s1 = inlined_call_operand.vmem [shape: bf16[3,144,128], index: 1, kind: input, shape index: {}]   ;;  %s935_s2 = inlined_call_operand.vmem [shape: f32[1,128], index: 2, kind: input, shape index: {}]   ;;  %s936_s3 = inlined_call_operand.vmem [shape: f32[2,128], index: 3, kind: output, shape index: {}]  }
   0x1 LB: > { %s783_s13 = sadd.s32 4294967295, %s753_s12   ;;  %p628_p0 = scmp.ge.s32.totalorder %s753_s12, 1  ;;  %s753_s12 = sphi %s777_s12, %s13_s12  }
   0x2   : > { %p132_p1 = scmp.lt.s32.totalorder %s753_s12, 3 }
   0x4   : > { %p133_p2 = pnand %p628_p0, %p132_p1 }
   0x5   : > { %v715_v0 = vld [vmem:[%s934_s1 + $0x48] sm:$0xff] (!%p133_p2)   ;;  %v755_v1 = vmov (!%p133_p2), 0   ;;  %v716_v2 = vld [vmem:[%s934_s1] sm:$0xff] (!%p133_p2)   ;;  %v717_v3 = vld [vmem:[%s934_s1 + $0x50] sm:$0xff] (!%p133_p2)   ;;  %p151_p3 = scmp.lt.s32.totalorder (!%p133_p2), %s783_s13, 1  ;;  %vm290_vm0 = vcmask (!%p133_p2), 130048  }
   0x6   : > { %136 = sbr.rel (%p133_p2) target bundleno = 319 (0x13f), region = 32  ;;  %294 = vmatprep.subr.bf16.mxu0 (!%p133_p2), %v755_v1  ;;  %392 = vmatprep.subr.bf16.mxu1 (!%p133_p2), %v755_v1  ;;  %v718_v4 = vld [vmem:[%s934_s1 + $0x8] sm:$0xff] (!%p133_p2)   ;;  %v719_v5 = vld [vmem:[%s934_s1 + $0x58] sm:$0xff] (!%p133_p2)   ;;  %v720_v6 = vld [vmem:[%s934_s1 + $0x10] sm:$0xff] (!%p133_p2)   ;;  %vm210_vm1 = vsmask.f32 (!%p133_p2), 7424 }
   0x7   : > { %295 = vmatpush1.bf16.msra.mxu0 (!%p133_p2), %v715_v0  ;;  %393 = vmatpush1.bf16.msra.mxu1 (!%p133_p2), %v716_v2  ;;  %v721_v7 = vld [vmem:[%s934_s1 + $0x60] sm:$0xff] (!%p133_p2)   ;;  %v722_v8 = vld [vmem:[%s934_s1 + $0x18] sm:$0xff] (!%p133_p2)   ;;  %v723_v9 = vld [vmem:[%s934_s1 + $0x68] sm:$0xff] (!%p133_p2)   ;;  %vm452_vm2 = vcmask (!%p133_p2), 1046528   ;;  %vm587_vm3 = vcmask (!%p133_p2), 1040384   ;;  %p701_p4 = scmp.ne.s32.totalorder (!%p133_p2), %s783_s13, 0 }
   0x8   : > { %296 = vmatprep.subr.bf16.mxu0 (!%p133_p2), %v755_v1  ;;  %394 = vmatprep.subr.bf16.mxu1 (!%p133_p2), %v755_v1  ;;  %v724_v10 = vld [vmem:[%s934_s1 + $0x20] sm:$0xff] (!%p133_p2)   ;;  %v725_v11 = vld [vmem:[%s934_s1 + $0x70] sm:$0xff] (!%p133_p2)   ;;  %v726_v12 = vld [vmem:[%s934_s1 + $0x28] sm:$0xff] (!%p133_p2)  }
   0x9   : > { %v727_v20 = vld [vmem:[%s934_s1 + $0x78] sm:$0xff] (!%p133_p2)   ;;  %v728_v21 = vld [vmem:[%s934_s1 + $0x30] sm:$0xff] (!%p133_p2)   ;;  %v729_v26 = vld [vmem:[%s934_s1 + $0x80] sm:$0xff] (!%p133_p2)  }
   0xa   : > { %v730_v31 = vld [vmem:[%s934_s1 + $0x38] sm:$0xff] (!%p133_p2)   ;;  %v731_v33 = vld [vmem:[%s934_s1 + $0x88] sm:$0xff] (!%p133_p2)   ;;  %v732_v36 = vld [vmem:[%s934_s1 + $0x40] sm:$0xff] (!%p133_p2)  }
   0xb   : > { %297 = vmatpush1.bf16.msra.mxu0 (!%p133_p2), %v717_v3  ;;  %395 = vmatpush1.bf16.msra.mxu1 (!%p133_p2), %v718_v4  ;;  %v738_v40 = vld [vmem:[%s934_s1 + $0x90] sm:$0xff] (!%p133_p2)   ;;  %v739_v42 = vld [vmem:[%s934_s1 + $0x98] sm:$0xff] (!%p133_p2)   ;;  %v740_v43 = vld [vmem:[%s934_s1 + $0xa0] sm:$0xff] (!%p133_p2)  }
   0xc   : > { %298 = vmatprep.subr.bf16.mxu0 (!%p133_p2), %v755_v1  ;;  %396 = vmatprep.subr.bf16.mxu1 (!%p133_p2), %v755_v1  ;;  %v741_v44 = vld [vmem:[%s934_s1 + $0xa8] sm:$0xff] (!%p133_p2)   ;;  %v742_v45 = vld [vmem:[%s934_s1 + $0xb0] sm:$0xff] (!%p133_p2)   ;;  %v743_v46 = vld [vmem:[%s934_s1 + $0xb8] sm:$0xff] (!%p133_p2)  }
   0xd   : > { %s152_s26 = scalar_select %p151_p3, %s783_s13, 1  ;;  %v744_v47 = vld [vmem:[%s934_s1 + $0xc0] sm:$0xff]   ;;  %v745_v48 = vld [vmem:[%s934_s1 + $0xc8] sm:$0xff]   ;;  %v746_v49 = vld [vmem:[%s934_s1 + $0xd0] sm:$0xff]  }
   0xe   : > { %v700_v0 = vld [vmem:[%s935_s2] ss:$0 sm:$0xff] }
   0xf   : > { %299 = vmatpush1.bf16.msra.mxu0 %v719_v5  ;;  %397 = vmatpush1.bf16.msra.mxu1 %v720_v6  ;;  %s704_s4 = smul.u32 24, %s152_s26 }
  0x10   : > { %300 = vmatprep.subr.bf16.mxu0 %v755_v1  ;;  %398 = vmatprep.subr.bf16.mxu1 %v755_v1 }
  0x11   : > { %s155_s11 = scalar_lea.vmem %s933_s0, %s704_s4 }
  0x12   : > { %v159_v13 = vld [vmem:[%s155_s11 + $0x10] sm:$0x11]  ;;  %v839_v14 = vld [vmem:[%s155_s11] ss:$8 sps:$4 sm:$0xff]   ;;  %v735_v15 = vld [vmem:[%s155_s11 + $0x4] ss:$8 sps:$4 sm:$0xff]  }
  0x13   : > { %301 = vmatpush1.bf16.msra.mxu0 %v721_v7  ;;  %399 = vmatpush1.bf16.msra.mxu1 %v722_v8  ;;  %v651_v16 = vcombine.high %v159_v13, %v159_v13  ;;  %v224_v17 = vshrl.u32 %v735_v15, 16  ;;  %v226_v18 = vshll.u32 %v735_v15, 16  ;;  %v849_v22 = vcombine.low %v159_v13, %v159_v13 }
  0x14   : > { %302 = vmatprep.subr.bf16.mxu0 %v755_v1  ;;  %400 = vmatprep.subr.bf16.mxu1 %v755_v1  ;;  %v214_v23 = vshll.u32 %v839_v14, 16  ;;  %v212_v27 = vshrl.u32 %v839_v14, 16  ;;  %v456_v37 = vrot.slane %v735_v15, 1  ;;  %v453_v50 = vrot.slane %v839_v14, 1 }
  0x15   : > { %v231_v19 = vshll.u32 %v651_v16, 16  ;;  %671 = vmatprep.mubr.msk.bf16.mxu1 %vm290_vm0, %v735_v15  ;;  %v228_v24 = vrot.slane %v226_v18, 1  ;;  %v219_v30 = vshll.u32 %v849_v22, 16  ;;  %v457_v38 = vrot.slane %v651_v16, 1 }
  0x16   : > { %v216_v29 = vrot.slane %v214_v23, 1  ;;  %v454_v51 = vrot.slane %v849_v22, 1 }
  0x17   : > { %303 = vmatpush1.bf16.msra.mxu0 %v723_v9  ;;  %401 = vmatpush1.bf16.msra.mxu1 %v724_v10  ;;  %v233_v25 = vrot.slane %v231_v19, 1  ;;  %v229_v28 = vor.u32 %v228_v24, %v224_v17  ;;  %v221_v35 = vrot.slane %v219_v30, 1  ;;  %v458_v41 = vsel %vm452_vm2, %v456_v37, %v457_v38 }
  0x18   : > { %304 = vmatprep.subr.bf16.mxu0 %v755_v1  ;;  %402 = vmatprep.subr.bf16.mxu1 %v755_v1  ;;  %v217_v34 = vor.u32 %v216_v29, %v212_v27  ;;  %v455_v52 = vsel %vm452_vm2, %v453_v50, %v454_v51  ;;  %v756_v27 = vmov (!%p701_p4), 0.0  }
  0x19   : > { %v234_v32 = vsel %vm210_vm1, %v229_v28, %v233_v25  ;;  %593 = vst [vmem:[%s936_s3] sm:$0x3] (!%p701_p4), %v756_v27 }
  0x1a   : > { %661 = vmatprep.mubr.msk.bf16.mxu0 %vm290_vm0, %v234_v32  ;;  %v222_v39 = vsel %vm210_vm1, %v217_v34, %v221_v35 }
  0x1b   : > { %305 = vmatpush1.bf16.msra.mxu0 %v725_v11  ;;  %403 = vmatpush1.bf16.msra.mxu1 %v726_v12 }
  0x1c   : > { %306 = vmatprep.subr.bf16.mxu0 %v755_v1  ;;  %404 = vmatprep.subr.bf16.mxu1 %v755_v1 }
  0x1f   : > { %307 = vmatpush1.bf16.msra.mxu0 %v727_v20  ;;  %405 = vmatpush1.bf16.msra.mxu1 %v728_v21 }
  0x20   : > { %308 = vmatprep.subr.bf16.mxu0 %v755_v1  ;;  %406 = vmatprep.subr.bf16.mxu1 %v755_v1 }
  0x23   : > { %309 = vmatpush1.bf16.msra.mxu0 %v729_v26  ;;  %407 = vmatpush1.bf16.msra.mxu1 %v730_v31 }
  0x24   : > { %310 = vmatprep.subr.bf16.mxu0 %v755_v1  ;;  %408 = vmatprep.subr.bf16.mxu1 %v755_v1 }
  0x27   : > { %311 = vmatpush1.bf16.msra.mxu0 %v731_v33  ;;  %409 = vmatpush1.bf16.msra.mxu1 %v732_v36 }
  0x28   : > { %517 = vmatprep.subr.bf16.mxu0 %v755_v1 }
  0x2a   : > { %327 = vmatmul.mubr.bf16.vlgmr.msra.gmra.mrb[0].mxu0 %v222_v39  ;;  %425 = vmatmul.mubr.bf16.vlgmr.msra.gmra.mrb[0].mxu1 %v839_v14 }
  0x2b   : > { %518 = vmatpush1.bf16.msra.mxu0 %v738_v40  ;;  %699 = vmatprep.mubr.msk.bf16.mxu0 %vm290_vm0, %v458_v41 }
  0x2c   : > { %519 = vmatprep.subr.bf16.mxu0 %v755_v1 }
  0x2f   : > { %520 = vmatpush1.bf16.msra.mxu0 %v739_v42 }
  0x30   : > { %521 = vmatprep.subr.bf16.mxu0 %v755_v1 }
  0x33   : > { %522 = vmatpush1.bf16.msra.mxu0 %v740_v43 }
  0x34   : > { %523 = vmatprep.subr.bf16.mxu0 %v755_v1 }
  0x37   : > { %524 = vmatpush1.bf16.msra.mxu0 %v741_v44 }
  0x38   : > { %525 = vmatprep.subr.bf16.mxu0 %v755_v1 }
  0x3b   : > { %526 = vmatpush1.bf16.msra.mxu0 %v742_v45 }
  0x3c   : > { %527 = vmatprep.subr.bf16.mxu0 %v755_v1 }
  0x3f   : > { %528 = vmatpush1.bf16.msra.mxu0 %v743_v46 }
  0x40   : > { %529 = vmatprep.subr.bf16.mxu0 %v755_v1 }
  0x43   : > { %530 = vmatpush1.bf16.msra.mxu0 %v744_v47 }
  0x44   : > { %531 = vmatprep.subr.bf16.mxu0 %v755_v1 }
  0x47   : > { %532 = vmatpush1.bf16.msra.mxu0 %v745_v48 }
  0x48   : > { %533 = vmatprep.subr.bf16.mxu0 %v755_v1 }
  0x4b   : > { %534 = vmatpush1.bf16.msra.mxu0 %v746_v49 }
  0x4e   : > { %550 = vmatmul.mubr.bf16.vlgmr.msra.gmra.mrb[4].mxu0 %v455_v52 }
  0xfd   : > { %v328_v53 = vpop.f32.mrb[0].mxu0  ;;  %v426_v54 = vpop.f32.mrb[0].mxu1 }
  0xfe   : > { %v330_v55 = vpop.f32.mrb[1].mxu0  ;;  %v427_v56 = vadd.f32 %v426_v54, %v328_v53  ;;  %v428_v57 = vpop.f32.mrb[1].mxu1 }
  0xff   : > { %v331_v58 = vpop.f32.mrb[2].mxu0  ;;  %v429_v59 = vpop.f32.mrb[2].mxu1 }
 0x100   : > { %v333_v60 = vpop.f32.mrb[3].mxu0  ;;  %v430_v61 = vadd.f32 %v429_v59, %v331_v58  ;;  %v431_v62 = vpop.f32.mrb[3].mxu1 }
 0x121   : > { %v551_v63 = vpop.f32.mrb[4].mxu0 }
 0x122   : > { %v558_v1 = vadd.f32 %v551_v63, %v427_v56  ;;  %v553_v2 = vpop.f32.mrb[5].mxu0 }
 0x123   : > { %v554_v3 = vpop.f32.mrb[6].mxu0 }
 0x124   : > { %v567_v4 = vadd.f32 %v700_v0, %v558_v1  ;;  %v559_v5 = vadd.f32 %v554_v3, %v430_v61  ;;  %v556_v6 = vpop.f32.mrb[7].mxu0 }
 0x126   : > { %v569_v7 = vmax.f32 %v567_v4, 0.0  ;;  %v568_v8 = vadd.f32 %v700_v0, %v559_v5 }
 0x128   : > { %v570_v9 = vmax.f32 %v568_v8, 0.0  ;;  %v578_v10 = vmul.f32 %v569_v7, %v569_v7 }
 0x12a   : > { %v571_v11 = vadd.f32 %v570_v9, %v569_v7  ;;  %v579_v12 = vmul.f32 %v570_v9, %v570_v9 }
 0x12c   : > { %v572_v13 = vrot.slane %v571_v11, 4  ;;  %v580_v14 = vadd.f32 %v579_v12, %v578_v10 }
 0x12e   : > { %v573_v15 = vadd.f32 %v572_v13, %v571_v11  ;;  %v581_v16 = vrot.slane %v580_v14, 4 }
 0x130   : > { %v574_v17 = vrot.slane %v573_v15, 2  ;;  %v582_v18 = vadd.f32 %v581_v16, %v580_v14 }
 0x132   : > { %v575_v19 = vadd.f32 %v574_v17, %v573_v15  ;;  %v583_v20 = vrot.slane %v582_v18, 2 }
 0x134   : > { %v576_v21 = vrot.slane %v575_v19, 1  ;;  %v584_v22 = vadd.f32 %v583_v20, %v582_v18  ;;  %592 = sbr.rel (%p701_p4) target bundleno = 315 (0x13b), region = 36 }
 0x136   : > { %v585_v23 = vrot.slane %v584_v22, 1  ;;  %v577_v24 = vadd.f32 %v576_v21, %v575_v19 }
 0x138   : > { %v586_v25 = vadd.f32 %v585_v23, %v584_v22 }
 0x13a   : > { %v588_v26 = vsel %vm587_vm3, %v577_v24, %v586_v25 }
 0x13b PF: > { %v594_v28 = vld [vmem:[%s936_s3] sm:$0x3] }
 0x13c   : > { %v595_v29 = vadd.f32 %v594_v28, %v588_v26 }
 0x13e   : > { %596 = vst [vmem:[%s936_s3] sm:$0x3] %v595_v29 }
 0x13f PF: > { %s13_s12 = sadd.s32 1, %s753_s12  }
 0x140   : > { %p10_p5 = scmp.ge.s32.totalorder %s13_s12, 4  }
 0x142   :  { %12 = sbr.rel (!%p10_p5) target bundleno = 1 (0x1), region = 64 }

// kernel: duck_block_forward.101
= control target key start
LH: loop header
LB: loop body
LE: loop exit
PB: predicated region body
PF: predicated region fallthrough
CT: control target
= control target key end

     0   :  { %s880_s18 = smov 0   ;;  %s1035_s0 = inlined_call_operand.vmem [shape: bf16[2,18,144], index: 0, kind: input, shape index: {}]   ;;  %s1036_s1 = inlined_call_operand.vmem [shape: bf16[3,144,128], index: 1, kind: input, shape index: {}]   ;;  %s1037_s2 = inlined_call_operand.vmem [shape: f32[1,128], index: 2, kind: input, shape index: {}]   ;;  %s1038_s3 = inlined_call_operand.vmem [shape: f32[1,128], index: 3, kind: input, shape index: {}]   ;;  %s1039_s4 = inlined_call_operand.vmem [shape: f32[1,128], index: 4, kind: input, shape index: {}]   ;;  %s1040_s5 = inlined_call_operand.vmem [shape: f32[2,16,128], index: 5, kind: output, shape index: {}]  }
   0x1 LB: > { %s715_s19 = sadd.s32 4294967295, %s847_s18   ;;  %p719_p0 = scmp.ge.s32.totalorder %s847_s18, 1  ;;  %s847_s18 = sphi %s880_s18, %s15_s18  }
   0x2   : > { %p187_p1 = scmp.lt.s32.totalorder %s847_s18, 3 }
   0x4   : > { %p188_p2 = pnand %p719_p0, %p187_p1 }
   0x5   : > { %v809_v0 = vld [vmem:[%s1036_s1 + $0x48] sm:$0xff] (!%p188_p2)   ;;  %v849_v1 = vmov (!%p188_p2), 0   ;;  %v810_v2 = vld [vmem:[%s1036_s1] sm:$0xff] (!%p188_p2)   ;;  %v811_v3 = vld [vmem:[%s1036_s1 + $0x50] sm:$0xff] (!%p188_p2)   ;;  %p215_p3 = scmp.lt.s32.totalorder (!%p188_p2), %s715_s19, 1  ;;  %vm359_vm0 = vcmask (!%p188_p2), 130048  }
   0x6   : > { %191 = sbr.rel (%p188_p2) target bundleno = 303 (0x12f), region = 40  ;;  %363 = vmatprep.subr.bf16.mxu0 (!%p188_p2), %v849_v1  ;;  %461 = vmatprep.subr.bf16.mxu1 (!%p188_p2), %v849_v1  ;;  %v812_v4 = vld [vmem:[%s1036_s1 + $0x8] sm:$0xff] (!%p188_p2)   ;;  %v813_v5 = vld [vmem:[%s1036_s1 + $0x58] sm:$0xff] (!%p188_p2)   ;;  %v814_v6 = vld [vmem:[%s1036_s1 + $0x10] sm:$0xff] (!%p188_p2)   ;;  %vm279_vm1 = vsmask.f32 (!%p188_p2), 7424 }
   0x7   : > { %364 = vmatpush1.bf16.msra.mxu0 (!%p188_p2), %v809_v0  ;;  %462 = vmatpush1.bf16.msra.mxu1 (!%p188_p2), %v810_v2  ;;  %v815_v7 = vld [vmem:[%s1036_s1 + $0x60] sm:$0xff] (!%p188_p2)   ;;  %v816_v8 = vld [vmem:[%s1036_s1 + $0x18] sm:$0xff] (!%p188_p2)   ;;  %v817_v9 = vld [vmem:[%s1036_s1 + $0x68] sm:$0xff] (!%p188_p2)   ;;  %vm521_vm2 = vcmask (!%p188_p2), 1046528  }
   0x8   : > { %365 = vmatprep.subr.bf16.mxu0 (!%p188_p2), %v849_v1  ;;  %463 = vmatprep.subr.bf16.mxu1 (!%p188_p2), %v849_v1  ;;  %v818_v10 = vld [vmem:[%s1036_s1 + $0x20] sm:$0xff] (!%p188_p2)   ;;  %v819_v11 = vld [vmem:[%s1036_s1 + $0x70] sm:$0xff] (!%p188_p2)   ;;  %v820_v12 = vld [vmem:[%s1036_s1 + $0x28] sm:$0xff] (!%p188_p2)  }
   0x9   : > { %v821_v20 = vld [vmem:[%s1036_s1 + $0x78] sm:$0xff] (!%p188_p2)   ;;  %v822_v21 = vld [vmem:[%s1036_s1 + $0x30] sm:$0xff] (!%p188_p2)   ;;  %v823_v26 = vld [vmem:[%s1036_s1 + $0x80] sm:$0xff] (!%p188_p2)  }
   0xa   : > { %v824_v31 = vld [vmem:[%s1036_s1 + $0x38] sm:$0xff] (!%p188_p2)   ;;  %v825_v33 = vld [vmem:[%s1036_s1 + $0x88] sm:$0xff] (!%p188_p2)   ;;  %v826_v36 = vld [vmem:[%s1036_s1 + $0x40] sm:$0xff] (!%p188_p2)  }
   0xb   : > { %366 = vmatpush1.bf16.msra.mxu0 (!%p188_p2), %v811_v3  ;;  %464 = vmatpush1.bf16.msra.mxu1 (!%p188_p2), %v812_v4  ;;  %v832_v40 = vld [vmem:[%s1036_s1 + $0x90] sm:$0xff] (!%p188_p2)   ;;  %v833_v42 = vld [vmem:[%s1036_s1 + $0x98] sm:$0xff] (!%p188_p2)   ;;  %v834_v43 = vld [vmem:[%s1036_s1 + $0xa0] sm:$0xff] (!%p188_p2)  }
   0xc   : > { %367 = vmatprep.subr.bf16.mxu0 (!%p188_p2), %v849_v1  ;;  %465 = vmatprep.subr.bf16.mxu1 (!%p188_p2), %v849_v1  ;;  %v835_v44 = vld [vmem:[%s1036_s1 + $0xa8] sm:$0xff] (!%p188_p2)   ;;  %v836_v45 = vld [vmem:[%s1036_s1 + $0xb0] sm:$0xff] (!%p188_p2)   ;;  %v837_v46 = vld [vmem:[%s1036_s1 + $0xb8] sm:$0xff] (!%p188_p2)  }
   0xd   : > { %s1042_s19 = smov (!%p215_p3, %s715_s19), 1  ;;  %v838_v47 = vld [vmem:[%s1036_s1 + $0xc0] sm:$0xff]   ;;  %v839_v48 = vld [vmem:[%s1036_s1 + $0xc8] sm:$0xff]   ;;  %v840_v49 = vld [vmem:[%s1036_s1 + $0xd0] sm:$0xff]  }
   0xe   : > { %s799_s11 = smul.u32 24, %s1042_s19  ;;  %v793_v0 = vld [vmem:[%s1037_s2] ss:$0 sm:$0xff] }
   0xf   : > { %368 = vmatpush1.bf16.msra.mxu0 %v813_v5  ;;  %466 = vmatpush1.bf16.msra.mxu1 %v814_v6 }
  0x10   : > { %369 = vmatprep.subr.bf16.mxu0 %v849_v1  ;;  %467 = vmatprep.subr.bf16.mxu1 %v849_v1  ;;  %s219_s20 = scalar_lea.vmem %s1035_s0, %s799_s11  ;;  %s798_s11 = sshll.u32 %s1042_s19, 4 }
  0x11   : > { %v228_v13 = vld [vmem:[%s219_s20 + $0x10] sm:$0x11]  ;;  %v941_v14 = vld [vmem:[%s219_s20] ss:$8 sps:$4 sm:$0xff]   ;;  %v829_v15 = vld [vmem:[%s219_s20 + $0x4] ss:$8 sps:$4 sm:$0xff]   ;;  %s224_s16 = scalar_lea.vmem %s1040_s5, %s798_s11 }
  0x12   : > { %v744_v16 = vcombine.high %v228_v13, %v228_v13  ;;  %v293_v17 = vshrl.u32 %v829_v15, 16  ;;  %v295_v18 = vshll.u32 %v829_v15, 16  ;;  %764 = vmatprep.mubr.msk.bf16.mxu1 %vm359_vm0, %v829_v15  ;;  %v951_v22 = vcombine.low %v228_v13, %v228_v13 }
  0x13   : > { %370 = vmatpush1.bf16.msra.mxu0 %v815_v7  ;;  %468 = vmatpush1.bf16.msra.mxu1 %v816_v8  ;;  %v283_v23 = vshll.u32 %v941_v14, 16  ;;  %v281_v27 = vshrl.u32 %v941_v14, 16  ;;  %v525_v37 = vrot.slane %v829_v15, 1  ;;  %v522_v50 = vrot.slane %v941_v14, 1  ;;  %v794_v7 = vld [vmem:[%s1038_s3] ss:$0 sm:$0xff] }
  0x14   : > { %371 = vmatprep.subr.bf16.mxu0 %v849_v1  ;;  %469 = vmatprep.subr.bf16.mxu1 %v849_v1  ;;  %v300_v19 = vshll.u32 %v744_v16, 16  ;;  %v297_v24 = vrot.slane %v295_v18, 1  ;;  %v288_v30 = vshll.u32 %v951_v22, 16  ;;  %v526_v38 = vrot.slane %v744_v16, 1 }
  0x15   : > { %v285_v29 = vrot.slane %v283_v23, 1  ;;  %v523_v51 = vrot.slane %v951_v22, 1 }
  0x16   : > { %v302_v25 = vrot.slane %v300_v19, 1  ;;  %v298_v28 = vor.u32 %v297_v24, %v293_v17  ;;  %v290_v35 = vrot.slane %v288_v30, 1  ;;  %v527_v41 = vsel %vm521_vm2, %v525_v37, %v526_v38 }
  0x17   : > { %372 = vmatpush1.bf16.msra.mxu0 %v817_v9  ;;  %470 = vmatpush1.bf16.msra.mxu1 %v818_v10  ;;  %v286_v34 = vor.u32 %v285_v29, %v281_v27  ;;  %v524_v52 = vsel %vm521_vm2, %v522_v50, %v523_v51  ;;  %v795_v10 = vld [vmem:[%s1039_s4] ss:$0 sm:$0xff] }
  0x18   : > { %373 = vmatprep.subr.bf16.mxu0 %v849_v1  ;;  %471 = vmatprep.subr.bf16.mxu1 %v849_v1  ;;  %v303_v32 = vsel %vm279_vm1, %v298_v28, %v302_v25 }
  0x19   : > { %754 = vmatprep.mubr.msk.bf16.mxu0 %vm359_vm0, %v303_v32  ;;  %v291_v39 = vsel %vm279_vm1, %v286_v34, %v290_v35 }
  0x1b   : > { %374 = vmatpush1.bf16.msra.mxu0 %v819_v11  ;;  %472 = vmatpush1.bf16.msra.mxu1 %v820_v12 }
  0x1c   : > { %375 = vmatprep.subr.bf16.mxu0 %v849_v1  ;;  %473 = vmatprep.subr.bf16.mxu1 %v849_v1 }
  0x1f   : > { %376 = vmatpush1.bf16.msra.mxu0 %v821_v20  ;;  %474 = vmatpush1.bf16.msra.mxu1 %v822_v21 }
  0x20   : > { %377 = vmatprep.subr.bf16.mxu0 %v849_v1  ;;  %475 = vmatprep.subr.bf16.mxu1 %v849_v1 }
  0x23   : > { %378 = vmatpush1.bf16.msra.mxu0 %v823_v26  ;;  %476 = vmatpush1.bf16.msra.mxu1 %v824_v31 }
  0x24   : > { %379 = vmatprep.subr.bf16.mxu0 %v849_v1  ;;  %477 = vmatprep.subr.bf16.mxu1 %v849_v1 }
  0x27   : > { %380 = vmatpush1.bf16.msra.mxu0 %v825_v33  ;;  %478 = vmatpush1.bf16.msra.mxu1 %v826_v36 }
  0x28   : > { %586 = vmatprep.subr.bf16.mxu0 %v849_v1 }
  0x2a   : > { %396 = vmatmul.mubr.bf16.vlgmr.msra.gmra.mrb[0].mxu0 %v291_v39  ;;  %494 = vmatmul.mubr.bf16.vlgmr.msra.gmra.mrb[0].mxu1 %v941_v14 }
  0x2b   : > { %587 = vmatpush1.bf16.msra.mxu0 %v832_v40  ;;  %792 = vmatprep.mubr.msk.bf16.mxu0 %vm359_vm0, %v527_v41 }
  0x2c   : > { %588 = vmatprep.subr.bf16.mxu0 %v849_v1 }
  0x2f   : > { %589 = vmatpush1.bf16.msra.mxu0 %v833_v42 }
  0x30   : > { %590 = vmatprep.subr.bf16.mxu0 %v849_v1 }
  0x33   : > { %591 = vmatpush1.bf16.msra.mxu0 %v834_v43 }
  0x34   : > { %592 = vmatprep.subr.bf16.mxu0 %v849_v1 }
  0x37   : > { %593 = vmatpush1.bf16.msra.mxu0 %v835_v44 }
  0x38   : > { %594 = vmatprep.subr.bf16.mxu0 %v849_v1 }
  0x3b   : > { %595 = vmatpush1.bf16.msra.mxu0 %v836_v45 }
  0x3c   : > { %596 = vmatprep.subr.bf16.mxu0 %v849_v1 }
  0x3f   : > { %597 = vmatpush1.bf16.msra.mxu0 %v837_v46 }
  0x40   : > { %598 = vmatprep.subr.bf16.mxu0 %v849_v1 }
  0x43   : > { %599 = vmatpush1.bf16.msra.mxu0 %v838_v47 }
  0x44   : > { %600 = vmatprep.subr.bf16.mxu0 %v849_v1 }
  0x47   : > { %601 = vmatpush1.bf16.msra.mxu0 %v839_v48 }
  0x48   : > { %602 = vmatprep.subr.bf16.mxu0 %v849_v1 }
  0x4b   : > { %603 = vmatpush1.bf16.msra.mxu0 %v840_v49 }
  0x4e   : > { %619 = vmatmul.mubr.bf16.vlgmr.msra.gmra.mrb[4].mxu0 %v524_v52 }
  0xfd   : > { %v397_v53 = vpop.f32.mrb[0].mxu0  ;;  %v495_v54 = vpop.f32.mrb[0].mxu1 }
  0xfe   : > { %v399_v55 = vpop.f32.mrb[1].mxu0  ;;  %v496_v56 = vadd.f32 %v495_v54, %v397_v53  ;;  %v497_v57 = vpop.f32.mrb[1].mxu1 }
  0xff   : > { %v400_v58 = vpop.f32.mrb[2].mxu0  ;;  %v498_v59 = vpop.f32.mrb[2].mxu1 }
 0x100   : > { %v402_v60 = vpop.f32.mrb[3].mxu0  ;;  %v499_v61 = vadd.f32 %v498_v59, %v400_v58  ;;  %v500_v62 = vpop.f32.mrb[3].mxu1 }
 0x121   : > { %v620_v63 = vpop.f32.mrb[4].mxu0 }
 0x122   : > { %v627_v1 = vadd.f32 %v620_v63, %v496_v56  ;;  %v622_v2 = vpop.f32.mrb[5].mxu0 }
 0x123   : > { %v623_v3 = vpop.f32.mrb[6].mxu0 }
 0x124   : > { %v636_v4 = vadd.f32 %v793_v0, %v627_v1  ;;  %v628_v5 = vadd.f32 %v623_v3, %v499_v61  ;;  %v625_v6 = vpop.f32.mrb[7].mxu0 }
 0x126   : > { %v638_v8 = vmax.f32 %v636_v4, 0.0  ;;  %v637_v9 = vadd.f32 %v793_v0, %v628_v5 }
 0x128   : > { %v647_v11 = vmul.f32 %v794_v7, %v638_v8  ;;  %v639_v12 = vmax.f32 %v637_v9, 0.0 }
 0x12a   : > { %v656_v13 = vadd.f32 %v795_v10, %v647_v11  ;;  %v648_v14 = vmul.f32 %v794_v7, %v639_v12 }
 0x12c   : > { %658 = vst [vmem:[%s224_s16] sm:$0xff] %v656_v13  ;;  %v657_v15 = vadd.f32 %v795_v10, %v648_v14 }
 0x12e   : > { %659 = vst [vmem:[%s224_s16 + $0x8] sm:$0xff] %v657_v15 }
 0x12f PF: > { %s15_s18 = sadd.s32 1, %s847_s18  }
 0x130   : > { %p12_p4 = scmp.ge.s32.totalorder %s15_s18, 4  }
 0x132   :  { %14 = sbr.rel (!%p12_p4) target bundleno = 1 (0x1), region = 72 }

// kernel: duck_block_forward.97
= control target key start
LH: loop header
LB: loop body
LE: loop exit
PB: predicated region body
PF: predicated region fallthrough
CT: control target
= control target key end

     0   :  { %s488_s18 = smov 0   ;;  %s526_s0 = inlined_call_operand.vmem [shape: bf16[2,16,64], index: 0, kind: input, shape index: {}]   ;;  %s527_s1 = inlined_call_operand.vmem [shape: bf16[1,64,128], index: 1, kind: input, shape index: {}]   ;;  %s528_s2 = inlined_call_operand.vmem [shape: f32[1,128], index: 2, kind: input, shape index: {}]   ;;  %s529_s3 = inlined_call_operand.vmem [shape: f32[1,128], index: 3, kind: input, shape index: {}]   ;;  %s530_s4 = inlined_call_operand.vmem [shape: f32[1,128], index: 4, kind: input, shape index: {}]   ;;  %s531_s5 = inlined_call_operand.vmem [shape: f32[2,16,128], index: 5, kind: output, shape index: {}]  }
   0x1 LB: > { %s394_s19 = sadd.s32 4294967295, %s454_s18   ;;  %p398_p0 = scmp.ge.s32.totalorder %s454_s18, 1  ;;  %s454_s18 = sphi %s488_s18, %s15_s18  }
   0x2   : > { %p187_p1 = scmp.lt.s32.totalorder %s454_s18, 3 }
   0x4   : > { %p188_p2 = pnand %p398_p0, %p187_p1 }
   0x5   : > { %v443_v0 = vld [vmem:[%s527_s1] sm:$0xff] (!%p188_p2)   ;;  %v456_v1 = vmov (!%p188_p2), 0.0   ;;  %v444_v2 = vld [vmem:[%s527_s1 + $0x8] sm:$0xff] (!%p188_p2)   ;;  %vm457_vm0 = vmmov (!%p188_p2), 0   ;;  %p215_p3 = scmp.lt.s32.totalorder (!%p188_p2), %s394_s19, 1  ;;  %v445_v3 = vld [vmem:[%s527_s1 + $0x10] sm:$0xff] (!%p188_p2)  }
   0x6   : > { %191 = sbr.rel (%p188_p2) target bundleno = 245 (0xf5), region = 40  ;;  %421 = vmatprep.subr.bf16.mxu0 (!%p188_p2), %v456_v1  ;;  %429 = vmatprep.mubr.msk.bf16.mxu0 (!%p188_p2), %vm457_vm0, %v456_v1  ;;  %v446_v4 = vld [vmem:[%s527_s1 + $0x18] sm:$0xff] (!%p188_p2)   ;;  %vm272_vm1 = vcmask (!%p188_p2), 523264   ;;  %v403_v6 = vld [vmem:[%s528_s2] ss:$0 sm:$0xff] (!%p188_p2) }
   0x7   : > { %422 = vmatpush3.bf16.msra.mxu0 (!%p188_p2), %v443_v0  ;;  %v410_v10 = vld [vmem:[%s529_s3] ss:$0 sm:$0xff] (!%p188_p2) }
   0x8   : > { %423 = vmatprep.subr.bf16.mxu0 (!%p188_p2), %v456_v1  ;;  %v411_v15 = vld [vmem:[%s530_s4] ss:$0 sm:$0xff] (!%p188_p2) }
   0xb   : > { %424 = vmatpush3.bf16.msra.mxu0 (!%p188_p2), %v444_v2 }
   0xc   : > { %425 = vmatprep.subr.bf16.mxu0 (!%p188_p2), %v456_v1 }
   0xd   : > { %s533_s19 = smov (!%p215_p3, %s394_s19), 1 }
   0xe   : > { %s414_s26 = sshll.u32 %s533_s19, 3  ;;  %s415_s11 = sshll.u32 %s533_s19, 4 }
   0xf   : > { %s219_s29 = scalar_lea.vmem %s526_s0, %s414_s26  ;;  %426 = vmatpush3.bf16.msra.mxu0 %v445_v3  ;;  %s224_s16 = scalar_lea.vmem %s531_s5, %s415_s11 }
  0x10   : > { %427 = vmatprep.subr.bf16.mxu0 %v456_v1  ;;  %v447_v5 = vld [vmem:[%s219_s29] sm:$0xff]  }
  0x13   : > { %428 = vmatpush3.bf16.msra.mxu0 %v446_v4 }
  0x16   : > { %430 = vmatmul.mubr.msk.bf16.vlgmr.msra.gmra.mrb[0].mxu0 %vm272_vm1, %v447_v5 }
  0xe9   : > { %v310_v7 = vpop.f32.mrb[0].mxu0 }
  0xea   : > { %v311_v8 = vadd.f32 %v403_v6, %v310_v7  ;;  %v431_v9 = vpop.f32.mrb[1].mxu0 }
  0xeb   : > { %v313_v11 = vpop.f32.mrb[2].mxu0 }
  0xec   : > { %v317_v12 = vmax.f32 %v311_v8, 0.0  ;;  %v314_v13 = vadd.f32 %v403_v6, %v313_v11  ;;  %v432_v14 = vpop.f32.mrb[3].mxu0 }
  0xee   : > { %v326_v16 = vmul.f32 %v410_v10, %v317_v12  ;;  %v318_v17 = vmax.f32 %v314_v13, 0.0 }
  0xf0   : > { %v335_v18 = vadd.f32 %v411_v15, %v326_v16  ;;  %v327_v19 = vmul.f32 %v410_v10, %v318_v17 }
  0xf2   : > { %337 = vst [vmem:[%s224_s16] sm:$0xff] %v335_v18  ;;  %v336_v20 = vadd.f32 %v411_v15, %v327_v19 }
  0xf4   : > { %338 = vst [vmem:[%s224_s16 + $0x8] sm:$0xff] %v336_v20 }
  0xf5 PF: > { %s15_s18 = sadd.s32 1, %s454_s18  }
  0xf6   : > { %p12_p4 = scmp.ge.s32.totalorder %s15_s18, 4  }
  0xf8   :  { %14 = sbr.rel (!%p12_p4) target bundleno = 1 (0x1), region = 70 }

// kernel: duck_block_forward.102
= control target key start
LH: loop header
LB: loop body
LE: loop exit
PB: predicated region body
PF: predicated region fallthrough
CT: control target
= control target key end

     0   :  { %s196_s6 = smov 0   ;;  %s224_s0 = inlined_call_operand.vmem [shape: f32[2,16,128], index: 0, kind: input, shape index: {}]   ;;  %s225_s1 = inlined_call_operand.vmem [shape: f32[2,128], index: 1, kind: output, shape index: {}]  }
   0x1 LB: > { %s202_s7 = sadd.s32 4294967295, %s183_s6   ;;  %p161_p0 = scmp.ge.s32.totalorder %s183_s6, 1  ;;  %s183_s6 = sphi %s196_s6, %s11_s6  }
   0x2   : > { %p82_p1 = scmp.lt.s32.totalorder %s183_s6, 3 }
   0x4   : > { %p83_p2 = pnand %p161_p0, %p82_p1 }
   0x5   : > { %p97_p3 = scmp.lt.s32.totalorder (!%p83_p2), %s202_s7, 1  ;;  %vm120_vm0 = vcmask (!%p83_p2), 1040384   ;;  %p164_p4 = scmp.ne.s32.totalorder (!%p83_p2), %s202_s7, 0 }
   0x6   : > { %86 = sbr.rel (%p83_p2) target bundleno = 39 (0x27), region = 24 }
   0xd   : > { %s98_s8 = scalar_select %p97_p3, %s202_s7, 1 }
   0xe   : > { %v185_v19 = vmov (!%p164_p4), 0.0  }
   0xf   : > { %s167_s9 = sshll.u32 %s98_s8, 4  ;;  %126 = vst [vmem:[%s225_s1] sm:$0x3] (!%p164_p4), %v185_v19 }
  0x10   : > { %s101_s12 = scalar_lea.vmem %s224_s0, %s167_s9 }
  0x11   : > { %v102_v0 = vld [vmem:[%s101_s12] sm:$0xff]  ;;  %v103_v1 = vld [vmem:[%s101_s12 + $0x8] sm:$0xff] }
  0x12   : > { %v104_v2 = vadd.f32 %v103_v1, %v102_v0  ;;  %v111_v3 = vmul.f32 %v102_v0, %v102_v0  ;;  %v112_v4 = vmul.f32 %v103_v1, %v103_v1 }
  0x14   : > { %v105_v5 = vrot.slane %v104_v2, 4  ;;  %v113_v6 = vadd.f32 %v112_v4, %v111_v3 }
  0x16   : > { %v106_v7 = vadd.f32 %v105_v5, %v104_v2  ;;  %v114_v8 = vrot.slane %v113_v6, 4 }
  0x18   : > { %v107_v9 = vrot.slane %v106_v7, 2  ;;  %v115_v10 = vadd.f32 %v114_v8, %v113_v6 }
  0x1a   : > { %v108_v11 = vadd.f32 %v107_v9, %v106_v7  ;;  %v116_v12 = vrot.slane %v115_v10, 2 }
  0x1c   : > { %v109_v13 = vrot.slane %v108_v11, 1  ;;  %v117_v14 = vadd.f32 %v116_v12, %v115_v10  ;;  %125 = sbr.rel (%p164_p4) target bundleno = 35 (0x23), region = 28 }
  0x1e   : > { %v110_v15 = vadd.f32 %v109_v13, %v108_v11  ;;  %v118_v16 = vrot.slane %v117_v14, 1 }
  0x20   : > { %v119_v17 = vadd.f32 %v118_v16, %v117_v14 }
  0x22   : > { %v121_v18 = vsel %vm120_vm0, %v110_v15, %v119_v17 }
  0x23 PF: > { %v127_v20 = vld [vmem:[%s225_s1] sm:$0x3] }
  0x24   : > { %v128_v21 = vadd.f32 %v127_v20, %v121_v18 }
  0x26   : > { %129 = vst [vmem:[%s225_s1] sm:$0x3] %v128_v21 }
  0x27 PF: > { %s11_s6 = sadd.s32 1, %s183_s6  }
  0x28   : > { %p8_p5 = scmp.ge.s32.totalorder %s11_s6, 4  }
  0x2a   :  { %10 = sbr.rel (!%p8_p5) target bundleno = 1 (0x1), region = 54 }

// kernel: duck_block_forward.103
= control target key start
LH: loop header
LB: loop body
LE: loop exit
PB: predicated region body
PF: predicated region fallthrough
CT: control target
= control target key end

     0   :  { %s275_s12 = smov 0   ;;  %s311_s0 = inlined_call_operand.vmem [shape: f32[2,16,128], index: 0, kind: input, shape index: {}]   ;;  %s312_s1 = inlined_call_operand.vmem [shape: f32[1,128], index: 1, kind: input, shape index: {}]   ;;  %s313_s2 = inlined_call_operand.vmem [shape: f32[1,128], index: 2, kind: input, shape index: {}]   ;;  %s314_s3 = inlined_call_operand.vmem [shape: f32[2,16,128], index: 3, kind: output, shape index: {}]  }
   0x1 LB: > { %s248_s13 = sadd.s32 4294967295, %s277_s12   ;;  %p252_p0 = scmp.ge.s32.totalorder %s277_s12, 1  ;;  %s277_s12 = sphi %s275_s12, %s13_s12  }
   0x2   : > { %p137_p1 = scmp.lt.s32.totalorder %s277_s12, 3 }
   0x4   : > { %p138_p2 = pnand %p252_p0, %p137_p1 }
   0x5   : > { %p161_p3 = scmp.lt.s32.totalorder (!%p138_p2), %s248_s13, 1  ;;  %v257_v0 = vld [vmem:[%s312_s1] ss:$0 sm:$0xff] (!%p138_p2) }
   0x6   : > { %141 = sbr.rel (%p138_p2) target bundleno = 22 (0x16), region = 32  ;;  %v258_v3 = vld [vmem:[%s313_s2] ss:$0 sm:$0xff] (!%p138_p2) }
   0xd   : > { %s316_s13 = smov (!%p161_p3, %s248_s13), 1 }
   0xe   : > { %s261_s14 = sshll.u32 %s316_s13, 4 }
   0xf   : > { %s165_s19 = scalar_lea.vmem %s311_s0, %s261_s14  ;;  %s170_s24 = scalar_lea.vmem %s314_s3, %s261_s14 }
  0x10   : > { %v171_v1 = vld [vmem:[%s165_s19] sm:$0xff]  ;;  %v172_v2 = vld [vmem:[%s165_s19 + $0x8] sm:$0xff] }
  0x11   : > { %v180_v4 = vmul.f32 %v257_v0, %v171_v1  ;;  %v181_v5 = vmul.f32 %v257_v0, %v172_v2 }
  0x13   : > { %v189_v6 = vadd.f32 %v258_v3, %v180_v4  ;;  %v190_v7 = vadd.f32 %v258_v3, %v181_v5 }
  0x15   : > { %191 = vst [vmem:[%s170_s24] sm:$0xff] %v189_v6  ;;  %192 = vst [vmem:[%s170_s24 + $0x8] sm:$0xff] %v190_v7 }
  0x16 PF: > { %s13_s12 = sadd.s32 1, %s277_s12  }
  0x17   : > { %p10_p4 = scmp.ge.s32.totalorder %s13_s12, 4  }
  0x19   :  { %12 = sbr.rel (!%p10_p4) target bundleno = 1 (0x1), region = 62 }

// kernel: duck_block_forward.104
= control target key start
LH: loop header
LB: loop body
LE: loop exit
PB: predicated region body
PF: predicated region fallthrough
CT: control target
= control target key end

     0   :  { %s536_s18 = smov 0   ;;  %s590_s0 = inlined_call_operand.vmem [shape: bf16[2,16,128], index: 0, kind: input, shape index: {}]   ;;  %s591_s1 = inlined_call_operand.vmem [shape: bf16[1,128,128], index: 1, kind: input, shape index: {}]   ;;  %s592_s2 = inlined_call_operand.vmem [shape: f32[1,128], index: 2, kind: input, shape index: {}]   ;;  %s593_s3 = inlined_call_operand.vmem [shape: f32[1,128], index: 3, kind: input, shape index: {}]   ;;  %s594_s4 = inlined_call_operand.vmem [shape: f32[1,128], index: 4, kind: input, shape index: {}]   ;;  %s595_s5 = inlined_call_operand.vmem [shape: f32[2,16,128], index: 5, kind: output, shape index: {}]  }
   0x1 LB: > { %s423_s19 = sadd.s32 4294967295, %s502_s18   ;;  %p427_p0 = scmp.ge.s32.totalorder %s502_s18, 1  ;;  %s502_s18 = sphi %s536_s18, %s15_s18  }
   0x2   : > { %p187_p1 = scmp.lt.s32.totalorder %s502_s18, 3 }
   0x4   : > { %p188_p2 = pnand %p427_p0, %p187_p1 }
   0x5   : > { %v487_v0 = vld [vmem:[%s591_s1] sm:$0xff] (!%p188_p2)   ;;  %v504_v1 = vmov (!%p188_p2), 0.0   ;;  %v488_v2 = vld [vmem:[%s591_s1 + $0x8] sm:$0xff] (!%p188_p2)   ;;  %vm505_vm0 = vmmov (!%p188_p2), 0   ;;  %p215_p3 = scmp.lt.s32.totalorder (!%p188_p2), %s423_s19, 1  ;;  %v489_v3 = vld [vmem:[%s591_s1 + $0x10] sm:$0xff] (!%p188_p2)  }
   0x6   : > { %191 = sbr.rel (%p188_p2) target bundleno = 261 (0x105), region = 40  ;;  %457 = vmatprep.subr.bf16.mxu0 (!%p188_p2), %v504_v1  ;;  %473 = vmatprep.mubr.msk.bf16.mxu0 (!%p188_p2), %vm505_vm0, %v504_v1  ;;  %v490_v4 = vld [vmem:[%s591_s1 + $0x18] sm:$0xff] (!%p188_p2)   ;;  %v491_v5 = vld [vmem:[%s591_s1 + $0x20] sm:$0xff] (!%p188_p2)   ;;  %v492_v6 = vld [vmem:[%s591_s1 + $0x28] sm:$0xff] (!%p188_p2)  }
   0x7   : > { %458 = vmatpush3.bf16.msra.mxu0 (!%p188_p2), %v487_v0  ;;  %v493_v7 = vld [vmem:[%s591_s1 + $0x30] sm:$0xff] (!%p188_p2)   ;;  %v494_v8 = vld [vmem:[%s591_s1 + $0x38] sm:$0xff] (!%p188_p2)   ;;  %v432_v10 = vld [vmem:[%s592_s2] ss:$0 sm:$0xff] (!%p188_p2) }
   0x8   : > { %459 = vmatprep.subr.bf16.mxu0 (!%p188_p2), %v504_v1  ;;  %v442_v14 = vld [vmem:[%s593_s3] ss:$0 sm:$0xff] (!%p188_p2) }
   0x9   : > { %v443_v19 = vld [vmem:[%s594_s4] ss:$0 sm:$0xff] (!%p188_p2) }
   0xb   : > { %460 = vmatpush3.bf16.msra.mxu0 (!%p188_p2), %v488_v2 }
   0xc   : > { %461 = vmatprep.subr.bf16.mxu0 (!%p188_p2), %v504_v1 }
   0xd   : > { %s597_s19 = smov (!%p215_p3, %s423_s19), 1 }
   0xe   : > { %s446_s26 = sshll.u32 %s597_s19, 3  ;;  %s447_s21 = sshll.u32 %s597_s19, 4 }
   0xf   : > { %s219_s29 = scalar_lea.vmem %s590_s0, %s446_s26  ;;  %462 = vmatpush3.bf16.msra.mxu0 %v489_v3  ;;  %s224_s26 = scalar_lea.vmem %s595_s5, %s447_s21 }
  0x10   : > { %463 = vmatprep.subr.bf16.mxu0 %v504_v1  ;;  %v495_v9 = vld [vmem:[%s219_s29] sm:$0xff]  }
  0x13   : > { %464 = vmatpush3.bf16.msra.mxu0 %v490_v4 }
  0x14   : > { %465 = vmatprep.subr.bf16.mxu0 %v504_v1 }
  0x17   : > { %466 = vmatpush3.bf16.msra.mxu0 %v491_v5 }
  0x18   : > { %467 = vmatprep.subr.bf16.mxu0 %v504_v1 }
  0x1b   : > { %468 = vmatpush3.bf16.msra.mxu0 %v492_v6 }
  0x1c   : > { %469 = vmatprep.subr.bf16.mxu0 %v504_v1 }
  0x1f   : > { %470 = vmatpush3.bf16.msra.mxu0 %v493_v7 }
  0x20   : > { %471 = vmatprep.subr.bf16.mxu0 %v504_v1 }
  0x23   : > { %472 = vmatpush3.bf16.msra.mxu0 %v494_v8 }
  0x26   : > { %474 = vmatmul.mubr.bf16.vlgmr.msra.gmra.mrb[0].mxu0 %v495_v9 }
  0xf9   : > { %v339_v11 = vpop.f32.mrb[0].mxu0 }
  0xfa   : > { %v340_v12 = vadd.f32 %v432_v10, %v339_v11  ;;  %v475_v13 = vpop.f32.mrb[1].mxu0 }
  0xfb   : > { %v342_v15 = vpop.f32.mrb[2].mxu0 }
  0xfc   : > { %v346_v16 = vmax.f32 %v340_v12, 0.0  ;;  %v343_v17 = vadd.f32 %v432_v10, %v342_v15  ;;  %v476_v18 = vpop.f32.mrb[3].mxu0 }
  0xfe   : > { %v355_v20 = vmul.f32 %v442_v14, %v346_v16  ;;  %v347_v21 = vmax.f32 %v343_v17, 0.0 }
 0x100   : > { %v364_v22 = vadd.f32 %v443_v19, %v355_v20  ;;  %v356_v23 = vmul.f32 %v442_v14, %v347_v21 }
 0x102   : > { %366 = vst [vmem:[%s224_s26] sm:$0xff] %v364_v22  ;;  %v365_v24 = vadd.f32 %v443_v19, %v356_v23 }
 0x104   : > { %367 = vst [vmem:[%s224_s26 + $0x8] sm:$0xff] %v365_v24 }
 0x105 PF: > { %s15_s18 = sadd.s32 1, %s502_s18  }
 0x106   : > { %p12_p4 = scmp.ge.s32.totalorder %s15_s18, 4  }
 0x108   :  { %14 = sbr.rel (!%p12_p4) target bundleno = 1 (0x1), region = 70 }

// kernel: tile.483
= control target key start
LH: loop header
LB: loop body
LE: loop exit
PB: predicated region body
PF: predicated region fallthrough
CT: control target
= control target key end

     0   :  { %s28_s0 = inlined_call_operand.vmem [shape: f32[8], index: 0, kind: input, shape index: {}]   ;;  %s29_s1 = inlined_call_operand.vmem [shape: f32[11,8], index: 1, kind: output, shape index: {}]  }
   0x1   :  { %v4_v0 = vld [vmem:[%s28_s0] ss:$0 sm:$0xff] }
   0x2   :  { %5 = vst [vmem:[%s29_s1] sm:$0xff] %v4_v0  ;;  %8 = vst [vmem:[%s29_s1 + $0x8] sm:$0xff] %v4_v0 }

// kernel: tile.484
= control target key start
LH: loop header
LB: loop body
LE: loop exit
PB: predicated region body
PF: predicated region fallthrough
CT: control target
= control target key end

     0   :  { %s91_s10 = smov 80   ;;  %s92_s11 = smov 64   ;;  %vm3_vm0 = vcmask 64512   ;;  %vm9_vm1 = vcmask 720512   ;;  %vm15_vm2 = vcmask 654912   ;;  %vm21_vm3 = vcmask 589312   ;;  %s147_s0 = inlined_call_operand.vmem [shape: f32[11,8], index: 0, kind: input, shape index: {}]   ;;  %s148_s1 = inlined_call_operand.vmem [shape: f32[1,88], index: 1, kind: output, shape index: {}]  }
   0x1   :  { %v71_v0 = vld [vmem:[%s147_s0 + $0xa] sm:$0x1]   ;;  %v73_v1 = vld [vmem:[%s147_s0 + $0x8] sm:$0x1]   ;;  %v72_v2 = vld [vmem:[%s147_s0 + $0x9] sm:$0x1]  }
   0x2   :  { %7 = vrot.lane.b32.xlu0 %v71_v0, %s91_s10  ;;  %19 = vrot.lane.b32.xlu1 %v73_v1, %s92_s11  ;;  %v74_v3 = vld [vmem:[%s147_s0 + $0x7] sm:$0x1]   ;;  %s93_s16 = smov 72   ;;  %s94_s17 = smov 56   ;;  %v2_v4 = vld [vmem:[%s147_s0] sm:$0x1]  }
   0x3   :  { %v75_v5 = vld [vmem:[%s147_s0 + $0x6] sm:$0x1]   ;;  %v76_v6 = vld [vmem:[%s147_s0 + $0x5] sm:$0x1]   ;;  %4 = vst.msk [vmem:[#allocation0] sm:$0x1] %vm3_vm0, %v2_v4  }
   0x4   :  { %s95_s24 = smov 48   ;;  %s96_s25 = smov 40   ;;  %v77_v7 = vld [vmem:[%s147_s0 + $0x4] sm:$0x1]   ;;  %v78_v8 = vld [vmem:[%s147_s0 + $0x3] sm:$0x1]  }
   0x5   :  { %s97_s30 = smov 32   ;;  %s98_s2 = smov 24   ;;  %v79_v9 = vld [vmem:[%s147_s0 + $0x2] sm:$0x1]   ;;  %v80_v10 = vld [vmem:[%s147_s0 + $0x1] sm:$0x1]  }
   0x6   :  { %13 = vrot.lane.b32.xlu0 %v72_v2, %s93_s16  ;;  %25 = vrot.lane.b32.xlu1 %v74_v3, %s94_s17  ;;  %s99_s0 = smov 16   ;;  %s100_s7 = smov 8   ;;  %vm27_vm4 = vcmask 523712   ;;  %vm33_vm5 = vcmask 458112   ;;  %vm39_vm6 = vcmask 392512   ;;  %vm45_vm7 = vcmask 326912  }
   0x7   :  { %vm51_vm8 = vcmask 261312   ;;  %vm57_vm9 = vcmask 195712   ;;  %vm63_vm10 = vcmask 130112  }
   0xa   :  { %31 = vrot.lane.b32.xlu0 %v75_v5, %s95_s24  ;;  %37 = vrot.lane.b32.xlu1 %v76_v6, %s96_s25 }
   0xe   :  { %43 = vrot.lane.b32.xlu0 %v77_v7, %s97_s30  ;;  %49 = vrot.lane.b32.xlu1 %v78_v8, %s98_s2 }
  0x12   :  { %55 = vrot.lane.b32.xlu0 %v79_v9, %s99_s0  ;;  %61 = vrot.lane.b32.xlu1 %v80_v10, %s100_s7 }
  0x74   :  { %v8_v11 = vpop.permute.xlu0 %7   ;;  %v20_v12 = vpop.permute.xlu1 %19  }
  0x75   :  { %10 = vst.msk [vmem:[#allocation0] sm:$0x1] %vm9_vm1, %v8_v11  }
  0x78   :  { %v14_v13 = vpop.permute.xlu0 %13   ;;  %v26_v14 = vpop.permute.xlu1 %25  }
  0x79   :  { %16 = vst.msk [vmem:[#allocation0] sm:$0x1] %vm15_vm2, %v14_v13  }
  0x7a   :  { %22 = vst.msk [vmem:[#allocation0] sm:$0x1] %vm21_vm3, %v20_v12  }
  0x7b   :  { %28 = vst.msk [vmem:[#allocation0] sm:$0x1] %vm27_vm4, %v26_v14  }
  0x7c   :  { %v32_v15 = vpop.permute.xlu0 %31   ;;  %v38_v16 = vpop.permute.xlu1 %37  }
  0x7d   :  { %34 = vst.msk [vmem:[#allocation0] sm:$0x1] %vm33_vm5, %v32_v15  }
  0x7e   :  { %40 = vst.msk [vmem:[#allocation0] sm:$0x1] %vm39_vm6, %v38_v16  }
  0x80   :  { %v44_v17 = vpop.permute.xlu0 %43   ;;  %v50_v18 = vpop.permute.xlu1 %49  }
  0x81   :  { %46 = vst.msk [vmem:[#allocation0] sm:$0x1] %vm45_vm7, %v44_v17  }
  0x82   :  { %52 = vst.msk [vmem:[#allocation0] sm:$0x1] %vm51_vm8, %v50_v18  }
  0x84   :  { %v56_v19 = vpop.permute.xlu0 %55   ;;  %v62_v20 = vpop.permute.xlu1 %61  }
  0x85   :  { %58 = vst.msk [vmem:[#allocation0] sm:$0x1] %vm57_vm9, %v56_v19  }
  0x86   :  { %64 = vst.msk [vmem:[#allocation0] sm:$0x1] %vm63_vm10, %v62_v20  }
  0x8d   :  { %v68_v21 = vld [vmem:[#allocation0] sm:$0x1] }
  0x8e   :  { %70 = vst [vmem:[%s148_s1] sm:$0x1] %v68_v21 }

// kernel: duck_block_forward.72
= control target key start
LH: loop header
LB: loop body
LE: loop exit
PB: predicated region body
PF: predicated region fallthrough
CT: control target
= control target key end

     0   :  { %s412_s12 = smov 0   ;;  %s455_s0 = inlined_call_operand.vmem [shape: bf16[2,21,64], index: 0, kind: input, shape index: {}]   ;;  %s456_s1 = inlined_call_operand.vmem [shape: bf16[1,64,88], index: 1, kind: input, shape index: {}]   ;;  %s457_s2 = inlined_call_operand.vmem [shape: f32[1,88], index: 2, kind: input, shape index: {}]   ;;  %s458_s3 = inlined_call_operand.vmem [shape: f32[2,88], index: 3, kind: output, shape index: {}]  }
   0x1 LB: > { %s418_s13 = sadd.s32 4294967295, %s389_s12   ;;  %p335_p0 = scmp.ge.s32.totalorder %s389_s12, 1  ;;  %s389_s12 = sphi %s412_s12, %s13_s12  }
   0x2   : > { %p132_p1 = scmp.lt.s32.totalorder %s389_s12, 3 }
   0x4   : > { %p133_p2 = pnand %p335_p0, %p132_p1 }
   0x5   : > { %v377_v0 = vld [vmem:[%s456_s1] sm:$0xff] (!%p133_p2)   ;;  %p151_p3 = scmp.lt.s32.totalorder (!%p133_p2), %s418_s13, 1  ;;  %v378_v1 = vld [vmem:[%s456_s1 + $0x8] sm:$0xff] (!%p133_p2)   ;;  %v379_v2 = vld [vmem:[%s456_s1 + $0x10] sm:$0xff] (!%p133_p2)   ;;  %vm207_vm0 = vcmask (!%p133_p2), 523264   ;;  %vm265_vm1 = vcmask (!%p133_p2), 719872  }
   0x6   : > { %136 = sbr.rel (%p133_p2) target bundleno = 265 (0x109), region = 32  ;;  %355 = vmatprep.subr.bf16.mxu0 (!%p133_p2), %v377_v0  ;;  %v380_v3 = vld [vmem:[%s456_s1 + $0x18] sm:$0xff] (!%p133_p2)   ;;  %v337_v6 = vld [vmem:[%s457_s2] ss:$0 sm:$0xff] (!%p133_p2)  ;;  %vm269_vm2 = vcmask (!%p133_p2), 716800   ;;  %vm292_vm3 = vcmask (!%p133_p2), 1040384  }
   0x7   : > { %356 = vmatpush3.bf16.msra.mxu0 (!%p133_p2), %v377_v0  ;;  %p346_p4 = scmp.ne.s32.totalorder (!%p133_p2), %s418_s13, 0 }
   0x8   : > { %357 = vmatprep.subr.bf16.mxu0 (!%p133_p2), %v378_v1 }
   0xb   : > { %358 = vmatpush3.bf16.msra.mxu0 (!%p133_p2), %v378_v1 }
   0xc   : > { %359 = vmatprep.subr.bf16.mxu0 (!%p133_p2), %v379_v2 }
   0xd   : > { %s152_s18 = scalar_select %p151_p3, %s418_s13, 1 }
   0xe   : > { %vm298_vm4 = vcmask (!%p346_p4), 713728   ;;  %v391_v43 = vmov (!%p346_p4), 0.0  }
   0xf   : > { %s367_s21 = smul.u32 12, %s152_s18  ;;  %360 = vmatpush3.bf16.msra.mxu0 %v379_v2  ;;  %299 = vst.msk [vmem:[%s458_s3] sm:$0x3] (!%p346_p4), %vm298_vm4, %v391_v43 }
  0x10   : > { %361 = vmatprep.subr.bf16.mxu0 %v380_v3 }
  0x11   : > { %s155_s24 = scalar_lea.vmem %s455_s0, %s367_s21 }
  0x12   : > { %v381_v4 = vld [vmem:[%s155_s24] sm:$0xff]   ;;  %v382_v5 = vld [vmem:[%s155_s24 + $0x8] ss:$0 sps:$4 sm:$0x77]  }
  0x13   : > { %363 = vmatprep.mubr.msk.bf16.mxu0 %vm207_vm0, %v381_v4  ;;  %362 = vmatpush3.bf16.msra.mxu0 %v380_v3 }
  0x16   : > { %364 = vmatmul.mubr.msk.bf16.vlgmr.msra.gmra.mrb[0].mxu0 %vm207_vm0, %v382_v5 }
  0xe9   : > { %v365_v7 = vpop.f32.mrb[0].mxu0 }
  0xea   : > { %v257_v8 = vadd.f32 %v365_v7, %v337_v6  ;;  %v248_v9 = vpop.f32.mrb[1].mxu0 }
  0xeb   : > { %v249_v10 = vadd.f32 %v337_v6, %v248_v9  ;;  %v366_v11 = vpop.f32.mrb[2].mxu0 }
  0xec   : > { %v251_v12 = vpop.f32.mrb[3].mxu0  ;;  %v264_v13 = vmax.f32 %v257_v8, 0.0 }
  0xed   : > { %v262_v14 = vmax.f32 %v249_v10, 0.0  ;;  %v252_v15 = vadd.f32 %v337_v6, %v251_v12 }
  0xee   : > { %v280_v18 = vmul.f32 %v264_v13, %v264_v13  ;;  %v270_v23 = vsel %vm269_vm2, %v264_v13, 0.0 }
  0xef   : > { %v278_v16 = vmul.f32 %v262_v14, %v262_v14  ;;  %v263_v17 = vmax.f32 %v252_v15, 0.0  ;;  %v266_v19 = vsel %vm265_vm1, %v262_v14, 0.0 }
  0xf0   : > { %v284_v28 = vsel %vm269_vm2, %v280_v18, 0.0 }
  0xf1   : > { %v267_v20 = vsel %vm265_vm1, %v263_v17, 0.0  ;;  %v279_v21 = vmul.f32 %v263_v17, %v263_v17  ;;  %v281_v24 = vsel %vm265_vm1, %v278_v16, 0.0 }
  0xf2   : > { %v268_v22 = vadd.f32 %v267_v20, %v266_v19 }
  0xf3   : > { %v282_v25 = vsel %vm265_vm1, %v279_v21, 0.0 }
  0xf4   : > { %v271_v26 = vadd.f32 %v270_v23, %v268_v22  ;;  %v283_v27 = vadd.f32 %v282_v25, %v281_v24 }
  0xf6   : > { %v272_v29 = vrot.slane %v271_v26, 4  ;;  %v285_v30 = vadd.f32 %v284_v28, %v283_v27 }
  0xf8   : > { %v273_v31 = vadd.f32 %v272_v29, %v271_v26  ;;  %v286_v32 = vrot.slane %v285_v30, 4 }
  0xfa   : > { %v274_v33 = vrot.slane %v273_v31, 2  ;;  %v287_v34 = vadd.f32 %v286_v32, %v285_v30 }
  0xfc   : > { %v275_v35 = vadd.f32 %v274_v33, %v273_v31  ;;  %v288_v36 = vrot.slane %v287_v34, 2 }
  0xfe   : > { %v276_v37 = vrot.slane %v275_v35, 1  ;;  %v289_v38 = vadd.f32 %v288_v36, %v287_v34  ;;  %297 = sbr.rel (%p346_p4) target bundleno = 261 (0x105), region = 36 }
 0x100   : > { %v290_v39 = vrot.slane %v289_v38, 1  ;;  %v277_v40 = vadd.f32 %v276_v37, %v275_v35 }
 0x102   : > { %v291_v41 = vadd.f32 %v290_v39, %v289_v38 }
 0x104   : > { %v293_v42 = vsel %vm292_vm3, %v277_v40, %v291_v41 }
 0x105 PF: > { %v300_v44 = vld [vmem:[%s458_s3] sm:$0x3]  ;;  %vm302_vm5 = vcmask 713728  }
 0x106   : > { %v301_v45 = vadd.f32 %v300_v44, %v293_v42 }
 0x108   : > { %303 = vst.msk [vmem:[%s458_s3] sm:$0x3] %vm302_vm5, %v301_v45 }
 0x109 PF: > { %s13_s12 = sadd.s32 1, %s389_s12  }
 0x10a   : > { %p10_p5 = scmp.ge.s32.totalorder %s13_s12, 4  }
 0x10c   :  { %12 = sbr.rel (!%p10_p5) target bundleno = 1 (0x1), region = 62 }

// kernel: duck_block_forward.73
= control target key start
LH: loop header
LB: loop body
LE: loop exit
PB: predicated region body
PF: predicated region fallthrough
CT: control target
= control target key end

     0   :  { %s506_s18 = smov 0   ;;  %s548_s0 = inlined_call_operand.vmem [shape: bf16[2,21,64], index: 0, kind: input, shape index: {}]   ;;  %s549_s1 = inlined_call_operand.vmem [shape: bf16[1,64,88], index: 1, kind: input, shape index: {}]   ;;  %s550_s2 = inlined_call_operand.vmem [shape: f32[1,88], index: 2, kind: input, shape index: {}]   ;;  %s551_s3 = inlined_call_operand.vmem [shape: f32[1,88], index: 3, kind: input, shape index: {}]   ;;  %s552_s4 = inlined_call_operand.vmem [shape: f32[1,88], index: 4, kind: input, shape index: {}]   ;;  %s553_s5 = inlined_call_operand.vmem [shape: f32[2,21,88], index: 5, kind: output, shape index: {}]  }
   0x1 LB: > { %s414_s19 = sadd.s32 4294967295, %s474_s18   ;;  %p418_p0 = scmp.ge.s32.totalorder %s474_s18, 1  ;;  %s474_s18 = sphi %s506_s18, %s15_s18  }
   0x2   : > { %p187_p1 = scmp.lt.s32.totalorder %s474_s18, 3 }
   0x4   : > { %p188_p2 = pnand %p418_p0, %p187_p1 }
   0x5   : > { %v462_v0 = vld [vmem:[%s549_s1] sm:$0xff] (!%p188_p2)   ;;  %p215_p3 = scmp.lt.s32.totalorder (!%p188_p2), %s414_s19, 1  ;;  %v463_v1 = vld [vmem:[%s549_s1 + $0x8] sm:$0xff] (!%p188_p2)   ;;  %v464_v2 = vld [vmem:[%s549_s1 + $0x10] sm:$0xff] (!%p188_p2)   ;;  %vm276_vm0 = vcmask (!%p188_p2), 523264   ;;  %vm357_vm1 = vcmask (!%p188_p2), 716800  }
   0x6   : > { %191 = sbr.rel (%p188_p2) target bundleno = 246 (0xf6), region = 40  ;;  %440 = vmatprep.subr.bf16.mxu0 (!%p188_p2), %v462_v0  ;;  %v465_v3 = vld [vmem:[%s549_s1 + $0x18] sm:$0xff] (!%p188_p2)   ;;  %v421_v6 = vld [vmem:[%s550_s2] ss:$0 sm:$0xff] (!%p188_p2)  ;;  %vm354_vm2 = vcmask (!%p188_p2), 719872  }
   0x7   : > { %441 = vmatpush3.bf16.msra.mxu0 (!%p188_p2), %v462_v0  ;;  %v430_v10 = vld [vmem:[%s551_s3] ss:$0 sm:$0xff] (!%p188_p2) }
   0x8   : > { %442 = vmatprep.subr.bf16.mxu0 (!%p188_p2), %v463_v1  ;;  %v431_v15 = vld [vmem:[%s552_s4] ss:$0 sm:$0xff] (!%p188_p2) }
   0xb   : > { %443 = vmatpush3.bf16.msra.mxu0 (!%p188_p2), %v463_v1 }
   0xc   : > { %444 = vmatprep.subr.bf16.mxu0 (!%p188_p2), %v464_v2 }
   0xd   : > { %s555_s19 = smov (!%p215_p3, %s414_s19), 1 }
   0xe   : > { %s452_s26 = smul.u32 12, %s555_s19 }
   0xf   : > { %445 = vmatpush3.bf16.msra.mxu0 %v464_v2  ;;  %s453_s9 = smul.u32 24, %s555_s19 }
  0x10   : > { %s219_s29 = scalar_lea.vmem %s548_s0, %s452_s26  ;;  %446 = vmatprep.subr.bf16.mxu0 %v465_v3 }
  0x11   : > { %v466_v4 = vld [vmem:[%s219_s29] sm:$0xff]   ;;  %v467_v5 = vld [vmem:[%s219_s29 + $0x8] ss:$0 sps:$4 sm:$0x77]   ;;  %s224_s16 = scalar_lea.vmem %s553_s5, %s453_s9 }
  0x12   : > { %448 = vmatprep.mubr.msk.bf16.mxu0 %vm276_vm0, %v466_v4 }
  0x13   : > { %447 = vmatpush3.bf16.msra.mxu0 %v465_v3 }
  0x16   : > { %449 = vmatmul.mubr.msk.bf16.vlgmr.msra.gmra.mrb[0].mxu0 %vm276_vm0, %v467_v5 }
  0xe9   : > { %v450_v7 = vpop.f32.mrb[0].mxu0 }
  0xea   : > { %v326_v8 = vadd.f32 %v450_v7, %v421_v6  ;;  %v317_v9 = vpop.f32.mrb[1].mxu0 }
  0xeb   : > { %v318_v11 = vadd.f32 %v421_v6, %v317_v9  ;;  %v451_v12 = vpop.f32.mrb[2].mxu0 }
  0xec   : > { %v333_v13 = vmax.f32 %v326_v8, 0.0  ;;  %v320_v14 = vpop.f32.mrb[3].mxu0 }
  0xed   : > { %v331_v16 = vmax.f32 %v318_v11, 0.0  ;;  %v321_v17 = vadd.f32 %v421_v6, %v320_v14 }
  0xee   : > { %v343_v18 = vmul.f32 %v430_v10, %v333_v13 }
  0xef   : > { %v341_v19 = vmul.f32 %v430_v10, %v331_v16  ;;  %v332_v20 = vmax.f32 %v321_v17, 0.0 }
  0xf0   : > { %v353_v21 = vadd.f32 %v431_v15, %v343_v18 }
  0xf1   : > { %v351_v22 = vadd.f32 %v431_v15, %v341_v19  ;;  %v342_v23 = vmul.f32 %v430_v10, %v332_v20 }
  0xf2   : > { %358 = vst.msk [vmem:[%s224_s16 + $0x10] sm:$0x1f] %vm357_vm1, %v353_v21 }
  0xf3   : > { %355 = vst.msk [vmem:[%s224_s16] sm:$0xff] %vm354_vm2, %v351_v22  ;;  %v352_v24 = vadd.f32 %v431_v15, %v342_v23 }
  0xf5   : > { %356 = vst.msk [vmem:[%s224_s16 + $0x8] sm:$0xff] %vm354_vm2, %v352_v24 }
  0xf6 PF: > { %s15_s18 = sadd.s32 1, %s474_s18  }
  0xf7   : > { %p12_p4 = scmp.ge.s32.totalorder %s15_s18, 4  }
  0xf9   :  { %14 = sbr.rel (!%p12_p4) target bundleno = 1 (0x1), region = 70 }

// kernel: duck_block_forward.74
= control target key start
LH: loop header
LB: loop body
LE: loop exit
PB: predicated region body
PF: predicated region fallthrough
CT: control target
= control target key end

     0   :  { %s1327_s12 = smov 0   ;;  %s1596_s0 = inlined_call_operand.vmem [shape: bf16[2,21,128], index: 0, kind: input, shape index: {}]   ;;  %s1597_s1 = inlined_call_operand.vmem [shape: bf16[6,128,128], index: 1, kind: input, shape index: {}]   ;;  %s1598_s2 = inlined_call_operand.vmem [shape: f32[1,128], index: 2, kind: input, shape index: {}]   ;;  %s1599_s3 = inlined_call_operand.vmem [shape: f32[2,128], index: 3, kind: output, shape index: {}]  }
   0x1 LB: > { %s1333_s13 = sadd.s32 4294967295, %s1302_s12   ;;  %p924_p0 = scmp.ge.s32.totalorder %s1302_s12, 1  ;;  %s1302_s12 = sphi %s1327_s12, %s13_s12  }
   0x2   : > { %p132_p1 = scmp.lt.s32.totalorder %s1302_s12, 3 }
   0x4   : > { %p133_p2 = pnand %p924_p0, %p132_p1 }
   0x5   : > { %v1246_v0 = vld [vmem:[%s1597_s1 + $0x40] sm:$0xff] (!%p133_p2)   ;;  %v1304_v1 = vmov (!%p133_p2), 0.0   ;;  %v1248_v3 = vld [vmem:[%s1597_s1 + $0x48] sm:$0xff] (!%p133_p2)   ;;  %vm1305_vm0 = vmmov (!%p133_p2), 0   ;;  %p151_p3 = scmp.lt.s32.totalorder (!%p133_p2), %s1333_s13, 1  ;;  %v1250_v5 = vld [vmem:[%s1597_s1 + $0x50] sm:$0xff] (!%p133_p2)  }
   0x6   : > { %136 = sbr.rel (%p133_p2) target bundleno = 345 (0x159), region = 32  ;;  %1114 = vmatprep.subr.bf16.mxu0 (!%p133_p2), %v1304_v1  ;;  %1134 = vmatprep.subr.bf16.mxu1 (!%p133_p2), %v1304_v1  ;;  %v1247_v2 = vld [vmem:[%s1597_s1] sm:$0xff] (!%p133_p2)   ;;  %v1249_v4 = vld [vmem:[%s1597_s1 + $0x8] sm:$0xff] (!%p133_p2)   ;;  %v1251_v6 = vld [vmem:[%s1597_s1 + $0x10] sm:$0xff] (!%p133_p2)   ;;  %vm201_vm1 = vsmask.f32 (!%p133_p2), 7424 }
   0x7   : > { %1115 = vmatpush3.bf16.msra.mxu0 (!%p133_p2), %v1246_v0  ;;  %1130 = vmatprep.mubr.msk.bf16.mxu0 (!%p133_p2), %vm1305_vm0, %v1304_v1  ;;  %v1252_v7 = vld [vmem:[%s1597_s1 + $0x58] sm:$0xff] (!%p133_p2)   ;;  %v1254_v9 = vld [vmem:[%s1597_s1 + $0x60] sm:$0xff] (!%p133_p2)   ;;  %v1256_v13 = vld [vmem:[%s1597_s1 + $0x68] sm:$0xff] (!%p133_p2)   ;;  %vm643_vm2 = vcmask (!%p133_p2), 1045504   ;;  %vm756_vm3 = vsmask.f32 (!%p133_p2), 5376 }
   0x8   : > { %1135 = vmatpush3.bf16.msra.mxu1 (!%p133_p2), %v1247_v2  ;;  %1116 = vmatprep.subr.bf16.mxu0 (!%p133_p2), %v1304_v1  ;;  %v1253_v8 = vld [vmem:[%s1597_s1 + $0x18] sm:$0xff] (!%p133_p2)   ;;  %v1255_v10 = vld [vmem:[%s1597_s1 + $0x20] sm:$0xff] (!%p133_p2)   ;;  %v1257_v14 = vld [vmem:[%s1597_s1 + $0x28] sm:$0xff] (!%p133_p2)   ;;  %vm411_vm4 = vcmask (!%p133_p2), 1046528   ;;  %vm524_vm5 = vsmask.f32 (!%p133_p2), 6400 }
   0x9   : > { %1136 = vmatprep.subr.bf16.mxu1 (!%p133_p2), %v1304_v1  ;;  %1150 = vmatprep.mubr.msk.bf16.mxu1 (!%p133_p2), %vm1305_vm0, %v1304_v1  ;;  %v1258_v16 = vld [vmem:[%s1597_s1 + $0x70] sm:$0xff] (!%p133_p2)   ;;  %v1260_v21 = vld [vmem:[%s1597_s1 + $0x78] sm:$0xff] (!%p133_p2)   ;;  %v1264_v26 = vld [vmem:[%s1597_s1 + $0x80] sm:$0xff] (!%p133_p2)   ;;  %vm883_vm6 = vcmask (!%p133_p2), 1040384   ;;  %p1057_p4 = scmp.ne.s32.totalorder (!%p133_p2), %s1333_s13, 0 }
   0xa   : > { %v1259_v20 = vld [vmem:[%s1597_s1 + $0x30] sm:$0xff] (!%p133_p2)   ;;  %v1261_v22 = vld [vmem:[%s1597_s1 + $0x38] sm:$0xff] (!%p133_p2)   ;;  %v1265_v28 = vld [vmem:[%s1597_s1 + $0xc0] sm:$0xff] (!%p133_p2)  }
   0xb   : > { %1117 = vmatpush3.bf16.msra.mxu0 (!%p133_p2), %v1248_v3  ;;  %v1266_v33 = vld [vmem:[%s1597_s1 + $0x88] sm:$0xff] (!%p133_p2)   ;;  %v1268_v36 = vld [vmem:[%s1597_s1 + $0x90] sm:$0xff] (!%p133_p2)   ;;  %v1270_v38 = vld [vmem:[%s1597_s1 + $0x98] sm:$0xff] (!%p133_p2)  }
   0xc   : > { %1137 = vmatpush3.bf16.msra.mxu1 (!%p133_p2), %v1249_v4  ;;  %1118 = vmatprep.subr.bf16.mxu0 (!%p133_p2), %v1304_v1  ;;  %v1267_v34 = vld [vmem:[%s1597_s1 + $0xc8] sm:$0xff] (!%p133_p2)   ;;  %v1269_v37 = vld [vmem:[%s1597_s1 + $0xd0] sm:$0xff] (!%p133_p2)   ;;  %v1271_v40 = vld [vmem:[%s1597_s1 + $0xd8] sm:$0xff] (!%p133_p2)  }
   0xd   : > { %s152_s24 = scalar_select %p151_p3, %s1333_s13, 1  ;;  %1138 = vmatprep.subr.bf16.mxu1 %v1304_v1  ;;  %v1272_v43 = vld [vmem:[%s1597_s1 + $0xa0] sm:$0xff]   ;;  %v1274_v46 = vld [vmem:[%s1597_s1 + $0xa8] sm:$0xff]   ;;  %v1276_v49 = vld [vmem:[%s1597_s1 + $0xb0] sm:$0xff]  }
   0xe   : > { %v1273_v44 = vld [vmem:[%s1597_s1 + $0xe0] sm:$0xff]   ;;  %v1275_v47 = vld [vmem:[%s1597_s1 + $0xe8] sm:$0xff]   ;;  %v1277_v50 = vld [vmem:[%s1597_s1 + $0xf0] sm:$0xff]  }
   0xf   : > { %1119 = vmatpush3.bf16.msra.mxu0 %v1250_v5  ;;  %s1234_s29 = smul.u32 12, %s152_s24  ;;  %v1278_v55 = vld [vmem:[%s1597_s1 + $0xb8] sm:$0xff]   ;;  %v1280_v62 = vld [vmem:[%s1597_s1 + $0x100] sm:$0xff]   ;;  %v1282_v2 = vld [vmem:[%s1597_s1 + $0x108] sm:$0xff]  }
  0x10   : > { %1139 = vmatpush3.bf16.msra.mxu1 %v1251_v6  ;;  %1120 = vmatprep.subr.bf16.mxu0 %v1304_v1  ;;  %v1279_v58 = vld [vmem:[%s1597_s1 + $0xf8] sm:$0xff]   ;;  %v1281_v0 = vld [vmem:[%s1597_s1 + $0x140] sm:$0xff]   ;;  %v1283_v3 = vld [vmem:[%s1597_s1 + $0x148] sm:$0xff]  }
  0x11   : > { %1140 = vmatprep.subr.bf16.mxu1 %v1304_v1  ;;  %s155_s9 = scalar_lea.vmem %s1596_s0, %s1234_s29  ;;  %v1284_v4 = vld [vmem:[%s1597_s1 + $0x110] sm:$0xff]   ;;  %v1286_v6 = vld [vmem:[%s1597_s1 + $0x118] sm:$0xff]  }
  0x12   : > { %v1386_v11 = vld [vmem:[%s155_s9] sm:$0xff]   ;;  %v1388_v12 = vld [vmem:[%s155_s9 + $0x8] ss:$0 sps:$4 sm:$0x77]   ;;  %v1285_v5 = vld [vmem:[%s1597_s1 + $0x150] sm:$0xff]  }
  0x13   : > { %1121 = vmatpush3.bf16.msra.mxu0 %v1252_v7  ;;  %v1398_v15 = vshll.u32 %v1386_v11, 16  ;;  %v1405_v17 = vshrl.u32 %v1386_v11, 16  ;;  %v1409_v19 = vshll.u32 %v1388_v12, 16  ;;  %v644_v27 = vrot.slane %v1386_v11, 2  ;;  %v1287_v7 = vld [vmem:[%s1597_s1 + $0x158] sm:$0xff]  }
  0x14   : > { %1141 = vmatpush3.bf16.msra.mxu1 %v1253_v8  ;;  %1122 = vmatprep.subr.bf16.mxu0 %v1304_v1  ;;  %v645_v29 = vrot.slane %v1388_v12, 2  ;;  %v528_v39 = vshrl.u32 %v1388_v12, 16  ;;  %v412_v56 = vrot.slane %v1386_v11, 1  ;;  %v413_v57 = vrot.slane %v1388_v12, 1  ;;  %v1288_v8 = vld [vmem:[%s1597_s1 + $0x120] sm:$0xff]   ;;  %v1292_v12 = vld [vmem:[%s1597_s1 + $0x130] sm:$0xff]  }
  0x15   : > { %1142 = vmatprep.subr.bf16.mxu1 %v1304_v1  ;;  %v207_v18 = vrot.slane %v1398_v15, 1  ;;  %v212_v24 = vrot.slane %v1409_v19, 1  ;;  %v757_v30 = vrot.slane %v1405_v17, 2  ;;  %v758_v32 = vrot.slane %v1398_v15, 3 }
  0x16   : > { %v1437_v31 = vsel %vm643_vm2, %v644_v27, %v645_v29  ;;  %v760_v41 = vrot.slane %v528_v39, 2  ;;  %v761_v42 = vrot.slane %v1409_v19, 3  ;;  %v525_v51 = vrot.slane %v1405_v17, 1 }
  0x17   : > { %1123 = vmatpush3.bf16.msra.mxu0 %v1254_v9  ;;  %v208_v23 = vor.u32 %v207_v18, %v1405_v17  ;;  %v759_v35 = vor.u32 %v758_v32, %v757_v30  ;;  %v526_v52 = vrot.slane %v1398_v15, 2  ;;  %v530_v53 = vrot.slane %v528_v39, 1  ;;  %v1289_v9 = vld [vmem:[%s1597_s1 + $0x160] sm:$0xff]   ;;  %v1295_v15 = vld [vmem:[%s1597_s1 + $0x178] sm:$0xff]  }
  0x18   : > { %1143 = vmatpush3.bf16.msra.mxu1 %v1255_v10  ;;  %1124 = vmatprep.subr.bf16.mxu0 %v1304_v1  ;;  %v762_v45 = vor.u32 %v761_v42, %v760_v41  ;;  %v531_v54 = vrot.slane %v1409_v19, 2  ;;  %v414_v61 = vsel %vm411_vm4, %v412_v56, %v413_v57  ;;  %v1290_v10 = vld [vmem:[%s1597_s1 + $0x128] sm:$0xff]   ;;  %v1056_v41 = vld [vmem:[%s1598_s2] ss:$0 sm:$0xff] }
  0x19   : > { %1144 = vmatprep.subr.bf16.mxu1 %v1304_v1  ;;  %v213_v25 = vsel %vm201_vm1, %v208_v23, %v212_v24  ;;  %v527_v59 = vor.u32 %v526_v52, %v525_v51 }
  0x1a   : > { %v1486_v48 = vsel %vm756_vm3, %v759_v35, %v762_v45  ;;  %v532_v60 = vor.u32 %v531_v54, %v530_v53 }
  0x1b   : > { %1125 = vmatpush3.bf16.msra.mxu0 %v1256_v13  ;;  %v1293_v13 = vld [vmem:[%s1597_s1 + $0x170] sm:$0xff]  }
  0x1c   : > { %1145 = vmatpush3.bf16.msra.mxu1 %v1257_v14  ;;  %1126 = vmatprep.subr.bf16.mxu0 %v1304_v1  ;;  %v533_v63 = vsel %vm524_vm5, %v527_v59, %v532_v60  ;;  %v1294_v14 = vld [vmem:[%s1597_s1 + $0x138] sm:$0xff]  }
  0x1d   : > { %1146 = vmatprep.subr.bf16.mxu1 %v1304_v1 }
  0x1f   : > { %1127 = vmatpush3.bf16.msra.mxu0 %v1258_v16 }
  0x20   : > { %1147 = vmatpush3.bf16.msra.mxu1 %v1259_v20  ;;  %1128 = vmatprep.subr.bf16.mxu0 %v1304_v1 }
  0x21   : > { %1148 = vmatprep.subr.bf16.mxu1 %v1304_v1 }
  0x23   : > { %1129 = vmatpush3.bf16.msra.mxu0 %v1260_v21 }
  0x24   : > { %1149 = vmatpush3.bf16.msra.mxu1 %v1261_v22  ;;  %1154 = vmatprep.subr.bf16.mxu0 %v1304_v1 }
  0x25   : > { %1174 = vmatprep.subr.bf16.mxu1 %v1304_v1 }
  0x26   : > { %1131 = vmatmul.mubr.bf16.vlgmr.msra.gmra.mrb[0].mxu0 %v213_v25 }
  0x27   : > { %1151 = vmatmul.mubr.bf16.vlgmr.msra.gmra.mrb[0].mxu1 %v1386_v11  ;;  %1155 = vmatpush3.bf16.msra.mxu0 %v1264_v26  ;;  %v1291_v11 = vld [vmem:[%s1597_s1 + $0x168] sm:$0xff]  }
  0x28   : > { %1175 = vmatpush3.bf16.msra.mxu1 %v1265_v28  ;;  %1156 = vmatprep.subr.bf16.mxu0 %v1304_v1 }
  0x29   : > { %1176 = vmatprep.subr.bf16.mxu1 %v1304_v1  ;;  %1170 = vmatprep.mubr.msk.bf16.mxu0 %vm1305_vm0, %v1304_v1 }
  0x2a   : > { %1190 = vmatprep.mubr.msk.bf16.mxu1 %vm1305_vm0, %v1304_v1 }
  0x2b   : > { %1157 = vmatpush3.bf16.msra.mxu0 %v1266_v33 }
  0x2c   : > { %1177 = vmatpush3.bf16.msra.mxu1 %v1267_v34  ;;  %1158 = vmatprep.subr.bf16.mxu0 %v1304_v1 }
  0x2d   : > { %1178 = vmatprep.subr.bf16.mxu1 %v1304_v1 }
  0x2f   : > { %1159 = vmatpush3.bf16.msra.mxu0 %v1268_v36 }
  0x30   : > { %1179 = vmatpush3.bf16.msra.mxu1 %v1269_v37  ;;  %1160 = vmatprep.subr.bf16.mxu0 %v1304_v1 }
  0x31   : > { %1180 = vmatprep.subr.bf16.mxu1 %v1304_v1 }
  0x33   : > { %1161 = vmatpush3.bf16.msra.mxu0 %v1270_v38 }
  0x34   : > { %1181 = vmatpush3.bf16.msra.mxu1 %v1271_v40  ;;  %1162 = vmatprep.subr.bf16.mxu0 %v1304_v1 }
  0x35   : > { %1182 = vmatprep.subr.bf16.mxu1 %v1304_v1 }
  0x37   : > { %1163 = vmatpush3.bf16.msra.mxu0 %v1272_v43 }
  0x38   : > { %1183 = vmatpush3.bf16.msra.mxu1 %v1273_v44  ;;  %1164 = vmatprep.subr.bf16.mxu0 %v1304_v1 }
  0x39   : > { %1184 = vmatprep.subr.bf16.mxu1 %v1304_v1 }
  0x3b   : > { %1165 = vmatpush3.bf16.msra.mxu0 %v1274_v46 }
  0x3c   : > { %1185 = vmatpush3.bf16.msra.mxu1 %v1275_v47  ;;  %1166 = vmatprep.subr.bf16.mxu0 %v1304_v1 }
  0x3d   : > { %1186 = vmatprep.subr.bf16.mxu1 %v1304_v1 }
  0x3f   : > { %1167 = vmatpush3.bf16.msra.mxu0 %v1276_v49 }
  0x40   : > { %1187 = vmatpush3.bf16.msra.mxu1 %v1277_v50  ;;  %1168 = vmatprep.subr.bf16.mxu0 %v1304_v1 }
  0x41   : > { %1188 = vmatprep.subr.bf16.mxu1 %v1304_v1 }
  0x43   : > { %1169 = vmatpush3.bf16.msra.mxu0 %v1278_v55 }
  0x44   : > { %1189 = vmatpush3.bf16.msra.mxu1 %v1279_v58  ;;  %1194 = vmatprep.subr.bf16.mxu0 %v1304_v1 }
  0x45   : > { %1214 = vmatprep.subr.bf16.mxu1 %v1304_v1 }
  0x46   : > { %1171 = vmatmul.mubr.bf16.vlgmr.msra.gmra.mrb[4].mxu0 %v414_v61 }
  0x47   : > { %1191 = vmatmul.mubr.bf16.vlgmr.msra.gmra.mrb[4].mxu1 %v533_v63  ;;  %1195 = vmatpush3.bf16.msra.mxu0 %v1280_v62 }
  0x48   : > { %1215 = vmatpush3.bf16.msra.mxu1 %v1281_v0  ;;  %1196 = vmatprep.subr.bf16.mxu0 %v1304_v1 }
  0x49   : > { %1216 = vmatprep.subr.bf16.mxu1 %v1304_v1  ;;  %1210 = vmatprep.mubr.msk.bf16.mxu0 %vm1305_vm0, %v1304_v1 }
  0x4a   : > { %1230 = vmatprep.mubr.msk.bf16.mxu1 %vm1305_vm0, %v1304_v1 }
  0x4b   : > { %1197 = vmatpush3.bf16.msra.mxu0 %v1282_v2 }
  0x4c   : > { %1217 = vmatpush3.bf16.msra.mxu1 %v1283_v3  ;;  %1198 = vmatprep.subr.bf16.mxu0 %v1304_v1 }
  0x4d   : > { %1218 = vmatprep.subr.bf16.mxu1 %v1304_v1 }
  0x4f   : > { %1199 = vmatpush3.bf16.msra.mxu0 %v1284_v4 }
  0x50   : > { %1219 = vmatpush3.bf16.msra.mxu1 %v1285_v5  ;;  %1200 = vmatprep.subr.bf16.mxu0 %v1304_v1 }
  0x51   : > { %1220 = vmatprep.subr.bf16.mxu1 %v1304_v1 }
  0x53   : > { %1201 = vmatpush3.bf16.msra.mxu0 %v1286_v6 }
  0x54   : > { %1221 = vmatpush3.bf16.msra.mxu1 %v1287_v7  ;;  %1202 = vmatprep.subr.bf16.mxu0 %v1304_v1 }
  0x55   : > { %1222 = vmatprep.subr.bf16.mxu1 %v1304_v1 }
  0x57   : > { %1203 = vmatpush3.bf16.msra.mxu0 %v1288_v8  ;;  %v1306_v8 = vmov (!%p1057_p4), 0.0  }
  0x58   : > { %1223 = vmatpush3.bf16.msra.mxu1 %v1289_v9  ;;  %1204 = vmatprep.subr.bf16.mxu0 %v1304_v1  ;;  %889 = vst [vmem:[%s1599_s3] sm:$0x3] (!%p1057_p4), %v1306_v8 }
  0x59   : > { %1224 = vmatprep.subr.bf16.mxu1 %v1304_v1 }
  0x5b   : > { %1205 = vmatpush3.bf16.msra.mxu0 %v1290_v10 }
  0x5c   : > { %1225 = vmatpush3.bf16.msra.mxu1 %v1291_v11  ;;  %1206 = vmatprep.subr.bf16.mxu0 %v1304_v1 }
  0x5d   : > { %1226 = vmatprep.subr.bf16.mxu1 %v1304_v1 }
  0x5f   : > { %1207 = vmatpush3.bf16.msra.mxu0 %v1292_v12 }
  0x60   : > { %1227 = vmatpush3.bf16.msra.mxu1 %v1293_v13  ;;  %1208 = vmatprep.subr.bf16.mxu0 %v1304_v1 }
  0x61   : > { %1228 = vmatprep.subr.bf16.mxu1 %v1304_v1 }
  0x63   : > { %1209 = vmatpush3.bf16.msra.mxu0 %v1294_v14 }
  0x64   : > { %1229 = vmatpush3.bf16.msra.mxu1 %v1295_v15 }
  0x66   : > { %1211 = vmatmul.mubr.bf16.vlgmr.msra.gmra.mrb[8].mxu0 %v1437_v31 }
  0x67   : > { %1231 = vmatmul.mubr.bf16.vlgmr.msra.gmra.mrb[8].mxu1 %v1486_v48 }
  0xf9   : > { %v297_v16 = vpop.f32.mrb[0].mxu0 }
  0xfa   : > { %v387_v17 = vpop.f32.mrb[0].mxu1  ;;  %v1132_v18 = vpop.f32.mrb[1].mxu0 }
  0xfb   : > { %v388_v19 = vadd.f32 %v387_v17, %v297_v16  ;;  %v1152_v20 = vpop.f32.mrb[1].mxu1  ;;  %v300_v21 = vpop.f32.mrb[2].mxu0 }
  0xfc   : > { %v390_v22 = vpop.f32.mrb[2].mxu1  ;;  %v1133_v23 = vpop.f32.mrb[3].mxu0 }
  0xfd   : > { %v391_v24 = vadd.f32 %v390_v22, %v300_v21  ;;  %v1153_v25 = vpop.f32.mrb[3].mxu1 }
 0x119   : > { %v498_v26 = vpop.f32.mrb[4].mxu0 }
 0x11a   : > { %v505_v27 = vadd.f32 %v498_v26, %v388_v19  ;;  %v617_v28 = vpop.f32.mrb[4].mxu1  ;;  %v1172_v1 = vpop.f32.mrb[5].mxu0 }
 0x11b   : > { %v1192_v29 = vpop.f32.mrb[5].mxu1  ;;  %v501_v30 = vpop.f32.mrb[6].mxu0 }
 0x11c   : > { %v624_v32 = vadd.f32 %v617_v28, %v505_v27  ;;  %v506_v31 = vadd.f32 %v501_v30, %v391_v24  ;;  %v620_v33 = vpop.f32.mrb[6].mxu1  ;;  %v1173_v34 = vpop.f32.mrb[7].mxu0 }
 0x11d   : > { %v1193_v35 = vpop.f32.mrb[7].mxu1 }
 0x11e   : > { %v625_v36 = vadd.f32 %v620_v33, %v506_v31 }
 0x139   : > { %v730_v37 = vpop.f32.mrb[8].mxu0 }
 0x13a   : > { %v737_v38 = vadd.f32 %v730_v37, %v624_v32  ;;  %v847_v39 = vpop.f32.mrb[8].mxu1  ;;  %v1212_v40 = vpop.f32.mrb[9].mxu0 }
 0x13b   : > { %v1232_v42 = vpop.f32.mrb[9].mxu1  ;;  %v733_v43 = vpop.f32.mrb[10].mxu0 }
 0x13c   : > { %v854_v44 = vadd.f32 %v847_v39, %v737_v38  ;;  %v738_v45 = vadd.f32 %v733_v43, %v625_v36  ;;  %v850_v46 = vpop.f32.mrb[10].mxu1  ;;  %v1213_v47 = vpop.f32.mrb[11].mxu0 }
 0x13d   : > { %v1233_v48 = vpop.f32.mrb[11].mxu1 }
 0x13e   : > { %v863_v49 = vadd.f32 %v1056_v41, %v854_v44  ;;  %v855_v50 = vadd.f32 %v850_v46, %v738_v45 }
 0x140   : > { %v865_v51 = vmax.f32 %v863_v49, 0.0  ;;  %v864_v52 = vadd.f32 %v1056_v41, %v855_v50 }
 0x142   : > { %v866_v53 = vmax.f32 %v864_v52, 0.0  ;;  %v874_v54 = vmul.f32 %v865_v51, %v865_v51 }
 0x144   : > { %v867_v55 = vadd.f32 %v866_v53, %v865_v51  ;;  %v875_v56 = vmul.f32 %v866_v53, %v866_v53 }
 0x146   : > { %v868_v57 = vrot.slane %v867_v55, 4  ;;  %v876_v58 = vadd.f32 %v875_v56, %v874_v54 }
 0x148   : > { %v869_v59 = vadd.f32 %v868_v57, %v867_v55  ;;  %v877_v60 = vrot.slane %v876_v58, 4 }
 0x14a   : > { %v870_v61 = vrot.slane %v869_v59, 2  ;;  %v878_v62 = vadd.f32 %v877_v60, %v876_v58 }
 0x14c   : > { %v871_v63 = vadd.f32 %v870_v61, %v869_v59  ;;  %v879_v0 = vrot.slane %v878_v62, 2 }
 0x14e   : > { %v872_v2 = vrot.slane %v871_v63, 1  ;;  %v880_v3 = vadd.f32 %v879_v0, %v878_v62  ;;  %888 = sbr.rel (%p1057_p4) target bundleno = 341 (0x155), region = 36 }
 0x150   : > { %v881_v4 = vrot.slane %v880_v3, 1  ;;  %v873_v5 = vadd.f32 %v872_v2, %v871_v63 }
 0x152   : > { %v882_v6 = vadd.f32 %v881_v4, %v880_v3 }
 0x154   : > { %v884_v7 = vsel %vm883_vm6, %v873_v5, %v882_v6 }
 0x155 PF: > { %v890_v9 = vld [vmem:[%s1599_s3] sm:$0x3] }
 0x156   : > { %v891_v10 = vadd.f32 %v890_v9, %v884_v7 }
 0x158   : > { %892 = vst [vmem:[%s1599_s3] sm:$0x3] %v891_v10 }
 0x159 PF: > { %s13_s12 = sadd.s32 1, %s1302_s12  }
 0x15a   : > { %p10_p5 = scmp.ge.s32.totalorder %s13_s12, 4  }
 0x15c   :  { %12 = sbr.rel (!%p10_p5) target bundleno = 1 (0x1), region = 67 }

// kernel: duck_block_forward.75
= control target key start
LH: loop header
LB: loop body
LE: loop exit
PB: predicated region body
PF: predicated region fallthrough
CT: control target
= control target key end

     0   :  { %s1430_s18 = smov 0   ;;  %s1698_s0 = inlined_call_operand.vmem [shape: bf16[2,21,128], index: 0, kind: input, shape index: {}]   ;;  %s1699_s1 = inlined_call_operand.vmem [shape: bf16[6,128,128], index: 1, kind: input, shape index: {}]   ;;  %s1700_s2 = inlined_call_operand.vmem [shape: f32[1,128], index: 2, kind: input, shape index: {}]   ;;  %s1701_s3 = inlined_call_operand.vmem [shape: f32[1,128], index: 3, kind: input, shape index: {}]   ;;  %s1702_s4 = inlined_call_operand.vmem [shape: f32[1,128], index: 4, kind: input, shape index: {}]   ;;  %s1703_s5 = inlined_call_operand.vmem [shape: f32[2,16,128], index: 5, kind: output, shape index: {}]  }
   0x1 LB: > { %s1011_s19 = sadd.s32 4294967295, %s1396_s18   ;;  %p1015_p0 = scmp.ge.s32.totalorder %s1396_s18, 1  ;;  %s1396_s18 = sphi %s1430_s18, %s15_s18  }
   0x2   : > { %p187_p1 = scmp.lt.s32.totalorder %s1396_s18, 3 }
   0x4   : > { %p188_p2 = pnand %p1015_p0, %p187_p1 }
   0x5   : > { %v1340_v0 = vld [vmem:[%s1699_s1 + $0x40] sm:$0xff] (!%p188_p2)   ;;  %v1398_v1 = vmov (!%p188_p2), 0.0   ;;  %v1342_v3 = vld [vmem:[%s1699_s1 + $0x48] sm:$0xff] (!%p188_p2)   ;;  %vm1399_vm0 = vmmov (!%p188_p2), 0   ;;  %p215_p3 = scmp.lt.s32.totalorder (!%p188_p2), %s1011_s19, 1  ;;  %v1344_v5 = vld [vmem:[%s1699_s1 + $0x50] sm:$0xff] (!%p188_p2)  }
   0x6   : > { %191 = sbr.rel (%p188_p2) target bundleno = 329 (0x149), region = 40  ;;  %1209 = vmatprep.subr.bf16.mxu0 (!%p188_p2), %v1398_v1  ;;  %1229 = vmatprep.subr.bf16.mxu1 (!%p188_p2), %v1398_v1  ;;  %v1341_v2 = vld [vmem:[%s1699_s1] sm:$0xff] (!%p188_p2)   ;;  %v1343_v4 = vld [vmem:[%s1699_s1 + $0x8] sm:$0xff] (!%p188_p2)   ;;  %v1345_v6 = vld [vmem:[%s1699_s1 + $0x10] sm:$0xff] (!%p188_p2)   ;;  %vm270_vm1 = vsmask.f32 (!%p188_p2), 7424 }
   0x7   : > { %1210 = vmatpush3.bf16.msra.mxu0 (!%p188_p2), %v1340_v0  ;;  %1225 = vmatprep.mubr.msk.bf16.mxu0 (!%p188_p2), %vm1399_vm0, %v1398_v1  ;;  %v1346_v7 = vld [vmem:[%s1699_s1 + $0x58] sm:$0xff] (!%p188_p2)   ;;  %v1348_v9 = vld [vmem:[%s1699_s1 + $0x60] sm:$0xff] (!%p188_p2)   ;;  %v1350_v13 = vld [vmem:[%s1699_s1 + $0x68] sm:$0xff] (!%p188_p2)   ;;  %vm712_vm2 = vcmask (!%p188_p2), 1045504   ;;  %vm825_vm3 = vsmask.f32 (!%p188_p2), 5376 }
   0x8   : > { %1230 = vmatpush3.bf16.msra.mxu1 (!%p188_p2), %v1341_v2  ;;  %1211 = vmatprep.subr.bf16.mxu0 (!%p188_p2), %v1398_v1  ;;  %v1347_v8 = vld [vmem:[%s1699_s1 + $0x18] sm:$0xff] (!%p188_p2)   ;;  %v1349_v10 = vld [vmem:[%s1699_s1 + $0x20] sm:$0xff] (!%p188_p2)   ;;  %v1351_v14 = vld [vmem:[%s1699_s1 + $0x28] sm:$0xff] (!%p188_p2)   ;;  %vm480_vm4 = vcmask (!%p188_p2), 1046528   ;;  %vm593_vm5 = vsmask.f32 (!%p188_p2), 6400 }
   0x9   : > { %1231 = vmatprep.subr.bf16.mxu1 (!%p188_p2), %v1398_v1  ;;  %1245 = vmatprep.mubr.msk.bf16.mxu1 (!%p188_p2), %vm1399_vm0, %v1398_v1  ;;  %v1352_v16 = vld [vmem:[%s1699_s1 + $0x70] sm:$0xff] (!%p188_p2)   ;;  %v1354_v21 = vld [vmem:[%s1699_s1 + $0x78] sm:$0xff] (!%p188_p2)   ;;  %v1358_v26 = vld [vmem:[%s1699_s1 + $0x80] sm:$0xff] (!%p188_p2)  }
   0xa   : > { %v1353_v20 = vld [vmem:[%s1699_s1 + $0x30] sm:$0xff] (!%p188_p2)   ;;  %v1355_v22 = vld [vmem:[%s1699_s1 + $0x38] sm:$0xff] (!%p188_p2)   ;;  %v1359_v28 = vld [vmem:[%s1699_s1 + $0xc0] sm:$0xff] (!%p188_p2)  }
   0xb   : > { %1212 = vmatpush3.bf16.msra.mxu0 (!%p188_p2), %v1342_v3  ;;  %v1360_v33 = vld [vmem:[%s1699_s1 + $0x88] sm:$0xff] (!%p188_p2)   ;;  %v1362_v36 = vld [vmem:[%s1699_s1 + $0x90] sm:$0xff] (!%p188_p2)   ;;  %v1364_v38 = vld [vmem:[%s1699_s1 + $0x98] sm:$0xff] (!%p188_p2)  }
   0xc   : > { %1232 = vmatpush3.bf16.msra.mxu1 (!%p188_p2), %v1343_v4  ;;  %1213 = vmatprep.subr.bf16.mxu0 (!%p188_p2), %v1398_v1  ;;  %v1361_v34 = vld [vmem:[%s1699_s1 + $0xc8] sm:$0xff] (!%p188_p2)   ;;  %v1363_v37 = vld [vmem:[%s1699_s1 + $0xd0] sm:$0xff] (!%p188_p2)   ;;  %v1365_v40 = vld [vmem:[%s1699_s1 + $0xd8] sm:$0xff] (!%p188_p2)  }
   0xd   : > { %s1705_s19 = smov (!%p215_p3, %s1011_s19), 1  ;;  %1233 = vmatprep.subr.bf16.mxu1 %v1398_v1  ;;  %v1366_v43 = vld [vmem:[%s1699_s1 + $0xa0] sm:$0xff]   ;;  %v1368_v46 = vld [vmem:[%s1699_s1 + $0xa8] sm:$0xff]   ;;  %v1370_v49 = vld [vmem:[%s1699_s1 + $0xb0] sm:$0xff]  }
   0xe   : > { %s1329_s9 = smul.u32 12, %s1705_s19  ;;  %v1367_v44 = vld [vmem:[%s1699_s1 + $0xe0] sm:$0xff]   ;;  %v1369_v47 = vld [vmem:[%s1699_s1 + $0xe8] sm:$0xff]   ;;  %v1371_v50 = vld [vmem:[%s1699_s1 + $0xf0] sm:$0xff]   ;;  %s1154_s7 = sshll.u32 %s1705_s19, 4 }
   0xf   : > { %1214 = vmatpush3.bf16.msra.mxu0 %v1344_v5  ;;  %v1372_v55 = vld [vmem:[%s1699_s1 + $0xb8] sm:$0xff]   ;;  %v1374_v62 = vld [vmem:[%s1699_s1 + $0x100] sm:$0xff]   ;;  %v1376_v2 = vld [vmem:[%s1699_s1 + $0x108] sm:$0xff]   ;;  %s224_s12 = scalar_lea.vmem %s1703_s5, %s1154_s7 }
  0x10   : > { %1234 = vmatpush3.bf16.msra.mxu1 %v1345_v6  ;;  %1215 = vmatprep.subr.bf16.mxu0 %v1398_v1  ;;  %s219_s16 = scalar_lea.vmem %s1698_s0, %s1329_s9  ;;  %v1373_v58 = vld [vmem:[%s1699_s1 + $0xf8] sm:$0xff]   ;;  %v1375_v0 = vld [vmem:[%s1699_s1 + $0x140] sm:$0xff]   ;;  %v1377_v3 = vld [vmem:[%s1699_s1 + $0x148] sm:$0xff]  }
  0x11   : > { %1235 = vmatprep.subr.bf16.mxu1 %v1398_v1  ;;  %v1488_v11 = vld [vmem:[%s219_s16] sm:$0xff]   ;;  %v1490_v12 = vld [vmem:[%s219_s16 + $0x8] ss:$0 sps:$4 sm:$0x77]   ;;  %v1378_v4 = vld [vmem:[%s1699_s1 + $0x110] sm:$0xff]  }
  0x12   : > { %v1500_v15 = vshll.u32 %v1488_v11, 16  ;;  %v1507_v17 = vshrl.u32 %v1488_v11, 16  ;;  %v1511_v19 = vshll.u32 %v1490_v12, 16  ;;  %v713_v27 = vrot.slane %v1488_v11, 2  ;;  %v1379_v5 = vld [vmem:[%s1699_s1 + $0x150] sm:$0xff]   ;;  %v1380_v6 = vld [vmem:[%s1699_s1 + $0x118] sm:$0xff]  }
  0x13   : > { %1216 = vmatpush3.bf16.msra.mxu0 %v1346_v7  ;;  %v714_v29 = vrot.slane %v1490_v12, 2  ;;  %v597_v39 = vshrl.u32 %v1490_v12, 16  ;;  %v481_v56 = vrot.slane %v1488_v11, 1  ;;  %v482_v57 = vrot.slane %v1490_v12, 1  ;;  %v1381_v7 = vld [vmem:[%s1699_s1 + $0x158] sm:$0xff]   ;;  %v1386_v12 = vld [vmem:[%s1699_s1 + $0x130] sm:$0xff]  }
  0x14   : > { %1236 = vmatpush3.bf16.msra.mxu1 %v1347_v8  ;;  %1217 = vmatprep.subr.bf16.mxu0 %v1398_v1  ;;  %v276_v18 = vrot.slane %v1500_v15, 1  ;;  %v281_v24 = vrot.slane %v1511_v19, 1  ;;  %v826_v30 = vrot.slane %v1507_v17, 2  ;;  %v827_v32 = vrot.slane %v1500_v15, 3  ;;  %v1382_v8 = vld [vmem:[%s1699_s1 + $0x120] sm:$0xff]  }
  0x15   : > { %1237 = vmatprep.subr.bf16.mxu1 %v1398_v1  ;;  %v1539_v31 = vsel %vm712_vm2, %v713_v27, %v714_v29  ;;  %v829_v41 = vrot.slane %v597_v39, 2  ;;  %v830_v42 = vrot.slane %v1511_v19, 3  ;;  %v594_v51 = vrot.slane %v1507_v17, 1 }
  0x16   : > { %v277_v23 = vor.u32 %v276_v18, %v1507_v17  ;;  %v828_v35 = vor.u32 %v827_v32, %v826_v30  ;;  %v595_v52 = vrot.slane %v1500_v15, 2  ;;  %v599_v53 = vrot.slane %v597_v39, 1  ;;  %v1389_v15 = vld [vmem:[%s1699_s1 + $0x178] sm:$0xff]  }
  0x17   : > { %1218 = vmatpush3.bf16.msra.mxu0 %v1348_v9  ;;  %v831_v45 = vor.u32 %v830_v42, %v829_v41  ;;  %v600_v54 = vrot.slane %v1511_v19, 2  ;;  %v483_v61 = vsel %vm480_vm4, %v481_v56, %v482_v57  ;;  %v1383_v9 = vld [vmem:[%s1699_s1 + $0x160] sm:$0xff]  }
  0x18   : > { %1238 = vmatpush3.bf16.msra.mxu1 %v1349_v10  ;;  %1219 = vmatprep.subr.bf16.mxu0 %v1398_v1  ;;  %v282_v25 = vsel %vm270_vm1, %v277_v23, %v281_v24  ;;  %v596_v59 = vor.u32 %v595_v52, %v594_v51  ;;  %v1384_v10 = vld [vmem:[%s1699_s1 + $0x128] sm:$0xff]   ;;  %v1149_v41 = vld [vmem:[%s1700_s2] ss:$0 sm:$0xff] }
  0x19   : > { %1239 = vmatprep.subr.bf16.mxu1 %v1398_v1  ;;  %v1588_v48 = vsel %vm825_vm3, %v828_v35, %v831_v45  ;;  %v601_v60 = vor.u32 %v600_v54, %v599_v53  ;;  %v1150_v51 = vld [vmem:[%s1701_s3] ss:$0 sm:$0xff] }
  0x1a   : > { %v1151_v54 = vld [vmem:[%s1702_s4] ss:$0 sm:$0xff] }
  0x1b   : > { %1220 = vmatpush3.bf16.msra.mxu0 %v1350_v13  ;;  %v602_v63 = vsel %vm593_vm5, %v596_v59, %v601_v60  ;;  %v1387_v13 = vld [vmem:[%s1699_s1 + $0x170] sm:$0xff]  }
  0x1c   : > { %1240 = vmatpush3.bf16.msra.mxu1 %v1351_v14  ;;  %1221 = vmatprep.subr.bf16.mxu0 %v1398_v1  ;;  %v1388_v14 = vld [vmem:[%s1699_s1 + $0x138] sm:$0xff]  }
  0x1d   : > { %1241 = vmatprep.subr.bf16.mxu1 %v1398_v1 }
  0x1f   : > { %1222 = vmatpush3.bf16.msra.mxu0 %v1352_v16 }
  0x20   : > { %1242 = vmatpush3.bf16.msra.mxu1 %v1353_v20  ;;  %1223 = vmatprep.subr.bf16.mxu0 %v1398_v1 }
  0x21   : > { %1243 = vmatprep.subr.bf16.mxu1 %v1398_v1 }
  0x23   : > { %1224 = vmatpush3.bf16.msra.mxu0 %v1354_v21 }
  0x24   : > { %1244 = vmatpush3.bf16.msra.mxu1 %v1355_v22  ;;  %1249 = vmatprep.subr.bf16.mxu0 %v1398_v1 }
  0x25   : > { %1269 = vmatprep.subr.bf16.mxu1 %v1398_v1 }
  0x26   : > { %1226 = vmatmul.mubr.bf16.vlgmr.msra.gmra.mrb[0].mxu0 %v282_v25 }
  0x27   : > { %1246 = vmatmul.mubr.bf16.vlgmr.msra.gmra.mrb[0].mxu1 %v1488_v11  ;;  %1250 = vmatpush3.bf16.msra.mxu0 %v1358_v26  ;;  %v1385_v11 = vld [vmem:[%s1699_s1 + $0x168] sm:$0xff]  }
  0x28   : > { %1270 = vmatpush3.bf16.msra.mxu1 %v1359_v28  ;;  %1251 = vmatprep.subr.bf16.mxu0 %v1398_v1 }
  0x29   : > { %1271 = vmatprep.subr.bf16.mxu1 %v1398_v1  ;;  %1265 = vmatprep.mubr.msk.bf16.mxu0 %vm1399_vm0, %v1398_v1 }
  0x2a   : > { %1285 = vmatprep.mubr.msk.bf16.mxu1 %vm1399_vm0, %v1398_v1 }
  0x2b   : > { %1252 = vmatpush3.bf16.msra.mxu0 %v1360_v33 }
  0x2c   : > { %1272 = vmatpush3.bf16.msra.mxu1 %v1361_v34  ;;  %1253 = vmatprep.subr.bf16.mxu0 %v1398_v1 }
  0x2d   : > { %1273 = vmatprep.subr.bf16.mxu1 %v1398_v1 }
  0x2f   : > { %1254 = vmatpush3.bf16.msra.mxu0 %v1362_v36 }
  0x30   : > { %1274 = vmatpush3.bf16.msra.mxu1 %v1363_v37  ;;  %1255 = vmatprep.subr.bf16.mxu0 %v1398_v1 }
  0x31   : > { %1275 = vmatprep.subr.bf16.mxu1 %v1398_v1 }
  0x33   : > { %1256 = vmatpush3.bf16.msra.mxu0 %v1364_v38 }
  0x34   : > { %1276 = vmatpush3.bf16.msra.mxu1 %v1365_v40  ;;  %1257 = vmatprep.subr.bf16.mxu0 %v1398_v1 }
  0x35   : > { %1277 = vmatprep.subr.bf16.mxu1 %v1398_v1 }
  0x37   : > { %1258 = vmatpush3.bf16.msra.mxu0 %v1366_v43 }
  0x38   : > { %1278 = vmatpush3.bf16.msra.mxu1 %v1367_v44  ;;  %1259 = vmatprep.subr.bf16.mxu0 %v1398_v1 }
  0x39   : > { %1279 = vmatprep.subr.bf16.mxu1 %v1398_v1 }
  0x3b   : > { %1260 = vmatpush3.bf16.msra.mxu0 %v1368_v46 }
  0x3c   : > { %1280 = vmatpush3.bf16.msra.mxu1 %v1369_v47  ;;  %1261 = vmatprep.subr.bf16.mxu0 %v1398_v1 }
  0x3d   : > { %1281 = vmatprep.subr.bf16.mxu1 %v1398_v1 }
  0x3f   : > { %1262 = vmatpush3.bf16.msra.mxu0 %v1370_v49 }
  0x40   : > { %1282 = vmatpush3.bf16.msra.mxu1 %v1371_v50  ;;  %1263 = vmatprep.subr.bf16.mxu0 %v1398_v1 }
  0x41   : > { %1283 = vmatprep.subr.bf16.mxu1 %v1398_v1 }
  0x43   : > { %1264 = vmatpush3.bf16.msra.mxu0 %v1372_v55 }
  0x44   : > { %1284 = vmatpush3.bf16.msra.mxu1 %v1373_v58  ;;  %1289 = vmatprep.subr.bf16.mxu0 %v1398_v1 }
  0x45   : > { %1309 = vmatprep.subr.bf16.mxu1 %v1398_v1 }
  0x46   : > { %1266 = vmatmul.mubr.bf16.vlgmr.msra.gmra.mrb[4].mxu0 %v483_v61 }
  0x47   : > { %1286 = vmatmul.mubr.bf16.vlgmr.msra.gmra.mrb[4].mxu1 %v602_v63  ;;  %1290 = vmatpush3.bf16.msra.mxu0 %v1374_v62 }
  0x48   : > { %1310 = vmatpush3.bf16.msra.mxu1 %v1375_v0  ;;  %1291 = vmatprep.subr.bf16.mxu0 %v1398_v1 }
  0x49   : > { %1311 = vmatprep.subr.bf16.mxu1 %v1398_v1  ;;  %1305 = vmatprep.mubr.msk.bf16.mxu0 %vm1399_vm0, %v1398_v1 }
  0x4a   : > { %1325 = vmatprep.mubr.msk.bf16.mxu1 %vm1399_vm0, %v1398_v1 }
  0x4b   : > { %1292 = vmatpush3.bf16.msra.mxu0 %v1376_v2 }
  0x4c   : > { %1312 = vmatpush3.bf16.msra.mxu1 %v1377_v3  ;;  %1293 = vmatprep.subr.bf16.mxu0 %v1398_v1 }
  0x4d   : > { %1313 = vmatprep.subr.bf16.mxu1 %v1398_v1 }
  0x4f   : > { %1294 = vmatpush3.bf16.msra.mxu0 %v1378_v4 }
  0x50   : > { %1314 = vmatpush3.bf16.msra.mxu1 %v1379_v5  ;;  %1295 = vmatprep.subr.bf16.mxu0 %v1398_v1 }
  0x51   : > { %1315 = vmatprep.subr.bf16.mxu1 %v1398_v1 }
  0x53   : > { %1296 = vmatpush3.bf16.msra.mxu0 %v1380_v6 }
  0x54   : > { %1316 = vmatpush3.bf16.msra.mxu1 %v1381_v7  ;;  %1297 = vmatprep.subr.bf16.mxu0 %v1398_v1 }
  0x55   : > { %1317 = vmatprep.subr.bf16.mxu1 %v1398_v1 }
  0x57   : > { %1298 = vmatpush3.bf16.msra.mxu0 %v1382_v8 }
  0x58   : > { %1318 = vmatpush3.bf16.msra.mxu1 %v1383_v9  ;;  %1299 = vmatprep.subr.bf16.mxu0 %v1398_v1 }
  0x59   : > { %1319 = vmatprep.subr.bf16.mxu1 %v1398_v1 }
  0x5b   : > { %1300 = vmatpush3.bf16.msra.mxu0 %v1384_v10 }
  0x5c   : > { %1320 = vmatpush3.bf16.msra.mxu1 %v1385_v11  ;;  %1301 = vmatprep.subr.bf16.mxu0 %v1398_v1 }
  0x5d   : > { %1321 = vmatprep.subr.bf16.mxu1 %v1398_v1 }
  0x5f   : > { %1302 = vmatpush3.bf16.msra.mxu0 %v1386_v12 }
  0x60   : > { %1322 = vmatpush3.bf16.msra.mxu1 %v1387_v13  ;;  %1303 = vmatprep.subr.bf16.mxu0 %v1398_v1 }
  0x61   : > { %1323 = vmatprep.subr.bf16.mxu1 %v1398_v1 }
  0x63   : > { %1304 = vmatpush3.bf16.msra.mxu0 %v1388_v14 }
  0x64   : > { %1324 = vmatpush3.bf16.msra.mxu1 %v1389_v15 }
  0x66   : > { %1306 = vmatmul.mubr.bf16.vlgmr.msra.gmra.mrb[8].mxu0 %v1539_v31 }
  0x67   : > { %1326 = vmatmul.mubr.bf16.vlgmr.msra.gmra.mrb[8].mxu1 %v1588_v48 }
  0xf9   : > { %v366_v16 = vpop.f32.mrb[0].mxu0 }
  0xfa   : > { %v456_v17 = vpop.f32.mrb[0].mxu1  ;;  %v1227_v18 = vpop.f32.mrb[1].mxu0 }
  0xfb   : > { %v457_v19 = vadd.f32 %v456_v17, %v366_v16  ;;  %v1247_v20 = vpop.f32.mrb[1].mxu1  ;;  %v369_v21 = vpop.f32.mrb[2].mxu0 }
  0xfc   : > { %v459_v22 = vpop.f32.mrb[2].mxu1  ;;  %v1228_v23 = vpop.f32.mrb[3].mxu0 }
  0xfd   : > { %v460_v24 = vadd.f32 %v459_v22, %v369_v21  ;;  %v1248_v25 = vpop.f32.mrb[3].mxu1 }
 0x119   : > { %v567_v26 = vpop.f32.mrb[4].mxu0 }
 0x11a   : > { %v574_v27 = vadd.f32 %v567_v26, %v457_v19  ;;  %v686_v28 = vpop.f32.mrb[4].mxu1  ;;  %v1267_v1 = vpop.f32.mrb[5].mxu0 }
 0x11b   : > { %v1287_v29 = vpop.f32.mrb[5].mxu1  ;;  %v570_v30 = vpop.f32.mrb[6].mxu0 }
 0x11c   : > { %v693_v32 = vadd.f32 %v686_v28, %v574_v27  ;;  %v575_v31 = vadd.f32 %v570_v30, %v460_v24  ;;  %v689_v33 = vpop.f32.mrb[6].mxu1  ;;  %v1268_v34 = vpop.f32.mrb[7].mxu0 }
 0x11d   : > { %v1288_v35 = vpop.f32.mrb[7].mxu1 }
 0x11e   : > { %v694_v36 = vadd.f32 %v689_v33, %v575_v31 }
 0x139   : > { %v799_v37 = vpop.f32.mrb[8].mxu0 }
 0x13a   : > { %v806_v38 = vadd.f32 %v799_v37, %v693_v32  ;;  %v916_v39 = vpop.f32.mrb[8].mxu1  ;;  %v1307_v40 = vpop.f32.mrb[9].mxu0 }
 0x13b   : > { %v1327_v42 = vpop.f32.mrb[9].mxu1  ;;  %v802_v43 = vpop.f32.mrb[10].mxu0 }
 0x13c   : > { %v923_v44 = vadd.f32 %v916_v39, %v806_v38  ;;  %v807_v45 = vadd.f32 %v802_v43, %v694_v36  ;;  %v919_v46 = vpop.f32.mrb[10].mxu1  ;;  %v1308_v47 = vpop.f32.mrb[11].mxu0 }
 0x13d   : > { %v1328_v48 = vpop.f32.mrb[11].mxu1 }
 0x13e   : > { %v932_v49 = vadd.f32 %v1149_v41, %v923_v44  ;;  %v924_v50 = vadd.f32 %v919_v46, %v807_v45 }
 0x140   : > { %v934_v52 = vmax.f32 %v932_v49, 0.0  ;;  %v933_v53 = vadd.f32 %v1149_v41, %v924_v50 }
 0x142   : > { %v943_v55 = vmul.f32 %v1150_v51, %v934_v52  ;;  %v935_v56 = vmax.f32 %v933_v53, 0.0 }
 0x144   : > { %v952_v57 = vadd.f32 %v1151_v54, %v943_v55  ;;  %v944_v58 = vmul.f32 %v1150_v51, %v935_v56 }
 0x146   : > { %954 = vst [vmem:[%s224_s12] sm:$0xff] %v952_v57  ;;  %v953_v59 = vadd.f32 %v1151_v54, %v944_v58 }
 0x148   : > { %955 = vst [vmem:[%s224_s12 + $0x8] sm:$0xff] %v953_v59 }
 0x149 PF: > { %s15_s18 = sadd.s32 1, %s1396_s18  }
 0x14a   : > { %p12_p4 = scmp.ge.s32.totalorder %s15_s18, 4  }
 0x14c   :  { %14 = sbr.rel (!%p12_p4) target bundleno = 1 (0x1), region = 75 }

// kernel: duck_block_forward.64
= control target key start
LH: loop header
LB: loop body
LE: loop exit
PB: predicated region body
PF: predicated region fallthrough
CT: control target
= control target key end

     0   :  { %s794_s12 = smov 0   ;;  %s957_s0 = inlined_call_operand.vmem [shape: bf16[2,20,160], index: 0, kind: input, shape index: {}]   ;;  %s958_s1 = inlined_call_operand.vmem [shape: bf16[3,160,128], index: 1, kind: input, shape index: {}]   ;;  %s959_s2 = inlined_call_operand.vmem [shape: f32[1,128], index: 2, kind: input, shape index: {}]   ;;  %s960_s3 = inlined_call_operand.vmem [shape: f32[2,128], index: 3, kind: output, shape index: {}]  }
   0x1 LB: > { %s800_s13 = sadd.s32 4294967295, %s770_s12   ;;  %p635_p0 = scmp.ge.s32.totalorder %s770_s12, 1  ;;  %s770_s12 = sphi %s794_s12, %s13_s12  }
   0x2   : > { %p132_p1 = scmp.lt.s32.totalorder %s770_s12, 3 }
   0x4   : > { %p133_p2 = pnand %p635_p0, %p132_p1 }
   0x5   : > { %v729_v0 = vld [vmem:[%s958_s1 + $0x50] sm:$0xff] (!%p133_p2)   ;;  %v772_v1 = vmov (!%p133_p2), 0   ;;  %v730_v2 = vld [vmem:[%s958_s1] sm:$0xff] (!%p133_p2)   ;;  %v731_v3 = vld [vmem:[%s958_s1 + $0x58] sm:$0xff] (!%p133_p2)   ;;  %p151_p3 = scmp.lt.s32.totalorder (!%p133_p2), %s800_s13, 1  ;;  %vm282_vm0 = vcmask (!%p133_p2), 261120  }
   0x6   : > { %136 = sbr.rel (%p133_p2) target bundleno = 327 (0x147), region = 32  ;;  %286 = vmatprep.subr.bf16.mxu0 (!%p133_p2), %v772_v1  ;;  %391 = vmatprep.subr.bf16.mxu1 (!%p133_p2), %v772_v1  ;;  %v732_v4 = vld [vmem:[%s958_s1 + $0x8] sm:$0xff] (!%p133_p2)   ;;  %v733_v5 = vld [vmem:[%s958_s1 + $0x60] sm:$0xff] (!%p133_p2)   ;;  %v734_v6 = vld [vmem:[%s958_s1 + $0x10] sm:$0xff] (!%p133_p2)   ;;  %vm214_vm1 = vcmask (!%p133_p2), 1046528   ;;  %vm453_vm2 = vcmask (!%p133_p2), 1045504  }
   0x7   : > { %287 = vmatpush1.bf16.msra.mxu0 (!%p133_p2), %v729_v0  ;;  %392 = vmatpush1.bf16.msra.mxu1 (!%p133_p2), %v730_v2  ;;  %v735_v7 = vld [vmem:[%s958_s1 + $0x68] sm:$0xff] (!%p133_p2)   ;;  %v736_v8 = vld [vmem:[%s958_s1 + $0x18] sm:$0xff] (!%p133_p2)   ;;  %v737_v9 = vld [vmem:[%s958_s1 + $0x70] sm:$0xff] (!%p133_p2)   ;;  %vm594_vm3 = vcmask (!%p133_p2), 1040384   ;;  %p715_p4 = scmp.ne.s32.totalorder (!%p133_p2), %s800_s13, 0 }
   0x8   : > { %288 = vmatprep.subr.bf16.mxu0 (!%p133_p2), %v772_v1  ;;  %393 = vmatprep.subr.bf16.mxu1 (!%p133_p2), %v772_v1  ;;  %v738_v10 = vld [vmem:[%s958_s1 + $0x20] sm:$0xff] (!%p133_p2)   ;;  %v739_v11 = vld [vmem:[%s958_s1 + $0x78] sm:$0xff] (!%p133_p2)   ;;  %v740_v12 = vld [vmem:[%s958_s1 + $0x28] sm:$0xff] (!%p133_p2)  }
   0x9   : > { %v741_v16 = vld [vmem:[%s958_s1 + $0x80] sm:$0xff] (!%p133_p2)   ;;  %v742_v17 = vld [vmem:[%s958_s1 + $0x30] sm:$0xff] (!%p133_p2)   ;;  %v743_v21 = vld [vmem:[%s958_s1 + $0x88] sm:$0xff] (!%p133_p2)  }
   0xa   : > { %v744_v22 = vld [vmem:[%s958_s1 + $0x38] sm:$0xff] (!%p133_p2)   ;;  %v745_v23 = vld [vmem:[%s958_s1 + $0x90] sm:$0xff] (!%p133_p2)   ;;  %v746_v26 = vld [vmem:[%s958_s1 + $0x40] sm:$0xff] (!%p133_p2)  }
   0xb   : > { %289 = vmatpush1.bf16.msra.mxu0 (!%p133_p2), %v731_v3  ;;  %394 = vmatpush1.bf16.msra.mxu1 (!%p133_p2), %v732_v4  ;;  %v747_v27 = vld [vmem:[%s958_s1 + $0x98] sm:$0xff] (!%p133_p2)   ;;  %v748_v30 = vld [vmem:[%s958_s1 + $0x48] sm:$0xff] (!%p133_p2)   ;;  %v754_v34 = vld [vmem:[%s958_s1 + $0xa0] sm:$0xff] (!%p133_p2)  }
   0xc   : > { %290 = vmatprep.subr.bf16.mxu0 (!%p133_p2), %v772_v1  ;;  %395 = vmatprep.subr.bf16.mxu1 (!%p133_p2), %v772_v1  ;;  %v755_v36 = vld [vmem:[%s958_s1 + $0xa8] sm:$0xff] (!%p133_p2)   ;;  %v756_v37 = vld [vmem:[%s958_s1 + $0xb0] sm:$0xff] (!%p133_p2)   ;;  %v757_v38 = vld [vmem:[%s958_s1 + $0xb8] sm:$0xff] (!%p133_p2)  }
   0xd   : > { %s152_s26 = scalar_select %p151_p3, %s800_s13, 1  ;;  %v758_v39 = vld [vmem:[%s958_s1 + $0xc0] sm:$0xff]   ;;  %v759_v40 = vld [vmem:[%s958_s1 + $0xc8] sm:$0xff]   ;;  %v760_v41 = vld [vmem:[%s958_s1 + $0xd0] sm:$0xff]  }
   0xe   : > { %v761_v42 = vld [vmem:[%s958_s1 + $0xd8] sm:$0xff]   ;;  %v762_v43 = vld [vmem:[%s958_s1 + $0xe0] sm:$0xff]   ;;  %v763_v44 = vld [vmem:[%s958_s1 + $0xe8] sm:$0xff]  }
   0xf   : > { %291 = vmatpush1.bf16.msra.mxu0 %v733_v5  ;;  %396 = vmatpush1.bf16.msra.mxu1 %v734_v6  ;;  %s718_s4 = smul.u32 24, %s152_s26  ;;  %v714_v59 = vld [vmem:[%s959_s2] ss:$0 sm:$0xff] }
  0x10   : > { %292 = vmatprep.subr.bf16.mxu0 %v772_v1  ;;  %397 = vmatprep.subr.bf16.mxu1 %v772_v1 }
  0x11   : > { %s849_s11 = scalar_lea.vmem %s957_s0, %s718_s4 }
  0x12   : > { %v159_v13 = vld [vmem:[%s849_s11 + $0x10] sm:$0x33]  ;;  %v749_v14 = vld [vmem:[%s849_s11 + $0x4] ss:$8 sps:$4 sm:$0xff]   ;;  %v752_v24 = vld [vmem:[%s849_s11] ss:$8 sps:$4 sm:$0xff]  }
  0x13   : > { %293 = vmatpush1.bf16.msra.mxu0 %v735_v7  ;;  %398 = vmatpush1.bf16.msra.mxu1 %v736_v8  ;;  %v660_v15 = vcombine.high %v159_v13, %v159_v13  ;;  %v218_v18 = vrot.slane %v749_v14, 1  ;;  %v659_v25 = vcombine.low %v159_v13, %v159_v13  ;;  %v215_v28 = vrot.slane %v752_v24, 1 }
  0x14   : > { %294 = vmatprep.subr.bf16.mxu0 %v772_v1  ;;  %399 = vmatprep.subr.bf16.mxu1 %v772_v1  ;;  %v457_v31 = vrot.slane %v749_v14, 2  ;;  %v454_v45 = vrot.slane %v752_v24, 2 }
  0x15   : > { %v219_v19 = vrot.slane %v660_v15, 1  ;;  %682 = vmatprep.mubr.msk.bf16.mxu1 %vm282_vm0, %v749_v14  ;;  %v216_v29 = vrot.slane %v659_v25, 1  ;;  %v458_v32 = vrot.slane %v660_v15, 2  ;;  %v455_v46 = vrot.slane %v659_v25, 2 }
  0x17   : > { %295 = vmatpush1.bf16.msra.mxu0 %v737_v9  ;;  %400 = vmatpush1.bf16.msra.mxu1 %v738_v10  ;;  %v220_v20 = vsel %vm214_vm1, %v218_v18, %v219_v19  ;;  %v217_v33 = vsel %vm214_vm1, %v215_v28, %v216_v29  ;;  %v459_v35 = vsel %vm453_vm2, %v457_v31, %v458_v32 }
  0x18   : > { %296 = vmatprep.subr.bf16.mxu0 %v772_v1  ;;  %401 = vmatprep.subr.bf16.mxu1 %v772_v1  ;;  %v456_v47 = vsel %vm453_vm2, %v454_v45, %v455_v46 }
  0x19   : > { %671 = vmatprep.mubr.msk.bf16.mxu0 %vm282_vm0, %v220_v20 }
  0x1b   : > { %297 = vmatpush1.bf16.msra.mxu0 %v739_v11  ;;  %402 = vmatpush1.bf16.msra.mxu1 %v740_v12 }
  0x1c   : > { %298 = vmatprep.subr.bf16.mxu0 %v772_v1  ;;  %403 = vmatprep.subr.bf16.mxu1 %v772_v1 }
  0x1f   : > { %299 = vmatpush1.bf16.msra.mxu0 %v741_v16  ;;  %404 = vmatpush1.bf16.msra.mxu1 %v742_v17 }
  0x20   : > { %300 = vmatprep.subr.bf16.mxu0 %v772_v1  ;;  %405 = vmatprep.subr.bf16.mxu1 %v772_v1 }
  0x23   : > { %301 = vmatpush1.bf16.msra.mxu0 %v743_v21  ;;  %406 = vmatpush1.bf16.msra.mxu1 %v744_v22  ;;  %v773_v22 = vmov (!%p715_p4), 0.0  }
  0x24   : > { %302 = vmatprep.subr.bf16.mxu0 %v772_v1  ;;  %407 = vmatprep.subr.bf16.mxu1 %v772_v1  ;;  %600 = vst [vmem:[%s960_s3] sm:$0x3] (!%p715_p4), %v773_v22 }
  0x27   : > { %303 = vmatpush1.bf16.msra.mxu0 %v745_v23  ;;  %408 = vmatpush1.bf16.msra.mxu1 %v746_v26 }
  0x28   : > { %304 = vmatprep.subr.bf16.mxu0 %v772_v1  ;;  %409 = vmatprep.subr.bf16.mxu1 %v772_v1 }
  0x2b   : > { %305 = vmatpush1.bf16.msra.mxu0 %v747_v27  ;;  %410 = vmatpush1.bf16.msra.mxu1 %v748_v30 }
  0x2c   : > { %524 = vmatprep.subr.bf16.mxu0 %v772_v1 }
  0x2e   : > { %319 = vmatmul.mubr.bf16.vlgmr.msra.gmra.mrb[0].mxu0 %v217_v33  ;;  %424 = vmatmul.mubr.bf16.vlgmr.msra.gmra.mrb[0].mxu1 %v752_v24 }
  0x2f   : > { %525 = vmatpush1.bf16.msra.mxu0 %v754_v34  ;;  %713 = vmatprep.mubr.msk.bf16.mxu0 %vm282_vm0, %v459_v35 }
  0x30   : > { %526 = vmatprep.subr.bf16.mxu0 %v772_v1 }
  0x33   : > { %527 = vmatpush1.bf16.msra.mxu0 %v755_v36 }
  0x34   : > { %528 = vmatprep.subr.bf16.mxu0 %v772_v1 }
  0x37   : > { %529 = vmatpush1.bf16.msra.mxu0 %v756_v37 }
  0x38   : > { %530 = vmatprep.subr.bf16.mxu0 %v772_v1 }
  0x3b   : > { %531 = vmatpush1.bf16.msra.mxu0 %v757_v38 }
  0x3c   : > { %532 = vmatprep.subr.bf16.mxu0 %v772_v1 }
  0x3f   : > { %533 = vmatpush1.bf16.msra.mxu0 %v758_v39 }
  0x40   : > { %534 = vmatprep.subr.bf16.mxu0 %v772_v1 }
  0x43   : > { %535 = vmatpush1.bf16.msra.mxu0 %v759_v40 }
  0x44   : > { %536 = vmatprep.subr.bf16.mxu0 %v772_v1 }
  0x47   : > { %537 = vmatpush1.bf16.msra.mxu0 %v760_v41 }
  0x48   : > { %538 = vmatprep.subr.bf16.mxu0 %v772_v1 }
  0x4b   : > { %539 = vmatpush1.bf16.msra.mxu0 %v761_v42 }
  0x4c   : > { %540 = vmatprep.subr.bf16.mxu0 %v772_v1 }
  0x4f   : > { %541 = vmatpush1.bf16.msra.mxu0 %v762_v43 }
  0x50   : > { %542 = vmatprep.subr.bf16.mxu0 %v772_v1 }
  0x53   : > { %543 = vmatpush1.bf16.msra.mxu0 %v763_v44 }
  0x56   : > { %557 = vmatmul.mubr.bf16.vlgmr.msra.gmra.mrb[4].mxu0 %v456_v47 }
 0x101   : > { %v320_v48 = vpop.f32.mrb[0].mxu0  ;;  %v425_v49 = vpop.f32.mrb[0].mxu1 }
 0x102   : > { %v322_v50 = vpop.f32.mrb[1].mxu0  ;;  %v426_v51 = vadd.f32 %v425_v49, %v320_v48  ;;  %v427_v52 = vpop.f32.mrb[1].mxu1 }
 0x103   : > { %v323_v53 = vpop.f32.mrb[2].mxu0  ;;  %v428_v54 = vpop.f32.mrb[2].mxu1 }
 0x104   : > { %v325_v55 = vpop.f32.mrb[3].mxu0  ;;  %v429_v56 = vadd.f32 %v428_v54, %v323_v53  ;;  %v430_v57 = vpop.f32.mrb[3].mxu1 }
 0x129   : > { %v558_v58 = vpop.f32.mrb[4].mxu0 }
 0x12a   : > { %v565_v60 = vadd.f32 %v558_v58, %v426_v51  ;;  %v560_v61 = vpop.f32.mrb[5].mxu0 }
 0x12b   : > { %v561_v62 = vpop.f32.mrb[6].mxu0 }
 0x12c   : > { %v574_v63 = vadd.f32 %v714_v59, %v565_v60  ;;  %v566_v0 = vadd.f32 %v561_v62, %v429_v56  ;;  %v563_v1 = vpop.f32.mrb[7].mxu0 }
 0x12e   : > { %v576_v2 = vmax.f32 %v574_v63, 0.0  ;;  %v575_v3 = vadd.f32 %v714_v59, %v566_v0 }
 0x130   : > { %v577_v4 = vmax.f32 %v575_v3, 0.0  ;;  %v585_v5 = vmul.f32 %v576_v2, %v576_v2 }
 0x132   : > { %v578_v6 = vadd.f32 %v577_v4, %v576_v2  ;;  %v586_v7 = vmul.f32 %v577_v4, %v577_v4 }
 0x134   : > { %v579_v8 = vrot.slane %v578_v6, 4  ;;  %v587_v9 = vadd.f32 %v586_v7, %v585_v5 }
 0x136   : > { %v580_v10 = vadd.f32 %v579_v8, %v578_v6  ;;  %v588_v11 = vrot.slane %v587_v9, 4 }
 0x138   : > { %v581_v12 = vrot.slane %v580_v10, 2  ;;  %v589_v13 = vadd.f32 %v588_v11, %v587_v9 }
 0x13a   : > { %v582_v14 = vadd.f32 %v581_v12, %v580_v10  ;;  %v590_v15 = vrot.slane %v589_v13, 2 }
 0x13c   : > { %v583_v16 = vrot.slane %v582_v14, 1  ;;  %v591_v17 = vadd.f32 %v590_v15, %v589_v13  ;;  %599 = sbr.rel (%p715_p4) target bundleno = 323 (0x143), region = 36 }
 0x13e   : > { %v592_v18 = vrot.slane %v591_v17, 1  ;;  %v584_v19 = vadd.f32 %v583_v16, %v582_v14 }
 0x140   : > { %v593_v20 = vadd.f32 %v592_v18, %v591_v17 }
 0x142   : > { %v595_v21 = vsel %vm594_vm3, %v584_v19, %v593_v20 }
 0x143 PF: > { %v601_v23 = vld [vmem:[%s960_s3] sm:$0x3] }
 0x144   : > { %v602_v24 = vadd.f32 %v601_v23, %v595_v21 }
 0x146   : > { %603 = vst [vmem:[%s960_s3] sm:$0x3] %v602_v24 }
 0x147 PF: > { %s13_s12 = sadd.s32 1, %s770_s12  }
 0x148   : > { %p10_p5 = scmp.ge.s32.totalorder %s13_s12, 4  }
 0x14a   :  { %12 = sbr.rel (!%p10_p5) target bundleno = 1 (0x1), region = 64 }

// kernel: duck_block_forward.65
= control target key start
LH: loop header
LB: loop body
LE: loop exit
PB: predicated region body
PF: predicated region fallthrough
CT: control target
= control target key end

     0   :  { %s897_s18 = smov 0   ;;  %s1059_s0 = inlined_call_operand.vmem [shape: bf16[2,20,160], index: 0, kind: input, shape index: {}]   ;;  %s1060_s1 = inlined_call_operand.vmem [shape: bf16[3,160,128], index: 1, kind: input, shape index: {}]   ;;  %s1061_s2 = inlined_call_operand.vmem [shape: f32[1,128], index: 2, kind: input, shape index: {}]   ;;  %s1062_s3 = inlined_call_operand.vmem [shape: f32[1,128], index: 3, kind: input, shape index: {}]   ;;  %s1063_s4 = inlined_call_operand.vmem [shape: f32[1,128], index: 4, kind: input, shape index: {}]   ;;  %s1064_s5 = inlined_call_operand.vmem [shape: f32[2,16,128], index: 5, kind: output, shape index: {}]  }
   0x1 LB: > { %s722_s19 = sadd.s32 4294967295, %s864_s18   ;;  %p726_p0 = scmp.ge.s32.totalorder %s864_s18, 1  ;;  %s864_s18 = sphi %s897_s18, %s15_s18  }
   0x2   : > { %p187_p1 = scmp.lt.s32.totalorder %s864_s18, 3 }
   0x4   : > { %p188_p2 = pnand %p726_p0, %p187_p1 }
   0x5   : > { %v823_v0 = vld [vmem:[%s1060_s1 + $0x50] sm:$0xff] (!%p188_p2)   ;;  %v866_v1 = vmov (!%p188_p2), 0   ;;  %v824_v2 = vld [vmem:[%s1060_s1] sm:$0xff] (!%p188_p2)   ;;  %v825_v3 = vld [vmem:[%s1060_s1 + $0x58] sm:$0xff] (!%p188_p2)   ;;  %p215_p3 = scmp.lt.s32.totalorder (!%p188_p2), %s722_s19, 1  ;;  %vm351_vm0 = vcmask (!%p188_p2), 261120  }
   0x6   : > { %191 = sbr.rel (%p188_p2) target bundleno = 311 (0x137), region = 40  ;;  %355 = vmatprep.subr.bf16.mxu0 (!%p188_p2), %v866_v1  ;;  %460 = vmatprep.subr.bf16.mxu1 (!%p188_p2), %v866_v1  ;;  %v826_v4 = vld [vmem:[%s1060_s1 + $0x8] sm:$0xff] (!%p188_p2)   ;;  %v827_v5 = vld [vmem:[%s1060_s1 + $0x60] sm:$0xff] (!%p188_p2)   ;;  %v828_v6 = vld [vmem:[%s1060_s1 + $0x10] sm:$0xff] (!%p188_p2)   ;;  %vm283_vm1 = vcmask (!%p188_p2), 1046528   ;;  %vm522_vm2 = vcmask (!%p188_p2), 1045504  }
   0x7   : > { %356 = vmatpush1.bf16.msra.mxu0 (!%p188_p2), %v823_v0  ;;  %461 = vmatpush1.bf16.msra.mxu1 (!%p188_p2), %v824_v2  ;;  %v829_v7 = vld [vmem:[%s1060_s1 + $0x68] sm:$0xff] (!%p188_p2)   ;;  %v830_v8 = vld [vmem:[%s1060_s1 + $0x18] sm:$0xff] (!%p188_p2)   ;;  %v831_v9 = vld [vmem:[%s1060_s1 + $0x70] sm:$0xff] (!%p188_p2)  }
   0x8   : > { %357 = vmatprep.subr.bf16.mxu0 (!%p188_p2), %v866_v1  ;;  %462 = vmatprep.subr.bf16.mxu1 (!%p188_p2), %v866_v1  ;;  %v832_v10 = vld [vmem:[%s1060_s1 + $0x20] sm:$0xff] (!%p188_p2)   ;;  %v833_v11 = vld [vmem:[%s1060_s1 + $0x78] sm:$0xff] (!%p188_p2)   ;;  %v834_v12 = vld [vmem:[%s1060_s1 + $0x28] sm:$0xff] (!%p188_p2)  }
   0x9   : > { %v835_v16 = vld [vmem:[%s1060_s1 + $0x80] sm:$0xff] (!%p188_p2)   ;;  %v836_v17 = vld [vmem:[%s1060_s1 + $0x30] sm:$0xff] (!%p188_p2)   ;;  %v837_v21 = vld [vmem:[%s1060_s1 + $0x88] sm:$0xff] (!%p188_p2)  }
   0xa   : > { %v838_v22 = vld [vmem:[%s1060_s1 + $0x38] sm:$0xff] (!%p188_p2)   ;;  %v839_v23 = vld [vmem:[%s1060_s1 + $0x90] sm:$0xff] (!%p188_p2)   ;;  %v840_v26 = vld [vmem:[%s1060_s1 + $0x40] sm:$0xff] (!%p188_p2)  }
   0xb   : > { %358 = vmatpush1.bf16.msra.mxu0 (!%p188_p2), %v825_v3  ;;  %463 = vmatpush1.bf16.msra.mxu1 (!%p188_p2), %v826_v4  ;;  %v841_v27 = vld [vmem:[%s1060_s1 + $0x98] sm:$0xff] (!%p188_p2)   ;;  %v842_v30 = vld [vmem:[%s1060_s1 + $0x48] sm:$0xff] (!%p188_p2)   ;;  %v848_v34 = vld [vmem:[%s1060_s1 + $0xa0] sm:$0xff] (!%p188_p2)  }
   0xc   : > { %359 = vmatprep.subr.bf16.mxu0 (!%p188_p2), %v866_v1  ;;  %464 = vmatprep.subr.bf16.mxu1 (!%p188_p2), %v866_v1  ;;  %v849_v36 = vld [vmem:[%s1060_s1 + $0xa8] sm:$0xff] (!%p188_p2)   ;;  %v850_v37 = vld [vmem:[%s1060_s1 + $0xb0] sm:$0xff] (!%p188_p2)   ;;  %v851_v38 = vld [vmem:[%s1060_s1 + $0xb8] sm:$0xff] (!%p188_p2)  }
   0xd   : > { %s1066_s19 = smov (!%p215_p3, %s722_s19), 1  ;;  %v852_v39 = vld [vmem:[%s1060_s1 + $0xc0] sm:$0xff]   ;;  %v853_v40 = vld [vmem:[%s1060_s1 + $0xc8] sm:$0xff]   ;;  %v854_v41 = vld [vmem:[%s1060_s1 + $0xd0] sm:$0xff]  }
   0xe   : > { %s813_s11 = smul.u32 24, %s1066_s19  ;;  %v855_v42 = vld [vmem:[%s1060_s1 + $0xd8] sm:$0xff]   ;;  %v856_v43 = vld [vmem:[%s1060_s1 + $0xe0] sm:$0xff]   ;;  %v857_v44 = vld [vmem:[%s1060_s1 + $0xe8] sm:$0xff]   ;;  %s812_s17 = sshll.u32 %s1066_s19, 4 }
   0xf   : > { %360 = vmatpush1.bf16.msra.mxu0 %v827_v5  ;;  %465 = vmatpush1.bf16.msra.mxu1 %v828_v6  ;;  %v807_v59 = vld [vmem:[%s1061_s2] ss:$0 sm:$0xff]  ;;  %s224_s24 = scalar_lea.vmem %s1064_s5, %s812_s17 }
  0x10   : > { %361 = vmatprep.subr.bf16.mxu0 %v866_v1  ;;  %466 = vmatprep.subr.bf16.mxu1 %v866_v1  ;;  %s951_s20 = scalar_lea.vmem %s1059_s0, %s813_s11  ;;  %v808_v2 = vld [vmem:[%s1062_s3] ss:$0 sm:$0xff] }
  0x11   : > { %v228_v13 = vld [vmem:[%s951_s20 + $0x10] sm:$0x33]  ;;  %v843_v14 = vld [vmem:[%s951_s20 + $0x4] ss:$8 sps:$4 sm:$0xff]   ;;  %v846_v24 = vld [vmem:[%s951_s20] ss:$8 sps:$4 sm:$0xff]  }
  0x12   : > { %v753_v15 = vcombine.high %v228_v13, %v228_v13  ;;  %v287_v18 = vrot.slane %v843_v14, 1  ;;  %775 = vmatprep.mubr.msk.bf16.mxu1 %vm351_vm0, %v843_v14  ;;  %v752_v25 = vcombine.low %v228_v13, %v228_v13  ;;  %v284_v28 = vrot.slane %v846_v24, 1  ;;  %v809_v5 = vld [vmem:[%s1063_s4] ss:$0 sm:$0xff] }
  0x13   : > { %362 = vmatpush1.bf16.msra.mxu0 %v829_v7  ;;  %467 = vmatpush1.bf16.msra.mxu1 %v830_v8  ;;  %v526_v31 = vrot.slane %v843_v14, 2  ;;  %v523_v45 = vrot.slane %v846_v24, 2 }
  0x14   : > { %363 = vmatprep.subr.bf16.mxu0 %v866_v1  ;;  %468 = vmatprep.subr.bf16.mxu1 %v866_v1  ;;  %v288_v19 = vrot.slane %v753_v15, 1  ;;  %v285_v29 = vrot.slane %v752_v25, 1  ;;  %v527_v32 = vrot.slane %v753_v15, 2  ;;  %v524_v46 = vrot.slane %v752_v25, 2 }
  0x16   : > { %v289_v20 = vsel %vm283_vm1, %v287_v18, %v288_v19  ;;  %v286_v33 = vsel %vm283_vm1, %v284_v28, %v285_v29  ;;  %v528_v35 = vsel %vm522_vm2, %v526_v31, %v527_v32  ;;  %v525_v47 = vsel %vm522_vm2, %v523_v45, %v524_v46 }
  0x17   : > { %364 = vmatpush1.bf16.msra.mxu0 %v831_v9  ;;  %469 = vmatpush1.bf16.msra.mxu1 %v832_v10 }
  0x18   : > { %365 = vmatprep.subr.bf16.mxu0 %v866_v1  ;;  %470 = vmatprep.subr.bf16.mxu1 %v866_v1 }
  0x19   : > { %764 = vmatprep.mubr.msk.bf16.mxu0 %vm351_vm0, %v289_v20 }
  0x1b   : > { %366 = vmatpush1.bf16.msra.mxu0 %v833_v11  ;;  %471 = vmatpush1.bf16.msra.mxu1 %v834_v12 }
  0x1c   : > { %367 = vmatprep.subr.bf16.mxu0 %v866_v1  ;;  %472 = vmatprep.subr.bf16.mxu1 %v866_v1 }
  0x1f   : > { %368 = vmatpush1.bf16.msra.mxu0 %v835_v16  ;;  %473 = vmatpush1.bf16.msra.mxu1 %v836_v17 }
  0x20   : > { %369 = vmatprep.subr.bf16.mxu0 %v866_v1  ;;  %474 = vmatprep.subr.bf16.mxu1 %v866_v1 }
  0x23   : > { %370 = vmatpush1.bf16.msra.mxu0 %v837_v21  ;;  %475 = vmatpush1.bf16.msra.mxu1 %v838_v22 }
  0x24   : > { %371 = vmatprep.subr.bf16.mxu0 %v866_v1  ;;  %476 = vmatprep.subr.bf16.mxu1 %v866_v1 }
  0x27   : > { %372 = vmatpush1.bf16.msra.mxu0 %v839_v23  ;;  %477 = vmatpush1.bf16.msra.mxu1 %v840_v26 }
  0x28   : > { %373 = vmatprep.subr.bf16.mxu0 %v866_v1  ;;  %478 = vmatprep.subr.bf16.mxu1 %v866_v1 }
  0x2b   : > { %374 = vmatpush1.bf16.msra.mxu0 %v841_v27  ;;  %479 = vmatpush1.bf16.msra.mxu1 %v842_v30 }
  0x2c   : > { %593 = vmatprep.subr.bf16.mxu0 %v866_v1 }
  0x2e   : > { %388 = vmatmul.mubr.bf16.vlgmr.msra.gmra.mrb[0].mxu0 %v286_v33  ;;  %493 = vmatmul.mubr.bf16.vlgmr.msra.gmra.mrb[0].mxu1 %v846_v24 }
  0x2f   : > { %594 = vmatpush1.bf16.msra.mxu0 %v848_v34  ;;  %806 = vmatprep.mubr.msk.bf16.mxu0 %vm351_vm0, %v528_v35 }
  0x30   : > { %595 = vmatprep.subr.bf16.mxu0 %v866_v1 }
  0x33   : > { %596 = vmatpush1.bf16.msra.mxu0 %v849_v36 }
  0x34   : > { %597 = vmatprep.subr.bf16.mxu0 %v866_v1 }
  0x37   : > { %598 = vmatpush1.bf16.msra.mxu0 %v850_v37 }
  0x38   : > { %599 = vmatprep.subr.bf16.mxu0 %v866_v1 }
  0x3b   : > { %600 = vmatpush1.bf16.msra.mxu0 %v851_v38 }
  0x3c   : > { %601 = vmatprep.subr.bf16.mxu0 %v866_v1 }
  0x3f   : > { %602 = vmatpush1.bf16.msra.mxu0 %v852_v39 }
  0x40   : > { %603 = vmatprep.subr.bf16.mxu0 %v866_v1 }
  0x43   : > { %604 = vmatpush1.bf16.msra.mxu0 %v853_v40 }
  0x44   : > { %605 = vmatprep.subr.bf16.mxu0 %v866_v1 }
  0x47   : > { %606 = vmatpush1.bf16.msra.mxu0 %v854_v41 }
  0x48   : > { %607 = vmatprep.subr.bf16.mxu0 %v866_v1 }
  0x4b   : > { %608 = vmatpush1.bf16.msra.mxu0 %v855_v42 }
  0x4c   : > { %609 = vmatprep.subr.bf16.mxu0 %v866_v1 }
  0x4f   : > { %610 = vmatpush1.bf16.msra.mxu0 %v856_v43 }
  0x50   : > { %611 = vmatprep.subr.bf16.mxu0 %v866_v1 }
  0x53   : > { %612 = vmatpush1.bf16.msra.mxu0 %v857_v44 }
  0x56   : > { %626 = vmatmul.mubr.bf16.vlgmr.msra.gmra.mrb[4].mxu0 %v525_v47 }
 0x101   : > { %v389_v48 = vpop.f32.mrb[0].mxu0  ;;  %v494_v49 = vpop.f32.mrb[0].mxu1 }
 0x102   : > { %v391_v50 = vpop.f32.mrb[1].mxu0  ;;  %v495_v51 = vadd.f32 %v494_v49, %v389_v48  ;;  %v496_v52 = vpop.f32.mrb[1].mxu1 }
 0x103   : > { %v392_v53 = vpop.f32.mrb[2].mxu0  ;;  %v497_v54 = vpop.f32.mrb[2].mxu1 }
 0x104   : > { %v394_v55 = vpop.f32.mrb[3].mxu0  ;;  %v498_v56 = vadd.f32 %v497_v54, %v392_v53  ;;  %v499_v57 = vpop.f32.mrb[3].mxu1 }
 0x129   : > { %v627_v58 = vpop.f32.mrb[4].mxu0 }
 0x12a   : > { %v634_v60 = vadd.f32 %v627_v58, %v495_v51  ;;  %v629_v61 = vpop.f32.mrb[5].mxu0 }
 0x12b   : > { %v630_v62 = vpop.f32.mrb[6].mxu0 }
 0x12c   : > { %v643_v63 = vadd.f32 %v807_v59, %v634_v60  ;;  %v635_v0 = vadd.f32 %v630_v62, %v498_v56  ;;  %v632_v1 = vpop.f32.mrb[7].mxu0 }
 0x12e   : > { %v645_v3 = vmax.f32 %v643_v63, 0.0  ;;  %v644_v4 = vadd.f32 %v807_v59, %v635_v0 }
 0x130   : > { %v654_v6 = vmul.f32 %v808_v2, %v645_v3  ;;  %v646_v7 = vmax.f32 %v644_v4, 0.0 }
 0x132   : > { %v663_v8 = vadd.f32 %v809_v5, %v654_v6  ;;  %v655_v9 = vmul.f32 %v808_v2, %v646_v7 }
 0x134   : > { %665 = vst [vmem:[%s224_s24] sm:$0xff] %v663_v8  ;;  %v664_v10 = vadd.f32 %v809_v5, %v655_v9 }
 0x136   : > { %666 = vst [vmem:[%s224_s24 + $0x8] sm:$0xff] %v664_v10 }
 0x137 PF: > { %s15_s18 = sadd.s32 1, %s864_s18  }
 0x138   : > { %p12_p4 = scmp.ge.s32.totalorder %s15_s18, 4  }
 0x13a   :  { %14 = sbr.rel (!%p12_p4) target bundleno = 1 (0x1), region = 72 }

// kernel: duck_block_forward.66
= control target key start
LH: loop header
LB: loop body
LE: loop exit
PB: predicated region body
PF: predicated region fallthrough
CT: control target
= control target key end

     0   :  { %s855_s12 = smov 0   ;;  %s1042_s0 = inlined_call_operand.vmem [shape: bf16[2,22,176], index: 0, kind: input, shape index: {}]   ;;  %s1043_s1 = inlined_call_operand.vmem [shape: bf16[3,176,128], index: 1, kind: input, shape index: {}]   ;;  %s1044_s2 = inlined_call_operand.vmem [shape: f32[1,128], index: 2, kind: input, shape index: {}]   ;;  %s1045_s3 = inlined_call_operand.vmem [shape: f32[2,128], index: 3, kind: output, shape index: {}]  }
   0x1 LB: > { %s861_s13 = sadd.s32 4294967295, %s831_s12   ;;  %p686_p0 = scmp.ge.s32.totalorder %s831_s12, 1  ;;  %s831_s12 = sphi %s855_s12, %s13_s12  }
   0x2   : > { %p132_p1 = scmp.lt.s32.totalorder %s831_s12, 3 }
   0x4   : > { %p133_p2 = pnand %p686_p0, %p132_p1 }
   0x5   : > { %v787_v0 = vld [vmem:[%s1043_s1 + $0x58] sm:$0xff] (!%p133_p2)   ;;  %v833_v1 = vmov (!%p133_p2), 0   ;;  %v788_v2 = vld [vmem:[%s1043_s1] sm:$0xff] (!%p133_p2)   ;;  %v790_v4 = vld [vmem:[%s1043_s1 + $0x8] sm:$0xff] (!%p133_p2)   ;;  %p151_p3 = scmp.lt.s32.totalorder (!%p133_p2), %s861_s13, 1  ;;  %vm320_vm0 = vcmask (!%p133_p2), 392192  }
   0x6   : > { %136 = sbr.rel (%p133_p2) target bundleno = 335 (0x14f), region = 32  ;;  %324 = vmatprep.subr.bf16.mxu0 (!%p133_p2), %v833_v1  ;;  %434 = vmatprep.subr.bf16.mxu1 (!%p133_p2), %v833_v1  ;;  %v789_v3 = vld [vmem:[%s1043_s1 + $0x60] sm:$0xff] (!%p133_p2)   ;;  %v791_v5 = vld [vmem:[%s1043_s1 + $0x68] sm:$0xff] (!%p133_p2)   ;;  %v792_v6 = vld [vmem:[%s1043_s1 + $0x10] sm:$0xff] (!%p133_p2)   ;;  %vm218_vm1 = vsmask.f32 (!%p133_p2), 6400 }
   0x7   : > { %325 = vmatpush1.bf16.msra.mxu0 (!%p133_p2), %v787_v0  ;;  %435 = vmatpush1.bf16.msra.mxu1 (!%p133_p2), %v788_v2  ;;  %v793_v7 = vld [vmem:[%s1043_s1 + $0x70] sm:$0xff] (!%p133_p2)   ;;  %v794_v8 = vld [vmem:[%s1043_s1 + $0x18] sm:$0xff] (!%p133_p2)   ;;  %v796_v10 = vld [vmem:[%s1043_s1 + $0x20] sm:$0xff] (!%p133_p2)   ;;  %vm498_vm2 = vcmask (!%p133_p2), 1044480   ;;  %vm645_vm3 = vcmask (!%p133_p2), 1040384   ;;  %p773_p4 = scmp.ne.s32.totalorder (!%p133_p2), %s861_s13, 0 }
   0x8   : > { %326 = vmatprep.subr.bf16.mxu0 (!%p133_p2), %v833_v1  ;;  %436 = vmatprep.subr.bf16.mxu1 (!%p133_p2), %v833_v1  ;;  %v795_v9 = vld [vmem:[%s1043_s1 + $0x78] sm:$0xff] (!%p133_p2)   ;;  %v797_v11 = vld [vmem:[%s1043_s1 + $0x80] sm:$0xff] (!%p133_p2)   ;;  %v798_v12 = vld [vmem:[%s1043_s1 + $0x28] sm:$0xff] (!%p133_p2)  }
   0x9   : > { %v799_v13 = vld [vmem:[%s1043_s1 + $0x88] sm:$0xff] (!%p133_p2)   ;;  %v800_v15 = vld [vmem:[%s1043_s1 + $0x30] sm:$0xff] (!%p133_p2)   ;;  %v802_v24 = vld [vmem:[%s1043_s1 + $0x38] sm:$0xff] (!%p133_p2)  }
   0xa   : > { %v801_v23 = vld [vmem:[%s1043_s1 + $0x90] sm:$0xff] (!%p133_p2)   ;;  %v803_v30 = vld [vmem:[%s1043_s1 + $0x98] sm:$0xff] (!%p133_p2)   ;;  %v804_v37 = vld [vmem:[%s1043_s1 + $0x40] sm:$0xff] (!%p133_p2)  }
   0xb   : > { %327 = vmatpush1.bf16.msra.mxu0 (!%p133_p2), %v789_v3  ;;  %437 = vmatpush1.bf16.msra.mxu1 (!%p133_p2), %v790_v4  ;;  %v805_v39 = vld [vmem:[%s1043_s1 + $0xa0] sm:$0xff] (!%p133_p2)   ;;  %v806_v44 = vld [vmem:[%s1043_s1 + $0x48] sm:$0xff] (!%p133_p2)   ;;  %v808_v48 = vld [vmem:[%s1043_s1 + $0x50] sm:$0xff] (!%p133_p2)  }
   0xc   : > { %328 = vmatprep.subr.bf16.mxu0 (!%p133_p2), %v833_v1  ;;  %438 = vmatprep.subr.bf16.mxu1 (!%p133_p2), %v833_v1  ;;  %v807_v45 = vld [vmem:[%s1043_s1 + $0xa8] sm:$0xff] (!%p133_p2)   ;;  %v814_v52 = vld [vmem:[%s1043_s1 + $0xb0] sm:$0xff] (!%p133_p2)   ;;  %v815_v54 = vld [vmem:[%s1043_s1 + $0xb8] sm:$0xff] (!%p133_p2)  }
   0xd   : > { %s152_s30 = scalar_select %p151_p3, %s861_s13, 1  ;;  %v816_v55 = vld [vmem:[%s1043_s1 + $0xc0] sm:$0xff]   ;;  %v817_v56 = vld [vmem:[%s1043_s1 + $0xc8] sm:$0xff]   ;;  %v818_v57 = vld [vmem:[%s1043_s1 + $0xd0] sm:$0xff]  }
   0xe   : > { %v819_v58 = vld [vmem:[%s1043_s1 + $0xd8] sm:$0xff]   ;;  %v820_v59 = vld [vmem:[%s1043_s1 + $0xe0] sm:$0xff]   ;;  %v821_v60 = vld [vmem:[%s1043_s1 + $0xe8] sm:$0xff]  }
   0xf   : > { %329 = vmatpush1.bf16.msra.mxu0 %v791_v5  ;;  %439 = vmatpush1.bf16.msra.mxu1 %v792_v6  ;;  %s776_s8 = smul.u32 24, %s152_s30  ;;  %v822_v61 = vld [vmem:[%s1043_s1 + $0xf0] sm:$0xff]   ;;  %v823_v62 = vld [vmem:[%s1043_s1 + $0xf8] sm:$0xff]   ;;  %v824_v63 = vld [vmem:[%s1043_s1 + $0x100] sm:$0xff]  }
  0x10   : > { %330 = vmatprep.subr.bf16.mxu0 %v833_v1  ;;  %440 = vmatprep.subr.bf16.mxu1 %v833_v1 }
  0x11   : > { %s155_s17 = scalar_lea.vmem %s1042_s0, %s776_s8 }
  0x12   : > { %v159_v14 = vld [vmem:[%s155_s17 + $0x10] sm:$0x77]  ;;  %v925_v16 = vld [vmem:[%s155_s17 + $0x4] ss:$8 sps:$4 sm:$0xff]   ;;  %v928_v18 = vld [vmem:[%s155_s17] ss:$8 sps:$4 sm:$0xff]  }
  0x13   : > { %331 = vmatpush1.bf16.msra.mxu0 %v793_v7  ;;  %441 = vmatpush1.bf16.msra.mxu1 %v794_v8  ;;  %v713_v17 = vcombine.high %v159_v14, %v159_v14  ;;  %v237_v19 = vshrl.u32 %v925_v16, 16  ;;  %v240_v20 = vshll.u32 %v925_v16, 16  ;;  %v940_v25 = vcombine.low %v159_v14, %v159_v14 }
  0x14   : > { %332 = vmatprep.subr.bf16.mxu0 %v833_v1  ;;  %442 = vmatprep.subr.bf16.mxu1 %v833_v1  ;;  %v220_v33 = vshrl.u32 %v928_v18, 16  ;;  %v223_v34 = vshll.u32 %v928_v18, 16  ;;  %v502_v49 = vrot.slane %v925_v16, 3  ;;  %v499_v0 = vrot.slane %v928_v18, 3 }
  0x15   : > { %v245_v21 = vshrl.u32 %v713_v17, 16  ;;  %v248_v22 = vshll.u32 %v713_v17, 16  ;;  %737 = vmatprep.mubr.msk.bf16.mxu1 %vm320_vm0, %v925_v16  ;;  %v239_v26 = vrot.slane %v237_v19, 1  ;;  %v242_v27 = vrot.slane %v240_v20, 2 }
  0x16   : > { %v228_v35 = vshrl.u32 %v940_v25, 16  ;;  %v231_v36 = vshll.u32 %v940_v25, 16  ;;  %v222_v40 = vrot.slane %v220_v33, 1  ;;  %v225_v41 = vrot.slane %v223_v34, 2 }
  0x17   : > { %333 = vmatpush1.bf16.msra.mxu0 %v795_v9  ;;  %443 = vmatpush1.bf16.msra.mxu1 %v796_v10  ;;  %v247_v28 = vrot.slane %v245_v21, 1  ;;  %v250_v29 = vrot.slane %v248_v22, 2  ;;  %v243_v31 = vor.u32 %v242_v27, %v239_v26  ;;  %v503_v50 = vrot.slane %v713_v17, 3 }
  0x18   : > { %334 = vmatprep.subr.bf16.mxu0 %v833_v1  ;;  %444 = vmatprep.subr.bf16.mxu1 %v833_v1  ;;  %v230_v42 = vrot.slane %v228_v35, 1  ;;  %v233_v43 = vrot.slane %v231_v36, 2  ;;  %v226_v46 = vor.u32 %v225_v41, %v222_v40  ;;  %v500_v2 = vrot.slane %v940_v25, 3 }
  0x19   : > { %v251_v32 = vor.u32 %v250_v29, %v247_v28  ;;  %v504_v53 = vsel %vm498_vm2, %v502_v49, %v503_v50  ;;  %v834_v41 = vmov (!%p773_p4), 0.0  }
  0x1a   : > { %v234_v47 = vor.u32 %v233_v43, %v230_v42  ;;  %v501_v3 = vsel %vm498_vm2, %v499_v0, %v500_v2  ;;  %651 = vst [vmem:[%s1045_s3] sm:$0x3] (!%p773_p4), %v834_v41 }
  0x1b   : > { %335 = vmatpush1.bf16.msra.mxu0 %v797_v11  ;;  %445 = vmatpush1.bf16.msra.mxu1 %v798_v12  ;;  %v252_v38 = vsel %vm218_vm1, %v243_v31, %v251_v32 }
  0x1c   : > { %336 = vmatprep.subr.bf16.mxu0 %v833_v1  ;;  %446 = vmatprep.subr.bf16.mxu1 %v833_v1  ;;  %v235_v51 = vsel %vm218_vm1, %v226_v46, %v234_v47 }
  0x1d   : > { %725 = vmatprep.mubr.msk.bf16.mxu0 %vm320_vm0, %v252_v38 }
  0x1f   : > { %337 = vmatpush1.bf16.msra.mxu0 %v799_v13  ;;  %447 = vmatpush1.bf16.msra.mxu1 %v800_v15  ;;  %v772_v15 = vld [vmem:[%s1044_s2] ss:$0 sm:$0xff] }
  0x20   : > { %338 = vmatprep.subr.bf16.mxu0 %v833_v1  ;;  %448 = vmatprep.subr.bf16.mxu1 %v833_v1 }
  0x23   : > { %339 = vmatpush1.bf16.msra.mxu0 %v801_v23  ;;  %449 = vmatpush1.bf16.msra.mxu1 %v802_v24 }
  0x24   : > { %340 = vmatprep.subr.bf16.mxu0 %v833_v1  ;;  %450 = vmatprep.subr.bf16.mxu1 %v833_v1 }
  0x27   : > { %341 = vmatpush1.bf16.msra.mxu0 %v803_v30  ;;  %451 = vmatpush1.bf16.msra.mxu1 %v804_v37 }
  0x28   : > { %342 = vmatprep.subr.bf16.mxu0 %v833_v1  ;;  %452 = vmatprep.subr.bf16.mxu1 %v833_v1 }
  0x2b   : > { %343 = vmatpush1.bf16.msra.mxu0 %v805_v39  ;;  %453 = vmatpush1.bf16.msra.mxu1 %v806_v44 }
  0x2c   : > { %344 = vmatprep.subr.bf16.mxu0 %v833_v1  ;;  %454 = vmatprep.subr.bf16.mxu1 %v833_v1 }
  0x2f   : > { %345 = vmatpush1.bf16.msra.mxu0 %v807_v45  ;;  %455 = vmatpush1.bf16.msra.mxu1 %v808_v48 }
  0x30   : > { %575 = vmatprep.subr.bf16.mxu0 %v833_v1 }
  0x32   : > { %357 = vmatmul.mubr.bf16.vlgmr.msra.gmra.mrb[0].mxu0 %v235_v51  ;;  %467 = vmatmul.mubr.bf16.vlgmr.msra.gmra.mrb[0].mxu1 %v928_v18 }
  0x33   : > { %576 = vmatpush1.bf16.msra.mxu0 %v814_v52  ;;  %771 = vmatprep.mubr.msk.bf16.mxu0 %vm320_vm0, %v504_v53 }
  0x34   : > { %577 = vmatprep.subr.bf16.mxu0 %v833_v1 }
  0x37   : > { %578 = vmatpush1.bf16.msra.mxu0 %v815_v54 }
  0x38   : > { %579 = vmatprep.subr.bf16.mxu0 %v833_v1 }
  0x3b   : > { %580 = vmatpush1.bf16.msra.mxu0 %v816_v55 }
  0x3c   : > { %581 = vmatprep.subr.bf16.mxu0 %v833_v1 }
  0x3f   : > { %582 = vmatpush1.bf16.msra.mxu0 %v817_v56 }
  0x40   : > { %583 = vmatprep.subr.bf16.mxu0 %v833_v1 }
  0x43   : > { %584 = vmatpush1.bf16.msra.mxu0 %v818_v57 }
  0x44   : > { %585 = vmatprep.subr.bf16.mxu0 %v833_v1 }
  0x47   : > { %586 = vmatpush1.bf16.msra.mxu0 %v819_v58 }
  0x48   : > { %587 = vmatprep.subr.bf16.mxu0 %v833_v1 }
  0x4b   : > { %588 = vmatpush1.bf16.msra.mxu0 %v820_v59 }
  0x4c   : > { %589 = vmatprep.subr.bf16.mxu0 %v833_v1 }
  0x4f   : > { %590 = vmatpush1.bf16.msra.mxu0 %v821_v60 }
  0x50   : > { %591 = vmatprep.subr.bf16.mxu0 %v833_v1 }
  0x53   : > { %592 = vmatpush1.bf16.msra.mxu0 %v822_v61 }
  0x54   : > { %593 = vmatprep.subr.bf16.mxu0 %v833_v1 }
  0x57   : > { %594 = vmatpush1.bf16.msra.mxu0 %v823_v62 }
  0x58   : > { %595 = vmatprep.subr.bf16.mxu0 %v833_v1 }
  0x5b   : > { %596 = vmatpush1.bf16.msra.mxu0 %v824_v63 }
  0x5e   : > { %608 = vmatmul.mubr.bf16.vlgmr.msra.gmra.mrb[4].mxu0 %v501_v3 }
 0x105   : > { %v358_v4 = vpop.f32.mrb[0].mxu0  ;;  %v468_v5 = vpop.f32.mrb[0].mxu1 }
 0x106   : > { %v360_v6 = vpop.f32.mrb[1].mxu0  ;;  %v469_v7 = vadd.f32 %v468_v5, %v358_v4  ;;  %v470_v8 = vpop.f32.mrb[1].mxu1 }
 0x107   : > { %v361_v9 = vpop.f32.mrb[2].mxu0  ;;  %v471_v10 = vpop.f32.mrb[2].mxu1 }
 0x108   : > { %v363_v11 = vpop.f32.mrb[3].mxu0  ;;  %v472_v12 = vadd.f32 %v471_v10, %v361_v9  ;;  %v473_v13 = vpop.f32.mrb[3].mxu1 }
 0x131   : > { %v609_v14 = vpop.f32.mrb[4].mxu0 }
 0x132   : > { %v616_v1 = vadd.f32 %v609_v14, %v469_v7  ;;  %v611_v16 = vpop.f32.mrb[5].mxu0 }
 0x133   : > { %v612_v17 = vpop.f32.mrb[6].mxu0 }
 0x134   : > { %v625_v18 = vadd.f32 %v772_v15, %v616_v1  ;;  %v617_v19 = vadd.f32 %v612_v17, %v472_v12  ;;  %v614_v20 = vpop.f32.mrb[7].mxu0 }
 0x136   : > { %v627_v21 = vmax.f32 %v625_v18, 0.0  ;;  %v626_v22 = vadd.f32 %v772_v15, %v617_v19 }
 0x138   : > { %v628_v23 = vmax.f32 %v626_v22, 0.0  ;;  %v636_v24 = vmul.f32 %v627_v21, %v627_v21 }
 0x13a   : > { %v629_v25 = vadd.f32 %v628_v23, %v627_v21  ;;  %v637_v26 = vmul.f32 %v628_v23, %v628_v23 }
 0x13c   : > { %v630_v27 = vrot.slane %v629_v25, 4  ;;  %v638_v28 = vadd.f32 %v637_v26, %v636_v24 }
 0x13e   : > { %v631_v29 = vadd.f32 %v630_v27, %v629_v25  ;;  %v639_v30 = vrot.slane %v638_v28, 4 }
 0x140   : > { %v632_v31 = vrot.slane %v631_v29, 2  ;;  %v640_v32 = vadd.f32 %v639_v30, %v638_v28 }
 0x142   : > { %v633_v33 = vadd.f32 %v632_v31, %v631_v29  ;;  %v641_v34 = vrot.slane %v640_v32, 2 }
 0x144   : > { %v634_v35 = vrot.slane %v633_v33, 1  ;;  %v642_v36 = vadd.f32 %v641_v34, %v640_v32  ;;  %650 = sbr.rel (%p773_p4) target bundleno = 331 (0x14b), region = 36 }
 0x146   : > { %v643_v37 = vrot.slane %v642_v36, 1  ;;  %v635_v38 = vadd.f32 %v634_v35, %v633_v33 }
 0x148   : > { %v644_v39 = vadd.f32 %v643_v37, %v642_v36 }
 0x14a   : > { %v646_v40 = vsel %vm645_vm3, %v635_v38, %v644_v39 }
 0x14b PF: > { %v652_v42 = vld [vmem:[%s1045_s3] sm:$0x3] }
 0x14c   : > { %v653_v43 = vadd.f32 %v652_v42, %v646_v40 }
 0x14e   : > { %654 = vst [vmem:[%s1045_s3] sm:$0x3] %v653_v43 }
 0x14f PF: > { %s13_s12 = sadd.s32 1, %s831_s12  }
 0x150   : > { %p10_p5 = scmp.ge.s32.totalorder %s13_s12, 4  }
 0x152   :  { %12 = sbr.rel (!%p10_p5) target bundleno = 1 (0x1), region = 64 }

// kernel: duck_block_forward.67
= control target key start
LH: loop header
LB: loop body
LE: loop exit
PB: predicated region body
PF: predicated region fallthrough
CT: control target
= control target key end

     0   :  { %s958_s18 = smov 0   ;;  %s1144_s0 = inlined_call_operand.vmem [shape: bf16[2,22,176], index: 0, kind: input, shape index: {}]   ;;  %s1145_s1 = inlined_call_operand.vmem [shape: bf16[3,176,128], index: 1, kind: input, shape index: {}]   ;;  %s1146_s2 = inlined_call_operand.vmem [shape: f32[1,128], index: 2, kind: input, shape index: {}]   ;;  %s1147_s3 = inlined_call_operand.vmem [shape: f32[1,128], index: 3, kind: input, shape index: {}]   ;;  %s1148_s4 = inlined_call_operand.vmem [shape: f32[1,128], index: 4, kind: input, shape index: {}]   ;;  %s1149_s5 = inlined_call_operand.vmem [shape: f32[2,16,128], index: 5, kind: output, shape index: {}]  }
   0x1 LB: > { %s773_s19 = sadd.s32 4294967295, %s925_s18   ;;  %p777_p0 = scmp.ge.s32.totalorder %s925_s18, 1  ;;  %s925_s18 = sphi %s958_s18, %s15_s18  }
   0x2   : > { %p187_p1 = scmp.lt.s32.totalorder %s925_s18, 3 }
   0x4   : > { %p188_p2 = pnand %p777_p0, %p187_p1 }
   0x5   : > { %v881_v0 = vld [vmem:[%s1145_s1 + $0x58] sm:$0xff] (!%p188_p2)   ;;  %v927_v1 = vmov (!%p188_p2), 0   ;;  %v882_v2 = vld [vmem:[%s1145_s1] sm:$0xff] (!%p188_p2)   ;;  %v884_v4 = vld [vmem:[%s1145_s1 + $0x8] sm:$0xff] (!%p188_p2)   ;;  %p215_p3 = scmp.lt.s32.totalorder (!%p188_p2), %s773_s19, 1  ;;  %vm389_vm0 = vcmask (!%p188_p2), 392192  }
   0x6   : > { %191 = sbr.rel (%p188_p2) target bundleno = 319 (0x13f), region = 40  ;;  %393 = vmatprep.subr.bf16.mxu0 (!%p188_p2), %v927_v1  ;;  %503 = vmatprep.subr.bf16.mxu1 (!%p188_p2), %v927_v1  ;;  %v883_v3 = vld [vmem:[%s1145_s1 + $0x60] sm:$0xff] (!%p188_p2)   ;;  %v885_v5 = vld [vmem:[%s1145_s1 + $0x68] sm:$0xff] (!%p188_p2)   ;;  %v886_v6 = vld [vmem:[%s1145_s1 + $0x10] sm:$0xff] (!%p188_p2)   ;;  %vm287_vm1 = vsmask.f32 (!%p188_p2), 6400 }
   0x7   : > { %394 = vmatpush1.bf16.msra.mxu0 (!%p188_p2), %v881_v0  ;;  %504 = vmatpush1.bf16.msra.mxu1 (!%p188_p2), %v882_v2  ;;  %v887_v7 = vld [vmem:[%s1145_s1 + $0x70] sm:$0xff] (!%p188_p2)   ;;  %v888_v8 = vld [vmem:[%s1145_s1 + $0x18] sm:$0xff] (!%p188_p2)   ;;  %v890_v10 = vld [vmem:[%s1145_s1 + $0x20] sm:$0xff] (!%p188_p2)   ;;  %vm567_vm2 = vcmask (!%p188_p2), 1044480  }
   0x8   : > { %395 = vmatprep.subr.bf16.mxu0 (!%p188_p2), %v927_v1  ;;  %505 = vmatprep.subr.bf16.mxu1 (!%p188_p2), %v927_v1  ;;  %v889_v9 = vld [vmem:[%s1145_s1 + $0x78] sm:$0xff] (!%p188_p2)   ;;  %v891_v11 = vld [vmem:[%s1145_s1 + $0x80] sm:$0xff] (!%p188_p2)   ;;  %v892_v12 = vld [vmem:[%s1145_s1 + $0x28] sm:$0xff] (!%p188_p2)  }
   0x9   : > { %v893_v13 = vld [vmem:[%s1145_s1 + $0x88] sm:$0xff] (!%p188_p2)   ;;  %v894_v15 = vld [vmem:[%s1145_s1 + $0x30] sm:$0xff] (!%p188_p2)   ;;  %v896_v24 = vld [vmem:[%s1145_s1 + $0x38] sm:$0xff] (!%p188_p2)  }
   0xa   : > { %v895_v23 = vld [vmem:[%s1145_s1 + $0x90] sm:$0xff] (!%p188_p2)   ;;  %v897_v30 = vld [vmem:[%s1145_s1 + $0x98] sm:$0xff] (!%p188_p2)   ;;  %v898_v37 = vld [vmem:[%s1145_s1 + $0x40] sm:$0xff] (!%p188_p2)  }
   0xb   : > { %396 = vmatpush1.bf16.msra.mxu0 (!%p188_p2), %v883_v3  ;;  %506 = vmatpush1.bf16.msra.mxu1 (!%p188_p2), %v884_v4  ;;  %v899_v39 = vld [vmem:[%s1145_s1 + $0xa0] sm:$0xff] (!%p188_p2)   ;;  %v900_v44 = vld [vmem:[%s1145_s1 + $0x48] sm:$0xff] (!%p188_p2)   ;;  %v902_v48 = vld [vmem:[%s1145_s1 + $0x50] sm:$0xff] (!%p188_p2)  }
   0xc   : > { %397 = vmatprep.subr.bf16.mxu0 (!%p188_p2), %v927_v1  ;;  %507 = vmatprep.subr.bf16.mxu1 (!%p188_p2), %v927_v1  ;;  %v901_v45 = vld [vmem:[%s1145_s1 + $0xa8] sm:$0xff] (!%p188_p2)   ;;  %v908_v52 = vld [vmem:[%s1145_s1 + $0xb0] sm:$0xff] (!%p188_p2)   ;;  %v909_v54 = vld [vmem:[%s1145_s1 + $0xb8] sm:$0xff] (!%p188_p2)  }
   0xd   : > { %s1151_s19 = smov (!%p215_p3, %s773_s19), 1  ;;  %v910_v55 = vld [vmem:[%s1145_s1 + $0xc0] sm:$0xff]   ;;  %v911_v56 = vld [vmem:[%s1145_s1 + $0xc8] sm:$0xff]   ;;  %v912_v57 = vld [vmem:[%s1145_s1 + $0xd0] sm:$0xff]  }
   0xe   : > { %s871_s15 = smul.u32 24, %s1151_s19  ;;  %v913_v58 = vld [vmem:[%s1145_s1 + $0xd8] sm:$0xff]   ;;  %v914_v59 = vld [vmem:[%s1145_s1 + $0xe0] sm:$0xff]   ;;  %v915_v60 = vld [vmem:[%s1145_s1 + $0xe8] sm:$0xff]   ;;  %s870_s25 = sshll.u32 %s1151_s19, 4 }
   0xf   : > { %398 = vmatpush1.bf16.msra.mxu0 %v885_v5  ;;  %508 = vmatpush1.bf16.msra.mxu1 %v886_v6  ;;  %v916_v61 = vld [vmem:[%s1145_s1 + $0xf0] sm:$0xff]   ;;  %v917_v62 = vld [vmem:[%s1145_s1 + $0xf8] sm:$0xff]   ;;  %v918_v63 = vld [vmem:[%s1145_s1 + $0x100] sm:$0xff]   ;;  %s224_s30 = scalar_lea.vmem %s1149_s5, %s870_s25 }
  0x10   : > { %399 = vmatprep.subr.bf16.mxu0 %v927_v1  ;;  %509 = vmatprep.subr.bf16.mxu1 %v927_v1  ;;  %s219_s24 = scalar_lea.vmem %s1144_s0, %s871_s15 }
  0x11   : > { %v228_v14 = vld [vmem:[%s219_s24 + $0x10] sm:$0x77]  ;;  %v1027_v16 = vld [vmem:[%s219_s24 + $0x4] ss:$8 sps:$4 sm:$0xff]   ;;  %v1030_v18 = vld [vmem:[%s219_s24] ss:$8 sps:$4 sm:$0xff]  }
  0x12   : > { %v806_v17 = vcombine.high %v228_v14, %v228_v14  ;;  %v306_v19 = vshrl.u32 %v1027_v16, 16  ;;  %v309_v20 = vshll.u32 %v1027_v16, 16  ;;  %830 = vmatprep.mubr.msk.bf16.mxu1 %vm389_vm0, %v1027_v16  ;;  %v1042_v25 = vcombine.low %v228_v14, %v228_v14 }
  0x13   : > { %400 = vmatpush1.bf16.msra.mxu0 %v887_v7  ;;  %510 = vmatpush1.bf16.msra.mxu1 %v888_v8  ;;  %v289_v33 = vshrl.u32 %v1030_v18, 16  ;;  %v292_v34 = vshll.u32 %v1030_v18, 16  ;;  %v571_v49 = vrot.slane %v1027_v16, 3  ;;  %v568_v0 = vrot.slane %v1030_v18, 3 }
  0x14   : > { %401 = vmatprep.subr.bf16.mxu0 %v927_v1  ;;  %511 = vmatprep.subr.bf16.mxu1 %v927_v1  ;;  %v314_v21 = vshrl.u32 %v806_v17, 16  ;;  %v317_v22 = vshll.u32 %v806_v17, 16  ;;  %v308_v26 = vrot.slane %v306_v19, 1  ;;  %v311_v27 = vrot.slane %v309_v20, 2 }
  0x15   : > { %v297_v35 = vshrl.u32 %v1042_v25, 16  ;;  %v300_v36 = vshll.u32 %v1042_v25, 16  ;;  %v291_v40 = vrot.slane %v289_v33, 1  ;;  %v294_v41 = vrot.slane %v292_v34, 2 }
  0x16   : > { %v316_v28 = vrot.slane %v314_v21, 1  ;;  %v319_v29 = vrot.slane %v317_v22, 2  ;;  %v312_v31 = vor.u32 %v311_v27, %v308_v26  ;;  %v572_v50 = vrot.slane %v806_v17, 3  ;;  %v866_v21 = vld [vmem:[%s1147_s3] ss:$0 sm:$0xff] }
  0x17   : > { %402 = vmatpush1.bf16.msra.mxu0 %v889_v9  ;;  %512 = vmatpush1.bf16.msra.mxu1 %v890_v10  ;;  %v299_v42 = vrot.slane %v297_v35, 1  ;;  %v302_v43 = vrot.slane %v300_v36, 2  ;;  %v295_v46 = vor.u32 %v294_v41, %v291_v40  ;;  %v569_v2 = vrot.slane %v1042_v25, 3 }
  0x18   : > { %403 = vmatprep.subr.bf16.mxu0 %v927_v1  ;;  %513 = vmatprep.subr.bf16.mxu1 %v927_v1  ;;  %v320_v32 = vor.u32 %v319_v29, %v316_v28  ;;  %v573_v53 = vsel %vm567_vm2, %v571_v49, %v572_v50 }
  0x19   : > { %v303_v47 = vor.u32 %v302_v43, %v299_v42  ;;  %v570_v3 = vsel %vm567_vm2, %v568_v0, %v569_v2 }
  0x1a   : > { %v321_v38 = vsel %vm287_vm1, %v312_v31, %v320_v32 }
  0x1b   : > { %404 = vmatpush1.bf16.msra.mxu0 %v891_v11  ;;  %514 = vmatpush1.bf16.msra.mxu1 %v892_v12  ;;  %v304_v51 = vsel %vm287_vm1, %v295_v46, %v303_v47 }
  0x1c   : > { %405 = vmatprep.subr.bf16.mxu0 %v927_v1  ;;  %515 = vmatprep.subr.bf16.mxu1 %v927_v1 }
  0x1d   : > { %818 = vmatprep.mubr.msk.bf16.mxu0 %vm389_vm0, %v321_v38 }
  0x1f   : > { %406 = vmatpush1.bf16.msra.mxu0 %v893_v13  ;;  %516 = vmatpush1.bf16.msra.mxu1 %v894_v15 }
  0x20   : > { %407 = vmatprep.subr.bf16.mxu0 %v927_v1  ;;  %517 = vmatprep.subr.bf16.mxu1 %v927_v1 }
  0x23   : > { %408 = vmatpush1.bf16.msra.mxu0 %v895_v23  ;;  %518 = vmatpush1.bf16.msra.mxu1 %v896_v24  ;;  %v867_v24 = vld [vmem:[%s1148_s4] ss:$0 sm:$0xff] }
  0x24   : > { %409 = vmatprep.subr.bf16.mxu0 %v927_v1  ;;  %519 = vmatprep.subr.bf16.mxu1 %v927_v1 }
  0x27   : > { %410 = vmatpush1.bf16.msra.mxu0 %v897_v30  ;;  %520 = vmatpush1.bf16.msra.mxu1 %v898_v37 }
  0x28   : > { %411 = vmatprep.subr.bf16.mxu0 %v927_v1  ;;  %521 = vmatprep.subr.bf16.mxu1 %v927_v1 }
  0x2b   : > { %412 = vmatpush1.bf16.msra.mxu0 %v899_v39  ;;  %522 = vmatpush1.bf16.msra.mxu1 %v900_v44 }
  0x2c   : > { %413 = vmatprep.subr.bf16.mxu0 %v927_v1  ;;  %523 = vmatprep.subr.bf16.mxu1 %v927_v1 }
  0x2f   : > { %414 = vmatpush1.bf16.msra.mxu0 %v901_v45  ;;  %524 = vmatpush1.bf16.msra.mxu1 %v902_v48 }
  0x30   : > { %644 = vmatprep.subr.bf16.mxu0 %v927_v1 }
  0x32   : > { %426 = vmatmul.mubr.bf16.vlgmr.msra.gmra.mrb[0].mxu0 %v304_v51  ;;  %536 = vmatmul.mubr.bf16.vlgmr.msra.gmra.mrb[0].mxu1 %v1030_v18 }
  0x33   : > { %645 = vmatpush1.bf16.msra.mxu0 %v908_v52  ;;  %864 = vmatprep.mubr.msk.bf16.mxu0 %vm389_vm0, %v573_v53 }
  0x34   : > { %646 = vmatprep.subr.bf16.mxu0 %v927_v1 }
  0x37   : > { %647 = vmatpush1.bf16.msra.mxu0 %v909_v54 }
  0x38   : > { %648 = vmatprep.subr.bf16.mxu0 %v927_v1 }
  0x3b   : > { %649 = vmatpush1.bf16.msra.mxu0 %v910_v55 }
  0x3c   : > { %650 = vmatprep.subr.bf16.mxu0 %v927_v1 }
  0x3f   : > { %651 = vmatpush1.bf16.msra.mxu0 %v911_v56 }
  0x40   : > { %652 = vmatprep.subr.bf16.mxu0 %v927_v1 }
  0x43   : > { %653 = vmatpush1.bf16.msra.mxu0 %v912_v57 }
  0x44   : > { %654 = vmatprep.subr.bf16.mxu0 %v927_v1 }
  0x47   : > { %655 = vmatpush1.bf16.msra.mxu0 %v913_v58 }
  0x48   : > { %656 = vmatprep.subr.bf16.mxu0 %v927_v1 }
  0x4b   : > { %657 = vmatpush1.bf16.msra.mxu0 %v914_v59 }
  0x4c   : > { %658 = vmatprep.subr.bf16.mxu0 %v927_v1 }
  0x4f   : > { %659 = vmatpush1.bf16.msra.mxu0 %v915_v60 }
  0x50   : > { %660 = vmatprep.subr.bf16.mxu0 %v927_v1 }
  0x53   : > { %661 = vmatpush1.bf16.msra.mxu0 %v916_v61 }
  0x54   : > { %662 = vmatprep.subr.bf16.mxu0 %v927_v1 }
  0x57   : > { %663 = vmatpush1.bf16.msra.mxu0 %v917_v62 }
  0x58   : > { %664 = vmatprep.subr.bf16.mxu0 %v927_v1  ;;  %v865_v1 = vld [vmem:[%s1146_s2] ss:$0 sm:$0xff] }
  0x5b   : > { %665 = vmatpush1.bf16.msra.mxu0 %v918_v63 }
  0x5e   : > { %677 = vmatmul.mubr.bf16.vlgmr.msra.gmra.mrb[4].mxu0 %v570_v3 }
 0x105   : > { %v427_v4 = vpop.f32.mrb[0].mxu0  ;;  %v537_v5 = vpop.f32.mrb[0].mxu1 }
 0x106   : > { %v429_v6 = vpop.f32.mrb[1].mxu0  ;;  %v538_v7 = vadd.f32 %v537_v5, %v427_v4  ;;  %v539_v8 = vpop.f32.mrb[1].mxu1 }
 0x107   : > { %v430_v9 = vpop.f32.mrb[2].mxu0  ;;  %v540_v10 = vpop.f32.mrb[2].mxu1 }
 0x108   : > { %v432_v11 = vpop.f32.mrb[3].mxu0  ;;  %v541_v12 = vadd.f32 %v540_v10, %v430_v9  ;;  %v542_v13 = vpop.f32.mrb[3].mxu1 }
 0x131   : > { %v678_v14 = vpop.f32.mrb[4].mxu0 }
 0x132   : > { %v685_v15 = vadd.f32 %v678_v14, %v538_v7  ;;  %v680_v16 = vpop.f32.mrb[5].mxu0 }
 0x133   : > { %v681_v17 = vpop.f32.mrb[6].mxu0 }
 0x134   : > { %v694_v18 = vadd.f32 %v865_v1, %v685_v15  ;;  %v686_v19 = vadd.f32 %v681_v17, %v541_v12  ;;  %v683_v20 = vpop.f32.mrb[7].mxu0 }
 0x136   : > { %v696_v22 = vmax.f32 %v694_v18, 0.0  ;;  %v695_v23 = vadd.f32 %v865_v1, %v686_v19 }
 0x138   : > { %v705_v25 = vmul.f32 %v866_v21, %v696_v22  ;;  %v697_v26 = vmax.f32 %v695_v23, 0.0 }
 0x13a   : > { %v714_v27 = vadd.f32 %v867_v24, %v705_v25  ;;  %v706_v28 = vmul.f32 %v866_v21, %v697_v26 }
 0x13c   : > { %716 = vst [vmem:[%s224_s30] sm:$0xff] %v714_v27  ;;  %v715_v29 = vadd.f32 %v867_v24, %v706_v28 }
 0x13e   : > { %717 = vst [vmem:[%s224_s30 + $0x8] sm:$0xff] %v715_v29 }
 0x13f PF: > { %s15_s18 = sadd.s32 1, %s925_s18  }
 0x140   : > { %p12_p4 = scmp.ge.s32.totalorder %s15_s18, 4  }
 0x142   :  { %14 = sbr.rel (!%p12_p4) target bundleno = 1 (0x1), region = 72 }

</bundles_post_ra>
